<compile_context>
chip_gen: v6e
topology: v6e:2x2x1
jax: 0.10.0
libtpu: 0.0.40
codegen_flags: <defaults>
</compile_context>

<pallas_src>
import functools

import jax
import jax.numpy as jnp
import numpy as np
from jax import lax
from jax.experimental import pallas as pl
from jax.experimental.pallas import tpu as pltpu

EPS = 1e-3
LANE = 128                     # channel padding target (lane width)
TM = 512                       # rows per M tile for the 1x1 GEMM / elementwise kernels
MXU_DTYPE = jnp.bfloat16       # MXU operand dtype; accumulation / BN math stays f32
Y_DTYPE = jnp.float32          # storage dtype of pre-BN conv outputs (see TODO above)


def _rup(x, m):
    return (x + m - 1) // m * m


def _vmem_limit_bytes():
    """Per-generation VMEM budget: leave ~16 MiB headroom below physical capacity."""
    default = 48 << 20
    try:
        info = pltpu.get_tpu_info()
    except Exception:
        return default
    cap = None
    for name in ("vmem_capacity_bytes", "vmem_size_bytes", "vmem_bytes"):
        cap = getattr(info, name, None)
        if cap:
            break
    if not cap:
        return default
    return int(min(max(int(cap) - (16 << 20), 32 << 20), 112 << 20))


_COMPILER_PARAMS = pltpu.CompilerParams(
    dimension_semantics=("parallel",),     # every 1-D grid axis here is independent
    vmem_limit_bytes=_vmem_limit_bytes(),
)


# --------------------------------------------------------------------------- #
# Shared in-kernel helpers
# --------------------------------------------------------------------------- #
def _centered_stats(y, cnt, valid):
    """Per-tile sum and mean-centered sum of squared deviations (f32)."""
    s = jnp.sum(y, axis=0, keepdims=True)              # [1, Cp]
    mean = s / cnt
    d = y - mean
    if valid is not None:                               # masked (padded) rows -> 0
        d = jnp.where(valid, d, 0.0)
    ssd = jnp.sum(d * d, axis=0, keepdims=True)         # [1, Cp]
    return s, ssd


def _row_mask(tm, m_real):
    i = pl.program_id(0)
    rows = i * tm + lax.broadcasted_iota(jnp.int32, (tm, 1), 0)
    valid = rows < m_real
    cnt = jnp.minimum(m_real - i * tm, tm).astype(jnp.float32)
    return valid, cnt


# --------------------------------------------------------------------------- #
# Kernel 1: conv1 1x1 GEMM + BN partial statistics
# --------------------------------------------------------------------------- #
def _gemm_stats_kernel(x_ref, w_ref, y_ref, sum_ref, ssd_ref, *, m_real, mask_rows):
    # x_ref: [tm, Cp] bf16   w_ref: [Cp, Cp] bf16
    # y_ref: [tm, Cp] f32    sum/ssd: [1, 1, Cp] f32
    tm = x_ref.shape[0]
    y = jnp.dot(x_ref[...], w_ref[...], preferred_element_type=jnp.float32)
    y_ref[...] = y.astype(y_ref.dtype)
    if mask_rows:
        valid, cnt = _row_mask(tm, m_real)      # padded x rows are zero -> y rows zero
    else:
        valid, cnt = None, float(tm)
    s, q = _centered_stats(y, cnt, valid)
    sum_ref[0] = s
    ssd_ref[0] = q


# --------------------------------------------------------------------------- #
# Kernel 2: RepBlock3x3 — fused BN1+ReLU on the input, 9-tap 3x3 conv and the
#           1x1 branch on the resident center slab, plus BN partials for both.
# --------------------------------------------------------------------------- #
def _rep3x3_kernel(y1p_ref, sc_ref, sh_ref, w3x3_ref, w1x1_ref,
                   y2a_ref, y2b_ref, sa_ref, qa_ref, sb_ref, qb_ref, *, h, w):
    # y1p_ref: [1, h+2, w+2, Cp] (raw, spatially padded conv1 output)
    # sc/sh  : [1, Cp] f32 folded BN1;  w3x3: [3,3,Cp,Cp] bf16;  w1x1: [Cp,Cp] bf16
    # y2a/y2b: [1, h*w, Cp];  stats: [1, 1, Cp] f32
    _, hp, wp, cp = y1p_ref.shape
    hw = h * w

    # Fused producer BN + ReLU.  The spatial halo is zero *pre*-BN and would become
    # relu(shift) after the affine, so force it back to exact zeros.
    a = y1p_ref[...].astype(jnp.float32) * sc_ref[...] + sh_ref[...]
    a = jnp.maximum(a, 0.0)
    hh = lax.broadcasted_iota(jnp.int32, (1, hp, wp, 1), 1)
    ww = lax.broadcasted_iota(jnp.int32, (1, hp, wp, 1), 2)
    interior = (hh >= 1) & (hh <= h) & (ww >= 1) & (ww <= w)
    a = jnp.where(interior, a, 0.0).astype(MXU_DTYPE)

    # 9-tap accumulation with the width shifts hoisted out of the dh loop
    # (3 bf16 relayout slices instead of 9).  The (1,1) center slab doubles as the
    # input of the fused 1x1 RepBlock branch.
    acc = jnp.zeros((hw, cp), jnp.float32)
    center = None
    for dw in range(3):
        slab = a[0, :, dw:dw + w, :]                     # [hp, w, cp]
        for dh in range(3):
            xs = slab[dh:dh + h].reshape(hw, cp)
            if dh == 1 and dw == 1:
                center = xs
            acc = acc + jnp.dot(xs, w3x3_ref[dh, dw],
                                preferred_element_type=jnp.float32)
    y2b = jnp.dot(center, w1x1_ref[...], preferred_element_type=jnp.float32)

    y2a_ref[0] = acc.astype(y2a_ref.dtype)
    y2b_ref[0] = y2b.astype(y2b_ref.dtype)

    cnt = float(hw)
    sa, qa = _centered_stats(acc, cnt, None)
    sb, qb = _centered_stats(y2b, cnt, None)
    sa_ref[0] = sa
    qa_ref[0] = qa
    sb_ref[0] = sb
    qb_ref[0] = qb


# --------------------------------------------------------------------------- #
# Kernel 3: conv3 — fused (BN_a + BN_b, add, ReLU) on the inputs, 1x1 GEMM + stats
# --------------------------------------------------------------------------- #
def _bn2_gemm_stats_kernel(ya_ref, yb_ref, sca_ref, sha_ref, scb_ref, shb_ref,
                           w_ref, y_ref, sum_ref, ssd_ref, *, m_real, mask_rows):
    tm = ya_ref.shape[0]
    a = ya_ref[...].astype(jnp.float32) * sca_ref[...] + sha_ref[...]
    b = yb_ref[...].astype(jnp.float32) * scb_ref[...] + shb_ref[...]
    act = jnp.maximum(a + b, 0.0)
    if mask_rows:
        valid, cnt = _row_mask(tm, m_real)
        act = jnp.where(valid, act, 0.0)                 # keep padded rows exactly zero
    else:
        valid, cnt = None, float(tm)
    y = jnp.dot(act.astype(MXU_DTYPE), w_ref[...], preferred_element_type=jnp.float32)
    y_ref[...] = y.astype(y_ref.dtype)
    s, q = _centered_stats(y, cnt, valid)
    sum_ref[0] = s
    ssd_ref[0] = q


# --------------------------------------------------------------------------- #
# Kernel 4: BN3 + ReLU + residual add (reads original-width f32 x, writes C-wide out)
# --------------------------------------------------------------------------- #
def _bn_relu_residual_kernel(y_ref, sc_ref, sh_ref, x_ref, o_ref, *, c):
    y = jnp.maximum(y_ref[...].astype(jnp.float32) * sc_ref[...] + sh_ref[...], 0.0)
    o_ref[...] = (x_ref[...] + y[:, :c]).astype(o_ref.dtype)


# --------------------------------------------------------------------------- #
# pallas_call wrappers
# --------------------------------------------------------------------------- #
def _conv1x1_stats(x, w, *, m_real, tm):
    mp, cp = x.shape
    g = mp // tm
    kernel = functools.partial(_gemm_stats_kernel, m_real=m_real,
                               mask_rows=(mp != m_real))
    return pl.pallas_call(
        kernel,
        out_shape=(
            jax.ShapeDtypeStruct((mp, cp), Y_DTYPE),
            jax.ShapeDtypeStruct((g, 1, cp), jnp.float32),
            jax.ShapeDtypeStruct((g, 1, cp), jnp.float32),
        ),
        grid=(g,),
        in_specs=[
            pl.BlockSpec((tm, cp), lambda i: (i, 0)),
            pl.BlockSpec((cp, cp), lambda i: (0, 0)),
        ],
        out_specs=(
            pl.BlockSpec((tm, cp), lambda i: (i, 0)),
            pl.BlockSpec((1, 1, cp), lambda i: (i, 0, 0)),
            pl.BlockSpec((1, 1, cp), lambda i: (i, 0, 0)),
        ),
        compiler_params=_COMPILER_PARAMS,
    )(x, w)


def _rep3x3_stats(y1p, sc1, sh1, w3x3, w1x1, *, h, w):
    n, hp, wp, cp = y1p.shape
    hw = h * w
    kernel = functools.partial(_rep3x3_kernel, h=h, w=w)
    stat = pl.BlockSpec((1, 1, cp), lambda i: (i, 0, 0))
    return pl.pallas_call(
        kernel,
        out_shape=(
            jax.ShapeDtypeStruct((n, hw, cp), Y_DTYPE),
            jax.ShapeDtypeStruct((n, hw, cp), Y_DTYPE),
            jax.ShapeDtypeStruct((n, 1, cp), jnp.float32),
            jax.ShapeDtypeStruct((n, 1, cp), jnp.float32),
            jax.ShapeDtypeStruct((n, 1, cp), jnp.float32),
            jax.ShapeDtypeStruct((n, 1, cp), jnp.float32),
        ),
        grid=(n,),
        in_specs=[
            pl.BlockSpec((1, hp, wp, cp), lambda i: (i, 0, 0, 0)),
            pl.BlockSpec((1, cp), lambda i: (0, 0)),
            pl.BlockSpec((1, cp), lambda i: (0, 0)),
            pl.BlockSpec((3, 3, cp, cp), lambda i: (0, 0, 0, 0)),
            pl.BlockSpec((cp, cp), lambda i: (0, 0)),
        ],
        out_specs=(
            pl.BlockSpec((1, hw, cp), lambda i: (i, 0, 0)),
            pl.BlockSpec((1, hw, cp), lambda i: (i, 0, 0)),
            stat, stat, stat, stat,
        ),
        compiler_params=_COMPILER_PARAMS,
    )(y1p, sc1, sh1, w3x3, w1x1)


def _bn2_add_relu_conv1x1_stats(ya, yb, sca, sha, scb, shb, w, *, m_real, tm):
    mp, cp = ya.shape
    g = mp // tm
    kernel = functools.partial(_bn2_gemm_stats_kernel, m_real=m_real,
                               mask_rows=(mp != m_real))
    tile = pl.BlockSpec((tm, cp), lambda i: (i, 0))
    row = pl.BlockSpec((1, cp), lambda i: (0, 0))
    return pl.pallas_call(
        kernel,
        out_shape=(
            jax.ShapeDtypeStruct((mp, cp), Y_DTYPE),
            jax.ShapeDtypeStruct((g, 1, cp), jnp.float32),
            jax.ShapeDtypeStruct((g, 1, cp), jnp.float32),
        ),
        grid=(g,),
        in_specs=[tile, tile, row, row, row, row,
                  pl.BlockSpec((cp, cp), lambda i: (0, 0))],
        out_specs=(
            tile,
            pl.BlockSpec((1, 1, cp), lambda i: (i, 0, 0)),
            pl.BlockSpec((1, 1, cp), lambda i: (i, 0, 0)),
        ),
        compiler_params=_COMPILER_PARAMS,
    )(ya, yb, sca, sha, scb, shb, w)


def _bn_relu_residual(y, sc, sh, x_res, *, tm):
    mp, cp = y.shape
    c = int(x_res.shape[1])
    g = mp // tm
    kernel = functools.partial(_bn_relu_residual_kernel, c=c)
    row = pl.BlockSpec((1, cp), lambda i: (0, 0))
    return pl.pallas_call(
        kernel,
        out_shape=jax.ShapeDtypeStruct((mp, c), jnp.float32),
        grid=(g,),
        in_specs=[
            pl.BlockSpec((tm, cp), lambda i: (i, 0)),
            row, row,
            pl.BlockSpec((tm, c), lambda i: (i, 0)),
        ],
        out_specs=pl.BlockSpec((tm, c), lambda i: (i, 0)),
        compiler_params=_COMPILER_PARAMS,
    )(y, sc, sh, x_res)


# --------------------------------------------------------------------------- #
# Parameter packing + BN stat folding (tiny wrapper glue)
# --------------------------------------------------------------------------- #
def _prep_w1x1(w, cp):
    cout, cin = int(w.shape[0]), int(w.shape[1])
    w2 = w.reshape(cout, cin).T.astype(jnp.float32)                 # [Cin, Cout]
    w2 = jnp.pad(w2, ((0, cp - cin), (0, cp - cout)))
    return w2.astype(MXU_DTYPE)


def _prep_w3x3(w, cp):
    cout, cin = int(w.shape[0]), int(w.shape[1])
    wt = jnp.transpose(w.astype(jnp.float32), (2, 3, 1, 0))         # [3,3,Cin,Cout]
    wt = jnp.pad(wt, ((0, 0), (0, 0), (0, cp - cin), (0, cp - cout)))
    return wt.astype(MXU_DTYPE)


def _scale_shift(sums, ssds, counts, gamma_p, beta_p):
    """Merge per-tile (sum, centered-SSD) partials Chan-style into BN scale/shift."""
    n_total = float(np.sum(counts))
    counts_j = jnp.asarray(counts, jnp.float32).reshape(-1, 1)      # [g, 1]
    s = sums[:, 0, :]                                               # [g, Cp]
    d = ssds[:, 0, :]
    mean = jnp.sum(s, axis=0) / n_total                             # [Cp]
    tile_mean = s / counts_j
    ssd = jnp.sum(d, axis=0) + jnp.sum(counts_j * (tile_mean - mean) ** 2, axis=0)
    var = ssd / n_total                                             # biased (train mode)
    inv = lax.rsqrt(var + EPS)
    scale = gamma_p * inv
    shift = beta_p - mean * scale
    return scale.reshape(1, -1), shift.reshape(1, -1)


# --------------------------------------------------------------------------- #
# ResBlock forward
# --------------------------------------------------------------------------- #
def res_block_nhwc(x_nhwc, params):
    n, h, w, c = map(int, x_nhwc.shape)
    cp = _rup(max(c, LANE), LANE)
    m = n * h * w
    tm = _rup(m, 8) if m <= TM else TM
    mp = _rup(m, tm)
    g = mp // tm

    gemm_counts = np.minimum(np.maximum(m - np.arange(g) * tm, 0), tm).astype(np.float32)
    img_counts = np.full((n,), float(h * w), np.float32)

    x_flat = x_nhwc.astype(jnp.float32).reshape(m, c)
    x_res = x_flat if mp == m else jnp.pad(x_flat, ((0, mp - m), (0, 0)))
    x_mxu = jnp.pad(x_flat, ((0, mp - m), (0, cp - c))).astype(MXU_DTYPE)

    def gb(gname, bname):
        gg = jnp.pad(params[gname].astype(jnp.float32), (0, cp - c))
        bb = jnp.pad(params[bname].astype(jnp.float32), (0, cp - c))
        return gg, bb

    # ---- conv1: 1x1 GEMM, raw y1 + BN partials ----------------------------
    y1, s1, q1 = _conv1x1_stats(x_mxu, _prep_w1x1(params["w1"], cp), m_real=m, tm=tm)
    sc1, sh1 = _scale_shift(s1, q1, gemm_counts, *gb("g1", "b1"))

    # ---- RepBlock3x3: one kernel does BN1+ReLU, the 3x3 conv and the fused
    # ---- 1x1 branch on the resident center slab ---------------------------
    y1_img = y1[:m].reshape(n, h, w, cp)
    y1p = jnp.pad(y1_img, ((0, 0), (1, 1), (1, 1), (0, 0)))   # spatial halo only
    y2a, y2b, s2a, q2a, s2b, q2b = _rep3x3_stats(
        y1p, sc1, sh1,
        _prep_w3x3(params["w2a"], cp), _prep_w1x1(params["w2b"], cp),
        h=h, w=w)
    sc2a, sh2a = _scale_shift(s2a, q2a, img_counts, *gb("g2a", "b2a"))
    sc2b, sh2b = _scale_shift(s2b, q2b, img_counts, *gb("g2b", "b2b"))

    # ---- conv3: BN_a + BN_b + add + ReLU fused into the 1x1 GEMM -----------
    y2a_f = y2a.reshape(m, cp)
    y2b_f = y2b.reshape(m, cp)
    if mp != m:
        y2a_f = jnp.pad(y2a_f, ((0, mp - m), (0, 0)))
        y2b_f = jnp.pad(y2b_f, ((0, mp - m), (0, 0)))
    y3, s3, q3 = _bn2_add_relu_conv1x1_stats(
        y2a_f, y2b_f, sc2a, sh2a, sc2b, sh2b, _prep_w1x1(params["w3"], cp),
        m_real=m, tm=tm)
    sc3, sh3 = _scale_shift(s3, q3, gemm_counts, *gb("g3", "b3"))

    # ---- BN3 + ReLU + residual add (original-width f32 x) ------------------
    out = _bn_relu_residual(y3, sc3, sh3, x_res, tm=tm)
    return out[:m].reshape(n, h, w, c)


@jax.jit
def res_block(x_nchw, params):
    """ResBlock forward, NCHW in/out (PyTorch layout)."""
    # TODO(synk): callers that can provide/consume NHWC should call res_block_nhwc
    # directly and skip these two layout transposes.
    x_nhwc = jnp.transpose(x_nchw, (0, 2, 3, 1))
    y = res_block_nhwc(x_nhwc, params)
    return jnp.transpose(y, (0, 3, 1, 2))


# --------------------------------------------------------------------------- #
# Pure-JAX reference (module semantics) and test
# --------------------------------------------------------------------------- #
def _ref_conv_bn(x, w, gamma, beta, act, matmul_dtype):
    k = w.shape[2]
    pad = (k - 1) // 2
    y = lax.conv_general_dilated(
        x.astype(matmul_dtype), w.astype(matmul_dtype),
        window_strides=(1, 1), padding=[(pad, pad), (pad, pad)],
        dimension_numbers=("NCHW", "OIHW", "NCHW"),
        preferred_element_type=jnp.float32)
    mean = jnp.mean(y, axis=(0, 2, 3), keepdims=True)
    var = jnp.mean((y - mean) ** 2, axis=(0, 2, 3), keepdims=True)
    y = (y - mean) * lax.rsqrt(var + EPS)
    y = y * gamma.reshape(1, -1, 1, 1) + beta.reshape(1, -1, 1, 1)
    if act:
        y = jnp.maximum(y, 0.0)
    return y


def _ref_res_block(x, params, matmul_dtype):
    x = x.astype(jnp.float32)
    y = _ref_conv_bn(x, params["w1"], params["g1"], params["b1"], True, matmul_dtype)
    ya = _ref_conv_bn(y, params["w2a"], params["g2a"], params["b2a"], False, matmul_dtype)
    yb = _ref_conv_bn(y, params["w2b"], params["g2b"], params["b2b"], False, matmul_dtype)
    y = jnp.maximum(ya + yb, 0.0)
    y = _ref_conv_bn(y, params["w3"], params["g3"], params["b3"], True, matmul_dtype)
    return x + y


if __name__ == "__main__":
    # ResBlock(in_channels=4, out_channels=4, act='relu'); x: [2, 4, 16, 16]
    N, C, H, W = 2, 4, 16, 16

    key = jax.random.PRNGKey(0)
    kx, k1, k2a, k2b, k3 = jax.random.split(key, 5)
    x = jax.random.normal(kx, (N, C, H, W), dtype=jnp.float32)

    def kaiming(k, cout, cin, ks):                    # kaiming_normal_, fan_in
        fan_in = cin * ks * ks
        return jax.random.normal(k, (cout, cin, ks, ks), jnp.float32) * np.sqrt(
            2.0 / fan_in)

    ones = jnp.ones((C,), jnp.float32)                # BatchNorm2d default weight
    zeros = jnp.zeros((C,), jnp.float32)              # BatchNorm2d default bias
    params = {
        "w1": kaiming(k1, C, C, 1), "g1": ones, "b1": zeros,
        "w2a": kaiming(k2a, C, C, 3), "g2a": ones, "b2a": zeros,
        "w2b": kaiming(k2b, C, C, 1), "g2b": ones, "b2b": zeros,
        "w3": kaiming(k3, C, C, 1), "g3": ones, "b3": zeros,
    }

    out = jax.block_until_ready(res_block(x, params))
    assert out.shape == (N, C, H, W), out.shape

    # Precision-matched reference (same bf16 MXU operands, f32 accumulation + BN).
    ref = jax.block_until_ready(_ref_res_block(x, params, MXU_DTYPE))
    np.testing.assert_allclose(np.asarray(out), np.asarray(ref), rtol=1e-2, atol=1e-2)

    # Loose sanity check vs pure-f32 math; the gap is the deliberate bf16 MXU feed.
    ref32 = jax.block_until_ready(_ref_res_block(x, params, jnp.float32))
    np.testing.assert_allclose(np.asarray(out), np.asarray(ref32), rtol=5e-2, atol=1e-1)

    print("KERNEL_OK")
</pallas_src>

<mosaic_0001>
module attributes {stable_mosaic.version = 11 : i64} {
  func.func @_gemm_stats_kernel(%arg0: i32, %arg1: memref<512x128xbf16, #tpu.memory_space<vmem>>, %arg2: memref<128x128xbf16, #tpu.memory_space<vmem>>, %arg3: memref<512x128xf32, #tpu.memory_space<vmem>>, %arg4: memref<1x1x128xf32, #tpu.memory_space<vmem>>, %arg5: memref<1x1x128xf32, #tpu.memory_space<vmem>>) attributes {dimension_semantics = [#tpu.dimension_semantics<parallel>], iteration_bounds = array<i64: 1>, scalar_prefetch = 0 : i64, scratch_operands = 0 : i64, tpu.core_type = #tpu.core_type<tc>, window_params = [{transform_indices = @transform_0, window_bounds = array<i64: 512, 128>}, {pipeline_mode = #tpu.pipeline_mode<synchronous>, transform_indices = @transform_1, window_bounds = array<i64: 128, 128>}, {transform_indices = @transform_2, window_bounds = array<i64: 512, 128>}, {transform_indices = @transform_3, window_bounds = array<i64: 1, 1, 128>}, {transform_indices = @transform_4, window_bounds = array<i64: 1, 1, 128>}]} {
    %c0 = arith.constant 0 : index
    %c0_0 = arith.constant 0 : index
    %0 = vector.load %arg1[%c0, %c0_0] : memref<512x128xbf16, #tpu.memory_space<vmem>>, vector<512x128xbf16>
    %c0_1 = arith.constant 0 : index
    %c0_2 = arith.constant 0 : index
    %1 = vector.load %arg2[%c0_1, %c0_2] : memref<128x128xbf16, #tpu.memory_space<vmem>>, vector<128x128xbf16>
    %cst = arith.constant dense<0.000000e+00> : vector<512x128xf32>
    %2 = tpu.matmul %0, %1, %cst {dimension_numbers = #tpu.dot_dimension_numbers<[1], [0], [0], [1], [0, 0, 1, 1], [], []>} : vector<512x128xbf16>, vector<128x128xbf16>, vector<512x128xf32> -> vector<512x128xf32>
    %c0_3 = arith.constant 0 : index
    %c0_4 = arith.constant 0 : index
    %3 = vector.load %arg3[%c0_3, %c0_4] : memref<512x128xf32, #tpu.memory_space<vmem>>, vector<512x128xf32>
    tpu.vector_store %arg3[%c0_3, %c0_4], %2 {strides = array<i32>} : memref<512x128xf32, #tpu.memory_space<vmem>>, vector<512x128xf32>,
    %cst_5 = arith.constant dense<0.000000e+00> : vector<128xf32>
    %4 = vector.multi_reduction <add>, %2, %cst_5 [0] : vector<512x128xf32> to vector<128xf32>
    %5 = vector.shape_cast %4 : vector<128xf32> to vector<1x128xf32>
    %cst_6 = arith.constant 5.120000e+02 : f32
    %6 = vector.broadcast %cst_6 : f32 to vector<1x128xf32>
    %7 = arith.divf %5, %6 : vector<1x128xf32>
    %8 = vector.broadcast %7 : vector<1x128xf32> to vector<512x128xf32>
    %9 = arith.subf %2, %8 : vector<512x128xf32>
    %10 = arith.mulf %9, %9 : vector<512x128xf32>
    %cst_7 = arith.constant dense<0.000000e+00> : vector<128xf32>
    %11 = vector.multi_reduction <add>, %10, %cst_7 [0] : vector<512x128xf32> to vector<128xf32>
    %12 = vector.shape_cast %11 : vector<128xf32> to vector<1x128xf32>
    %c0_8 = arith.constant 0 : index
    %c0_9 = arith.constant 0 : index
    %c0_10 = arith.constant 0 : index
    %13 = vector.load %arg4[%c0_8, %c0_9, %c0_10] : memref<1x1x128xf32, #tpu.memory_space<vmem>>, vector<1x1x128xf32>
    %14 = vector.shape_cast %13 : vector<1x1x128xf32> to vector<1x128xf32>
    %15 = vector.shape_cast %5 : vector<1x128xf32> to vector<1x1x128xf32>
    tpu.vector_store %arg4[%c0_8, %c0_9, %c0_10], %15 {strides = array<i32>} : memref<1x1x128xf32, #tpu.memory_space<vmem>>, vector<1x1x128xf32>,
    %c0_11 = arith.constant 0 : index
    %c0_12 = arith.constant 0 : index
    %c0_13 = arith.constant 0 : index
    %16 = vector.load %arg5[%c0_11, %c0_12, %c0_13] : memref<1x1x128xf32, #tpu.memory_space<vmem>>, vector<1x1x128xf32>
    %17 = vector.shape_cast %16 : vector<1x1x128xf32> to vector<1x128xf32>
    %18 = vector.shape_cast %12 : vector<1x128xf32> to vector<1x1x128xf32>
    tpu.vector_store %arg5[%c0_11, %c0_12, %c0_13], %18 {strides = array<i32>} : memref<1x1x128xf32, #tpu.memory_space<vmem>>, vector<1x1x128xf32>,
    return
  }
  func.func @transform_0(%arg0: i32) -> (i32, i32) {
    %c0_i32 = arith.constant 0 : i32
    %c0_i32_0 = arith.constant 0 : i32
    return %arg0, %c0_i32 : i32, i32
  }
  func.func @transform_1(%arg0: i32) -> (i32, i32) {
    %c0_i32 = arith.constant 0 : i32
    %c0_i32_0 = arith.constant 0 : i32
    %c0_i32_1 = arith.constant 0 : i32
    return %c0_i32, %c0_i32_0 : i32, i32
  }
  func.func @transform_2(%arg0: i32) -> (i32, i32) {
    %c0_i32 = arith.constant 0 : i32
    %c0_i32_0 = arith.constant 0 : i32
    return %arg0, %c0_i32 : i32, i32
  }
  func.func @transform_3(%arg0: i32) -> (i32, i32, i32) {
    %c0_i32 = arith.constant 0 : i32
    %c0_i32_0 = arith.constant 0 : i32
    %c0_i32_1 = arith.constant 0 : i32
    return %arg0, %c0_i32, %c0_i32_0 : i32, i32, i32
  }
  func.func @transform_4(%arg0: i32) -> (i32, i32, i32) {
    %c0_i32 = arith.constant 0 : i32
    %c0_i32_0 = arith.constant 0 : i32
    %c0_i32_1 = arith.constant 0 : i32
    return %arg0, %c0_i32, %c0_i32_0 : i32, i32, i32
  }
}

module attributes {stable_mosaic.version = 11 : i64} {
  func.func @_rep3x3_kernel(%arg0: i32, %arg1: memref<1x18x18x128xf32, #tpu.memory_space<vmem>>, %arg2: memref<1x128xf32, #tpu.memory_space<vmem>>, %arg3: memref<1x128xf32, #tpu.memory_space<vmem>>, %arg4: memref<3x3x128x128xbf16, #tpu.memory_space<vmem>>, %arg5: memref<128x128xbf16, #tpu.memory_space<vmem>>, %arg6: memref<1x256x128xf32, #tpu.memory_space<vmem>>, %arg7: memref<1x256x128xf32, #tpu.memory_space<vmem>>, %arg8: memref<1x1x128xf32, #tpu.memory_space<vmem>>, %arg9: memref<1x1x128xf32, #tpu.memory_space<vmem>>, %arg10: memref<1x1x128xf32, #tpu.memory_space<vmem>>, %arg11: memref<1x1x128xf32, #tpu.memory_space<vmem>>) attributes {dimension_semantics = [#tpu.dimension_semantics<parallel>], iteration_bounds = array<i64: 2>, scalar_prefetch = 0 : i64, scratch_operands = 0 : i64, tpu.core_type = #tpu.core_type<tc>, window_params = [{transform_indices = @transform_0, window_bounds = array<i64: 1, 18, 18, 128>}, {pipeline_mode = #tpu.pipeline_mode<synchronous>, transform_indices = @transform_1, window_bounds = array<i64: 1, 128>}, {pipeline_mode = #tpu.pipeline_mode<synchronous>, transform_indices = @transform_2, window_bounds = array<i64: 1, 128>}, {pipeline_mode = #tpu.pipeline_mode<synchronous>, transform_indices = @transform_3, window_bounds = array<i64: 3, 3, 128, 128>}, {pipeline_mode = #tpu.pipeline_mode<synchronous>, transform_indices = @transform_4, window_bounds = array<i64: 128, 128>}, {transform_indices = @transform_5, window_bounds = array<i64: 1, 256, 128>}, {transform_indices = @transform_6, window_bounds = array<i64: 1, 256, 128>}, {transform_indices = @transform_7, window_bounds = array<i64: 1, 1, 128>}, {transform_indices = @transform_8, window_bounds = array<i64: 1, 1, 128>}, {transform_indices = @transform_9, window_bounds = array<i64: 1, 1, 128>}, {transform_indices = @transform_10, window_bounds = array<i64: 1, 1, 128>}]} {
    %c0 = arith.constant 0 : index
    %c0_0 = arith.constant 0 : index
    %c0_1 = arith.constant 0 : index
    %c0_2 = arith.constant 0 : index
    %0 = vector.load %arg1[%c0, %c0_0, %c0_1, %c0_2] : memref<1x18x18x128xf32, #tpu.memory_space<vmem>>, vector<1x18x18x128xf32>
    %c0_3 = arith.constant 0 : index
    %c0_4 = arith.constant 0 : index
    %1 = vector.load %arg2[%c0_3, %c0_4] : memref<1x128xf32, #tpu.memory_space<vmem>>, vector<1x128xf32>
    %2 = vector.shape_cast %1 : vector<1x128xf32> to vector<1x1x1x128xf32>
    %3 = vector.broadcast %2 : vector<1x1x1x128xf32> to vector<1x18x18x128xf32>
    %4 = arith.mulf %0, %3 : vector<1x18x18x128xf32>
    %c0_5 = arith.constant 0 : index
    %c0_6 = arith.constant 0 : index
    %5 = vector.load %arg3[%c0_5, %c0_6] : memref<1x128xf32, #tpu.memory_space<vmem>>, vector<1x128xf32>
    %6 = vector.shape_cast %5 : vector<1x128xf32> to vector<1x1x1x128xf32>
    %7 = vector.broadcast %6 : vector<1x1x1x128xf32> to vector<1x18x18x128xf32>
    %8 = arith.addf %4, %7 : vector<1x18x18x128xf32>
    %cst = arith.constant 0.000000e+00 : f32
    %9 = vector.broadcast %cst : f32 to vector<1x18x18x128xf32>
    %10 = arith.maximumf %8, %9 : vector<1x18x18x128xf32>
    %11 = tpu.iota {dimensions = array<i32: 1>} : vector<1x18x18x1xi32>
    %12 = tpu.iota {dimensions = array<i32: 2>} : vector<1x18x18x1xi32>
    %c1_i32 = arith.constant 1 : i32
    %13 = vector.broadcast %c1_i32 : i32 to vector<1x18x18x1xi32>
    %14 = arith.cmpi sge, %11, %13 : vector<1x18x18x1xi32>
    %c16_i32 = arith.constant 16 : i32
    %15 = vector.broadcast %c16_i32 : i32 to vector<1x18x18x1xi32>
    %16 = arith.cmpi sle, %11, %15 : vector<1x18x18x1xi32>
    %17 = arith.andi %14, %16 : vector<1x18x18x1xi1>
    %c1_i32_7 = arith.constant 1 : i32
    %18 = vector.broadcast %c1_i32_7 : i32 to vector<1x18x18x1xi32>
    %19 = arith.cmpi sge, %12, %18 : vector<1x18x18x1xi32>
    %20 = arith.andi %17, %19 : vector<1x18x18x1xi1>
    %c16_i32_8 = arith.constant 16 : i32
    %21 = vector.broadcast %c16_i32_8 : i32 to vector<1x18x18x1xi32>
    %22 = arith.cmpi sle, %12, %21 : vector<1x18x18x1xi32>
    %23 = arith.andi %20, %22 : vector<1x18x18x1xi1>
    %cst_9 = arith.constant 0.000000e+00 : f32
    %24 = vector.shape_cast %23 : vector<1x18x18x1xi1> to vector<1x18x18x1xi1>
    %25 = vector.broadcast %24 : vector<1x18x18x1xi1> to vector<1x18x18x128xi1>
    %26 = vector.broadcast %cst_9 : f32 to vector<1x18x18x128xf32>
    %27 = arith.select %25, %10, %26 : vector<1x18x18x128xi1>, vector<1x18x18x128xf32>
    %28 = arith.truncf %27 : vector<1x18x18x128xf32> to vector<1x18x18x128xbf16>
    %cst_10 = arith.constant 0.000000e+00 : f32
    %29 = vector.broadcast %cst_10 : f32 to vector<256x128xf32>
    %30 = vector.extract_strided_slice %28 {offsets = [0, 0, 0, 0], sizes = [1, 18, 16, 128], strides = [1, 1, 1, 1]} : vector<1x18x18x128xbf16> to vector<1x18x16x128xbf16>
    %31 = vector.shape_cast %30 : vector<1x18x16x128xbf16> to vector<18x16x128xbf16>
    %32 = vector.extract_strided_slice %31 {offsets = [0, 0, 0], sizes = [16, 16, 128], strides = [1, 1, 1]} : vector<18x16x128xbf16> to vector<16x16x128xbf16>
    %33 = vector.shape_cast %32 : vector<16x16x128xbf16> to vector<256x128xbf16>
    %c0_11 = arith.constant 0 : index
    %c0_12 = arith.constant 0 : index
    %c0_13 = arith.constant 0 : index
    %c0_14 = arith.constant 0 : index
    %34 = vector.load %arg4[%c0_11, %c0_12, %c0_13, %c0_14] : memref<3x3x128x128xbf16, #tpu.memory_space<vmem>>, vector<1x1x128x128xbf16>
    %35 = vector.shape_cast %34 : vector<1x1x128x128xbf16> to vector<128x128xbf16>
    %cst_15 = arith.constant dense<0.000000e+00> : vector<256x128xf32>
    %36 = tpu.matmul %33, %35, %cst_15 {dimension_numbers = #tpu.dot_dimension_numbers<[1], [0], [0], [1], [0, 0, 1, 1], [], []>} : vector<256x128xbf16>, vector<128x128xbf16>, vector<256x128xf32> -> vector<256x128xf32>
    %37 = arith.addf %29, %36 : vector<256x128xf32>
    %38 = vector.extract_strided_slice %31 {offsets = [1, 0, 0], sizes = [16, 16, 128], strides = [1, 1, 1]} : vector<18x16x128xbf16> to vector<16x16x128xbf16>
    %39 = vector.shape_cast %38 : vector<16x16x128xbf16> to vector<256x128xbf16>
    %c1 = arith.constant 1 : index
    %c0_16 = arith.constant 0 : index
    %c0_17 = arith.constant 0 : index
    %c0_18 = arith.constant 0 : index
    %40 = vector.load %arg4[%c1, %c0_16, %c0_17, %c0_18] : memref<3x3x128x128xbf16, #tpu.memory_space<vmem>>, vector<1x1x128x128xbf16>
    %41 = vector.shape_cast %40 : vector<1x1x128x128xbf16> to vector<128x128xbf16>
    %cst_19 = arith.constant dense<0.000000e+00> : vector<256x128xf32>
    %42 = tpu.matmul %39, %41, %cst_19 {dimension_numbers = #tpu.dot_dimension_numbers<[1], [0], [0], [1], [0, 0, 1, 1], [], []>} : vector<256x128xbf16>, vector<128x128xbf16>, vector<256x128xf32> -> vector<256x128xf32>
    %43 = arith.addf %37, %42 : vector<256x128xf32>
    %44 = vector.extract_strided_slice %31 {offsets = [2, 0, 0], sizes = [16, 16, 128], strides = [1, 1, 1]} : vector<18x16x128xbf16> to vector<16x16x128xbf16>
    %45 = vector.shape_cast %44 : vector<16x16x128xbf16> to vector<256x128xbf16>
    %c2 = arith.constant 2 : index
    %c0_20 = arith.constant 0 : index
    %c0_21 = arith.constant 0 : index
    %c0_22 = arith.constant 0 : index
    %46 = vector.load %arg4[%c2, %c0_20, %c0_21, %c0_22] : memref<3x3x128x128xbf16, #tpu.memory_space<vmem>>, vector<1x1x128x128xbf16>
    %47 = vector.shape_cast %46 : vector<1x1x128x128xbf16> to vector<128x128xbf16>
    %cst_23 = arith.constant dense<0.000000e+00> : vector<256x128xf32>
    %48 = tpu.matmul %45, %47, %cst_23 {dimension_numbers = #tpu.dot_dimension_numbers<[1], [0], [0], [1], [0, 0, 1, 1], [], []>} : vector<256x128xbf16>, vector<128x128xbf16>, vector<256x128xf32> -> vector<256x128xf32>
    %49 = arith.addf %43, %48 : vector<256x128xf32>
    %50 = vector.extract_strided_slice %28 {offsets = [0, 0, 1, 0], sizes = [1, 18, 16, 128], strides = [1, 1, 1, 1]} : vector<1x18x18x128xbf16> to vector<1x18x16x128xbf16>
    %51 = vector.shape_cast %50 : vector<1x18x16x128xbf16> to vector<18x16x128xbf16>
    %52 = vector.extract_strided_slice %51 {offsets = [0, 0, 0], sizes = [16, 16, 128], strides = [1, 1, 1]} : vector<18x16x128xbf16> to vector<16x16x128xbf16>
    %53 = vector.shape_cast %52 : vector<16x16x128xbf16> to vector<256x128xbf16>
    %c0_24 = arith.constant 0 : index
    %c1_25 = arith.constant 1 : index
    %c0_26 = arith.constant 0 : index
    %c0_27 = arith.constant 0 : index
    %54 = vector.load %arg4[%c0_24, %c1_25, %c0_26, %c0_27] : memref<3x3x128x128xbf16, #tpu.memory_space<vmem>>, vector<1x1x128x128xbf16>
    %55 = vector.shape_cast %54 : vector<1x1x128x128xbf16> to vector<128x128xbf16>
    %cst_28 = arith.constant dense<0.000000e+00> : vector<256x128xf32>
    %56 = tpu.matmul %53, %55, %cst_28 {dimension_numbers = #tpu.dot_dimension_numbers<[1], [0], [0], [1], [0, 0, 1, 1], [], []>} : vector<256x128xbf16>, vector<128x128xbf16>, vector<256x128xf32> -> vector<256x128xf32>
    %57 = arith.addf %49, %56 : vector<256x128xf32>
    %58 = vector.extract_strided_slice %51 {offsets = [1, 0, 0], sizes = [16, 16, 128], strides = [1, 1, 1]} : vector<18x16x128xbf16> to vector<16x16x128xbf16>
    %59 = vector.shape_cast %58 : vector<16x16x128xbf16> to vector<256x128xbf16>
    %c1_29 = arith.constant 1 : index
    %c1_30 = arith.constant 1 : index
    %c0_31 = arith.constant 0 : index
    %c0_32 = arith.constant 0 : index
    %60 = vector.load %arg4[%c1_29, %c1_30, %c0_31, %c0_32] : memref<3x3x128x128xbf16, #tpu.memory_space<vmem>>, vector<1x1x128x128xbf16>
    %61 = vector.shape_cast %60 : vector<1x1x128x128xbf16> to vector<128x128xbf16>
    %cst_33 = arith.constant dense<0.000000e+00> : vector<256x128xf32>
    %62 = tpu.matmul %59, %61, %cst_33 {dimension_numbers = #tpu.dot_dimension_numbers<[1], [0], [0], [1], [0, 0, 1, 1], [], []>} : vector<256x128xbf16>, vector<128x128xbf16>, vector<256x128xf32> -> vector<256x128xf32>
    %63 = arith.addf %57, %62 : vector<256x128xf32>
    %64 = vector.extract_strided_slice %51 {offsets = [2, 0, 0], sizes = [16, 16, 128], strides = [1, 1, 1]} : vector<18x16x128xbf16> to vector<16x16x128xbf16>
    %65 = vector.shape_cast %64 : vector<16x16x128xbf16> to vector<256x128xbf16>
    %c2_34 = arith.constant 2 : index
    %c1_35 = arith.constant 1 : index
    %c0_36 = arith.constant 0 : index
    %c0_37 = arith.constant 0 : index
    %66 = vector.load %arg4[%c2_34, %c1_35, %c0_36, %c0_37] : memref<3x3x128x128xbf16, #tpu.memory_space<vmem>>, vector<1x1x128x128xbf16>
    %67 = vector.shape_cast %66 : vector<1x1x128x128xbf16> to vector<128x128xbf16>
    %cst_38 = arith.constant dense<0.000000e+00> : vector<256x128xf32>
    %68 = tpu.matmul %65, %67, %cst_38 {dimension_numbers = #tpu.dot_dimension_numbers<[1], [0], [0], [1], [0, 0, 1, 1], [], []>} : vector<256x128xbf16>, vector<128x128xbf16>, vector<256x128xf32> -> vector<256x128xf32>
    %69 = arith.addf %63, %68 : vector<256x128xf32>
    %70 = vector.extract_strided_slice %28 {offsets = [0, 0, 2, 0], sizes = [1, 18, 16, 128], strides = [1, 1, 1, 1]} : vector<1x18x18x128xbf16> to vector<1x18x16x128xbf16>
    %71 = vector.shape_cast %70 : vector<1x18x16x128xbf16> to vector<18x16x128xbf16>
    %72 = vector.extract_strided_slice %71 {offsets = [0, 0, 0], sizes = [16, 16, 128], strides = [1, 1, 1]} : vector<18x16x128xbf16> to vector<16x16x128xbf16>
    %73 = vector.shape_cast %72 : vector<16x16x128xbf16> to vector<256x128xbf16>
    %c0_39 = arith.constant 0 : index
    %c2_40 = arith.constant 2 : index
    %c0_41 = arith.constant 0 : index
    %c0_42 = arith.constant 0 : index
    %74 = vector.load %arg4[%c0_39, %c2_40, %c0_41, %c0_42] : memref<3x3x128x128xbf16, #tpu.memory_space<vmem>>, vector<1x1x128x128xbf16>
    %75 = vector.shape_cast %74 : vector<1x1x128x128xbf16> to vector<128x128xbf16>
    %cst_43 = arith.constant dense<0.000000e+00> : vector<256x128xf32>
    %76 = tpu.matmul %73, %75, %cst_43 {dimension_numbers = #tpu.dot_dimension_numbers<[1], [0], [0], [1], [0, 0, 1, 1], [], []>} : vector<256x128xbf16>, vector<128x128xbf16>, vector<256x128xf32> -> vector<256x128xf32>
    %77 = arith.addf %69, %76 : vector<256x128xf32>
    %78 = vector.extract_strided_slice %71 {offsets = [1, 0, 0], sizes = [16, 16, 128], strides = [1, 1, 1]} : vector<18x16x128xbf16> to vector<16x16x128xbf16>
    %79 = vector.shape_cast %78 : vector<16x16x128xbf16> to vector<256x128xbf16>
    %c1_44 = arith.constant 1 : index
    %c2_45 = arith.constant 2 : index
    %c0_46 = arith.constant 0 : index
    %c0_47 = arith.constant 0 : index
    %80 = vector.load %arg4[%c1_44, %c2_45, %c0_46, %c0_47] : memref<3x3x128x128xbf16, #tpu.memory_space<vmem>>, vector<1x1x128x128xbf16>
    %81 = vector.shape_cast %80 : vector<1x1x128x128xbf16> to vector<128x128xbf16>
    %cst_48 = arith.constant dense<0.000000e+00> : vector<256x128xf32>
    %82 = tpu.matmul %79, %81, %cst_48 {dimension_numbers = #tpu.dot_dimension_numbers<[1], [0], [0], [1], [0, 0, 1, 1], [], []>} : vector<256x128xbf16>, vector<128x128xbf16>, vector<256x128xf32> -> vector<256x128xf32>
    %83 = arith.addf %77, %82 : vector<256x128xf32>
    %84 = vector.extract_strided_slice %71 {offsets = [2, 0, 0], sizes = [16, 16, 128], strides = [1, 1, 1]} : vector<18x16x128xbf16> to vector<16x16x128xbf16>
    %85 = vector.shape_cast %84 : vector<16x16x128xbf16> to vector<256x128xbf16>
    %c2_49 = arith.constant 2 : index
    %c2_50 = arith.constant 2 : index
    %c0_51 = arith.constant 0 : index
    %c0_52 = arith.constant 0 : index
    %86 = vector.load %arg4[%c2_49, %c2_50, %c0_51, %c0_52] : memref<3x3x128x128xbf16, #tpu.memory_space<vmem>>, vector<1x1x128x128xbf16>
    %87 = vector.shape_cast %86 : vector<1x1x128x128xbf16> to vector<128x128xbf16>
    %cst_53 = arith.constant dense<0.000000e+00> : vector<256x128xf32>
    %88 = tpu.matmul %85, %87, %cst_53 {dimension_numbers = #tpu.dot_dimension_numbers<[1], [0], [0], [1], [0, 0, 1, 1], [], []>} : vector<256x128xbf16>, vector<128x128xbf16>, vector<256x128xf32> -> vector<256x128xf32>
    %89 = arith.addf %83, %88 : vector<256x128xf32>
    %c0_54 = arith.constant 0 : index
    %c0_55 = arith.constant 0 : index
    %90 = vector.load %arg5[%c0_54, %c0_55] : memref<128x128xbf16, #tpu.memory_space<vmem>>, vector<128x128xbf16>
    %cst_56 = arith.constant dense<0.000000e+00> : vector<256x128xf32>
    %91 = tpu.matmul %59, %90, %cst_56 {dimension_numbers = #tpu.dot_dimension_numbers<[1], [0], [0], [1], [0, 0, 1, 1], [], []>} : vector<256x128xbf16>, vector<128x128xbf16>, vector<256x128xf32> -> vector<256x128xf32>
    %c0_57 = arith.constant 0 : index
    %c0_58 = arith.constant 0 : index
    %c0_59 = arith.constant 0 : index
    %92 = vector.load %arg6[%c0_57, %c0_58, %c0_59] : memref<1x256x128xf32, #tpu.memory_space<vmem>>, vector<1x256x128xf32>
    %93 = vector.shape_cast %92 : vector<1x256x128xf32> to vector<256x128xf32>
    %94 = vector.shape_cast %89 : vector<256x128xf32> to vector<1x256x128xf32>
    tpu.vector_store %arg6[%c0_57, %c0_58, %c0_59], %94 {strides = array<i32>} : memref<1x256x128xf32, #tpu.memory_space<vmem>>, vector<1x256x128xf32>,
    %c0_60 = arith.constant 0 : index
    %c0_61 = arith.constant 0 : index
    %c0_62 = arith.constant 0 : index
    %95 = vector.load %arg7[%c0_60, %c0_61, %c0_62] : memref<1x256x128xf32, #tpu.memory_space<vmem>>, vector<1x256x128xf32>
    %96 = vector.shape_cast %95 : vector<1x256x128xf32> to vector<256x128xf32>
    %97 = vector.shape_cast %91 : vector<256x128xf32> to vector<1x256x128xf32>
    tpu.vector_store %arg7[%c0_60, %c0_61, %c0_62], %97 {strides = array<i32>} : memref<1x256x128xf32, #tpu.memory_space<vmem>>, vector<1x256x128xf32>,
    %cst_63 = arith.constant dense<0.000000e+00> : vector<128xf32>
    %98 = vector.multi_reduction <add>, %89, %cst_63 [0] : vector<256x128xf32> to vector<128xf32>
    %99 = vector.shape_cast %98 : vector<128xf32> to vector<1x128xf32>
    %cst_64 = arith.constant 2.560000e+02 : f32
    %100 = vector.broadcast %cst_64 : f32 to vector<1x128xf32>
    %101 = arith.divf %99, %100 : vector<1x128xf32>
    %102 = vector.broadcast %101 : vector<1x128xf32> to vector<256x128xf32>
    %103 = arith.subf %89, %102 : vector<256x128xf32>
    %104 = arith.mulf %103, %103 : vector<256x128xf32>
    %cst_65 = arith.constant dense<0.000000e+00> : vector<128xf32>
    %105 = vector.multi_reduction <add>, %104, %cst_65 [0] : vector<256x128xf32> to vector<128xf32>
    %106 = vector.shape_cast %105 : vector<128xf32> to vector<1x128xf32>
    %cst_66 = arith.constant dense<0.000000e+00> : vector<128xf32>
    %107 = vector.multi_reduction <add>, %91, %cst_66 [0] : vector<256x128xf32> to vector<128xf32>
    %108 = vector.shape_cast %107 : vector<128xf32> to vector<1x128xf32>
    %cst_67 = arith.constant 2.560000e+02 : f32
    %109 = vector.broadcast %cst_67 : f32 to vector<1x128xf32>
    %110 = arith.divf %108, %109 : vector<1x128xf32>
    %111 = vector.broadcast %110 : vector<1x128xf32> to vector<256x128xf32>
    %112 = arith.subf %91, %111 : vector<256x128xf32>
    %113 = arith.mulf %112, %112 : vector<256x128xf32>
    %cst_68 = arith.constant dense<0.000000e+00> : vector<128xf32>
    %114 = vector.multi_reduction <add>, %113, %cst_68 [0] : vector<256x128xf32> to vector<128xf32>
    %115 = vector.shape_cast %114 : vector<128xf32> to vector<1x128xf32>
    %c0_69 = arith.constant 0 : index
    %c0_70 = arith.constant 0 : index
    %c0_71 = arith.constant 0 : index
    %116 = vector.load %arg8[%c0_69, %c0_70, %c0_71] : memref<1x1x128xf32, #tpu.memory_space<vmem>>, vector<1x1x128xf32>
    %117 = vector.shape_cast %116 : vector<1x1x128xf32> to vector<1x128xf32>
    %118 = vector.shape_cast %99 : vector<1x128xf32> to vector<1x1x128xf32>
    tpu.vector_store %arg8[%c0_69, %c0_70, %c0_71], %118 {strides = array<i32>} : memref<1x1x128xf32, #tpu.memory_space<vmem>>, vector<1x1x128xf32>,
    %c0_72 = arith.constant 0 : index
    %c0_73 = arith.constant 0 : index
    %c0_74 = arith.constant 0 : index
    %119 = vector.load %arg9[%c0_72, %c0_73, %c0_74] : memref<1x1x128xf32, #tpu.memory_space<vmem>>, vector<1x1x128xf32>
    %120 = vector.shape_cast %119 : vector<1x1x128xf32> to vector<1x128xf32>
    %121 = vector.shape_cast %106 : vector<1x128xf32> to vector<1x1x128xf32>
    tpu.vector_store %arg9[%c0_72, %c0_73, %c0_74], %121 {strides = array<i32>} : memref<1x1x128xf32, #tpu.memory_space<vmem>>, vector<1x1x128xf32>,
    %c0_75 = arith.constant 0 : index
    %c0_76 = arith.constant 0 : index
    %c0_77 = arith.constant 0 : index
    %122 = vector.load %arg10[%c0_75, %c0_76, %c0_77] : memref<1x1x128xf32, #tpu.memory_space<vmem>>, vector<1x1x128xf32>
    %123 = vector.shape_cast %122 : vector<1x1x128xf32> to vector<1x128xf32>
    %124 = vector.shape_cast %108 : vector<1x128xf32> to vector<1x1x128xf32>
    tpu.vector_store %arg10[%c0_75, %c0_76, %c0_77], %124 {strides = array<i32>} : memref<1x1x128xf32, #tpu.memory_space<vmem>>, vector<1x1x128xf32>,
    %c0_78 = arith.constant 0 : index
    %c0_79 = arith.constant 0 : index
    %c0_80 = arith.constant 0 : index
    %125 = vector.load %arg11[%c0_78, %c0_79, %c0_80] : memref<1x1x128xf32, #tpu.memory_space<vmem>>, vector<1x1x128xf32>
    %126 = vector.shape_cast %125 : vector<1x1x128xf32> to vector<1x128xf32>
    %127 = vector.shape_cast %115 : vector<1x128xf32> to vector<1x1x128xf32>
    tpu.vector_store %arg11[%c0_78, %c0_79, %c0_80], %127 {strides = array<i32>} : memref<1x1x128xf32, #tpu.memory_space<vmem>>, vector<1x1x128xf32>,
    return
  }
  func.func @transform_0(%arg0: i32) -> (i32, i32, i32, i32) {
    %c0_i32 = arith.constant 0 : i32
    %c0_i32_0 = arith.constant 0 : i32
    %c0_i32_1 = arith.constant 0 : i32
    %c0_i32_2 = arith.constant 0 : i32
    return %arg0, %c0_i32, %c0_i32_0, %c0_i32_1 : i32, i32, i32, i32
  }
  func.func @transform_1(%arg0: i32) -> (i32, i32) {
    %c0_i32 = arith.constant 0 : i32
    %c0_i32_0 = arith.constant 0 : i32
    %c0_i32_1 = arith.constant 0 : i32
    return %c0_i32, %c0_i32_0 : i32, i32
  }
  func.func @transform_2(%arg0: i32) -> (i32, i32) {
    %c0_i32 = arith.constant 0 : i32
    %c0_i32_0 = arith.constant 0 : i32
    %c0_i32_1 = arith.constant 0 : i32
    return %c0_i32, %c0_i32_0 : i32, i32
  }
  func.func @transform_3(%arg0: i32) -> (i32, i32, i32, i32) {
    %c0_i32 = arith.constant 0 : i32
    %c0_i32_0 = arith.constant 0 : i32
    %c0_i32_1 = arith.constant 0 : i32
    %c0_i32_2 = arith.constant 0 : i32
    %c0_i32_3 = arith.constant 0 : i32
    return %c0_i32, %c0_i32_0, %c0_i32_1, %c0_i32_2 : i32, i32, i32, i32
  }
  func.func @transform_4(%arg0: i32) -> (i32, i32) {
    %c0_i32 = arith.constant 0 : i32
    %c0_i32_0 = arith.constant 0 : i32
    %c0_i32_1 = arith.constant 0 : i32
    return %c0_i32, %c0_i32_0 : i32, i32
  }
  func.func @transform_5(%arg0: i32) -> (i32, i32, i32) {
    %c0_i32 = arith.constant 0 : i32
    %c0_i32_0 = arith.constant 0 : i32
    %c0_i32_1 = arith.constant 0 : i32
    return %arg0, %c0_i32, %c0_i32_0 : i32, i32, i32
  }
  func.func @transform_6(%arg0: i32) -> (i32, i32, i32) {
    %c0_i32 = arith.constant 0 : i32
    %c0_i32_0 = arith.constant 0 : i32
    %c0_i32_1 = arith.constant 0 : i32
    return %arg0, %c0_i32, %c0_i32_0 : i32, i32, i32
  }
  func.func @transform_7(%arg0: i32) -> (i32, i32, i32) {
    %c0_i32 = arith.constant 0 : i32
    %c0_i32_0 = arith.constant 0 : i32
    %c0_i32_1 = arith.constant 0 : i32
    return %arg0, %c0_i32, %c0_i32_0 : i32, i32, i32
  }
  func.func @transform_8(%arg0: i32) -> (i32, i32, i32) {
    %c0_i32 = arith.constant 0 : i32
    %c0_i32_0 = arith.constant 0 : i32
    %c0_i32_1 = arith.constant 0 : i32
    return %arg0, %c0_i32, %c0_i32_0 : i32, i32, i32
  }
  func.func @transform_9(%arg0: i32) -> (i32, i32, i32) {
    %c0_i32 = arith.constant 0 : i32
    %c0_i32_0 = arith.constant 0 : i32
    %c0_i32_1 = arith.constant 0 : i32
    return %arg0, %c0_i32, %c0_i32_0 : i32, i32, i32
  }
  func.func @transform_10(%arg0: i32) -> (i32, i32, i32) {
    %c0_i32 = arith.constant 0 : i32
    %c0_i32_0 = arith.constant 0 : i32
    %c0_i32_1 = arith.constant 0 : i32
    return %arg0, %c0_i32, %c0_i32_0 : i32, i32, i32
  }
}

module attributes {stable_mosaic.version = 11 : i64} {
  func.func @_bn2_gemm_stats_kernel(%arg0: i32, %arg1: memref<512x128xf32, #tpu.memory_space<vmem>>, %arg2: memref<512x128xf32, #tpu.memory_space<vmem>>, %arg3: memref<1x128xf32, #tpu.memory_space<vmem>>, %arg4: memref<1x128xf32, #tpu.memory_space<vmem>>, %arg5: memref<1x128xf32, #tpu.memory_space<vmem>>, %arg6: memref<1x128xf32, #tpu.memory_space<vmem>>, %arg7: memref<128x128xbf16, #tpu.memory_space<vmem>>, %arg8: memref<512x128xf32, #tpu.memory_space<vmem>>, %arg9: memref<1x1x128xf32, #tpu.memory_space<vmem>>, %arg10: memref<1x1x128xf32, #tpu.memory_space<vmem>>) attributes {dimension_semantics = [#tpu.dimension_semantics<parallel>], iteration_bounds = array<i64: 1>, scalar_prefetch = 0 : i64, scratch_operands = 0 : i64, tpu.core_type = #tpu.core_type<tc>, window_params = [{transform_indices = @transform_0, window_bounds = array<i64: 512, 128>}, {transform_indices = @transform_1, window_bounds = array<i64: 512, 128>}, {pipeline_mode = #tpu.pipeline_mode<synchronous>, transform_indices = @transform_2, window_bounds = array<i64: 1, 128>}, {pipeline_mode = #tpu.pipeline_mode<synchronous>, transform_indices = @transform_3, window_bounds = array<i64: 1, 128>}, {pipeline_mode = #tpu.pipeline_mode<synchronous>, transform_indices = @transform_4, window_bounds = array<i64: 1, 128>}, {pipeline_mode = #tpu.pipeline_mode<synchronous>, transform_indices = @transform_5, window_bounds = array<i64: 1, 128>}, {pipeline_mode = #tpu.pipeline_mode<synchronous>, transform_indices = @transform_6, window_bounds = array<i64: 128, 128>}, {transform_indices = @transform_7, window_bounds = array<i64: 512, 128>}, {transform_indices = @transform_8, window_bounds = array<i64: 1, 1, 128>}, {transform_indices = @transform_9, window_bounds = array<i64: 1, 1, 128>}]} {
    %c0 = arith.constant 0 : index
    %c0_0 = arith.constant 0 : index
    %0 = vector.load %arg1[%c0, %c0_0] : memref<512x128xf32, #tpu.memory_space<vmem>>, vector<512x128xf32>
    %c0_1 = arith.constant 0 : index
    %c0_2 = arith.constant 0 : index
    %1 = vector.load %arg3[%c0_1, %c0_2] : memref<1x128xf32, #tpu.memory_space<vmem>>, vector<1x128xf32>
    %2 = vector.broadcast %1 : vector<1x128xf32> to vector<512x128xf32>
    %3 = arith.mulf %0, %2 : vector<512x128xf32>
    %c0_3 = arith.constant 0 : index
    %c0_4 = arith.constant 0 : index
    %4 = vector.load %arg4[%c0_3, %c0_4] : memref<1x128xf32, #tpu.memory_space<vmem>>, vector<1x128xf32>
    %5 = vector.broadcast %4 : vector<1x128xf32> to vector<512x128xf32>
    %6 = arith.addf %3, %5 : vector<512x128xf32>
    %c0_5 = arith.constant 0 : index
    %c0_6 = arith.constant 0 : index
    %7 = vector.load %arg2[%c0_5, %c0_6] : memref<512x128xf32, #tpu.memory_space<vmem>>, vector<512x128xf32>
    %c0_7 = arith.constant 0 : index
    %c0_8 = arith.constant 0 : index
    %8 = vector.load %arg5[%c0_7, %c0_8] : memref<1x128xf32, #tpu.memory_space<vmem>>, vector<1x128xf32>
    %9 = vector.broadcast %8 : vector<1x128xf32> to vector<512x128xf32>
    %10 = arith.mulf %7, %9 : vector<512x128xf32>
    %c0_9 = arith.constant 0 : index
    %c0_10 = arith.constant 0 : index
    %11 = vector.load %arg6[%c0_9, %c0_10] : memref<1x128xf32, #tpu.memory_space<vmem>>, vector<1x128xf32>
    %12 = vector.broadcast %11 : vector<1x128xf32> to vector<512x128xf32>
    %13 = arith.addf %10, %12 : vector<512x128xf32>
    %14 = arith.addf %6, %13 : vector<512x128xf32>
    %cst = arith.constant 0.000000e+00 : f32
    %15 = vector.broadcast %cst : f32 to vector<512x128xf32>
    %16 = arith.maximumf %14, %15 : vector<512x128xf32>
    %17 = arith.truncf %16 : vector<512x128xf32> to vector<512x128xbf16>
    %c0_11 = arith.constant 0 : index
    %c0_12 = arith.constant 0 : index
    %18 = vector.load %arg7[%c0_11, %c0_12] : memref<128x128xbf16, #tpu.memory_space<vmem>>, vector<128x128xbf16>
    %cst_13 = arith.constant dense<0.000000e+00> : vector<512x128xf32>
    %19 = tpu.matmul %17, %18, %cst_13 {dimension_numbers = #tpu.dot_dimension_numbers<[1], [0], [0], [1], [0, 0, 1, 1], [], []>} : vector<512x128xbf16>, vector<128x128xbf16>, vector<512x128xf32> -> vector<512x128xf32>
    %c0_14 = arith.constant 0 : index
    %c0_15 = arith.constant 0 : index
    %20 = vector.load %arg8[%c0_14, %c0_15] : memref<512x128xf32, #tpu.memory_space<vmem>>, vector<512x128xf32>
    tpu.vector_store %arg8[%c0_14, %c0_15], %19 {strides = array<i32>} : memref<512x128xf32, #tpu.memory_space<vmem>>, vector<512x128xf32>,
    %cst_16 = arith.constant dense<0.000000e+00> : vector<128xf32>
    %21 = vector.multi_reduction <add>, %19, %cst_16 [0] : vector<512x128xf32> to vector<128xf32>
    %22 = vector.shape_cast %21 : vector<128xf32> to vector<1x128xf32>
    %cst_17 = arith.constant 5.120000e+02 : f32
    %23 = vector.broadcast %cst_17 : f32 to vector<1x128xf32>
    %24 = arith.divf %22, %23 : vector<1x128xf32>
    %25 = vector.broadcast %24 : vector<1x128xf32> to vector<512x128xf32>
    %26 = arith.subf %19, %25 : vector<512x128xf32>
    %27 = arith.mulf %26, %26 : vector<512x128xf32>
    %cst_18 = arith.constant dense<0.000000e+00> : vector<128xf32>
    %28 = vector.multi_reduction <add>, %27, %cst_18 [0] : vector<512x128xf32> to vector<128xf32>
    %29 = vector.shape_cast %28 : vector<128xf32> to vector<1x128xf32>
    %c0_19 = arith.constant 0 : index
    %c0_20 = arith.constant 0 : index
    %c0_21 = arith.constant 0 : index
    %30 = vector.load %arg9[%c0_19, %c0_20, %c0_21] : memref<1x1x128xf32, #tpu.memory_space<vmem>>, vector<1x1x128xf32>
    %31 = vector.shape_cast %30 : vector<1x1x128xf32> to vector<1x128xf32>
    %32 = vector.shape_cast %22 : vector<1x128xf32> to vector<1x1x128xf32>
    tpu.vector_store %arg9[%c0_19, %c0_20, %c0_21], %32 {strides = array<i32>} : memref<1x1x128xf32, #tpu.memory_space<vmem>>, vector<1x1x128xf32>,
    %c0_22 = arith.constant 0 : index
    %c0_23 = arith.constant 0 : index
    %c0_24 = arith.constant 0 : index
    %33 = vector.load %arg10[%c0_22, %c0_23, %c0_24] : memref<1x1x128xf32, #tpu.memory_space<vmem>>, vector<1x1x128xf32>
    %34 = vector.shape_cast %33 : vector<1x1x128xf32> to vector<1x128xf32>
    %35 = vector.shape_cast %29 : vector<1x128xf32> to vector<1x1x128xf32>
    tpu.vector_store %arg10[%c0_22, %c0_23, %c0_24], %35 {strides = array<i32>} : memref<1x1x128xf32, #tpu.memory_space<vmem>>, vector<1x1x128xf32>,
    return
  }
  func.func @transform_0(%arg0: i32) -> (i32, i32) {
    %c0_i32 = arith.constant 0 : i32
    %c0_i32_0 = arith.constant 0 : i32
    return %arg0, %c0_i32 : i32, i32
  }
  func.func @transform_1(%arg0: i32) -> (i32, i32) {
    %c0_i32 = arith.constant 0 : i32
    %c0_i32_0 = arith.constant 0 : i32
    return %arg0, %c0_i32 : i32, i32
  }
  func.func @transform_2(%arg0: i32) -> (i32, i32) {
    %c0_i32 = arith.constant 0 : i32
    %c0_i32_0 = arith.constant 0 : i32
    %c0_i32_1 = arith.constant 0 : i32
    return %c0_i32, %c0_i32_0 : i32, i32
  }
  func.func @transform_3(%arg0: i32) -> (i32, i32) {
    %c0_i32 = arith.constant 0 : i32
    %c0_i32_0 = arith.constant 0 : i32
    %c0_i32_1 = arith.constant 0 : i32
    return %c0_i32, %c0_i32_0 : i32, i32
  }
  func.func @transform_4(%arg0: i32) -> (i32, i32) {
    %c0_i32 = arith.constant 0 : i32
    %c0_i32_0 = arith.constant 0 : i32
    %c0_i32_1 = arith.constant 0 : i32
    return %c0_i32, %c0_i32_0 : i32, i32
  }
  func.func @transform_5(%arg0: i32) -> (i32, i32) {
    %c0_i32 = arith.constant 0 : i32
    %c0_i32_0 = arith.constant 0 : i32
    %c0_i32_1 = arith.constant 0 : i32
    return %c0_i32, %c0_i32_0 : i32, i32
  }
  func.func @transform_6(%arg0: i32) -> (i32, i32) {
    %c0_i32 = arith.constant 0 : i32
    %c0_i32_0 = arith.constant 0 : i32
    %c0_i32_1 = arith.constant 0 : i32
    return %c0_i32, %c0_i32_0 : i32, i32
  }
  func.func @transform_7(%arg0: i32) -> (i32, i32) {
    %c0_i32 = arith.constant 0 : i32
    %c0_i32_0 = arith.constant 0 : i32
    return %arg0, %c0_i32 : i32, i32
  }
  func.func @transform_8(%arg0: i32) -> (i32, i32, i32) {
    %c0_i32 = arith.constant 0 : i32
    %c0_i32_0 = arith.constant 0 : i32
    %c0_i32_1 = arith.constant 0 : i32
    return %arg0, %c0_i32, %c0_i32_0 : i32, i32, i32
  }
  func.func @transform_9(%arg0: i32) -> (i32, i32, i32) {
    %c0_i32 = arith.constant 0 : i32
    %c0_i32_0 = arith.constant 0 : i32
    %c0_i32_1 = arith.constant 0 : i32
    return %arg0, %c0_i32, %c0_i32_0 : i32, i32, i32
  }
}

module attributes {stable_mosaic.version = 11 : i64} {
  func.func @_bn_relu_residual_kernel(%arg0: i32, %arg1: memref<512x128xf32, #tpu.memory_space<vmem>>, %arg2: memref<1x128xf32, #tpu.memory_space<vmem>>, %arg3: memref<1x128xf32, #tpu.memory_space<vmem>>, %arg4: memref<512x4xf32, #tpu.memory_space<vmem>>, %arg5: memref<512x4xf32, #tpu.memory_space<vmem>>) attributes {dimension_semantics = [#tpu.dimension_semantics<parallel>], iteration_bounds = array<i64: 1>, scalar_prefetch = 0 : i64, scratch_operands = 0 : i64, tpu.core_type = #tpu.core_type<tc>, window_params = [{transform_indices = @transform_0, window_bounds = array<i64: 512, 128>}, {pipeline_mode = #tpu.pipeline_mode<synchronous>, transform_indices = @transform_1, window_bounds = array<i64: 1, 128>}, {pipeline_mode = #tpu.pipeline_mode<synchronous>, transform_indices = @transform_2, window_bounds = array<i64: 1, 128>}, {transform_indices = @transform_3, window_bounds = array<i64: 512, 4>}, {transform_indices = @transform_4, window_bounds = array<i64: 512, 4>}]} {
    %c0 = arith.constant 0 : index
    %c0_0 = arith.constant 0 : index
    %0 = vector.load %arg1[%c0, %c0_0] : memref<512x128xf32, #tpu.memory_space<vmem>>, vector<512x128xf32>
    %c0_1 = arith.constant 0 : index
    %c0_2 = arith.constant 0 : index
    %1 = vector.load %arg2[%c0_1, %c0_2] : memref<1x128xf32, #tpu.memory_space<vmem>>, vector<1x128xf32>
    %2 = vector.broadcast %1 : vector<1x128xf32> to vector<512x128xf32>
    %3 = arith.mulf %0, %2 : vector<512x128xf32>
    %c0_3 = arith.constant 0 : index
    %c0_4 = arith.constant 0 : index
    %4 = vector.load %arg3[%c0_3, %c0_4] : memref<1x128xf32, #tpu.memory_space<vmem>>, vector<1x128xf32>
    %5 = vector.broadcast %4 : vector<1x128xf32> to vector<512x128xf32>
    %6 = arith.addf %3, %5 : vector<512x128xf32>
    %cst = arith.constant 0.000000e+00 : f32
    %7 = vector.broadcast %cst : f32 to vector<512x128xf32>
    %8 = arith.maximumf %6, %7 : vector<512x128xf32>
    %c0_5 = arith.constant 0 : index
    %c0_6 = arith.constant 0 : index
    %9 = vector.load %arg4[%c0_5, %c0_6] : memref<512x4xf32, #tpu.memory_space<vmem>>, vector<512x4xf32>
    %10 = vector.extract_strided_slice %8 {offsets = [0, 0], sizes = [512, 4], strides = [1, 1]} : vector<512x128xf32> to vector<512x4xf32>
    %11 = arith.addf %9, %10 : vector<512x4xf32>
    %c0_7 = arith.constant 0 : index
    %c0_8 = arith.constant 0 : index
    %12 = vector.load %arg5[%c0_7, %c0_8] : memref<512x4xf32, #tpu.memory_space<vmem>>, vector<512x4xf32>
    tpu.vector_store %arg5[%c0_7, %c0_8], %11 {strides = array<i32>} : memref<512x4xf32, #tpu.memory_space<vmem>>, vector<512x4xf32>,
    return
  }
  func.func @transform_0(%arg0: i32) -> (i32, i32) {
    %c0_i32 = arith.constant 0 : i32
    %c0_i32_0 = arith.constant 0 : i32
    return %arg0, %c0_i32 : i32, i32
  }
  func.func @transform_1(%arg0: i32) -> (i32, i32) {
    %c0_i32 = arith.constant 0 : i32
    %c0_i32_0 = arith.constant 0 : i32
    %c0_i32_1 = arith.constant 0 : i32
    return %c0_i32, %c0_i32_0 : i32, i32
  }
  func.func @transform_2(%arg0: i32) -> (i32, i32) {
    %c0_i32 = arith.constant 0 : i32
    %c0_i32_0 = arith.constant 0 : i32
    %c0_i32_1 = arith.constant 0 : i32
    return %c0_i32, %c0_i32_0 : i32, i32
  }
  func.func @transform_3(%arg0: i32) -> (i32, i32) {
    %c0_i32 = arith.constant 0 : i32
    %c0_i32_0 = arith.constant 0 : i32
    return %arg0, %c0_i32 : i32, i32
  }
  func.func @transform_4(%arg0: i32) -> (i32, i32) {
    %c0_i32 = arith.constant 0 : i32
    %c0_i32_0 = arith.constant 0 : i32
    return %arg0, %c0_i32 : i32, i32
  }
}

</mosaic_0001>

<bundles_post_ra>
// kernel: res_block.4
= control target key start
LH: loop header
LB: loop body
LE: loop exit
PB: predicated region body
PF: predicated region fallthrough
CT: control target
= control target key end

     0   :  { %s1915_s1 = inlined_call_operand.vmem [shape: bf16[128,128], index: 1, kind: input, shape index: {}]   ;;  %s1916_s0 = inlined_call_operand.vmem [shape: bf16[512,128], index: 0, kind: input, shape index: {}]   ;;  %s1917_s2 = inlined_call_operand.vmem [shape: f32[512,128], index: 2, kind: output, shape index: {0}]   ;;  %s1918_s3 = inlined_call_operand.vmem [shape: f32[1,1,128], index: 3, kind: output, shape index: {1}]   ;;  %s1919_s4 = inlined_call_operand.vmem [shape: f32[1,1,128], index: 4, kind: output, shape index: {2}]  }
   0x1   :  { %v1146_v0 = vld [vmem:[%s1915_s1 + $0x38] sm:$0xff]   ;;  %v1147_v1 = vld [vmem:[%s1915_s1 + $0x30] sm:$0xff]   ;;  %v1148_v2 = vld [vmem:[%s1915_s1 + $0x28] sm:$0xff]  }
   0x2   :  { %1050 = vmatprep.subr.bf16.mxu0 %v1146_v0  ;;  %1130 = vmatprep.subr.bf16.mxu1 %v1146_v0  ;;  %v1149_v3 = vld [vmem:[%s1915_s1 + $0x20] sm:$0xff]   ;;  %v1150_v5 = vld [vmem:[%s1915_s1 + $0x18] sm:$0xff]   ;;  %v1151_v6 = vld [vmem:[%s1915_s1 + $0x10] sm:$0xff]  }
   0x3   :  { %1051 = vmatpush3.bf16.msra.mxu0 %v1146_v0  ;;  %1138 = vmatpush3.bf16.msra.mxu1 %v1146_v0  ;;  %v1154_v4 = vld [vmem:[%s1916_s0] sm:$0xff]   ;;  %v1152_v7 = vld [vmem:[%s1915_s1 + $0x8] sm:$0xff]   ;;  %v1156_v11 = vld [vmem:[%s1916_s0 + $0x10] sm:$0xff]  }
   0x4   :  { %1052 = vmatprep.subr.bf16.mxu0 %v1147_v1  ;;  %1131 = vmatprep.subr.bf16.mxu1 %v1147_v1  ;;  %v1153_v8 = vld [vmem:[%s1915_s1] sm:$0xff]   ;;  %v1155_v10 = vld [vmem:[%s1916_s0 + $0x8] sm:$0xff]   ;;  %v1172_v13 = vld [vmem:[%s1916_s0 + $0x90] sm:$0xff]  }
   0x5   :  { %1066 = vmatprep.mubr.bf16.mxu0 %v1154_v4  ;;  %v1170_v9 = vld [vmem:[%s1916_s0 + $0x80] sm:$0xff]   ;;  %v1171_v12 = vld [vmem:[%s1916_s0 + $0x88] sm:$0xff]   ;;  %v1157_v14 = vld [vmem:[%s1916_s0 + $0x18] sm:$0xff]  }
   0x6   :  { %1098 = vmatprep.mubr.bf16.mxu1 %v1170_v9  ;;  %v1158_v15 = vld [vmem:[%s1916_s0 + $0x20] sm:$0xff]   ;;  %v1173_v16 = vld [vmem:[%s1916_s0 + $0x98] sm:$0xff]   ;;  %v1159_v18 = vld [vmem:[%s1916_s0 + $0x28] sm:$0xff]  }
   0x7   :  { %1053 = vmatpush3.bf16.msra.mxu0 %v1147_v1  ;;  %1139 = vmatpush3.bf16.msra.mxu1 %v1147_v1  ;;  %v1174_v17 = vld [vmem:[%s1916_s0 + $0xa0] sm:$0xff]   ;;  %v1175_v19 = vld [vmem:[%s1916_s0 + $0xa8] sm:$0xff]   ;;  %v1160_v20 = vld [vmem:[%s1916_s0 + $0x30] sm:$0xff]  }
   0x8   :  { %1054 = vmatprep.subr.bf16.mxu0 %v1148_v2  ;;  %1132 = vmatprep.subr.bf16.mxu1 %v1148_v2  ;;  %v1176_v21 = vld [vmem:[%s1916_s0 + $0xb0] sm:$0xff]   ;;  %v1161_v22 = vld [vmem:[%s1916_s0 + $0x38] sm:$0xff]   ;;  %v1162_v24 = vld [vmem:[%s1916_s0 + $0x40] sm:$0xff]  }
   0x9   :  { %v1177_v23 = vld [vmem:[%s1916_s0 + $0xb8] sm:$0xff]   ;;  %v1178_v25 = vld [vmem:[%s1916_s0 + $0xc0] sm:$0xff]   ;;  %v1163_v26 = vld [vmem:[%s1916_s0 + $0x48] sm:$0xff]  }
   0xa   :  { %v1179_v27 = vld [vmem:[%s1916_s0 + $0xc8] sm:$0xff]   ;;  %v1164_v28 = vld [vmem:[%s1916_s0 + $0x50] sm:$0xff]   ;;  %v1165_v30 = vld [vmem:[%s1916_s0 + $0x58] sm:$0xff]  }
   0xb   :  { %1055 = vmatpush3.bf16.msra.mxu0 %v1148_v2  ;;  %1140 = vmatpush3.bf16.msra.mxu1 %v1148_v2  ;;  %v1180_v29 = vld [vmem:[%s1916_s0 + $0xd0] sm:$0xff]   ;;  %v1181_v31 = vld [vmem:[%s1916_s0 + $0xd8] sm:$0xff]   ;;  %v1166_v32 = vld [vmem:[%s1916_s0 + $0x60] sm:$0xff]  }
   0xc   :  { %1056 = vmatprep.subr.bf16.mxu0 %v1149_v3  ;;  %1133 = vmatprep.subr.bf16.mxu1 %v1149_v3  ;;  %v1182_v33 = vld [vmem:[%s1916_s0 + $0xe0] sm:$0xff]   ;;  %v1167_v34 = vld [vmem:[%s1916_s0 + $0x68] sm:$0xff]   ;;  %v1168_v36 = vld [vmem:[%s1916_s0 + $0x70] sm:$0xff]  }
   0xd   :  { %v1183_v35 = vld [vmem:[%s1916_s0 + $0xe8] sm:$0xff]   ;;  %v1184_v37 = vld [vmem:[%s1916_s0 + $0xf0] sm:$0xff]   ;;  %v1169_v38 = vld [vmem:[%s1916_s0 + $0x78] sm:$0xff]  }
   0xe   :  { %v1185_v39 = vld [vmem:[%s1916_s0 + $0xf8] sm:$0xff]  }
   0xf   :  { %1057 = vmatpush3.bf16.msra.mxu0 %v1149_v3  ;;  %1141 = vmatpush3.bf16.msra.mxu1 %v1149_v3 }
  0x10   :  { %1058 = vmatprep.subr.bf16.mxu0 %v1150_v5  ;;  %1134 = vmatprep.subr.bf16.mxu1 %v1150_v5 }
  0x13   :  { %1059 = vmatpush3.bf16.msra.mxu0 %v1150_v5  ;;  %1142 = vmatpush3.bf16.msra.mxu1 %v1150_v5 }
  0x14   :  { %1060 = vmatprep.subr.bf16.mxu0 %v1151_v6  ;;  %1135 = vmatprep.subr.bf16.mxu1 %v1151_v6 }
  0x17   :  { %1061 = vmatpush3.bf16.msra.mxu0 %v1151_v6  ;;  %1143 = vmatpush3.bf16.msra.mxu1 %v1151_v6 }
  0x18   :  { %1062 = vmatprep.subr.bf16.mxu0 %v1152_v7  ;;  %1136 = vmatprep.subr.bf16.mxu1 %v1152_v7 }
  0x1b   :  { %1063 = vmatpush3.bf16.msra.mxu0 %v1152_v7  ;;  %1144 = vmatpush3.bf16.msra.mxu1 %v1152_v7 }
  0x1c   :  { %1064 = vmatprep.subr.bf16.mxu0 %v1153_v8  ;;  %1137 = vmatprep.subr.bf16.mxu1 %v1153_v8 }
  0x1f   :  { %1065 = vmatpush3.bf16.msra.mxu0 %v1153_v8  ;;  %1145 = vmatpush3.bf16.msra.mxu1 %v1153_v8 }
  0x22   :  { %1067 = vmatmul.mubr.bf16.vlgmr.msra.gmra.mxu0 %v1155_v10  ;;  %1099 = vmatmul.mubr.bf16.vlgmr.msra.gmra.mxu1 %v1171_v12 }
  0x23   :  { %1070 = vmatprep.mubr.bf16.mxu0 %v1156_v11  ;;  %1102 = vmatprep.mubr.bf16.mxu1 %v1172_v13 }
  0x2a   :  { %1071 = vmatmul.mubr.bf16.gmra.mxu0 %v1157_v14  ;;  %1103 = vmatmul.mubr.bf16.gmra.mxu1 %v1173_v16 }
  0x2b   :  { %1074 = vmatprep.mubr.bf16.mxu0 %v1158_v15  ;;  %1106 = vmatprep.mubr.bf16.mxu1 %v1174_v17 }
  0x32   :  { %1075 = vmatmul.mubr.bf16.gmra.mxu0 %v1159_v18  ;;  %1107 = vmatmul.mubr.bf16.gmra.mxu1 %v1175_v19 }
  0x33   :  { %1078 = vmatprep.mubr.bf16.mxu0 %v1160_v20  ;;  %1110 = vmatprep.mubr.bf16.mxu1 %v1176_v21 }
  0x3a   :  { %1079 = vmatmul.mubr.bf16.gmra.mxu0 %v1161_v22  ;;  %1111 = vmatmul.mubr.bf16.gmra.mxu1 %v1177_v23 }
  0x3b   :  { %1082 = vmatprep.mubr.bf16.mxu0 %v1162_v24  ;;  %1114 = vmatprep.mubr.bf16.mxu1 %v1178_v25 }
  0x42   :  { %1083 = vmatmul.mubr.bf16.gmra.mxu0 %v1163_v26  ;;  %1115 = vmatmul.mubr.bf16.gmra.mxu1 %v1179_v27 }
  0x43   :  { %1086 = vmatprep.mubr.bf16.mxu0 %v1164_v28  ;;  %1118 = vmatprep.mubr.bf16.mxu1 %v1180_v29 }
  0x4a   :  { %1087 = vmatmul.mubr.bf16.gmra.mxu0 %v1165_v30  ;;  %1119 = vmatmul.mubr.bf16.gmra.mxu1 %v1181_v31 }
  0x4b   :  { %1090 = vmatprep.mubr.bf16.mxu0 %v1166_v32  ;;  %1122 = vmatprep.mubr.bf16.mxu1 %v1182_v33 }
  0x52   :  { %1091 = vmatmul.mubr.bf16.gmra.mxu0 %v1167_v34  ;;  %1123 = vmatmul.mubr.bf16.gmra.mxu1 %v1183_v35 }
  0x53   :  { %1094 = vmatprep.mubr.bf16.mxu0 %v1168_v36  ;;  %1126 = vmatprep.mubr.bf16.mxu1 %v1184_v37 }
  0x5a   :  { %1095 = vmatmul.mubr.bf16.gmra.mxu0 %v1169_v38  ;;  %1127 = vmatmul.mubr.bf16.gmra.mxu1 %v1185_v39 }
  0xe2   :  { %v1331_v40 = vpop.f32.mrf.mxu0  ;;  %v1333_v41 = vpop.f32.mrf.mxu1 }
  0xe3   :  { %626 = vst [vmem:[%s1917_s2 + $0x10] sm:$0xff] %v1331_v40  ;;  %658 = vst [vmem:[%s1917_s2 + $0x110] sm:$0xff] %v1333_v41 }
  0xe4   :  { %v1343_v42 = vpop.f32.mrf.mxu0  ;;  %v1345_v43 = vpop.f32.mrf.mxu1 }
  0xe5   :  { %624 = vst [vmem:[%s1917_s2] sm:$0xff] %v1343_v42  ;;  %656 = vst [vmem:[%s1917_s2 + $0x100] sm:$0xff] %v1345_v43 }
  0xe6   :  { %v1355_v44 = vpop.f32.mrf.mxu0  ;;  %v1357_v45 = vpop.f32.mrf.mxu1 }
  0xe7   :  { %627 = vst [vmem:[%s1917_s2 + $0x18] sm:$0xff] %v1355_v44  ;;  %659 = vst [vmem:[%s1917_s2 + $0x118] sm:$0xff] %v1357_v45 }
  0xe8   :  { %v1367_v46 = vpop.f32.mrf.mxu0  ;;  %v1369_v47 = vpop.f32.mrf.mxu1 }
  0xe9   :  { %625 = vst [vmem:[%s1917_s2 + $0x8] sm:$0xff] %v1367_v46  ;;  %v688_v48 = vadd.f32 %v1367_v46, %v1343_v42  ;;  %657 = vst [vmem:[%s1917_s2 + $0x108] sm:$0xff] %v1369_v47 }
  0xea   :  { %v1381_v49 = vpop.f32.mrf.mxu0  ;;  %v1383_v50 = vpop.f32.mrf.mxu1 }
  0xeb   :  { %v689_v51 = vadd.f32 %v1331_v40, %v688_v48  ;;  %630 = vst [vmem:[%s1917_s2 + $0x30] sm:$0xff] %v1381_v49  ;;  %662 = vst [vmem:[%s1917_s2 + $0x130] sm:$0xff] %v1383_v50 }
  0xec   :  { %v1394_v52 = vpop.f32.mrf.mxu0  ;;  %v1396_v53 = vpop.f32.mrf.mxu1 }
  0xed   :  { %628 = vst [vmem:[%s1917_s2 + $0x20] sm:$0xff] %v1394_v52  ;;  %v690_v54 = vadd.f32 %v1355_v44, %v689_v51  ;;  %660 = vst [vmem:[%s1917_s2 + $0x120] sm:$0xff] %v1396_v53 }
  0xee   :  { %v1407_v55 = vpop.f32.mrf.mxu0  ;;  %v1409_v56 = vpop.f32.mrf.mxu1 }
  0xef   :  { %v691_v57 = vadd.f32 %v690_v54, %v1394_v52  ;;  %631 = vst [vmem:[%s1917_s2 + $0x38] sm:$0xff] %v1407_v55  ;;  %663 = vst [vmem:[%s1917_s2 + $0x138] sm:$0xff] %v1409_v56 }
  0xf0   :  { %v1420_v58 = vpop.f32.mrf.mxu0  ;;  %v1422_v59 = vpop.f32.mrf.mxu1 }
  0xf1   :  { %629 = vst [vmem:[%s1917_s2 + $0x28] sm:$0xff] %v1420_v58  ;;  %v692_v60 = vadd.f32 %v691_v57, %v1420_v58  ;;  %661 = vst [vmem:[%s1917_s2 + $0x128] sm:$0xff] %v1422_v59 }
  0xf2   :  { %v1433_v61 = vpop.f32.mrf.mxu0  ;;  %v1435_v62 = vpop.f32.mrf.mxu1 }
  0xf3   :  { %v693_v63 = vadd.f32 %v1381_v49, %v692_v60  ;;  %634 = vst [vmem:[%s1917_s2 + $0x50] sm:$0xff] %v1433_v61  ;;  %666 = vst [vmem:[%s1917_s2 + $0x150] sm:$0xff] %v1435_v62 }
  0xf4   :  { %v1446_v0 = vpop.f32.mrf.mxu0  ;;  %v1448_v1 = vpop.f32.mrf.mxu1 }
  0xf5   :  { %632 = vst [vmem:[%s1917_s2 + $0x40] sm:$0xff] %v1446_v0  ;;  %v694_v2 = vadd.f32 %v1407_v55, %v693_v63  ;;  %664 = vst [vmem:[%s1917_s2 + $0x140] sm:$0xff] %v1448_v1 }
  0xf6   :  { %v1459_v3 = vpop.f32.mrf.mxu0  ;;  %v1461_v4 = vpop.f32.mrf.mxu1 }
  0xf7   :  { %v695_v5 = vadd.f32 %v694_v2, %v1446_v0  ;;  %635 = vst [vmem:[%s1917_s2 + $0x58] sm:$0xff] %v1459_v3  ;;  %667 = vst [vmem:[%s1917_s2 + $0x158] sm:$0xff] %v1461_v4 }
  0xf8   :  { %v1472_v6 = vpop.f32.mrf.mxu0  ;;  %v1474_v7 = vpop.f32.mrf.mxu1 }
  0xf9   :  { %633 = vst [vmem:[%s1917_s2 + $0x48] sm:$0xff] %v1472_v6  ;;  %v696_v8 = vadd.f32 %v695_v5, %v1472_v6  ;;  %665 = vst [vmem:[%s1917_s2 + $0x148] sm:$0xff] %v1474_v7 }
  0xfa   :  { %v1485_v9 = vpop.f32.mrf.mxu0  ;;  %v1487_v10 = vpop.f32.mrf.mxu1 }
  0xfb   :  { %v697_v11 = vadd.f32 %v1433_v61, %v696_v8  ;;  %638 = vst [vmem:[%s1917_s2 + $0x70] sm:$0xff] %v1485_v9  ;;  %670 = vst [vmem:[%s1917_s2 + $0x170] sm:$0xff] %v1487_v10 }
  0xfc   :  { %v1498_v12 = vpop.f32.mrf.mxu0  ;;  %v1500_v13 = vpop.f32.mrf.mxu1 }
  0xfd   :  { %636 = vst [vmem:[%s1917_s2 + $0x60] sm:$0xff] %v1498_v12  ;;  %v698_v14 = vadd.f32 %v1459_v3, %v697_v11  ;;  %668 = vst [vmem:[%s1917_s2 + $0x160] sm:$0xff] %v1500_v13 }
  0xfe   :  { %v1511_v15 = vpop.f32.mrf.mxu0  ;;  %v1513_v16 = vpop.f32.mrf.mxu1 }
  0xff   :  { %v699_v17 = vadd.f32 %v698_v14, %v1498_v12  ;;  %639 = vst [vmem:[%s1917_s2 + $0x78] sm:$0xff] %v1511_v15  ;;  %671 = vst [vmem:[%s1917_s2 + $0x178] sm:$0xff] %v1513_v16 }
 0x100   :  { %v1524_v18 = vpop.f32.mrf.mxu0  ;;  %v1526_v19 = vpop.f32.mrf.mxu1 }
 0x101   :  { %637 = vst [vmem:[%s1917_s2 + $0x68] sm:$0xff] %v1524_v18  ;;  %v700_v20 = vadd.f32 %v699_v17, %v1524_v18  ;;  %669 = vst [vmem:[%s1917_s2 + $0x168] sm:$0xff] %v1526_v19 }
 0x102   :  { %v1537_v21 = vpop.f32.mrf.mxu0  ;;  %v1539_v22 = vpop.f32.mrf.mxu1 }
 0x103   :  { %v701_v23 = vadd.f32 %v1485_v9, %v700_v20  ;;  %642 = vst [vmem:[%s1917_s2 + $0x90] sm:$0xff] %v1537_v21  ;;  %674 = vst [vmem:[%s1917_s2 + $0x190] sm:$0xff] %v1539_v22 }
 0x104   :  { %v1550_v24 = vpop.f32.mrf.mxu0  ;;  %v1552_v25 = vpop.f32.mrf.mxu1 }
 0x105   :  { %640 = vst [vmem:[%s1917_s2 + $0x80] sm:$0xff] %v1550_v24  ;;  %v702_v26 = vadd.f32 %v1511_v15, %v701_v23  ;;  %672 = vst [vmem:[%s1917_s2 + $0x180] sm:$0xff] %v1552_v25 }
 0x106   :  { %v1563_v27 = vpop.f32.mrf.mxu0  ;;  %v1565_v28 = vpop.f32.mrf.mxu1 }
 0x107   :  { %1934 = vst [vmem:[#allocation2_spill] sm:$0xff] %v1563_v27  ;;  %v703_v29 = vadd.f32 %v702_v26, %v1550_v24  ;;  %643 = vst [vmem:[%s1917_s2 + $0x98] sm:$0xff] %v1563_v27 }
 0x108   :  { %675 = vst [vmem:[%s1917_s2 + $0x198] sm:$0xff] %v1565_v28  ;;  %v1576_v30 = vpop.f32.mrf.mxu0  ;;  %v1578_v31 = vpop.f32.mrf.mxu1 }
 0x109   :  { %641 = vst [vmem:[%s1917_s2 + $0x88] sm:$0xff] %v1576_v30  ;;  %v704_v32 = vadd.f32 %v703_v29, %v1576_v30  ;;  %673 = vst [vmem:[%s1917_s2 + $0x188] sm:$0xff] %v1578_v31 }
 0x10a   :  { %v1589_v33 = vpop.f32.mrf.mxu0  ;;  %v1591_v34 = vpop.f32.mrf.mxu1 }
 0x10b   :  { %1935 = vst [vmem:[#allocation3_spill] sm:$0xff] %v1589_v33  ;;  %1936 = vst [vmem:[#allocation4_spill] sm:$0xff] %v1591_v34  ;;  %v705_v35 = vadd.f32 %v1537_v21, %v704_v32 }
 0x10c   :  { %646 = vst [vmem:[%s1917_s2 + $0xb0] sm:$0xff] %v1589_v33  ;;  %678 = vst [vmem:[%s1917_s2 + $0x1b0] sm:$0xff] %v1591_v34  ;;  %v1602_v36 = vpop.f32.mrf.mxu0  ;;  %v1604_v37 = vpop.f32.mrf.mxu1 }
 0x10d   :  { %1937 = vst [vmem:[#allocation5_spill] sm:$0xff] %v1602_v36  ;;  %644 = vst [vmem:[%s1917_s2 + $0xa0] sm:$0xff] %v1602_v36  ;;  %v706_v38 = vadd.f32 %v1563_v27, %v705_v35 }
 0x10e   :  { %676 = vst [vmem:[%s1917_s2 + $0x1a0] sm:$0xff] %v1604_v37  ;;  %v1615_v39 = vpop.f32.mrf.mxu0  ;;  %v1617_v48 = vpop.f32.mrf.mxu1 }
 0x10f   :  { %1938 = vst [vmem:[#allocation6_spill] sm:$0xff] %v1615_v39  ;;  %1939 = vst [vmem:[#allocation7_spill] sm:$0xff] %v1617_v48  ;;  %v707_v51 = vadd.f32 %v706_v38, %v1602_v36 }
 0x110   :  { %647 = vst [vmem:[%s1917_s2 + $0xb8] sm:$0xff] %v1615_v39  ;;  %679 = vst [vmem:[%s1917_s2 + $0x1b8] sm:$0xff] %v1617_v48  ;;  %v1628_v54 = vpop.f32.mrf.mxu0  ;;  %v1630_v57 = vpop.f32.mrf.mxu1 }
 0x111   :  { %1940 = vst [vmem:[#allocation8_spill] sm:$0xff] %v1628_v54  ;;  %1941 = vst [vmem:[#allocation9_spill] sm:$0xff] %v1630_v57  ;;  %v708_v60 = vadd.f32 %v707_v51, %v1628_v54 }
 0x112   :  { %645 = vst [vmem:[%s1917_s2 + $0xa8] sm:$0xff] %v1628_v54  ;;  %677 = vst [vmem:[%s1917_s2 + $0x1a8] sm:$0xff] %v1630_v57  ;;  %v1641_v63 = vpop.f32.mrf.mxu0  ;;  %v1643_v2 = vpop.f32.mrf.mxu1 }
 0x113   :  { %1942 = vst [vmem:[#allocation10_spill] sm:$0xff] %v1641_v63  ;;  %v709_v5 = vadd.f32 %v1589_v33, %v708_v60  ;;  %650 = vst [vmem:[%s1917_s2 + $0xd0] sm:$0xff] %v1641_v63 }
 0x114   :  { %682 = vst [vmem:[%s1917_s2 + $0x1d0] sm:$0xff] %v1643_v2  ;;  %v1654_v8 = vpop.f32.mrf.mxu0  ;;  %v1656_v11 = vpop.f32.mrf.mxu1 }
 0x115   :  { %1943 = vst [vmem:[#allocation11_spill] sm:$0xff] %v1654_v8  ;;  %648 = vst [vmem:[%s1917_s2 + $0xc0] sm:$0xff] %v1654_v8  ;;  %v710_v14 = vadd.f32 %v1615_v39, %v709_v5 }
 0x116   :  { %680 = vst [vmem:[%s1917_s2 + $0x1c0] sm:$0xff] %v1656_v11  ;;  %v1667_v17 = vpop.f32.mrf.mxu0  ;;  %v1669_v20 = vpop.f32.mrf.mxu1 }
 0x117   :  { %1944 = vst [vmem:[#allocation12_spill] sm:$0xff] %v1667_v17  ;;  %v711_v23 = vadd.f32 %v710_v14, %v1654_v8  ;;  %651 = vst [vmem:[%s1917_s2 + $0xd8] sm:$0xff] %v1667_v17 }
 0x118   :  { %683 = vst [vmem:[%s1917_s2 + $0x1d8] sm:$0xff] %v1669_v20  ;;  %v1680_v26 = vpop.f32.mrf.mxu0  ;;  %v1682_v29 = vpop.f32.mrf.mxu1 }
 0x119   :  { %1945 = vst [vmem:[#allocation13_spill] sm:$0xff] %v1680_v26  ;;  %649 = vst [vmem:[%s1917_s2 + $0xc8] sm:$0xff] %v1680_v26  ;;  %v712_v32 = vadd.f32 %v711_v23, %v1680_v26 }
 0x11a   :  { %681 = vst [vmem:[%s1917_s2 + $0x1c8] sm:$0xff] %v1682_v29  ;;  %v1693_v35 = vpop.f32.mrf.mxu0  ;;  %v1695_v38 = vpop.f32.mrf.mxu1 }
 0x11b   :  { %v713_v51 = vadd.f32 %v1641_v63, %v712_v32  ;;  %654 = vst [vmem:[%s1917_s2 + $0xf0] sm:$0xff] %v1693_v35  ;;  %686 = vst [vmem:[%s1917_s2 + $0x1f0] sm:$0xff] %v1695_v38 }
 0x11c   :  { %v1706_v60 = vpop.f32.mrf.mxu0  ;;  %v1708_v5 = vpop.f32.mrf.mxu1 }
 0x11d   :  { %1946 = vst [vmem:[#allocation14_spill] sm:$0xff] %v1706_v60  ;;  %652 = vst [vmem:[%s1917_s2 + $0xe0] sm:$0xff] %v1706_v60  ;;  %v714_v14 = vadd.f32 %v1667_v17, %v713_v51 }
 0x11e   :  { %684 = vst [vmem:[%s1917_s2 + $0x1e0] sm:$0xff] %v1708_v5  ;;  %v1719_v23 = vpop.f32.mrf.mxu0  ;;  %v1721_v32 = vpop.f32.mrf.mxu1 }
 0x11f   :  { %v715_v63 = vadd.f32 %v714_v14, %v1706_v60  ;;  %655 = vst [vmem:[%s1917_s2 + $0xf8] sm:$0xff] %v1719_v23  ;;  %687 = vst [vmem:[%s1917_s2 + $0x1f8] sm:$0xff] %v1721_v32 }
 0x120   :  { %v1732_v51 = vpop.f32.mrf.mxu0  ;;  %v1734_v17 = vpop.f32.mrf.mxu1 }
 0x121   :  { %1947 = vst [vmem:[#allocation15_spill] sm:$0xff] %v1732_v51  ;;  %653 = vst [vmem:[%s1917_s2 + $0xe8] sm:$0xff] %v1732_v51  ;;  %v716_v14 = vadd.f32 %v715_v63, %v1732_v51 }
 0x122   :  { %685 = vst [vmem:[%s1917_s2 + $0x1e8] sm:$0xff] %v1734_v17 }
 0x123   :  { %v717_v60 = vadd.f32 %v1693_v35, %v716_v14 }
 0x125   :  { %v718_v26 = vadd.f32 %v1719_v23, %v717_v60 }
 0x127   :  { %v719_v8 = vadd.f32 %v718_v26, %v1345_v43 }
 0x129   :  { %v720_v39 = vadd.f32 %v719_v8, %v1369_v47 }
 0x12b   :  { %v721_v33 = vadd.f32 %v1333_v41, %v720_v39 }
 0x12d   :  { %v722_v54 = vadd.f32 %v1357_v45, %v721_v33 }
 0x12f   :  { %v723_v36 = vadd.f32 %v722_v54, %v1396_v53 }
 0x131   :  { %v724_v63 = vadd.f32 %v723_v36, %v1422_v59 }
 0x133   :  { %v725_v51 = vadd.f32 %v1383_v50, %v724_v63 }
 0x135   :  { %v726_v27 = vadd.f32 %v1409_v56, %v725_v51 }
 0x137   :  { %v727_v14 = vadd.f32 %v726_v27, %v1448_v1 }
 0x139   :  { %v728_v60 = vadd.f32 %v727_v14, %v1474_v7 }
 0x13b   :  { %v729_v26 = vadd.f32 %v1435_v62, %v728_v60 }
 0x13d   :  { %v730_v8 = vadd.f32 %v1461_v4, %v729_v26 }
 0x13f   :  { %v731_v39 = vadd.f32 %v730_v8, %v1500_v13 }
 0x141   :  { %v732_v33 = vadd.f32 %v731_v39, %v1526_v19 }
 0x143   :  { %v733_v54 = vadd.f32 %v1487_v10, %v732_v33 }
 0x145   :  { %v734_v36 = vadd.f32 %v1513_v16, %v733_v54 }
 0x147   :  { %v735_v63 = vadd.f32 %v734_v36, %v1552_v25 }
 0x149   :  { %v736_v51 = vadd.f32 %v735_v63, %v1578_v31 }
 0x14b   :  { %v737_v27 = vadd.f32 %v1539_v22, %v736_v51 }
 0x14d   :  { %v738_v14 = vadd.f32 %v1565_v28, %v737_v27 }
 0x14f   :  { %v739_v60 = vadd.f32 %v738_v14, %v1604_v37 }
 0x151   :  { %v740_v26 = vadd.f32 %v739_v60, %v1630_v57 }
 0x153   :  { %v741_v8 = vadd.f32 %v1591_v34, %v740_v26 }
 0x155   :  { %v742_v39 = vadd.f32 %v1617_v48, %v741_v8 }
 0x157   :  { %v743_v33 = vadd.f32 %v742_v39, %v1656_v11 }
 0x159   :  { %v744_v54 = vadd.f32 %v743_v33, %v1682_v29 }
 0x15b   :  { %v745_v36 = vadd.f32 %v1643_v2, %v744_v54 }
 0x15d   :  { %v746_v63 = vadd.f32 %v1669_v20, %v745_v36 }
 0x15f   :  { %v747_v51 = vadd.f32 %v746_v63, %v1708_v5 }
 0x161   :  { %v748_v27 = vadd.f32 %v747_v51, %v1734_v17 }
 0x163   :  { %v749_v14 = vadd.f32 %v1695_v38, %v748_v27 }
 0x165   :  { %v750_v60 = vadd.f32 %v1721_v32, %v749_v14 }
 0x167   :  { %v751_v57 = vrot.slane %v750_v60, 4 }
 0x169   :  { %v752_v26 = vadd.f32 %v751_v57, %v750_v60 }
 0x16b   :  { %v753_v34 = vrot.slane %v752_v26, 2 }
 0x16d   :  { %v754_v8 = vadd.f32 %v753_v34, %v752_v26 }
 0x16f   :  { %v755_v48 = vrot.slane %v754_v8, 1 }
 0x171   :  { %v756_v39 = vadd.f32 %v755_v48, %v754_v8 }
 0x173   :  { %956 = vst [vmem:[%s1918_s3] sm:$0x1] %v756_v39  ;;  %v1782_v33 = vmul.f32 0.001953125, %v756_v39 }
 0x175   :  { %v759_v54 = vsub.f32 %v1343_v42, %v1782_v33  ;;  %v760_v36 = vsub.f32 %v1367_v46, %v1782_v33  ;;  %v761_v63 = vsub.f32 %v1331_v40, %v1782_v33  ;;  %v762_v34 = vsub.f32 %v1355_v44, %v1782_v33 }
 0x176   :  { %v763_v48 = vsub.f32 %v1394_v52, %v1782_v33  ;;  %v764_v60 = vsub.f32 %v1420_v58, %v1782_v33  ;;  %v765_v46 = vsub.f32 %v1381_v49, %v1782_v33  ;;  %v766_v39 = vsub.f32 %v1407_v55, %v1782_v33 }
 0x177   :  { %v823_v57 = vmul.f32 %v759_v54, %v759_v54  ;;  %v824_v51 = vmul.f32 %v760_v36, %v760_v36  ;;  %v825_v27 = vmul.f32 %v761_v63, %v761_v63  ;;  %v826_v42 = vmul.f32 %v762_v34, %v762_v34 }
 0x178   :  { %v827_v8 = vmul.f32 %v763_v48, %v763_v48  ;;  %v828_v54 = vmul.f32 %v764_v60, %v764_v60  ;;  %v767_v52 = vsub.f32 %v1446_v0, %v1782_v33  ;;  %v829_v36 = vmul.f32 %v765_v46, %v765_v46 }
 0x179   :  { %v887_v14 = vadd.f32 %v824_v51, %v823_v57  ;;  %v768_v58 = vsub.f32 %v1472_v6, %v1782_v33  ;;  %v830_v57 = vmul.f32 %v766_v39, %v766_v39  ;;  %v769_v49 = vsub.f32 %v1433_v61, %v1782_v33 }
 0x17a   :  { %v831_v34 = vmul.f32 %v767_v52, %v767_v52  ;;  %v770_v55 = vsub.f32 %v1459_v3, %v1782_v33  ;;  %v771_v0 = vsub.f32 %v1498_v12, %v1782_v33  ;;  %v772_v6 = vsub.f32 %v1524_v18, %v1782_v33 }
 0x17b   :  { %v888_v26 = vadd.f32 %v887_v14, %v825_v27  ;;  %v832_v27 = vmul.f32 %v768_v58, %v768_v58  ;;  %v833_v60 = vmul.f32 %v769_v49, %v769_v49  ;;  %v773_v61 = vsub.f32 %v1485_v9, %v1782_v33 }
 0x17c   :  { %v774_v3 = vsub.f32 %v1511_v15, %v1782_v33  ;;  %v836_v39 = vmul.f32 %v772_v6, %v772_v6  ;;  %v775_v12 = vsub.f32 %v1550_v24, %v1782_v33  ;;  %v776_v18 = vsub.f32 %v1576_v30, %v1782_v33 }
 0x17d   :  { %v889_v40 = vadd.f32 %v888_v26, %v826_v42  ;;  %v834_v26 = vmul.f32 %v770_v55, %v770_v55  ;;  %v777_v9 = vsub.f32 %v1537_v21, %v1782_v33 }
 0x17e   :  { %v839_v58 = vmul.f32 %v775_v12, %v775_v12  ;;  %v840_v49 = vmul.f32 %v776_v18, %v776_v18 }
 0x17f   :  { %v890_v44 = vadd.f32 %v889_v40, %v827_v8  ;;  %v835_v8 = vmul.f32 %v771_v0, %v771_v0  ;;  %v841_v55 = vmul.f32 %v777_v9, %v777_v9 }
 0x181   :  { %v891_v63 = vadd.f32 %v890_v44, %v828_v54  ;;  %v837_v44 = vmul.f32 %v773_v61, %v773_v61 }
 0x183   :  { %v892_v51 = vadd.f32 %v891_v63, %v829_v36  ;;  %v838_v36 = vmul.f32 %v774_v3, %v774_v3  ;;  %v1953_v3 = vld [vmem:[#allocation11_spill] sm:$0xff] }
 0x185   :  { %v893_v48 = vadd.f32 %v892_v51, %v830_v57  ;;  %v1948_v51 = vld [vmem:[#allocation2_spill] sm:$0xff] }
 0x186   :  { %v778_v15 = vsub.f32 %v1948_v51, %v1782_v33  ;;  %v1956_v51 = vld [vmem:[#allocation12_spill] sm:$0xff] }
 0x187   :  { %v894_v14 = vadd.f32 %v893_v48, %v831_v34  ;;  %v1949_v48 = vld [vmem:[#allocation5_spill] sm:$0xff] }
 0x188   :  { %v779_v24 = vsub.f32 %v1949_v48, %v1782_v33  ;;  %v842_v0 = vmul.f32 %v778_v15, %v778_v15  ;;  %v786_v15 = vsub.f32 %v1956_v51, %v1782_v33  ;;  %v1957_v48 = vld [vmem:[#allocation14_spill] sm:$0xff] }
 0x189   :  { %v895_v42 = vadd.f32 %v894_v14, %v832_v27  ;;  %v1950_v14 = vld [vmem:[#allocation8_spill] sm:$0xff] }
 0x18a   :  { %v780_v30 = vsub.f32 %v1950_v14, %v1782_v33  ;;  %v843_v6 = vmul.f32 %v779_v24, %v779_v24  ;;  %v787_v24 = vsub.f32 %v1957_v48, %v1782_v33  ;;  %v1958_v14 = vld [vmem:[#allocation15_spill] sm:$0xff] }
 0x18b   :  { %v896_v46 = vadd.f32 %v895_v42, %v833_v60  ;;  %v1951_v42 = vld [vmem:[#allocation3_spill] sm:$0xff] }
 0x18c   :  { %v781_v21 = vsub.f32 %v1951_v42, %v1782_v33  ;;  %v789_v42 = vsub.f32 %v1693_v35, %v1782_v33  ;;  %v793_v35 = vsub.f32 %v1333_v41, %v1782_v33  ;;  %v797_v41 = vsub.f32 %v1383_v50, %v1782_v33 }
 0x18d   :  { %v897_v40 = vadd.f32 %v896_v46, %v834_v26  ;;  %v1952_v46 = vld [vmem:[#allocation6_spill] sm:$0xff]  ;;  %v801_v50 = vsub.f32 %v1435_v62, %v1782_v33  ;;  %v805_v62 = vsub.f32 %v1487_v10, %v1782_v33  ;;  %v809_v10 = vsub.f32 %v1539_v22, %v1782_v33 }
 0x18e   :  { %v782_v61 = vsub.f32 %v1952_v46, %v1782_v33  ;;  %v861_v48 = vmul.f32 %v797_v41, %v797_v41  ;;  %v1961_v41 = vld [vmem:[#allocation7_spill] sm:$0xff] }
 0x18f   :  { %v898_v54 = vadd.f32 %v897_v40, %v835_v8  ;;  %v844_v8 = vmul.f32 %v780_v30, %v780_v30  ;;  %v788_v30 = vsub.f32 %v1958_v14, %v1782_v33 }
 0x190   :  { %v846_v18 = vmul.f32 %v782_v61, %v782_v61 }
 0x191   :  { %v899_v52 = vadd.f32 %v898_v54, %v836_v39  ;;  %v783_v39 = vsub.f32 %v1953_v3, %v1782_v33  ;;  %v845_v54 = vmul.f32 %v781_v21, %v781_v21  ;;  %v851_v21 = vmul.f32 %v787_v24, %v787_v24 }
 0x192   :  { %v852_v46 = vmul.f32 %v788_v30, %v788_v30 }
 0x193   :  { %v900_v63 = vadd.f32 %v899_v52, %v837_v44  ;;  %v1954_v44 = vld [vmem:[#allocation13_spill] sm:$0xff] }
 0x194   :  { %v784_v52 = vsub.f32 %v1954_v44, %v1782_v33 }
 0x195   :  { %v901_v57 = vadd.f32 %v900_v63, %v838_v36  ;;  %v1955_v63 = vld [vmem:[#allocation10_spill] sm:$0xff] }
 0x196   :  { %v785_v9 = vsub.f32 %v1955_v63, %v1782_v33  ;;  %v857_v63 = vmul.f32 %v793_v35, %v793_v35 }
 0x197   :  { %v902_v34 = vadd.f32 %v901_v57, %v839_v58  ;;  %v847_v58 = vmul.f32 %v783_v39, %v783_v39  ;;  %v792_v39 = vsub.f32 %v1369_v47, %v1782_v33  ;;  %v796_v47 = vsub.f32 %v1422_v59, %v1782_v33 }
 0x198   :  { %v800_v59 = vsub.f32 %v1474_v7, %v1782_v33  ;;  %v804_v7 = vsub.f32 %v1526_v19, %v1782_v33  ;;  %v808_v19 = vsub.f32 %v1578_v31, %v1782_v33 }
 0x199   :  { %v903_v27 = vadd.f32 %v902_v34, %v840_v49  ;;  %v848_v49 = vmul.f32 %v784_v52, %v784_v52 }
 0x19b   :  { %v904_v60 = vadd.f32 %v903_v27, %v841_v55  ;;  %v849_v55 = vmul.f32 %v785_v9, %v785_v9 }
 0x19d   :  { %v905_v26 = vadd.f32 %v904_v60, %v842_v0  ;;  %v850_v0 = vmul.f32 %v786_v15, %v786_v15 }
 0x19f   :  { %v906_v40 = vadd.f32 %v905_v26, %v843_v6  ;;  %v790_v26 = vsub.f32 %v1719_v23, %v1782_v33  ;;  %v794_v23 = vsub.f32 %v1357_v45, %v1782_v33  ;;  %v798_v45 = vsub.f32 %v1409_v56, %v1782_v33 }
 0x1a0   :  { %v802_v56 = vsub.f32 %v1461_v4, %v1782_v33  ;;  %v806_v4 = vsub.f32 %v1513_v16, %v1782_v33  ;;  %v810_v16 = vsub.f32 %v1565_v28, %v1782_v33  ;;  %v814_v28 = vsub.f32 %v1961_v41, %v1782_v33 }
 0x1a1   :  { %v907_v12 = vadd.f32 %v906_v40, %v844_v8  ;;  %v791_v8 = vsub.f32 %v1345_v43, %v1782_v33  ;;  %v853_v40 = vmul.f32 %v789_v42, %v789_v42  ;;  %v795_v43 = vsub.f32 %v1396_v53, %v1782_v33 }
 0x1a2   :  { %v799_v53 = vsub.f32 %v1448_v1, %v1782_v33  ;;  %v803_v1 = vsub.f32 %v1500_v13, %v1782_v33  ;;  %v865_v42 = vmul.f32 %v801_v50, %v801_v50  ;;  %v807_v13 = vsub.f32 %v1552_v25, %v1782_v33 }
 0x1a3   :  { %v908_v36 = vadd.f32 %v907_v12, %v845_v54  ;;  %v854_v54 = vmul.f32 %v790_v26, %v790_v26  ;;  %v855_v44 = vmul.f32 %v791_v8, %v791_v8  ;;  %v859_v51 = vmul.f32 %v795_v43, %v795_v43  ;;  %v1959_v43 = vld [vmem:[#allocation9_spill] sm:$0xff] }
 0x1a4   :  { %v863_v14 = vmul.f32 %v799_v53, %v799_v53  ;;  %v868_v8 = vmul.f32 %v804_v7, %v804_v7  ;;  %v871_v35 = vmul.f32 %v807_v13, %v807_v13  ;;  %v811_v25 = vsub.f32 %v1604_v37, %v1782_v33 }
 0x1a5   :  { %v909_v57 = vadd.f32 %v908_v36, %v846_v18  ;;  %v856_v18 = vmul.f32 %v792_v39, %v792_v39  ;;  %v812_v31 = vsub.f32 %v1959_v43, %v1782_v33  ;;  %v815_v37 = vsub.f32 %v1656_v11, %v1782_v33 }
 0x1a6   :  { %v878_v53 = vmul.f32 %v814_v28, %v814_v28  ;;  %v819_v11 = vsub.f32 %v1708_v5, %v1782_v33 }
 0x1a7   :  { %v910_v34 = vadd.f32 %v909_v57, %v847_v58  ;;  %v858_v58 = vmul.f32 %v794_v23, %v794_v23 }
 0x1a9   :  { %v911_v27 = vadd.f32 %v910_v34, %v848_v49  ;;  %v860_v49 = vmul.f32 %v796_v47, %v796_v47  ;;  %v1960_v47 = vld [vmem:[#allocation4_spill] sm:$0xff] }
 0x1aa   :  { %v813_v22 = vsub.f32 %v1960_v47, %v1782_v33 }
 0x1ab   :  { %v912_v60 = vadd.f32 %v911_v27, %v849_v55  ;;  %v862_v55 = vmul.f32 %v798_v45, %v798_v45 }
 0x1ac   :  { %v877_v45 = vmul.f32 %v813_v22, %v813_v22 }
 0x1ad   :  { %v913_v6 = vadd.f32 %v912_v60, %v850_v0  ;;  %v864_v0 = vmul.f32 %v800_v59, %v800_v59  ;;  %v879_v59 = vmul.f32 %v815_v37, %v815_v37 }
 0x1af   :  { %v914_v61 = vadd.f32 %v913_v6, %v851_v21  ;;  %v866_v6 = vmul.f32 %v802_v56, %v802_v56 }
 0x1b1   :  { %v915_v3 = vadd.f32 %v914_v61, %v852_v46  ;;  %v867_v46 = vmul.f32 %v803_v1, %v803_v1  ;;  %v883_v1 = vmul.f32 %v819_v11, %v819_v11 }
 0x1b3   :  { %v916_v12 = vadd.f32 %v915_v3, %v853_v40  ;;  %v869_v3 = vmul.f32 %v805_v62, %v805_v62 }
 0x1b5   :  { %v917_v52 = vadd.f32 %v916_v12, %v854_v54  ;;  %v870_v54 = vmul.f32 %v806_v4, %v806_v4 }
 0x1b7   :  { %v918_v36 = vadd.f32 %v917_v52, %v855_v44  ;;  %v872_v52 = vmul.f32 %v808_v19, %v808_v19 }
 0x1b9   :  { %v919_v9 = vadd.f32 %v918_v36, %v856_v18  ;;  %v873_v18 = vmul.f32 %v809_v10, %v809_v10 }
 0x1bb   :  { %v920_v57 = vadd.f32 %v919_v9, %v857_v63  ;;  %v874_v63 = vmul.f32 %v810_v16, %v810_v16 }
 0x1bd   :  { %v921_v15 = vadd.f32 %v920_v57, %v858_v58  ;;  %v875_v58 = vmul.f32 %v811_v25, %v811_v25 }
 0x1bf   :  { %v922_v34 = vadd.f32 %v921_v15, %v859_v51  ;;  %v876_v51 = vmul.f32 %v812_v31, %v812_v31 }
 0x1c1   :  { %v923_v24 = vadd.f32 %v922_v34, %v860_v49  ;;  %v816_v34 = vsub.f32 %v1682_v29, %v1782_v33  ;;  %v820_v29 = vsub.f32 %v1734_v17, %v1782_v33 }
 0x1c3   :  { %v924_v27 = vadd.f32 %v923_v24, %v861_v48  ;;  %v817_v24 = vsub.f32 %v1643_v2, %v1782_v33  ;;  %v880_v50 = vmul.f32 %v816_v34, %v816_v34  ;;  %v821_v2 = vsub.f32 %v1695_v38, %v1782_v33 }
 0x1c5   :  { %v925_v30 = vadd.f32 %v924_v27, %v862_v55  ;;  %v818_v27 = vsub.f32 %v1669_v20, %v1782_v33  ;;  %v822_v20 = vsub.f32 %v1721_v32, %v1782_v33 }
 0x1c7   :  { %v926_v60 = vadd.f32 %v925_v30, %v863_v14  ;;  %v881_v30 = vmul.f32 %v817_v24, %v817_v24  ;;  %v886_v5 = vmul.f32 %v822_v20, %v822_v20 }
 0x1c9   :  { %v927_v21 = vadd.f32 %v926_v60, %v864_v0  ;;  %v882_v0 = vmul.f32 %v818_v27, %v818_v27 }
 0x1cb   :  { %v928_v26 = vadd.f32 %v927_v21, %v865_v42  ;;  %v884_v21 = vmul.f32 %v820_v29, %v820_v29 }
 0x1cd   :  { %v929_v61 = vadd.f32 %v928_v26, %v866_v6  ;;  %v885_v6 = vmul.f32 %v821_v2, %v821_v2 }
 0x1cf   :  { %v930_v40 = vadd.f32 %v929_v61, %v867_v46 }
 0x1d1   :  { %v931_v39 = vadd.f32 %v930_v40, %v868_v8 }
 0x1d3   :  { %v932_v12 = vadd.f32 %v931_v39, %v869_v3 }
 0x1d5   :  { %v933_v44 = vadd.f32 %v932_v12, %v870_v54 }
 0x1d7   :  { %v934_v23 = vadd.f32 %v933_v44, %v871_v35 }
 0x1d9   :  { %v935_v36 = vadd.f32 %v934_v23, %v872_v52 }
 0x1db   :  { %v936_v9 = vadd.f32 %v935_v36, %v873_v18 }
 0x1dd   :  { %v937_v57 = vadd.f32 %v936_v9, %v874_v63 }
 0x1df   :  { %v938_v15 = vadd.f32 %v937_v57, %v875_v58 }
 0x1e1   :  { %v939_v49 = vadd.f32 %v938_v15, %v876_v51 }
 0x1e3   :  { %v940_v48 = vadd.f32 %v939_v49, %v877_v45 }
 0x1e5   :  { %v941_v55 = vadd.f32 %v940_v48, %v878_v53 }
 0x1e7   :  { %v942_v14 = vadd.f32 %v941_v55, %v879_v59 }
 0x1e9   :  { %v943_v56 = vadd.f32 %v942_v14, %v880_v50 }
 0x1eb   :  { %v944_v60 = vadd.f32 %v943_v56, %v881_v30 }
 0x1ed   :  { %v945_v42 = vadd.f32 %v944_v60, %v882_v0 }
 0x1ef   :  { %v946_v7 = vadd.f32 %v945_v42, %v883_v1 }
 0x1f1   :  { %v947_v26 = vadd.f32 %v946_v7, %v884_v21 }
 0x1f3   :  { %v948_v62 = vadd.f32 %v947_v26, %v885_v6 }
 0x1f5   :  { %v949_v46 = vadd.f32 %v948_v62, %v886_v5 }
 0x1f7   :  { %v950_v61 = vrot.slane %v949_v46, 4 }
 0x1f9   :  { %v951_v4 = vadd.f32 %v950_v61, %v949_v46 }
 0x1fb   :  { %v952_v17 = vrot.slane %v951_v4, 2 }
 0x1fd   :  { %v953_v8 = vadd.f32 %v952_v17, %v951_v4 }
 0x1ff   :  { %v954_v40 = vrot.slane %v953_v8, 1 }
 0x201   :  { %v955_v13 = vadd.f32 %v954_v40, %v953_v8 }
 0x203   :  { %957 = vst [vmem:[%s1919_s4] sm:$0x1] %v955_v13 }

// kernel: res_block.7
= control target key start
LH: loop header
LB: loop body
LE: loop exit
PB: predicated region body
PF: predicated region fallthrough
CT: control target
= control target key end

     0   :  { %vm415_vm0 = vcmask 31744   ;;  %s1289_s0 = inlined_call_operand.vmem [shape: f32[512,128], index: 0, kind: input, shape index: {}]   ;;  %s1290_s1 = inlined_call_operand.vmem [shape: f32[1,128], index: 1, kind: input, shape index: {}]   ;;  %s1291_s2 = inlined_call_operand.vmem [shape: f32[1,128], index: 2, kind: input, shape index: {}]   ;;  %s1292_s3 = inlined_call_operand.vmem [shape: f32[512,4], index: 3, kind: input, shape index: {}]   ;;  %s1293_s4 = inlined_call_operand.vmem [shape: f32[512,4], index: 4, kind: output, shape index: {}]  }
   0x1   :  { %v17_v0 = vld [vmem:[%s1289_s0] sm:$0xff]  ;;  %v18_v4 = vld [vmem:[%s1289_s0 + $0x8] sm:$0xff]  ;;  %v19_v6 = vld [vmem:[%s1289_s0 + $0x10] sm:$0xff] }
   0x2   :  { %v517_v1 = vld [vmem:[%s1290_s1] ss:$0 sm:$0xff]  ;;  %v20_v7 = vld [vmem:[%s1289_s0 + $0x18] sm:$0xff]  ;;  %v22_v15 = vld [vmem:[%s1289_s0 + $0x28] sm:$0xff] }
   0x3   :  { %v522_v2 = vld [vmem:[%s1291_s2] ss:$0 sm:$0xff]  ;;  %v88_v3 = vmul.f32 %v517_v1, %v17_v0  ;;  %v89_v5 = vmul.f32 %v517_v1, %v18_v4  ;;  %v90_v9 = vmul.f32 %v517_v1, %v19_v6  ;;  %v91_v10 = vmul.f32 %v517_v1, %v20_v7  ;;  %v23_v16 = vld [vmem:[%s1289_s0 + $0x30] sm:$0xff]  ;;  %v288_v18 = vld [vmem:[%s1292_s3 + $0x8] sm:$0xff] }
   0x4   :  { %v21_v11 = vld [vmem:[%s1289_s0 + $0x20] sm:$0xff]  ;;  %v93_v21 = vmul.f32 %v517_v1, %v22_v15  ;;  %v24_v22 = vld [vmem:[%s1289_s0 + $0x38] sm:$0xff]  ;;  %v289_v24 = vld [vmem:[%s1292_s3 + $0x10] sm:$0xff]  ;;  %v94_v27 = vmul.f32 %v517_v1, %v23_v16 }
   0x5   :  { %v159_v8 = vadd.f32 %v522_v2, %v88_v3  ;;  %v287_v12 = vld [vmem:[%s1292_s3] sm:$0xff]  ;;  %v160_v13 = vadd.f32 %v522_v2, %v89_v5  ;;  %v92_v14 = vmul.f32 %v517_v1, %v21_v11  ;;  %v161_v19 = vadd.f32 %v522_v2, %v90_v9  ;;  %v290_v25 = vld [vmem:[%s1292_s3 + $0x18] sm:$0xff]  ;;  %v26_v35 = vld [vmem:[%s1289_s0 + $0x48] sm:$0xff] }
   0x6   :  { %v162_v20 = vadd.f32 %v522_v2, %v91_v10  ;;  %v95_v28 = vmul.f32 %v517_v1, %v24_v22  ;;  %v25_v29 = vld [vmem:[%s1289_s0 + $0x40] sm:$0xff]  ;;  %v164_v34 = vadd.f32 %v522_v2, %v93_v21  ;;  %v292_v38 = vld [vmem:[%s1292_s3 + $0x28] sm:$0xff]  ;;  %v165_v39 = vadd.f32 %v522_v2, %v94_v27  ;;  %v27_v41 = vld [vmem:[%s1289_s0 + $0x50] sm:$0xff] }
   0x7   :  { %v223_v17 = vmax.f32 %v159_v8, 0.0  ;;  %v224_v23 = vmax.f32 %v160_v13, 0.0  ;;  %v163_v26 = vadd.f32 %v522_v2, %v92_v14  ;;  %v225_v31 = vmax.f32 %v161_v19, 0.0  ;;  %v291_v33 = vld [vmem:[%s1292_s3 + $0x20] sm:$0xff]  ;;  %v28_v42 = vld [vmem:[%s1289_s0 + $0x58] sm:$0xff]  ;;  %v293_v46 = vld [vmem:[%s1292_s3 + $0x30] sm:$0xff] }
   0x8   :  { %v226_v32 = vmax.f32 %v162_v20, 0.0  ;;  %v166_v40 = vadd.f32 %v522_v2, %v95_v28  ;;  %v228_v45 = vmax.f32 %v164_v34, 0.0  ;;  %v294_v47 = vld [vmem:[%s1292_s3 + $0x38] sm:$0xff]  ;;  %v96_v48 = vmul.f32 %v517_v1, %v25_v29  ;;  %v29_v49 = vld [vmem:[%s1289_s0 + $0x60] sm:$0xff]  ;;  %v30_v54 = vld [vmem:[%s1289_s0 + $0x68] sm:$0xff] }
   0x9   :  { %v351_v30 = vadd.f32 %v287_v12, %v223_v17  ;;  %v352_v36 = vadd.f32 %v288_v18, %v224_v23  ;;  %v227_v37 = vmax.f32 %v163_v26, 0.0  ;;  %v353_v43 = vadd.f32 %v289_v24, %v225_v31  ;;  %v31_v59 = vld [vmem:[%s1289_s0 + $0x70] sm:$0xff]  ;;  %v32_v60 = vld [vmem:[%s1289_s0 + $0x78] sm:$0xff]  ;;  %v295_v63 = vld [vmem:[%s1292_s3 + $0x40] sm:$0xff] }
   0xa   :  { %v354_v44 = vadd.f32 %v290_v25, %v226_v32  ;;  %v229_v51 = vmax.f32 %v165_v39, 0.0  ;;  %v230_v52 = vmax.f32 %v166_v40, 0.0  ;;  %v97_v53 = vmul.f32 %v517_v1, %v26_v35  ;;  %v296_v5 = vld [vmem:[%s1292_s3 + $0x48] sm:$0xff]  ;;  %v297_v10 = vld [vmem:[%s1292_s3 + $0x50] sm:$0xff]  ;;  %v298_v11 = vld [vmem:[%s1292_s3 + $0x58] sm:$0xff] }
   0xb   :  { %416 = vst.msk [vmem:[%s1293_s4] sm:$0xff] %vm415_vm0, %v351_v30  ;;  %417 = vst.msk [vmem:[%s1293_s4 + $0x8] sm:$0xff] %vm415_vm0, %v352_v36  ;;  %v355_v50 = vadd.f32 %v291_v33, %v227_v37  ;;  %v356_v55 = vadd.f32 %v292_v38, %v228_v45  ;;  %v167_v56 = vadd.f32 %v522_v2, %v96_v48  ;;  %v33_v15 = vld [vmem:[%s1289_s0 + $0x80] sm:$0xff]  ;;  %v34_v21 = vld [vmem:[%s1289_s0 + $0x88] sm:$0xff] }
   0xc   :  { %418 = vst.msk [vmem:[%s1293_s4 + $0x10] sm:$0xff] %vm415_vm0, %v353_v43  ;;  %419 = vst.msk [vmem:[%s1293_s4 + $0x18] sm:$0xff] %vm415_vm0, %v354_v44  ;;  %v98_v57 = vmul.f32 %v517_v1, %v27_v41  ;;  %v99_v58 = vmul.f32 %v517_v1, %v28_v42  ;;  %v357_v61 = vadd.f32 %v293_v46, %v229_v51  ;;  %v299_v19 = vld [vmem:[%s1292_s3 + $0x60] sm:$0xff]  ;;  %v300_v24 = vld [vmem:[%s1292_s3 + $0x68] sm:$0xff] }
   0xd   :  { %420 = vst.msk [vmem:[%s1293_s4 + $0x20] sm:$0xff] %vm415_vm0, %v355_v50  ;;  %v358_v62 = vadd.f32 %v294_v47, %v230_v52  ;;  %v168_v0 = vadd.f32 %v522_v2, %v97_v53  ;;  %v100_v3 = vmul.f32 %v517_v1, %v29_v49  ;;  %421 = vst.msk [vmem:[%s1293_s4 + $0x28] sm:$0xff] %vm415_vm0, %v356_v55  ;;  %v231_v4 = vmax.f32 %v167_v56, 0.0  ;;  %v35_v27 = vld [vmem:[%s1289_s0 + $0x90] sm:$0xff]  ;;  %v36_v28 = vld [vmem:[%s1289_s0 + $0x98] sm:$0xff] }
   0xe   :  { %v169_v6 = vadd.f32 %v522_v2, %v98_v57  ;;  %v170_v7 = vadd.f32 %v522_v2, %v99_v58  ;;  %v101_v8 = vmul.f32 %v517_v1, %v30_v54  ;;  %422 = vst.msk [vmem:[%s1293_s4 + $0x30] sm:$0xff] %vm415_vm0, %v357_v61  ;;  %v102_v13 = vmul.f32 %v517_v1, %v31_v59  ;;  %v301_v32 = vld [vmem:[%s1292_s3 + $0x70] sm:$0xff]  ;;  %v302_v33 = vld [vmem:[%s1292_s3 + $0x78] sm:$0xff]  ;;  %v37_v35 = vld [vmem:[%s1289_s0 + $0xa0] sm:$0xff] }
   0xf   :  { %423 = vst.msk [vmem:[%s1293_s4 + $0x38] sm:$0xff] %vm415_vm0, %v358_v62  ;;  %v232_v9 = vmax.f32 %v168_v0, 0.0  ;;  %v171_v12 = vadd.f32 %v522_v2, %v100_v3  ;;  %v103_v14 = vmul.f32 %v517_v1, %v32_v60  ;;  %v359_v16 = vadd.f32 %v295_v63, %v231_v4  ;;  %v38_v40 = vld [vmem:[%s1289_s0 + $0xa8] sm:$0xff]  ;;  %v39_v45 = vld [vmem:[%s1289_s0 + $0xb0] sm:$0xff]  ;;  %v40_v46 = vld [vmem:[%s1289_s0 + $0xb8] sm:$0xff] }
  0x10   :  { %v233_v17 = vmax.f32 %v169_v6, 0.0  ;;  %v234_v18 = vmax.f32 %v170_v7, 0.0  ;;  %v172_v20 = vadd.f32 %v522_v2, %v101_v8  ;;  %v173_v25 = vadd.f32 %v522_v2, %v102_v13  ;;  %v303_v49 = vld [vmem:[%s1292_s3 + $0x80] sm:$0xff]  ;;  %v304_v53 = vld [vmem:[%s1292_s3 + $0x88] sm:$0xff]  ;;  %v305_v58 = vld [vmem:[%s1292_s3 + $0x90] sm:$0xff] }
  0x11   :  { %v360_v22 = vadd.f32 %v296_v5, %v232_v9  ;;  %v235_v23 = vmax.f32 %v171_v12, 0.0  ;;  %v174_v26 = vadd.f32 %v522_v2, %v103_v14  ;;  %424 = vst.msk [vmem:[%s1293_s4 + $0x40] sm:$0xff] %vm415_vm0, %v359_v16  ;;  %v104_v34 = vmul.f32 %v517_v1, %v33_v15  ;;  %v306_v59 = vld [vmem:[%s1292_s3 + $0x98] sm:$0xff]  ;;  %v41_v63 = vld [vmem:[%s1289_s0 + $0xc0] sm:$0xff]  ;;  %v42_v7 = vld [vmem:[%s1289_s0 + $0xc8] sm:$0xff] }
  0x12   :  { %v361_v29 = vadd.f32 %v297_v10, %v233_v17  ;;  %v362_v30 = vadd.f32 %v298_v11, %v234_v18  ;;  %v236_v31 = vmax.f32 %v172_v20, 0.0  ;;  %v237_v37 = vmax.f32 %v173_v25, 0.0  ;;  %v307_v5 = vld [vmem:[%s1292_s3 + $0xa0] sm:$0xff]  ;;  %v308_v10 = vld [vmem:[%s1292_s3 + $0xa8] sm:$0xff]  ;;  %v43_v13 = vld [vmem:[%s1289_s0 + $0xd0] sm:$0xff] }
  0x13   :  { %425 = vst.msk [vmem:[%s1293_s4 + $0x48] sm:$0xff] %vm415_vm0, %v360_v22  ;;  %v363_v36 = vadd.f32 %v299_v19, %v235_v23  ;;  %v238_v38 = vmax.f32 %v174_v26, 0.0  ;;  %v105_v39 = vmul.f32 %v517_v1, %v34_v21  ;;  %v175_v42 = vadd.f32 %v522_v2, %v104_v34  ;;  %v44_v14 = vld [vmem:[%s1289_s0 + $0xd8] sm:$0xff]  ;;  %v309_v18 = vld [vmem:[%s1292_s3 + $0xb0] sm:$0xff]  ;;  %v45_v21 = vld [vmem:[%s1289_s0 + $0xe0] sm:$0xff] }
  0x14   :  { %426 = vst.msk [vmem:[%s1293_s4 + $0x50] sm:$0xff] %vm415_vm0, %v361_v29  ;;  %427 = vst.msk [vmem:[%s1293_s4 + $0x58] sm:$0xff] %vm415_vm0, %v362_v30  ;;  %v364_v41 = vadd.f32 %v300_v24, %v236_v31  ;;  %v106_v43 = vmul.f32 %v517_v1, %v35_v27  ;;  %v107_v44 = vmul.f32 %v517_v1, %v36_v28  ;;  %v310_v19 = vld [vmem:[%s1292_s3 + $0xb8] sm:$0xff]  ;;  %v46_v26 = vld [vmem:[%s1289_s0 + $0xe8] sm:$0xff] }
  0x15   :  { %428 = vst.msk [vmem:[%s1293_s4 + $0x60] sm:$0xff] %vm415_vm0, %v363_v36  ;;  %v365_v47 = vadd.f32 %v301_v32, %v237_v37  ;;  %v366_v48 = vadd.f32 %v302_v33, %v238_v38  ;;  %v176_v50 = vadd.f32 %v522_v2, %v105_v39  ;;  %v108_v51 = vmul.f32 %v517_v1, %v37_v35  ;;  %v47_v31 = vld [vmem:[%s1289_s0 + $0xf0] sm:$0xff]  ;;  %v48_v32 = vld [vmem:[%s1289_s0 + $0xf8] sm:$0xff]  ;;  %v311_v35 = vld [vmem:[%s1292_s3 + $0xc0] sm:$0xff] }
  0x16   :  { %429 = vst.msk [vmem:[%s1293_s4 + $0x68] sm:$0xff] %vm415_vm0, %v364_v41  ;;  %v239_v52 = vmax.f32 %v175_v42, 0.0  ;;  %v177_v54 = vadd.f32 %v522_v2, %v106_v43  ;;  %v178_v55 = vadd.f32 %v522_v2, %v107_v44  ;;  %v109_v56 = vmul.f32 %v517_v1, %v38_v40  ;;  %v312_v39 = vld [vmem:[%s1292_s3 + $0xc8] sm:$0xff]  ;;  %v313_v44 = vld [vmem:[%s1292_s3 + $0xd0] sm:$0xff] }
  0x17   :  { %430 = vst.msk [vmem:[%s1293_s4 + $0x70] sm:$0xff] %vm415_vm0, %v365_v47  ;;  %431 = vst.msk [vmem:[%s1293_s4 + $0x78] sm:$0xff] %vm415_vm0, %v366_v48  ;;  %v240_v57 = vmax.f32 %v176_v50, 0.0  ;;  %v179_v60 = vadd.f32 %v522_v2, %v108_v51  ;;  %v110_v61 = vmul.f32 %v517_v1, %v39_v45  ;;  %v111_v62 = vmul.f32 %v517_v1, %v40_v46  ;;  %v314_v45 = vld [vmem:[%s1292_s3 + $0xd8] sm:$0xff] }
  0x18   :  { %v367_v0 = vadd.f32 %v303_v49, %v239_v52  ;;  %v241_v3 = vmax.f32 %v177_v54, 0.0  ;;  %v242_v4 = vmax.f32 %v178_v55, 0.0  ;;  %v180_v6 = vadd.f32 %v522_v2, %v109_v56  ;;  %v49_v49 = vld [vmem:[%s1289_s0 + $0x100] sm:$0xff]  ;;  %v50_v55 = vld [vmem:[%s1289_s0 + $0x108] sm:$0xff] }
  0x19   :  { %v368_v8 = vadd.f32 %v304_v53, %v240_v57  ;;  %v243_v9 = vmax.f32 %v179_v60, 0.0  ;;  %v181_v11 = vadd.f32 %v522_v2, %v110_v61  ;;  %v182_v12 = vadd.f32 %v522_v2, %v111_v62  ;;  %v315_v53 = vld [vmem:[%s1292_s3 + $0xe0] sm:$0xff]  ;;  %v51_v61 = vld [vmem:[%s1289_s0 + $0x110] sm:$0xff]  ;;  %v52_v62 = vld [vmem:[%s1289_s0 + $0x118] sm:$0xff] }
  0x1a   :  { %432 = vst.msk [vmem:[%s1293_s4 + $0x80] sm:$0xff] %vm415_vm0, %v367_v0  ;;  %v369_v15 = vadd.f32 %v305_v58, %v241_v3  ;;  %v370_v16 = vadd.f32 %v306_v59, %v242_v4  ;;  %v244_v17 = vmax.f32 %v180_v6, 0.0  ;;  %v112_v20 = vmul.f32 %v517_v1, %v41_v63  ;;  %v316_v58 = vld [vmem:[%s1292_s3 + $0xe8] sm:$0xff]  ;;  %v317_v4 = vld [vmem:[%s1292_s3 + $0xf0] sm:$0xff] }
  0x1b   :  { %433 = vst.msk [vmem:[%s1293_s4 + $0x88] sm:$0xff] %vm415_vm0, %v368_v8  ;;  %v371_v22 = vadd.f32 %v307_v5, %v243_v9  ;;  %v245_v23 = vmax.f32 %v181_v11, 0.0  ;;  %v246_v24 = vmax.f32 %v182_v12, 0.0  ;;  %v113_v25 = vmul.f32 %v517_v1, %v42_v7  ;;  %v318_v5 = vld [vmem:[%s1292_s3 + $0xf8] sm:$0xff]  ;;  %v53_v7 = vld [vmem:[%s1289_s0 + $0x120] sm:$0xff]  ;;  %v54_v12 = vld [vmem:[%s1289_s0 + $0x128] sm:$0xff] }
  0x1c   :  { %434 = vst.msk [vmem:[%s1293_s4 + $0x90] sm:$0xff] %vm415_vm0, %v369_v15  ;;  %435 = vst.msk [vmem:[%s1293_s4 + $0x98] sm:$0xff] %vm415_vm0, %v370_v16  ;;  %v372_v27 = vadd.f32 %v308_v10, %v244_v17  ;;  %v183_v28 = vadd.f32 %v522_v2, %v112_v20  ;;  %v114_v29 = vmul.f32 %v517_v1, %v43_v13  ;;  %v55_v17 = vld [vmem:[%s1289_s0 + $0x130] sm:$0xff] }
  0x1d   :  { %v115_v30 = vmul.f32 %v517_v1, %v44_v14  ;;  %436 = vst.msk [vmem:[%s1293_s4 + $0xa0] sm:$0xff] %vm415_vm0, %v371_v22  ;;  %v373_v33 = vadd.f32 %v309_v18, %v245_v23  ;;  %v374_v34 = vadd.f32 %v310_v19, %v246_v24  ;;  %v184_v36 = vadd.f32 %v522_v2, %v113_v25  ;;  %v56_v18 = vld [vmem:[%s1289_s0 + $0x138] sm:$0xff]  ;;  %v320_v25 = vld [vmem:[%s1292_s3 + $0x108] sm:$0xff] }
  0x1e   :  { %v116_v37 = vmul.f32 %v517_v1, %v45_v21  ;;  %437 = vst.msk [vmem:[%s1293_s4 + $0xa8] sm:$0xff] %vm415_vm0, %v372_v27  ;;  %v247_v38 = vmax.f32 %v183_v28, 0.0  ;;  %v185_v40 = vadd.f32 %v522_v2, %v114_v29  ;;  %v117_v42 = vmul.f32 %v517_v1, %v46_v26  ;;  %v319_v21 = vld [vmem:[%s1292_s3 + $0x100] sm:$0xff] }
  0x1f   :  { %v186_v41 = vadd.f32 %v522_v2, %v115_v30  ;;  %438 = vst.msk [vmem:[%s1293_s4 + $0xb0] sm:$0xff] %vm415_vm0, %v373_v33  ;;  %439 = vst.msk [vmem:[%s1293_s4 + $0xb8] sm:$0xff] %vm415_vm0, %v374_v34  ;;  %v248_v43 = vmax.f32 %v184_v36, 0.0  ;;  %v118_v47 = vmul.f32 %v517_v1, %v47_v31  ;;  %v119_v48 = vmul.f32 %v517_v1, %v48_v32  ;;  %v321_v30 = vld [vmem:[%s1292_s3 + $0x110] sm:$0xff]  ;;  %v322_v31 = vld [vmem:[%s1292_s3 + $0x118] sm:$0xff] }
  0x20   :  { %v187_v46 = vadd.f32 %v522_v2, %v116_v37  ;;  %v375_v50 = vadd.f32 %v311_v35, %v247_v38  ;;  %v249_v51 = vmax.f32 %v185_v40, 0.0  ;;  %v188_v54 = vadd.f32 %v522_v2, %v117_v42  ;;  %v57_v35 = vld [vmem:[%s1289_s0 + $0x140] sm:$0xff] }
  0x21   :  { %v250_v52 = vmax.f32 %v186_v41, 0.0  ;;  %v376_v56 = vadd.f32 %v312_v39, %v248_v43  ;;  %v189_v59 = vadd.f32 %v522_v2, %v118_v47  ;;  %v190_v60 = vadd.f32 %v522_v2, %v119_v48  ;;  %v323_v39 = vld [vmem:[%s1292_s3 + $0x120] sm:$0xff]  ;;  %v58_v41 = vld [vmem:[%s1289_s0 + $0x148] sm:$0xff]  ;;  %v59_v47 = vld [vmem:[%s1289_s0 + $0x150] sm:$0xff] }
  0x22   :  { %v251_v57 = vmax.f32 %v187_v46, 0.0  ;;  %440 = vst.msk [vmem:[%s1293_s4 + $0xc0] sm:$0xff] %vm415_vm0, %v375_v50  ;;  %v377_v63 = vadd.f32 %v313_v44, %v249_v51  ;;  %v252_v3 = vmax.f32 %v188_v54, 0.0  ;;  %v120_v6 = vmul.f32 %v517_v1, %v49_v49  ;;  %v324_v44 = vld [vmem:[%s1292_s3 + $0x128] sm:$0xff]  ;;  %v60_v48 = vld [vmem:[%s1289_s0 + $0x158] sm:$0xff] }
  0x23   :  { %v378_v0 = vadd.f32 %v314_v45, %v250_v52  ;;  %441 = vst.msk [vmem:[%s1293_s4 + $0xc8] sm:$0xff] %vm415_vm0, %v376_v56  ;;  %v253_v9 = vmax.f32 %v189_v59, 0.0  ;;  %v254_v10 = vmax.f32 %v190_v60, 0.0  ;;  %v121_v11 = vmul.f32 %v517_v1, %v50_v55  ;;  %v325_v52 = vld [vmem:[%s1292_s3 + $0x130] sm:$0xff]  ;;  %v61_v55 = vld [vmem:[%s1289_s0 + $0x160] sm:$0xff]  ;;  %v62_v60 = vld [vmem:[%s1289_s0 + $0x168] sm:$0xff] }
  0x24   :  { %v379_v8 = vadd.f32 %v315_v53, %v251_v57  ;;  %442 = vst.msk [vmem:[%s1293_s4 + $0xd0] sm:$0xff] %vm415_vm0, %v377_v63  ;;  %v380_v13 = vadd.f32 %v316_v58, %v252_v3  ;;  %v191_v14 = vadd.f32 %v522_v2, %v120_v6  ;;  %v122_v15 = vmul.f32 %v517_v1, %v51_v61  ;;  %v326_v53 = vld [vmem:[%s1292_s3 + $0x138] sm:$0xff]  ;;  %v63_v3 = vld [vmem:[%s1289_s0 + $0x170] sm:$0xff] }
  0x25   :  { %443 = vst.msk [vmem:[%s1293_s4 + $0xd8] sm:$0xff] %vm415_vm0, %v378_v0  ;;  %v123_v16 = vmul.f32 %v517_v1, %v52_v62  ;;  %v381_v19 = vadd.f32 %v317_v4, %v253_v9  ;;  %v382_v20 = vadd.f32 %v318_v5, %v254_v10  ;;  %v192_v22 = vadd.f32 %v522_v2, %v121_v11  ;;  %v64_v4 = vld [vmem:[%s1289_s0 + $0x178] sm:$0xff]  ;;  %v328_v11 = vld [vmem:[%s1292_s3 + $0x148] sm:$0xff] }
  0x26   :  { %444 = vst.msk [vmem:[%s1293_s4 + $0xe0] sm:$0xff] %vm415_vm0, %v379_v8  ;;  %v124_v23 = vmul.f32 %v517_v1, %v53_v7  ;;  %445 = vst.msk [vmem:[%s1293_s4 + $0xe8] sm:$0xff] %vm415_vm0, %v380_v13  ;;  %v255_v24 = vmax.f32 %v191_v14, 0.0  ;;  %v193_v26 = vadd.f32 %v522_v2, %v122_v15  ;;  %v125_v28 = vmul.f32 %v517_v1, %v54_v12  ;;  %v327_v7 = vld [vmem:[%s1292_s3 + $0x140] sm:$0xff] }
  0x27   :  { %v194_v27 = vadd.f32 %v522_v2, %v123_v16  ;;  %446 = vst.msk [vmem:[%s1293_s4 + $0xf0] sm:$0xff] %vm415_vm0, %v381_v19  ;;  %447 = vst.msk [vmem:[%s1293_s4 + $0xf8] sm:$0xff] %vm415_vm0, %v382_v20  ;;  %v256_v29 = vmax.f32 %v192_v22, 0.0  ;;  %v126_v33 = vmul.f32 %v517_v1, %v55_v17  ;;  %v127_v34 = vmul.f32 %v517_v1, %v56_v18  ;;  %v329_v16 = vld [vmem:[%s1292_s3 + $0x150] sm:$0xff]  ;;  %v330_v17 = vld [vmem:[%s1292_s3 + $0x158] sm:$0xff] }
  0x28   :  { %v195_v32 = vadd.f32 %v522_v2, %v124_v23  ;;  %v383_v36 = vadd.f32 %v319_v21, %v255_v24  ;;  %v257_v37 = vmax.f32 %v193_v26, 0.0  ;;  %v196_v40 = vadd.f32 %v522_v2, %v125_v28  ;;  %v65_v21 = vld [vmem:[%s1289_s0 + $0x180] sm:$0xff] }
  0x29   :  { %v258_v38 = vmax.f32 %v194_v27, 0.0  ;;  %v384_v42 = vadd.f32 %v320_v25, %v256_v29  ;;  %v197_v45 = vadd.f32 %v522_v2, %v126_v33  ;;  %v198_v46 = vadd.f32 %v522_v2, %v127_v34  ;;  %v331_v25 = vld [vmem:[%s1292_s3 + $0x160] sm:$0xff]  ;;  %v66_v27 = vld [vmem:[%s1289_s0 + $0x188] sm:$0xff]  ;;  %v67_v33 = vld [vmem:[%s1289_s0 + $0x190] sm:$0xff] }
  0x2a   :  { %v259_v43 = vmax.f32 %v195_v32, 0.0  ;;  %448 = vst.msk [vmem:[%s1293_s4 + $0x100] sm:$0xff] %vm415_vm0, %v383_v36  ;;  %v385_v49 = vadd.f32 %v321_v30, %v257_v37  ;;  %v260_v51 = vmax.f32 %v196_v40, 0.0  ;;  %v128_v54 = vmul.f32 %v517_v1, %v57_v35  ;;  %v332_v30 = vld [vmem:[%s1292_s3 + $0x168] sm:$0xff]  ;;  %v68_v34 = vld [vmem:[%s1289_s0 + $0x198] sm:$0xff] }
  0x2b   :  { %v386_v50 = vadd.f32 %v322_v31, %v258_v38  ;;  %449 = vst.msk [vmem:[%s1293_s4 + $0x108] sm:$0xff] %vm415_vm0, %v384_v42  ;;  %v261_v57 = vmax.f32 %v197_v45, 0.0  ;;  %v262_v58 = vmax.f32 %v198_v46, 0.0  ;;  %v129_v59 = vmul.f32 %v517_v1, %v58_v41  ;;  %v333_v38 = vld [vmem:[%s1292_s3 + $0x170] sm:$0xff]  ;;  %v69_v41 = vld [vmem:[%s1289_s0 + $0x1a0] sm:$0xff]  ;;  %v70_v46 = vld [vmem:[%s1289_s0 + $0x1a8] sm:$0xff] }
  0x2c   :  { %v387_v56 = vadd.f32 %v323_v39, %v259_v43  ;;  %450 = vst.msk [vmem:[%s1293_s4 + $0x110] sm:$0xff] %vm415_vm0, %v385_v49  ;;  %v388_v61 = vadd.f32 %v324_v44, %v260_v51  ;;  %v199_v62 = vadd.f32 %v522_v2, %v128_v54  ;;  %v130_v63 = vmul.f32 %v517_v1, %v59_v47  ;;  %v334_v39 = vld [vmem:[%s1292_s3 + $0x178] sm:$0xff]  ;;  %v71_v51 = vld [vmem:[%s1289_s0 + $0x1b0] sm:$0xff] }
  0x2d   :  { %451 = vst.msk [vmem:[%s1293_s4 + $0x118] sm:$0xff] %vm415_vm0, %v386_v50  ;;  %v131_v0 = vmul.f32 %v517_v1, %v60_v48  ;;  %v389_v5 = vadd.f32 %v325_v52, %v261_v57  ;;  %v390_v6 = vadd.f32 %v326_v53, %v262_v58  ;;  %v200_v8 = vadd.f32 %v522_v2, %v129_v59  ;;  %v72_v52 = vld [vmem:[%s1289_s0 + $0x1b8] sm:$0xff]  ;;  %v336_v59 = vld [vmem:[%s1292_s3 + $0x188] sm:$0xff] }
  0x2e   :  { %452 = vst.msk [vmem:[%s1293_s4 + $0x120] sm:$0xff] %vm415_vm0, %v387_v56  ;;  %v132_v9 = vmul.f32 %v517_v1, %v61_v55  ;;  %453 = vst.msk [vmem:[%s1293_s4 + $0x128] sm:$0xff] %vm415_vm0, %v388_v61  ;;  %v263_v10 = vmax.f32 %v199_v62, 0.0  ;;  %v201_v12 = vadd.f32 %v522_v2, %v130_v63  ;;  %v133_v14 = vmul.f32 %v517_v1, %v62_v60  ;;  %v335_v55 = vld [vmem:[%s1292_s3 + $0x180] sm:$0xff] }
  0x2f   :  { %v202_v13 = vadd.f32 %v522_v2, %v131_v0  ;;  %454 = vst.msk [vmem:[%s1293_s4 + $0x130] sm:$0xff] %vm415_vm0, %v389_v5  ;;  %455 = vst.msk [vmem:[%s1293_s4 + $0x138] sm:$0xff] %vm415_vm0, %v390_v6  ;;  %v264_v15 = vmax.f32 %v200_v8, 0.0  ;;  %v134_v19 = vmul.f32 %v517_v1, %v63_v3  ;;  %v135_v20 = vmul.f32 %v517_v1, %v64_v4  ;;  %v337_v0 = vld [vmem:[%s1292_s3 + $0x190] sm:$0xff]  ;;  %v338_v3 = vld [vmem:[%s1292_s3 + $0x198] sm:$0xff] }
  0x30   :  { %v203_v18 = vadd.f32 %v522_v2, %v132_v9  ;;  %v391_v22 = vadd.f32 %v327_v7, %v263_v10  ;;  %v265_v23 = vmax.f32 %v201_v12, 0.0  ;;  %v204_v26 = vadd.f32 %v522_v2, %v133_v14  ;;  %v73_v7 = vld [vmem:[%s1289_s0 + $0x1c0] sm:$0xff] }
  0x31   :  { %v266_v24 = vmax.f32 %v202_v13, 0.0  ;;  %v392_v28 = vadd.f32 %v328_v11, %v264_v15  ;;  %v205_v31 = vadd.f32 %v522_v2, %v134_v19  ;;  %v206_v32 = vadd.f32 %v522_v2, %v135_v20  ;;  %v339_v11 = vld [vmem:[%s1292_s3 + $0x1a0] sm:$0xff]  ;;  %v74_v13 = vld [vmem:[%s1289_s0 + $0x1c8] sm:$0xff]  ;;  %v75_v19 = vld [vmem:[%s1289_s0 + $0x1d0] sm:$0xff] }
  0x32   :  { %v267_v29 = vmax.f32 %v203_v18, 0.0  ;;  %456 = vst.msk [vmem:[%s1293_s4 + $0x140] sm:$0xff] %vm415_vm0, %v391_v22  ;;  %v393_v35 = vadd.f32 %v329_v16, %v265_v23  ;;  %v268_v37 = vmax.f32 %v204_v26, 0.0  ;;  %v136_v40 = vmul.f32 %v517_v1, %v65_v21  ;;  %v340_v16 = vld [vmem:[%s1292_s3 + $0x1a8] sm:$0xff]  ;;  %v76_v20 = vld [vmem:[%s1289_s0 + $0x1d8] sm:$0xff] }
  0x33   :  { %v394_v36 = vadd.f32 %v330_v17, %v266_v24  ;;  %457 = vst.msk [vmem:[%s1293_s4 + $0x148] sm:$0xff] %vm415_vm0, %v392_v28  ;;  %v269_v43 = vmax.f32 %v205_v31, 0.0  ;;  %v270_v44 = vmax.f32 %v206_v32, 0.0  ;;  %v137_v45 = vmul.f32 %v517_v1, %v66_v27  ;;  %v341_v24 = vld [vmem:[%s1292_s3 + $0x1b0] sm:$0xff]  ;;  %v77_v27 = vld [vmem:[%s1289_s0 + $0x1e0] sm:$0xff]  ;;  %v78_v32 = vld [vmem:[%s1289_s0 + $0x1e8] sm:$0xff] }
  0x34   :  { %v395_v42 = vadd.f32 %v331_v25, %v267_v29  ;;  %458 = vst.msk [vmem:[%s1293_s4 + $0x150] sm:$0xff] %vm415_vm0, %v393_v35  ;;  %v396_v47 = vadd.f32 %v332_v30, %v268_v37  ;;  %v207_v48 = vadd.f32 %v522_v2, %v136_v40  ;;  %v138_v49 = vmul.f32 %v517_v1, %v67_v33  ;;  %v342_v25 = vld [vmem:[%s1292_s3 + $0x1b8] sm:$0xff]  ;;  %v79_v37 = vld [vmem:[%s1289_s0 + $0x1f0] sm:$0xff] }
  0x35   :  { %459 = vst.msk [vmem:[%s1293_s4 + $0x158] sm:$0xff] %vm415_vm0, %v394_v36  ;;  %v139_v50 = vmul.f32 %v517_v1, %v68_v34  ;;  %v397_v53 = vadd.f32 %v333_v38, %v269_v43  ;;  %v398_v54 = vadd.f32 %v334_v39, %v270_v44  ;;  %v208_v56 = vadd.f32 %v522_v2, %v137_v45  ;;  %v80_v38 = vld [vmem:[%s1289_s0 + $0x1f8] sm:$0xff]  ;;  %v344_v45 = vld [vmem:[%s1292_s3 + $0x1c8] sm:$0xff] }
  0x36   :  { %460 = vst.msk [vmem:[%s1293_s4 + $0x160] sm:$0xff] %vm415_vm0, %v395_v42  ;;  %v140_v57 = vmul.f32 %v517_v1, %v69_v41  ;;  %461 = vst.msk [vmem:[%s1293_s4 + $0x168] sm:$0xff] %vm415_vm0, %v396_v47  ;;  %v271_v58 = vmax.f32 %v207_v48, 0.0  ;;  %v209_v60 = vadd.f32 %v522_v2, %v138_v49  ;;  %v141_v62 = vmul.f32 %v517_v1, %v70_v46  ;;  %v343_v41 = vld [vmem:[%s1292_s3 + $0x1c0] sm:$0xff] }
  0x37   :  { %v210_v61 = vadd.f32 %v522_v2, %v139_v50  ;;  %462 = vst.msk [vmem:[%s1293_s4 + $0x170] sm:$0xff] %vm415_vm0, %v397_v53  ;;  %463 = vst.msk [vmem:[%s1293_s4 + $0x178] sm:$0xff] %vm415_vm0, %v398_v54  ;;  %v272_v63 = vmax.f32 %v208_v56, 0.0  ;;  %v142_v5 = vmul.f32 %v517_v1, %v71_v51  ;;  %v143_v6 = vmul.f32 %v517_v1, %v72_v52  ;;  %v345_v50 = vld [vmem:[%s1292_s3 + $0x1d0] sm:$0xff]  ;;  %v346_v51 = vld [vmem:[%s1292_s3 + $0x1d8] sm:$0xff] }
  0x38   :  { %v211_v4 = vadd.f32 %v522_v2, %v140_v57  ;;  %v399_v8 = vadd.f32 %v335_v55, %v271_v58  ;;  %v273_v9 = vmax.f32 %v209_v60, 0.0  ;;  %v212_v12 = vadd.f32 %v522_v2, %v141_v62  ;;  %v347_v58 = vld [vmem:[%s1292_s3 + $0x1e0] sm:$0xff]  ;;  %v348_v62 = vld [vmem:[%s1292_s3 + $0x1e8] sm:$0xff] }
  0x39   :  { %v274_v10 = vmax.f32 %v210_v61, 0.0  ;;  %v400_v14 = vadd.f32 %v336_v59, %v272_v63  ;;  %v213_v17 = vadd.f32 %v522_v2, %v142_v5  ;;  %v214_v18 = vadd.f32 %v522_v2, %v143_v6  ;;  %v349_v5 = vld [vmem:[%s1292_s3 + $0x1f0] sm:$0xff]  ;;  %v350_v6 = vld [vmem:[%s1292_s3 + $0x1f8] sm:$0xff] }
  0x3a   :  { %v275_v15 = vmax.f32 %v211_v4, 0.0  ;;  %464 = vst.msk [vmem:[%s1293_s4 + $0x180] sm:$0xff] %vm415_vm0, %v399_v8  ;;  %v401_v21 = vadd.f32 %v337_v0, %v273_v9  ;;  %v276_v23 = vmax.f32 %v212_v12, 0.0  ;;  %v144_v26 = vmul.f32 %v517_v1, %v73_v7 }
  0x3b   :  { %v402_v22 = vadd.f32 %v338_v3, %v274_v10  ;;  %465 = vst.msk [vmem:[%s1293_s4 + $0x188] sm:$0xff] %vm415_vm0, %v400_v14  ;;  %v277_v29 = vmax.f32 %v213_v17, 0.0  ;;  %v278_v30 = vmax.f32 %v214_v18, 0.0  ;;  %v145_v31 = vmul.f32 %v517_v1, %v74_v13 }
  0x3c   :  { %v403_v28 = vadd.f32 %v339_v11, %v275_v15  ;;  %466 = vst.msk [vmem:[%s1293_s4 + $0x190] sm:$0xff] %vm415_vm0, %v401_v21  ;;  %v404_v33 = vadd.f32 %v340_v16, %v276_v23  ;;  %v215_v34 = vadd.f32 %v522_v2, %v144_v26  ;;  %v146_v35 = vmul.f32 %v517_v1, %v75_v19 }
  0x3d   :  { %467 = vst.msk [vmem:[%s1293_s4 + $0x198] sm:$0xff] %vm415_vm0, %v402_v22  ;;  %v147_v36 = vmul.f32 %v517_v1, %v76_v20  ;;  %v405_v39 = vadd.f32 %v341_v24, %v277_v29  ;;  %v406_v40 = vadd.f32 %v342_v25, %v278_v30  ;;  %v216_v42 = vadd.f32 %v522_v2, %v145_v31 }
  0x3e   :  { %468 = vst.msk [vmem:[%s1293_s4 + $0x1a0] sm:$0xff] %vm415_vm0, %v403_v28  ;;  %v148_v43 = vmul.f32 %v517_v1, %v77_v27  ;;  %469 = vst.msk [vmem:[%s1293_s4 + $0x1a8] sm:$0xff] %vm415_vm0, %v404_v33  ;;  %v279_v44 = vmax.f32 %v215_v34, 0.0  ;;  %v217_v46 = vadd.f32 %v522_v2, %v146_v35  ;;  %v149_v48 = vmul.f32 %v517_v1, %v78_v32 }
  0x3f   :  { %v218_v47 = vadd.f32 %v522_v2, %v147_v36  ;;  %470 = vst.msk [vmem:[%s1293_s4 + $0x1b0] sm:$0xff] %vm415_vm0, %v405_v39  ;;  %471 = vst.msk [vmem:[%s1293_s4 + $0x1b8] sm:$0xff] %vm415_vm0, %v406_v40  ;;  %v280_v49 = vmax.f32 %v216_v42, 0.0  ;;  %v150_v53 = vmul.f32 %v517_v1, %v79_v37  ;;  %v151_v54 = vmul.f32 %v517_v1, %v80_v38 }
  0x40   :  { %v219_v52 = vadd.f32 %v522_v2, %v148_v43  ;;  %v407_v55 = vadd.f32 %v343_v41, %v279_v44  ;;  %v281_v56 = vmax.f32 %v217_v46, 0.0  ;;  %v220_v59 = vadd.f32 %v522_v2, %v149_v48 }
  0x41   :  { %v282_v57 = vmax.f32 %v218_v47, 0.0  ;;  %v408_v60 = vadd.f32 %v344_v45, %v280_v49  ;;  %v221_v63 = vadd.f32 %v522_v2, %v150_v53  ;;  %v222_v0 = vadd.f32 %v522_v2, %v151_v54 }
  0x42   :  { %v283_v61 = vmax.f32 %v219_v52, 0.0  ;;  %472 = vst.msk [vmem:[%s1293_s4 + $0x1c0] sm:$0xff] %vm415_vm0, %v407_v55  ;;  %v409_v1 = vadd.f32 %v345_v50, %v281_v56  ;;  %v284_v4 = vmax.f32 %v220_v59, 0.0 }
  0x43   :  { %v410_v3 = vadd.f32 %v346_v51, %v282_v57  ;;  %473 = vst.msk [vmem:[%s1293_s4 + $0x1c8] sm:$0xff] %vm415_vm0, %v408_v60  ;;  %v285_v7 = vmax.f32 %v221_v63, 0.0  ;;  %v286_v8 = vmax.f32 %v222_v0, 0.0 }
  0x44   :  { %v411_v2 = vadd.f32 %v347_v58, %v283_v61  ;;  %474 = vst.msk [vmem:[%s1293_s4 + $0x1d0] sm:$0xff] %vm415_vm0, %v409_v1  ;;  %v412_v9 = vadd.f32 %v348_v62, %v284_v4 }
  0x45   :  { %475 = vst.msk [vmem:[%s1293_s4 + $0x1d8] sm:$0xff] %vm415_vm0, %v410_v3  ;;  %v413_v10 = vadd.f32 %v349_v5, %v285_v7  ;;  %v414_v11 = vadd.f32 %v350_v6, %v286_v8 }
  0x46   :  { %476 = vst.msk [vmem:[%s1293_s4 + $0x1e0] sm:$0xff] %vm415_vm0, %v411_v2  ;;  %477 = vst.msk [vmem:[%s1293_s4 + $0x1e8] sm:$0xff] %vm415_vm0, %v412_v9 }
  0x47   :  { %478 = vst.msk [vmem:[%s1293_s4 + $0x1f0] sm:$0xff] %vm415_vm0, %v413_v10  ;;  %479 = vst.msk [vmem:[%s1293_s4 + $0x1f8] sm:$0xff] %vm415_vm0, %v414_v11 }

// kernel: res_block.6
= control target key start
LH: loop header
LB: loop body
LE: loop exit
PB: predicated region body
PF: predicated region fallthrough
CT: control target
= control target key end

     0   :  { %s2860_s6 = inlined_call_operand.vmem [shape: bf16[128,128], index: 6, kind: input, shape index: {}]   ;;  %s2861_s0 = inlined_call_operand.vmem [shape: f32[512,128], index: 0, kind: input, shape index: {}]   ;;  %s2862_s2 = inlined_call_operand.vmem [shape: f32[1,128], index: 2, kind: input, shape index: {}]   ;;  %s2863_s1 = inlined_call_operand.vmem [shape: f32[512,128], index: 1, kind: input, shape index: {}]   ;;  %s2864_s3 = inlined_call_operand.vmem [shape: f32[1,128], index: 3, kind: input, shape index: {}]   ;;  %s2865_s4 = inlined_call_operand.vmem [shape: f32[1,128], index: 4, kind: input, shape index: {}]   ;;  %s2866_s5 = inlined_call_operand.vmem [shape: f32[1,128], index: 5, kind: input, shape index: {}]   ;;  %s2867_s7 = inlined_call_operand.vmem [shape: f32[512,128], index: 7, kind: output, shape index: {0}]   ;;  %s2868_s8 = inlined_call_operand.vmem [shape: f32[1,1,128], index: 8, kind: output, shape index: {1}]   ;;  %s2869_s9 = inlined_call_operand.vmem [shape: f32[1,1,128], index: 9, kind: output, shape index: {2}]  }
   0x1   :  { %v1449_v0 = vld [vmem:[%s2860_s6 + $0x38] sm:$0xff]   ;;  %v1450_v1 = vld [vmem:[%s2860_s6 + $0x30] sm:$0xff]   ;;  %v1451_v2 = vld [vmem:[%s2860_s6 + $0x28] sm:$0xff]  }
   0x2   :  { %1353 = vmatprep.subr.bf16.mxu0 %v1449_v0  ;;  %1433 = vmatprep.subr.bf16.mxu1 %v1449_v0  ;;  %v1523_v3 = vld [vmem:[%s2860_s6 + $0x20] sm:$0xff]   ;;  %v31_v5 = vld [vmem:[%s2861_s0 + $0x8] sm:$0xff]  ;;  %v32_v14 = vld [vmem:[%s2861_s0 + $0x10] sm:$0xff] }
   0x3   :  { %1354 = vmatpush3.bf16.msra.mxu0 %v1449_v0  ;;  %1441 = vmatpush3.bf16.msra.mxu1 %v1449_v0  ;;  %v30_v4 = vld [vmem:[%s2861_s0] sm:$0xff]  ;;  %v237_v11 = vld [vmem:[%s2863_s1 + $0x8] sm:$0xff]  ;;  %v33_v19 = vld [vmem:[%s2861_s0 + $0x18] sm:$0xff] }
   0x4   :  { %1355 = vmatprep.subr.bf16.mxu0 %v1450_v1  ;;  %1434 = vmatprep.subr.bf16.mxu1 %v1450_v1  ;;  %v1534_v6 = vld [vmem:[%s2862_s2] ss:$0 sm:$0xff]  ;;  %v238_v20 = vld [vmem:[%s2863_s1 + $0x10] sm:$0xff]  ;;  %v239_v21 = vld [vmem:[%s2863_s1 + $0x18] sm:$0xff] }
   0x5   :  { %v101_v7 = vmul.f32 %v1534_v6, %v30_v4  ;;  %v102_v8 = vmul.f32 %v1534_v6, %v31_v5  ;;  %v1541_v9 = vld [vmem:[%s2864_s3] ss:$0 sm:$0xff]  ;;  %v1579_v22 = vld [vmem:[%s2860_s6 + $0x18] sm:$0xff]   ;;  %v103_v23 = vmul.f32 %v1534_v6, %v32_v14  ;;  %v104_v24 = vmul.f32 %v1534_v6, %v33_v19  ;;  %v35_v28 = vld [vmem:[%s2861_s0 + $0x28] sm:$0xff] }
   0x6   :  { %v236_v10 = vld [vmem:[%s2863_s1] sm:$0xff]  ;;  %v106_v32 = vmul.f32 %v1534_v6, %v35_v28  ;;  %v241_v34 = vld [vmem:[%s2863_s1 + $0x28] sm:$0xff]  ;;  %v36_v39 = vld [vmem:[%s2861_s0 + $0x30] sm:$0xff] }
   0x7   :  { %1356 = vmatpush3.bf16.msra.mxu0 %v1450_v1  ;;  %1442 = vmatpush3.bf16.msra.mxu1 %v1450_v1  ;;  %v1552_v12 = vld [vmem:[%s2865_s4] ss:$0 sm:$0xff]  ;;  %v172_v15 = vadd.f32 %v1541_v9, %v101_v7  ;;  %v173_v16 = vadd.f32 %v1541_v9, %v102_v8  ;;  %v174_v35 = vadd.f32 %v1541_v9, %v103_v23  ;;  %v37_v40 = vld [vmem:[%s2861_s0 + $0x38] sm:$0xff]  ;;  %v1619_v45 = vld [vmem:[%s2860_s6 + $0x10] sm:$0xff]  }
   0x8   :  { %1357 = vmatprep.subr.bf16.mxu0 %v1451_v2  ;;  %1435 = vmatprep.subr.bf16.mxu1 %v1451_v2  ;;  %v1557_v13 = vld [vmem:[%s2866_s5] ss:$0 sm:$0xff]  ;;  %v307_v17 = vmul.f32 %v1552_v12, %v236_v10  ;;  %v308_v18 = vmul.f32 %v1552_v12, %v237_v11  ;;  %v309_v25 = vmul.f32 %v1552_v12, %v238_v20  ;;  %v242_v50 = vld [vmem:[%s2863_s1 + $0x30] sm:$0xff]  ;;  %v243_v55 = vld [vmem:[%s2863_s1 + $0x38] sm:$0xff] }
   0x9   :  { %v310_v26 = vmul.f32 %v1552_v12, %v239_v21  ;;  %v34_v27 = vld [vmem:[%s2861_s0 + $0x20] sm:$0xff]  ;;  %v175_v36 = vadd.f32 %v1541_v9, %v104_v24  ;;  %v177_v44 = vadd.f32 %v1541_v9, %v106_v32  ;;  %v312_v49 = vmul.f32 %v1552_v12, %v241_v34  ;;  %v39_v61 = vld [vmem:[%s2861_s0 + $0x48] sm:$0xff]  ;;  %v41_v23 = vld [vmem:[%s2861_s0 + $0x58] sm:$0xff] }
   0xa   :  { %v378_v29 = vadd.f32 %v1557_v13, %v307_v17  ;;  %v379_v30 = vadd.f32 %v1557_v13, %v308_v18  ;;  %v105_v31 = vmul.f32 %v1534_v6, %v34_v27  ;;  %v240_v33 = vld [vmem:[%s2863_s1 + $0x20] sm:$0xff]  ;;  %v380_v37 = vadd.f32 %v1557_v13, %v309_v25  ;;  %v1655_v4 = vld [vmem:[%s2860_s6 + $0x8] sm:$0xff]   ;;  %v40_v17 = vld [vmem:[%s2861_s0 + $0x50] sm:$0xff] }
   0xb   :  { %1358 = vmatpush3.bf16.msra.mxu0 %v1451_v2  ;;  %1443 = vmatpush3.bf16.msra.mxu1 %v1451_v2  ;;  %v381_v38 = vadd.f32 %v1557_v13, %v310_v26  ;;  %v311_v48 = vmul.f32 %v1552_v12, %v240_v33  ;;  %v107_v53 = vmul.f32 %v1534_v6, %v36_v39  ;;  %v38_v60 = vld [vmem:[%s2861_s0 + $0x40] sm:$0xff]  ;;  %v246_v24 = vld [vmem:[%s2863_s1 + $0x50] sm:$0xff]  ;;  %v43_v39 = vld [vmem:[%s2861_s0 + $0x68] sm:$0xff] }
   0xc   :  { %1359 = vmatprep.subr.bf16.mxu0 %v1523_v3  ;;  %1436 = vmatprep.subr.bf16.mxu1 %v1523_v3  ;;  %v442_v41 = vadd.f32 %v378_v29, %v172_v15  ;;  %v443_v42 = vadd.f32 %v379_v30, %v173_v16  ;;  %v176_v43 = vadd.f32 %v1541_v9, %v105_v31  ;;  %v244_v62 = vld [vmem:[%s2863_s1 + $0x40] sm:$0xff]  ;;  %v247_v29 = vld [vmem:[%s2863_s1 + $0x58] sm:$0xff] }
   0xd   :  { %v444_v46 = vadd.f32 %v380_v37, %v174_v35  ;;  %v445_v47 = vadd.f32 %v381_v38, %v175_v36  ;;  %v108_v54 = vmul.f32 %v1534_v6, %v37_v40  ;;  %v382_v58 = vadd.f32 %v1557_v13, %v311_v48  ;;  %v1687_v30 = vld [vmem:[%s2860_s6] sm:$0xff]  }
   0xe   :  { %v506_v51 = vmax.f32 %v442_v41, 0.0  ;;  %v507_v52 = vmax.f32 %v443_v42, 0.0  ;;  %v383_v59 = vadd.f32 %v1557_v13, %v312_v49  ;;  %v178_v0 = vadd.f32 %v1541_v9, %v107_v53  ;;  %v42_v34 = vld [vmem:[%s2861_s0 + $0x60] sm:$0xff] }
   0xf   :  { %1360 = vmatpush3.bf16.msra.mxu0 %v1523_v3  ;;  %1444 = vmatpush3.bf16.msra.mxu1 %v1523_v3  ;;  %v508_v56 = vmax.f32 %v444_v46, 0.0  ;;  %v509_v57 = vmax.f32 %v445_v47, 0.0  ;;  %v179_v1 = vadd.f32 %v1541_v9, %v108_v54  ;;  %v313_v2 = vmul.f32 %v1552_v12, %v242_v50  ;;  %v245_v3 = vld [vmem:[%s2863_s1 + $0x48] sm:$0xff] }
  0x10   :  { %1361 = vmatprep.subr.bf16.mxu0 %v1579_v22  ;;  %1437 = vmatprep.subr.bf16.mxu1 %v1579_v22  ;;  %v570_v63 = vpack.c.bf16 %v507_v52, %v506_v51  ;;  %v446_v7 = vadd.f32 %v382_v58, %v176_v43  ;;  %v447_v8 = vadd.f32 %v383_v59, %v177_v44  ;;  %v248_v44 = vld [vmem:[%s2863_s1 + $0x60] sm:$0xff]  ;;  %v249_v46 = vld [vmem:[%s2863_s1 + $0x68] sm:$0xff]  ;;  %v44_v51 = vld [vmem:[%s2861_s0 + $0x70] sm:$0xff] }
  0x11   :  { %v1657_v5 = vpack.c.bf16 %v509_v57, %v508_v56  ;;  %v314_v10 = vmul.f32 %v1552_v12, %v243_v55  ;;  %v384_v11 = vadd.f32 %v1557_v13, %v313_v2  ;;  %v109_v14 = vmul.f32 %v1534_v6, %v38_v60  ;;  %v45_v55 = vld [vmem:[%s2861_s0 + $0x78] sm:$0xff]  ;;  %v250_v60 = vld [vmem:[%s2863_s1 + $0x70] sm:$0xff]  ;;  %v46_v2 = vld [vmem:[%s2861_s0 + $0x80] sm:$0xff] }
  0x12   :  { %1369 = vmatprep.mubr.bf16.mxu0 %v570_v63  ;;  %v110_v15 = vmul.f32 %v1534_v6, %v39_v61  ;;  %v315_v16 = vmul.f32 %v1552_v12, %v244_v62  ;;  %v510_v18 = vmax.f32 %v446_v7, 0.0  ;;  %v511_v19 = vmax.f32 %v447_v8, 0.0  ;;  %v251_v61 = vld [vmem:[%s2863_s1 + $0x78] sm:$0xff] }
  0x13   :  { %1362 = vmatpush3.bf16.msra.mxu0 %v1579_v22  ;;  %v385_v20 = vadd.f32 %v1557_v13, %v314_v10  ;;  %v316_v21 = vmul.f32 %v1552_v12, %v245_v3  ;;  %1445 = vmatpush3.bf16.msra.mxu1 %v1579_v22  ;;  %v448_v25 = vadd.f32 %v384_v11, %v178_v0  ;;  %v47_v11 = vld [vmem:[%s2861_s0 + $0x88] sm:$0xff] }
  0x14   :  { %1363 = vmatprep.subr.bf16.mxu0 %v1619_v45  ;;  %v180_v26 = vadd.f32 %v1541_v9, %v109_v14  ;;  %v181_v27 = vadd.f32 %v1541_v9, %v110_v15  ;;  %v386_v28 = vadd.f32 %v1557_v13, %v315_v16  ;;  %v1689_v22 = vpack.c.bf16 %v511_v19, %v510_v18 }
  0x15   :  { %v449_v31 = vadd.f32 %v385_v20, %v179_v1  ;;  %v387_v32 = vadd.f32 %v1557_v13, %v316_v21  ;;  %v111_v33 = vmul.f32 %v1534_v6, %v40_v17  ;;  %v512_v35 = vmax.f32 %v448_v25, 0.0  ;;  %1438 = vmatprep.subr.bf16.mxu1 %v1619_v45  ;;  %v252_v17 = vld [vmem:[%s2863_s1 + $0x80] sm:$0xff] }
  0x16   :  { %v450_v36 = vadd.f32 %v386_v28, %v180_v26  ;;  %v112_v37 = vmul.f32 %v1534_v6, %v41_v23  ;;  %v317_v38 = vmul.f32 %v1552_v12, %v246_v24  ;;  %v318_v43 = vmul.f32 %v1552_v12, %v247_v29  ;;  %v253_v23 = vld [vmem:[%s2863_s1 + $0x88] sm:$0xff]  ;;  %v48_v28 = vld [vmem:[%s2861_s0 + $0x90] sm:$0xff]  ;;  %v49_v29 = vld [vmem:[%s2861_s0 + $0x98] sm:$0xff] }
  0x17   :  { %1364 = vmatpush3.bf16.msra.mxu0 %v1619_v45  ;;  %v513_v40 = vmax.f32 %v449_v31, 0.0  ;;  %v451_v41 = vadd.f32 %v387_v32, %v181_v27  ;;  %v182_v42 = vadd.f32 %v1541_v9, %v111_v33  ;;  %1446 = vmatpush3.bf16.msra.mxu1 %v1619_v45  ;;  %v113_v50 = vmul.f32 %v1534_v6, %v42_v34  ;;  %v254_v34 = vld [vmem:[%s2863_s1 + $0x90] sm:$0xff] }
  0x18   :  { %1365 = vmatprep.subr.bf16.mxu0 %v1655_v4  ;;  %v514_v47 = vmax.f32 %v450_v36, 0.0  ;;  %v183_v48 = vadd.f32 %v1541_v9, %v112_v37  ;;  %v388_v49 = vadd.f32 %v1557_v13, %v317_v38  ;;  %1439 = vmatprep.subr.bf16.mxu1 %v1655_v4  ;;  %v389_v53 = vadd.f32 %v1557_v13, %v318_v43 }
  0x19   :  { %v1720_v52 = vpack.c.bf16 %v513_v40, %v512_v35  ;;  %v515_v45 = vmax.f32 %v451_v41, 0.0  ;;  %v114_v54 = vmul.f32 %v1534_v6, %v43_v39  ;;  %v184_v57 = vadd.f32 %v1541_v9, %v113_v50 }
  0x1a   :  { %v452_v56 = vadd.f32 %v388_v49, %v182_v42  ;;  %v319_v58 = vmul.f32 %v1552_v12, %v248_v44  ;;  %v320_v59 = vmul.f32 %v1552_v12, %v249_v46  ;;  %v453_v63 = vadd.f32 %v389_v53, %v183_v48  ;;  %v51_v48 = vld [vmem:[%s2861_s0 + $0xa8] sm:$0xff]  ;;  %v256_v49 = vld [vmem:[%s2863_s1 + $0xa0] sm:$0xff] }
  0x1b   :  { %1366 = vmatpush3.bf16.msra.mxu0 %v1655_v4  ;;  %v1736_v62 = vpack.c.bf16 %v515_v45, %v514_v47  ;;  %v185_v0 = vadd.f32 %v1541_v9, %v114_v54  ;;  %v115_v1 = vmul.f32 %v1534_v6, %v44_v51  ;;  %1447 = vmatpush3.bf16.msra.mxu1 %v1655_v4  ;;  %v257_v54 = vld [vmem:[%s2863_s1 + $0xa8] sm:$0xff] }
  0x1c   :  { %1367 = vmatprep.subr.bf16.mxu0 %v1687_v30  ;;  %v516_v3 = vmax.f32 %v452_v56, 0.0  ;;  %v390_v7 = vadd.f32 %v1557_v13, %v319_v58  ;;  %v391_v8 = vadd.f32 %v1557_v13, %v320_v59  ;;  %v116_v10 = vmul.f32 %v1534_v6, %v45_v55  ;;  %1440 = vmatprep.subr.bf16.mxu1 %v1687_v30  ;;  %v52_v59 = vld [vmem:[%s2861_s0 + $0xb0] sm:$0xff] }
  0x1d   :  { %v517_v14 = vmax.f32 %v453_v63, 0.0  ;;  %v186_v15 = vadd.f32 %v1541_v9, %v115_v1  ;;  %v321_v4 = vmul.f32 %v1552_v12, %v250_v60  ;;  %v322_v16 = vmul.f32 %v1552_v12, %v251_v61  ;;  %v53_v1 = vld [vmem:[%s2861_s0 + $0xb8] sm:$0xff] }
  0x1e   :  { %v454_v18 = vadd.f32 %v390_v7, %v184_v57  ;;  %v455_v19 = vadd.f32 %v391_v8, %v185_v0  ;;  %v187_v20 = vadd.f32 %v1541_v9, %v116_v10  ;;  %v117_v21 = vmul.f32 %v1534_v6, %v46_v2  ;;  %v258_v10 = vld [vmem:[%s2863_s1 + $0xb0] sm:$0xff] }
  0x1f   :  { %1368 = vmatpush3.bf16.msra.mxu0 %v1687_v30  ;;  %v1764_v24 = vpack.c.bf16 %v517_v14, %v516_v3  ;;  %v392_v25 = vadd.f32 %v1557_v13, %v321_v4  ;;  %v393_v26 = vadd.f32 %v1557_v13, %v322_v16  ;;  %v118_v27 = vmul.f32 %v1534_v6, %v47_v11  ;;  %v54_v16 = vld [vmem:[%s2861_s0 + $0xc0] sm:$0xff] }
  0x20   :  { %v518_v31 = vmax.f32 %v454_v18, 0.0  ;;  %v188_v32 = vadd.f32 %v1541_v9, %v117_v21  ;;  %v323_v33 = vmul.f32 %v1552_v12, %v252_v17  ;;  %1448 = vmatpush3.bf16.msra.mxu1 %v1687_v30  ;;  %v324_v38 = vmul.f32 %v1552_v12, %v253_v23  ;;  %v50_v30 = vld [vmem:[%s2861_s0 + $0xa0] sm:$0xff] }
  0x21   :  { %v456_v35 = vadd.f32 %v392_v25, %v186_v15  ;;  %v457_v36 = vadd.f32 %v393_v26, %v187_v20  ;;  %v189_v37 = vadd.f32 %v1541_v9, %v118_v27  ;;  %v119_v41 = vmul.f32 %v1534_v6, %v48_v28  ;;  %v55_v20 = vld [vmem:[%s2861_s0 + $0xc8] sm:$0xff]  ;;  %v260_v27 = vld [vmem:[%s2863_s1 + $0xc0] sm:$0xff] }
  0x22   :  { %1370 = vmatmul.mubr.bf16.vlgmr.msra.gmra.mxu0 %v1657_v5  ;;  %v519_v5 = vmax.f32 %v455_v19, 0.0  ;;  %v394_v40 = vadd.f32 %v1557_v13, %v323_v33  ;;  %v120_v42 = vmul.f32 %v1534_v6, %v49_v29  ;;  %v395_v46 = vadd.f32 %v1557_v13, %v324_v38  ;;  %v56_v33 = vld [vmem:[%s2861_s0 + $0xd0] sm:$0xff]  ;;  %v57_v38 = vld [vmem:[%s2861_s0 + $0xd8] sm:$0xff] }
  0x23   :  { %1373 = vmatprep.mubr.bf16.mxu0 %v1689_v22  ;;  %v255_v22 = vld [vmem:[%s2863_s1 + $0x98] sm:$0xff]  ;;  %v520_v43 = vmax.f32 %v456_v35, 0.0  ;;  %v521_v44 = vmax.f32 %v457_v36, 0.0  ;;  %v325_v47 = vmul.f32 %v1552_v12, %v254_v34  ;;  %v190_v51 = vadd.f32 %v1541_v9, %v119_v41 }
  0x24   :  { %v1787_v39 = vpack.c.bf16 %v519_v5, %v518_v31  ;;  %v458_v50 = vadd.f32 %v394_v40, %v188_v32  ;;  %v191_v45 = vadd.f32 %v1541_v9, %v120_v42  ;;  %v326_v53 = vmul.f32 %v1552_v12, %v255_v22  ;;  %v261_v32 = vld [vmem:[%s2863_s1 + $0xc8] sm:$0xff] }
  0x25   :  { %v1809_v55 = vpack.c.bf16 %v521_v44, %v520_v43  ;;  %v459_v56 = vadd.f32 %v395_v46, %v189_v37  ;;  %v396_v57 = vadd.f32 %v1557_v13, %v325_v47  ;;  %v121_v58 = vmul.f32 %v1534_v6, %v50_v30  ;;  %v262_v30 = vld [vmem:[%s2863_s1 + $0xd0] sm:$0xff] }
  0x26   :  { %v522_v60 = vmax.f32 %v458_v50, 0.0  ;;  %v397_v61 = vadd.f32 %v1557_v13, %v326_v53  ;;  %v122_v63 = vmul.f32 %v1534_v6, %v51_v48  ;;  %v327_v0 = vmul.f32 %v1552_v12, %v256_v49  ;;  %v263_v48 = vld [vmem:[%s2863_s1 + $0xd8] sm:$0xff]  ;;  %v58_v53 = vld [vmem:[%s2861_s0 + $0xe0] sm:$0xff] }
  0x27   :  { %v523_v2 = vmax.f32 %v459_v56, 0.0  ;;  %v460_v3 = vadd.f32 %v396_v57, %v190_v51  ;;  %v192_v7 = vadd.f32 %v1541_v9, %v121_v58  ;;  %v328_v8 = vmul.f32 %v1552_v12, %v257_v54  ;;  %v59_v54 = vld [vmem:[%s2861_s0 + $0xe8] sm:$0xff] }
  0x28   :  { %v461_v11 = vadd.f32 %v397_v61, %v191_v45  ;;  %v193_v14 = vadd.f32 %v1541_v9, %v122_v63  ;;  %v398_v15 = vadd.f32 %v1557_v13, %v327_v0  ;;  %v123_v4 = vmul.f32 %v1534_v6, %v52_v59  ;;  %v264_v59 = vld [vmem:[%s2863_s1 + $0xe0] sm:$0xff] }
  0x29   :  { %v1838_v17 = vpack.c.bf16 %v523_v2, %v522_v60  ;;  %v524_v18 = vmax.f32 %v460_v3, 0.0  ;;  %v124_v19 = vmul.f32 %v1534_v6, %v53_v1  ;;  %v329_v26 = vmul.f32 %v1552_v12, %v258_v10 }
  0x2a   :  { %1374 = vmatmul.mubr.bf16.gmra.mxu0 %v1720_v52  ;;  %v259_v52 = vld [vmem:[%s2863_s1 + $0xb8] sm:$0xff]  ;;  %v525_v21 = vmax.f32 %v461_v11, 0.0  ;;  %v462_v23 = vadd.f32 %v398_v15, %v192_v7  ;;  %v194_v25 = vadd.f32 %v1541_v9, %v123_v4  ;;  %v125_v5 = vmul.f32 %v1534_v6, %v54_v16  ;;  %v265_v7 = vld [vmem:[%s2863_s1 + $0xe8] sm:$0xff] }
  0x2b   :  { %1377 = vmatprep.mubr.bf16.mxu0 %v1736_v62  ;;  %v399_v62 = vadd.f32 %v1557_v13, %v328_v8  ;;  %v195_v29 = vadd.f32 %v1541_v9, %v124_v19  ;;  %v330_v31 = vmul.f32 %v1552_v12, %v259_v52  ;;  %v400_v36 = vadd.f32 %v1557_v13, %v329_v26  ;;  %v60_v8 = vld [vmem:[%s2861_s0 + $0xf0] sm:$0xff]  ;;  %v61_v4 = vld [vmem:[%s2861_s0 + $0xf8] sm:$0xff] }
  0x2c   :  { %v1859_v34 = vpack.c.bf16 %v525_v21, %v524_v18  ;;  %v526_v35 = vmax.f32 %v462_v23, 0.0  ;;  %v126_v37 = vmul.f32 %v1534_v6, %v55_v20  ;;  %v196_v41 = vadd.f32 %v1541_v9, %v125_v5  ;;  %v266_v52 = vld [vmem:[%s2863_s1 + $0xf0] sm:$0xff]  ;;  %v267_v26 = vld [vmem:[%s2863_s1 + $0xf8] sm:$0xff] }
  0x2d   :  { %v463_v28 = vadd.f32 %v399_v62, %v193_v14  ;;  %v401_v40 = vadd.f32 %v1557_v13, %v330_v31  ;;  %v331_v42 = vmul.f32 %v1552_v12, %v260_v27  ;;  %v464_v43 = vadd.f32 %v400_v36, %v194_v25  ;;  %v62_v27 = vld [vmem:[%s2861_s0 + $0x100] sm:$0xff] }
  0x2e   :  { %v197_v44 = vadd.f32 %v1541_v9, %v126_v37  ;;  %v332_v46 = vmul.f32 %v1552_v12, %v261_v32  ;;  %v127_v47 = vmul.f32 %v1534_v6, %v56_v33  ;;  %v128_v45 = vmul.f32 %v1534_v6, %v57_v38  ;;  %v63_v32 = vld [vmem:[%s2861_s0 + $0x108] sm:$0xff]  ;;  %v268_v38 = vld [vmem:[%s2863_s1 + $0x100] sm:$0xff] }
  0x2f   :  { %v527_v22 = vmax.f32 %v463_v28, 0.0  ;;  %v465_v50 = vadd.f32 %v401_v40, %v195_v29  ;;  %v402_v51 = vadd.f32 %v1557_v13, %v331_v42  ;;  %v528_v56 = vmax.f32 %v464_v43, 0.0  ;;  %v269_v42 = vld [vmem:[%s2863_s1 + $0x108] sm:$0xff] }
  0x30   :  { %v198_v57 = vadd.f32 %v1541_v9, %v127_v47  ;;  %v333_v58 = vmul.f32 %v1552_v12, %v262_v30  ;;  %v199_v63 = vadd.f32 %v1541_v9, %v128_v45  ;;  %v334_v0 = vmul.f32 %v1552_v12, %v263_v48  ;;  %v64_v30 = vld [vmem:[%s2861_s0 + $0x110] sm:$0xff]  ;;  %v65_v47 = vld [vmem:[%s2861_s0 + $0x118] sm:$0xff] }
  0x31   :  { %v1879_v49 = vpack.c.bf16 %v527_v22, %v526_v35  ;;  %v529_v60 = vmax.f32 %v465_v50, 0.0  ;;  %v466_v61 = vadd.f32 %v402_v51, %v196_v41  ;;  %v129_v2 = vmul.f32 %v1534_v6, %v58_v53  ;;  %v270_v53 = vld [vmem:[%s2863_s1 + $0x110] sm:$0xff] }
  0x32   :  { %1378 = vmatmul.mubr.bf16.gmra.mxu0 %v1764_v24  ;;  %v403_v24 = vadd.f32 %v1557_v13, %v332_v46  ;;  %v130_v3 = vmul.f32 %v1534_v6, %v59_v54  ;;  %v405_v14 = vadd.f32 %v1557_v13, %v334_v0  ;;  %v335_v15 = vmul.f32 %v1552_v12, %v264_v59  ;;  %v66_v0 = vld [vmem:[%s2861_s0 + $0x120] sm:$0xff] }
  0x33   :  { %1381 = vmatprep.mubr.bf16.mxu0 %v1787_v39  ;;  %v404_v39 = vadd.f32 %v1557_v13, %v333_v58  ;;  %v1907_v10 = vpack.c.bf16 %v529_v60, %v528_v56  ;;  %v530_v11 = vmax.f32 %v466_v61, 0.0  ;;  %v200_v62 = vadd.f32 %v1541_v9, %v129_v2  ;;  %v271_v58 = vld [vmem:[%s2863_s1 + $0x118] sm:$0xff] }
  0x34   :  { %v467_v1 = vadd.f32 %v403_v24, %v197_v44  ;;  %v201_v19 = vadd.f32 %v1541_v9, %v130_v3  ;;  %v469_v20 = vadd.f32 %v405_v14, %v199_v63  ;;  %v336_v21 = vmul.f32 %v1552_v12, %v265_v7 }
  0x35   :  { %v468_v18 = vadd.f32 %v404_v39, %v198_v57  ;;  %v406_v23 = vadd.f32 %v1557_v13, %v335_v15  ;;  %v131_v25 = vmul.f32 %v1534_v6, %v60_v8  ;;  %v132_v31 = vmul.f32 %v1534_v6, %v61_v4  ;;  %v272_v8 = vld [vmem:[%s2863_s1 + $0x120] sm:$0xff] }
  0x36   :  { %v531_v16 = vmax.f32 %v467_v1, 0.0  ;;  %v337_v5 = vmul.f32 %v1552_v12, %v266_v52  ;;  %v533_v33 = vmax.f32 %v469_v20, 0.0  ;;  %v407_v35 = vadd.f32 %v1557_v13, %v336_v21  ;;  %v67_v1 = vld [vmem:[%s2861_s0 + $0x128] sm:$0xff]  ;;  %v68_v20 = vld [vmem:[%s2861_s0 + $0x130] sm:$0xff] }
  0x37   :  { %v532_v29 = vmax.f32 %v468_v18, 0.0  ;;  %v470_v36 = vadd.f32 %v406_v23, %v200_v62  ;;  %v202_v37 = vadd.f32 %v1541_v9, %v131_v25  ;;  %v203_v22 = vadd.f32 %v1541_v9, %v132_v31 }
  0x38   :  { %v1928_v28 = vpack.c.bf16 %v531_v16, %v530_v11  ;;  %v338_v40 = vmul.f32 %v1552_v12, %v267_v26  ;;  %v408_v41 = vadd.f32 %v1557_v13, %v337_v5  ;;  %v471_v44 = vadd.f32 %v407_v35, %v201_v19  ;;  %v273_v19 = vld [vmem:[%s2863_s1 + $0x128] sm:$0xff]  ;;  %v69_v26 = vld [vmem:[%s2861_s0 + $0x138] sm:$0xff] }
  0x39   :  { %v1952_v43 = vpack.c.bf16 %v533_v33, %v532_v29  ;;  %v134_v46 = vmul.f32 %v1534_v6, %v63_v32  ;;  %v339_v45 = vmul.f32 %v1552_v12, %v268_v38  ;;  %v340_v24 = vmul.f32 %v1552_v12, %v269_v42  ;;  %v70_v38 = vld [vmem:[%s2861_s0 + $0x140] sm:$0xff]  ;;  %v71_v42 = vld [vmem:[%s2861_s0 + $0x148] sm:$0xff] }
  0x3a   :  { %1382 = vmatmul.mubr.bf16.gmra.mxu0 %v1809_v55  ;;  %v133_v55 = vmul.f32 %v1534_v6, %v62_v27  ;;  %v409_v48 = vadd.f32 %v1557_v13, %v338_v40  ;;  %v472_v50 = vadd.f32 %v408_v41, %v202_v37  ;;  %v535_v54 = vmax.f32 %v471_v44, 0.0  ;;  %v274_v27 = vld [vmem:[%s2863_s1 + $0x130] sm:$0xff]  ;;  %v275_v37 = vld [vmem:[%s2863_s1 + $0x138] sm:$0xff] }
  0x3b   :  { %1385 = vmatprep.mubr.bf16.mxu0 %v1838_v17  ;;  %v534_v17 = vmax.f32 %v470_v36, 0.0  ;;  %v205_v56 = vadd.f32 %v1541_v9, %v134_v46  ;;  %v135_v57 = vmul.f32 %v1534_v6, %v64_v30  ;;  %v410_v61 = vadd.f32 %v1557_v13, %v339_v45 }
  0x3c   :  { %v204_v51 = vadd.f32 %v1541_v9, %v133_v55  ;;  %v473_v59 = vadd.f32 %v409_v48, %v203_v22  ;;  %v536_v60 = vmax.f32 %v472_v50, 0.0  ;;  %v136_v63 = vmul.f32 %v1534_v6, %v65_v47  ;;  %v276_v47 = vld [vmem:[%s2863_s1 + $0x140] sm:$0xff] }
  0x3d   :  { %v1978_v39 = vpack.c.bf16 %v535_v54, %v534_v17  ;;  %v411_v2 = vadd.f32 %v1557_v13, %v340_v24  ;;  %v206_v3 = vadd.f32 %v1541_v9, %v135_v57  ;;  %v341_v7 = vmul.f32 %v1552_v12, %v270_v53  ;;  %v277_v53 = vld [vmem:[%s2863_s1 + $0x148] sm:$0xff]  ;;  %v72_v54 = vld [vmem:[%s2861_s0 + $0x150] sm:$0xff] }
  0x3e   :  { %v537_v11 = vmax.f32 %v473_v59, 0.0  ;;  %v474_v14 = vadd.f32 %v410_v61, %v204_v51  ;;  %v207_v15 = vadd.f32 %v1541_v9, %v136_v63  ;;  %v342_v4 = vmul.f32 %v1552_v12, %v271_v58  ;;  %v73_v59 = vld [vmem:[%s2861_s0 + $0x158] sm:$0xff] }
  0x3f   :  { %v475_v52 = vadd.f32 %v411_v2, %v205_v56  ;;  %v412_v16 = vadd.f32 %v1557_v13, %v341_v7  ;;  %v137_v18 = vmul.f32 %v1534_v6, %v66_v0  ;;  %v138_v62 = vmul.f32 %v1534_v6, %v67_v1  ;;  %v278_v1 = vld [vmem:[%s2863_s1 + $0x150] sm:$0xff] }
  0x40   :  { %v1999_v21 = vpack.c.bf16 %v537_v11, %v536_v60  ;;  %v413_v23 = vadd.f32 %v1557_v13, %v342_v4  ;;  %v343_v25 = vmul.f32 %v1552_v12, %v272_v8  ;;  %v344_v33 = vmul.f32 %v1552_v12, %v273_v19  ;;  %v279_v8 = vld [vmem:[%s2863_s1 + $0x158] sm:$0xff] }
  0x41   :  { %v539_v29 = vmax.f32 %v475_v52, 0.0  ;;  %v476_v31 = vadd.f32 %v412_v16, %v206_v3  ;;  %v208_v5 = vadd.f32 %v1541_v9, %v137_v18  ;;  %v139_v36 = vmul.f32 %v1534_v6, %v68_v20  ;;  %v75_v52 = vld [vmem:[%s2861_s0 + $0x168] sm:$0xff]  ;;  %v280_v20 = vld [vmem:[%s2863_s1 + $0x160] sm:$0xff] }
  0x42   :  { %1386 = vmatmul.mubr.bf16.gmra.mxu0 %v1859_v34  ;;  %v538_v34 = vmax.f32 %v474_v14, 0.0  ;;  %v477_v32 = vadd.f32 %v413_v23, %v207_v15  ;;  %v414_v35 = vadd.f32 %v1557_v13, %v343_v25  ;;  %v140_v41 = vmul.f32 %v1534_v6, %v69_v26 }
  0x43   :  { %1389 = vmatprep.mubr.bf16.mxu0 %v1879_v49  ;;  %v209_v49 = vadd.f32 %v1541_v9, %v138_v62  ;;  %v540_v40 = vmax.f32 %v476_v31, 0.0  ;;  %v345_v55 = vmul.f32 %v1552_v12, %v274_v27  ;;  %v415_v44 = vadd.f32 %v1557_v13, %v344_v33 }
  0x44   :  { %v586_v22 = vpack.c.bf16 %v539_v29, %v538_v34  ;;  %v541_v30 = vmax.f32 %v477_v32, 0.0  ;;  %v478_v17 = vadd.f32 %v414_v35, %v208_v5  ;;  %v210_v46 = vadd.f32 %v1541_v9, %v139_v36  ;;  %v76_v32 = vld [vmem:[%s2861_s0 + $0x170] sm:$0xff] }
  0x45   :  { %v211_v48 = vadd.f32 %v1541_v9, %v140_v41  ;;  %v346_v50 = vmul.f32 %v1552_v12, %v275_v37  ;;  %v416_v51 = vadd.f32 %v1557_v13, %v345_v55  ;;  %v141_v45 = vmul.f32 %v1534_v6, %v70_v38  ;;  %v77_v38 = vld [vmem:[%s2861_s0 + $0x178] sm:$0xff] }
  0x46   :  { %1401 = vmatprep.mubr.bf16.mxu1 %v586_v22  ;;  %v587_v56 = vpack.c.bf16 %v541_v30, %v540_v40  ;;  %v479_v24 = vadd.f32 %v415_v44, %v209_v49  ;;  %v542_v57 = vmax.f32 %v478_v17, 0.0  ;;  %v142_v58 = vmul.f32 %v1534_v6, %v71_v42  ;;  %v281_v49 = vld [vmem:[%s2863_s1 + $0x168] sm:$0xff]  ;;  %v282_v22 = vld [vmem:[%s2863_s1 + $0x170] sm:$0xff] }
  0x47   :  { %v417_v60 = vadd.f32 %v1557_v13, %v346_v50  ;;  %v480_v61 = vadd.f32 %v416_v51, %v210_v46  ;;  %v212_v63 = vadd.f32 %v1541_v9, %v141_v45  ;;  %v347_v0 = vmul.f32 %v1552_v12, %v276_v47  ;;  %v283_v47 = vld [vmem:[%s2863_s1 + $0x178] sm:$0xff] }
  0x48   :  { %1402 = vmatmul.mubr.bf16.vlgmr.msra.gmra.mxu1 %v587_v56  ;;  %v543_v2 = vmax.f32 %v479_v24, 0.0  ;;  %v213_v3 = vadd.f32 %v1541_v9, %v142_v58  ;;  %v348_v7 = vmul.f32 %v1552_v12, %v277_v53  ;;  %v144_v4 = vmul.f32 %v1534_v6, %v73_v59  ;;  %v79_v53 = vld [vmem:[%s2861_s0 + $0x188] sm:$0xff] }
  0x49   :  { %v481_v11 = vadd.f32 %v417_v60, %v211_v48  ;;  %v544_v14 = vmax.f32 %v480_v61, 0.0  ;;  %v418_v15 = vadd.f32 %v1557_v13, %v347_v0  ;;  %v349_v19 = vmul.f32 %v1552_v12, %v278_v1  ;;  %v78_v48 = vld [vmem:[%s2861_s0 + $0x180] sm:$0xff]  ;;  %v80_v0 = vld [vmem:[%s2861_s0 + $0x190] sm:$0xff] }
  0x4a   :  { %1390 = vmatmul.mubr.bf16.gmra.mxu0 %v1907_v10  ;;  %v143_v10 = vmul.f32 %v1534_v6, %v72_v54  ;;  %v588_v16 = vpack.c.bf16 %v543_v2, %v542_v57  ;;  %v419_v18 = vadd.f32 %v1557_v13, %v348_v7  ;;  %v215_v25 = vadd.f32 %v1541_v9, %v144_v4  ;;  %v286_v4 = vld [vmem:[%s2863_s1 + $0x190] sm:$0xff] }
  0x4b   :  { %1393 = vmatprep.mubr.bf16.mxu0 %v1928_v28  ;;  %v74_v28 = vld [vmem:[%s2861_s0 + $0x160] sm:$0xff]  ;;  %v545_v34 = vmax.f32 %v481_v11, 0.0  ;;  %v482_v23 = vadd.f32 %v418_v15, %v212_v63  ;;  %v350_v26 = vmul.f32 %v1552_v12, %v279_v8  ;;  %v420_v29 = vadd.f32 %v1557_v13, %v349_v19  ;;  %v285_v63 = vld [vmem:[%s2863_s1 + $0x188] sm:$0xff] }
  0x4c   :  { %v214_v62 = vadd.f32 %v1541_v9, %v143_v10  ;;  %1405 = vmatprep.mubr.bf16.mxu1 %v588_v16  ;;  %v483_v27 = vadd.f32 %v419_v18, %v213_v3  ;;  %v145_v31 = vmul.f32 %v1534_v6, %v74_v28  ;;  %v146_v5 = vmul.f32 %v1534_v6, %v75_v52  ;;  %v81_v10 = vld [vmem:[%s2861_s0 + $0x198] sm:$0xff] }
  0x4d   :  { %v589_v33 = vpack.c.bf16 %v545_v34, %v544_v14  ;;  %v546_v35 = vmax.f32 %v482_v23, 0.0  ;;  %v421_v36 = vadd.f32 %v1557_v13, %v350_v26  ;;  %v351_v37 = vmul.f32 %v1552_v12, %v280_v20  ;;  %v83_v26 = vld [vmem:[%s2861_s0 + $0x1a8] sm:$0xff] }
  0x4e   :  { %v547_v40 = vmax.f32 %v483_v27, 0.0  ;;  %v484_v41 = vadd.f32 %v420_v29, %v214_v62  ;;  %v216_v55 = vadd.f32 %v1541_v9, %v145_v31  ;;  %v217_v42 = vadd.f32 %v1541_v9, %v146_v5  ;;  %v287_v62 = vld [vmem:[%s2863_s1 + $0x198] sm:$0xff] }
  0x4f   :  { %v485_v30 = vadd.f32 %v421_v36, %v215_v25  ;;  %v352_v44 = vmul.f32 %v1552_v12, %v281_v49  ;;  %v422_v17 = vadd.f32 %v1557_v13, %v351_v37  ;;  %v147_v46 = vmul.f32 %v1534_v6, %v76_v32  ;;  %v82_v25 = vld [vmem:[%s2861_s0 + $0x1a0] sm:$0xff] }
  0x50   :  { %1406 = vmatmul.mubr.bf16.gmra.mxu1 %v589_v33  ;;  %v590_v50 = vpack.c.bf16 %v547_v40, %v546_v35  ;;  %v148_v51 = vmul.f32 %v1534_v6, %v77_v38  ;;  %v353_v45 = vmul.f32 %v1552_v12, %v282_v22  ;;  %v354_v59 = vmul.f32 %v1552_v12, %v283_v47  ;;  %v288_v49 = vld [vmem:[%s2863_s1 + $0x1a0] sm:$0xff]  ;;  %v289_v40 = vld [vmem:[%s2863_s1 + $0x1a8] sm:$0xff] }
  0x51   :  { %v549_v54 = vmax.f32 %v485_v30, 0.0  ;;  %v423_v56 = vadd.f32 %v1557_v13, %v352_v44  ;;  %v486_v24 = vadd.f32 %v422_v17, %v216_v55  ;;  %v218_v57 = vadd.f32 %v1541_v9, %v147_v46  ;;  %v85_v17 = vld [vmem:[%s2861_s0 + $0x1b8] sm:$0xff]  ;;  %v290_v46 = vld [vmem:[%s2863_s1 + $0x1b0] sm:$0xff] }
  0x52   :  { %1394 = vmatmul.mubr.bf16.gmra.mxu0 %v1952_v43  ;;  %v548_v43 = vmax.f32 %v484_v41, 0.0  ;;  %1409 = vmatprep.mubr.bf16.mxu1 %v590_v50  ;;  %v219_v58 = vadd.f32 %v1541_v9, %v148_v51  ;;  %v424_v60 = vadd.f32 %v1557_v13, %v353_v45  ;;  %v149_v61 = vmul.f32 %v1534_v6, %v78_v48  ;;  %v84_v41 = vld [vmem:[%s2861_s0 + $0x1b0] sm:$0xff] }
  0x53   :  { %1397 = vmatprep.mubr.bf16.mxu0 %v1978_v39  ;;  %v284_v39 = vld [vmem:[%s2863_s1 + $0x180] sm:$0xff]  ;;  %v487_v2 = vadd.f32 %v423_v56, %v217_v42  ;;  %v550_v3 = vmax.f32 %v486_v24, 0.0  ;;  %v150_v7 = vmul.f32 %v1534_v6, %v79_v53  ;;  %v425_v8 = vadd.f32 %v1557_v13, %v354_v59  ;;  %v291_v56 = vld [vmem:[%s2863_s1 + $0x1b8] sm:$0xff] }
  0x54   :  { %v591_v1 = vpack.c.bf16 %v549_v54, %v548_v43  ;;  %v488_v11 = vadd.f32 %v424_v60, %v218_v57  ;;  %v220_v14 = vadd.f32 %v1541_v9, %v149_v61  ;;  %v355_v15 = vmul.f32 %v1552_v12, %v284_v39  ;;  %v86_v24 = vld [vmem:[%s2861_s0 + $0x1c0] sm:$0xff]  ;;  %v87_v60 = vld [vmem:[%s2861_s0 + $0x1c8] sm:$0xff] }
  0x55   :  { %v551_v28 = vmax.f32 %v487_v2, 0.0  ;;  %v221_v52 = vadd.f32 %v1541_v9, %v150_v7  ;;  %v356_v16 = vmul.f32 %v1552_v12, %v285_v63  ;;  %v151_v18 = vmul.f32 %v1534_v6, %v80_v0  ;;  %v292_v2 = vld [vmem:[%s2863_s1 + $0x1c0] sm:$0xff] }
  0x56   :  { %v489_v19 = vadd.f32 %v425_v8, %v219_v58  ;;  %v552_v20 = vmax.f32 %v488_v11, 0.0  ;;  %v426_v34 = vadd.f32 %v1557_v13, %v355_v15  ;;  %v152_v23 = vmul.f32 %v1534_v6, %v81_v10  ;;  %v2206_v8 = vld [vmem:[%s2862_s2] ss:$0 sm:$0xff]  ;;  %v293_v11 = vld [vmem:[%s2863_s1 + $0x1c8] sm:$0xff] }
  0x57   :  { %v592_v27 = vpack.c.bf16 %v551_v28, %v550_v3  ;;  %v427_v29 = vadd.f32 %v1557_v13, %v356_v16  ;;  %v222_v31 = vadd.f32 %v1541_v9, %v151_v18  ;;  %v357_v5 = vmul.f32 %v1552_v12, %v286_v4  ;;  %v89_v28 = vld [vmem:[%s2861_s0 + $0x1d8] sm:$0xff] }
  0x58   :  { %1410 = vmatmul.mubr.bf16.gmra.mxu1 %v591_v1  ;;  %v553_v32 = vmax.f32 %v489_v19, 0.0  ;;  %v490_v33 = vadd.f32 %v426_v34, %v220_v14  ;;  %v223_v35 = vadd.f32 %v1541_v9, %v152_v23  ;;  %v358_v36 = vmul.f32 %v1552_v12, %v287_v62  ;;  %v88_v14 = vld [vmem:[%s2861_s0 + $0x1d0] sm:$0xff]  ;;  %v1460_v19 = vld [vmem:[%s2865_s4] ss:$0 sm:$0xff] }
  0x59   :  { %1413 = vmatprep.mubr.bf16.mxu1 %v592_v27  ;;  %v428_v37 = vadd.f32 %v1557_v13, %v357_v5  ;;  %v153_v38 = vmul.f32 %v1534_v6, %v82_v25  ;;  %v154_v22 = vmul.f32 %v1534_v6, %v83_v26  ;;  %v359_v44 = vmul.f32 %v1552_v12, %v288_v49  ;;  %v294_v34 = vld [vmem:[%s2863_s1 + $0x1d0] sm:$0xff] }
  0x5a   :  { %1398 = vmatmul.mubr.bf16.gmra.mxu0 %v1999_v21  ;;  %v491_v21 = vadd.f32 %v427_v29, %v221_v52  ;;  %v593_v55 = vpack.c.bf16 %v553_v32, %v552_v20  ;;  %v554_v42 = vmax.f32 %v490_v33, 0.0  ;;  %v429_v30 = vadd.f32 %v1557_v13, %v358_v36  ;;  %v2222_v52 = vld [vmem:[%s2866_s5] ss:$0 sm:$0xff]  ;;  %v295_v29 = vld [vmem:[%s2863_s1 + $0x1d8] sm:$0xff] }
  0x5b   :  { %v492_v48 = vadd.f32 %v428_v37, %v222_v31  ;;  %v224_v50 = vadd.f32 %v1541_v9, %v153_v38  ;;  %v225_v43 = vadd.f32 %v1541_v9, %v154_v22  ;;  %v360_v45 = vmul.f32 %v1552_v12, %v289_v40  ;;  %v90_v33 = vld [vmem:[%s2861_s0 + $0x1e0] sm:$0xff] }
  0x5c   :  { %v555_v47 = vmax.f32 %v491_v21, 0.0  ;;  %v493_v51 = vadd.f32 %v429_v30, %v223_v35  ;;  %v430_v53 = vadd.f32 %v1557_v13, %v359_v44  ;;  %v155_v54 = vmul.f32 %v1534_v6, %v84_v41  ;;  %v91_v35 = vld [vmem:[%s2861_s0 + $0x1e8] sm:$0xff]  ;;  %v296_v22 = vld [vmem:[%s2863_s1 + $0x1e0] sm:$0xff] }
  0x5d   :  { %v556_v39 = vmax.f32 %v492_v48, 0.0  ;;  %v156_v58 = vmul.f32 %v1534_v6, %v85_v17  ;;  %v361_v59 = vmul.f32 %v1552_v12, %v290_v46  ;;  %v431_v63 = vadd.f32 %v1557_v13, %v360_v45  ;;  %v2198_v6 = vld [vmem:[%s2864_s3] ss:$0 sm:$0xff]  ;;  %v92_v48 = vld [vmem:[%s2861_s0 + $0x1f0] sm:$0xff] }
  0x5e   :  { %v594_v57 = vpack.c.bf16 %v555_v47, %v554_v42  ;;  %v557_v61 = vmax.f32 %v493_v51, 0.0  ;;  %v494_v0 = vadd.f32 %v430_v53, %v224_v50  ;;  %v226_v1 = vadd.f32 %v1541_v9, %v155_v54  ;;  %v297_v47 = vld [vmem:[%s2863_s1 + $0x1e8] sm:$0xff]  ;;  %v93_v53 = vld [vmem:[%s2861_s0 + $0x1f8] sm:$0xff]  ;;  %v298_v54 = vld [vmem:[%s2863_s1 + $0x1f0] sm:$0xff] }
  0x5f   :  { %v227_v3 = vadd.f32 %v2198_v6, %v156_v58  ;;  %v362_v7 = vmul.f32 %v1552_v12, %v291_v56  ;;  %v432_v10 = vadd.f32 %v1557_v13, %v361_v59  ;;  %v157_v9 = vmul.f32 %v2206_v8, %v86_v24 }
  0x60   :  { %1414 = vmatmul.mubr.bf16.gmra.mxu1 %v593_v55  ;;  %v595_v15 = vpack.c.bf16 %v557_v61, %v556_v39  ;;  %v495_v12 = vadd.f32 %v431_v63, %v225_v43  ;;  %v558_v4 = vmax.f32 %v494_v0, 0.0  ;;  %v158_v13 = vmul.f32 %v2206_v8, %v87_v60  ;;  %v299_v63 = vld [vmem:[%s2863_s1 + $0x1f8] sm:$0xff] }
  0x61   :  { %1417 = vmatprep.mubr.bf16.mxu1 %v594_v57  ;;  %v433_v16 = vadd.f32 %v2222_v52, %v362_v7  ;;  %v496_v18 = vadd.f32 %v432_v10, %v226_v1  ;;  %v228_v62 = vadd.f32 %v2198_v6, %v157_v9  ;;  %v363_v20 = vmul.f32 %v1460_v19, %v292_v2 }
  0x62   :  { %v559_v23 = vmax.f32 %v495_v12, 0.0  ;;  %v229_v25 = vadd.f32 %v2198_v6, %v158_v13  ;;  %v364_v26 = vmul.f32 %v1460_v19, %v293_v11  ;;  %v159_v27 = vmul.f32 %v2206_v8, %v88_v14 }
  0x63   :  { %v497_v31 = vadd.f32 %v433_v16, %v227_v3  ;;  %v560_v5 = vmax.f32 %v496_v18, 0.0  ;;  %v434_v49 = vadd.f32 %v2222_v52, %v363_v20  ;;  %v160_v32 = vmul.f32 %v2206_v8, %v89_v28 }
  0x64   :  { %v596_v36 = vpack.c.bf16 %v559_v23, %v558_v4  ;;  %v435_v21 = vadd.f32 %v2222_v52, %v364_v26  ;;  %v230_v37 = vadd.f32 %v2198_v6, %v159_v27  ;;  %v365_v38 = vmul.f32 %v1460_v19, %v294_v34 }
  0x65   :  { %v561_v40 = vmax.f32 %v497_v31, 0.0  ;;  %v498_v41 = vadd.f32 %v434_v49, %v228_v62  ;;  %v231_v55 = vadd.f32 %v2198_v6, %v160_v32  ;;  %v366_v42 = vmul.f32 %v1460_v19, %v295_v29 }
  0x66   :  { %v499_v30 = vadd.f32 %v435_v21, %v229_v25  ;;  %v436_v44 = vadd.f32 %v2222_v52, %v365_v38  ;;  %v161_v17 = vmul.f32 %v2206_v8, %v90_v33  ;;  %v162_v46 = vmul.f32 %v2206_v8, %v91_v35 }
  0x67   :  { %v597_v50 = vpack.c.bf16 %v561_v40, %v560_v5  ;;  %v562_v43 = vmax.f32 %v498_v41, 0.0  ;;  %v437_v51 = vadd.f32 %v2222_v52, %v366_v42  ;;  %v367_v45 = vmul.f32 %v1460_v19, %v296_v22 }
  0x68   :  { %1418 = vmatmul.mubr.bf16.gmra.mxu1 %v595_v15  ;;  %v563_v56 = vmax.f32 %v499_v30, 0.0  ;;  %v500_v24 = vadd.f32 %v436_v44, %v230_v37  ;;  %v232_v57 = vadd.f32 %v2198_v6, %v161_v17  ;;  %v233_v39 = vadd.f32 %v2198_v6, %v162_v46 }
  0x69   :  { %1421 = vmatprep.mubr.bf16.mxu1 %v596_v36  ;;  %v501_v58 = vadd.f32 %v437_v51, %v231_v55  ;;  %v368_v59 = vmul.f32 %v1460_v19, %v297_v47  ;;  %v438_v60 = vadd.f32 %v2222_v52, %v367_v45  ;;  %v163_v61 = vmul.f32 %v2206_v8, %v92_v48 }
  0x6a   :  { %v598_v0 = vpack.c.bf16 %v563_v56, %v562_v43  ;;  %v564_v1 = vmax.f32 %v500_v24, 0.0  ;;  %v164_v2 = vmul.f32 %v2206_v8, %v93_v53  ;;  %v369_v3 = vmul.f32 %v1460_v19, %v298_v54 }
  0x6b   :  { %v565_v7 = vmax.f32 %v501_v58, 0.0  ;;  %v439_v10 = vadd.f32 %v2222_v52, %v368_v59  ;;  %v502_v9 = vadd.f32 %v438_v60, %v232_v57  ;;  %v234_v11 = vadd.f32 %v2198_v6, %v163_v61 }
  0x6c   :  { %v235_v14 = vadd.f32 %v2198_v6, %v164_v2  ;;  %v370_v15 = vmul.f32 %v1460_v19, %v299_v63  ;;  %v440_v12 = vadd.f32 %v2222_v52, %v369_v3 }
  0x6d   :  { %v599_v4 = vpack.c.bf16 %v565_v7, %v564_v1  ;;  %v503_v13 = vadd.f32 %v439_v10, %v233_v39  ;;  %v566_v28 = vmax.f32 %v502_v9, 0.0 }
  0x6e   :  { %v441_v16 = vadd.f32 %v2222_v52, %v370_v15  ;;  %v504_v18 = vadd.f32 %v440_v12, %v234_v11 }
  0x6f   :  { %v567_v62 = vmax.f32 %v503_v13, 0.0 }
  0x70   :  { %1422 = vmatmul.mubr.bf16.gmra.mxu1 %v597_v50  ;;  %v505_v8 = vadd.f32 %v441_v16, %v235_v14  ;;  %v568_v20 = vmax.f32 %v504_v18, 0.0 }
  0x71   :  { %1425 = vmatprep.mubr.bf16.mxu1 %v598_v0  ;;  %v600_v34 = vpack.c.bf16 %v567_v62, %v566_v28 }
  0x72   :  { %v569_v23 = vmax.f32 %v505_v8, 0.0 }
  0x74   :  { %v601_v25 = vpack.c.bf16 %v569_v23, %v568_v20 }
  0x78   :  { %1426 = vmatmul.mubr.bf16.gmra.mxu1 %v599_v4 }
  0x79   :  { %1429 = vmatprep.mubr.bf16.mxu1 %v600_v34 }
  0x80   :  { %1430 = vmatmul.mubr.bf16.gmra.mxu1 %v601_v25 }
  0xe2   :  { %v2280_v6 = vpop.f32.mrf.mxu0 }
  0xe3   :  { %957 = vst [vmem:[%s2867_s7 + $0x10] sm:$0xff] %v2280_v6 }
  0xe4   :  { %v2286_v52 = vpop.f32.mrf.mxu0 }
  0xe5   :  { %955 = vst [vmem:[%s2867_s7] sm:$0xff] %v2286_v52 }
  0xe6   :  { %v2292_v19 = vpop.f32.mrf.mxu0 }
  0xe7   :  { %958 = vst [vmem:[%s2867_s7 + $0x18] sm:$0xff] %v2292_v19 }
  0xe8   :  { %v2298_v26 = vpop.f32.mrf.mxu0 }
  0xe9   :  { %956 = vst [vmem:[%s2867_s7 + $0x8] sm:$0xff] %v2298_v26  ;;  %v1019_v27 = vadd.f32 %v2298_v26, %v2286_v52 }
  0xea   :  { %v2306_v29 = vpop.f32.mrf.mxu0 }
  0xeb   :  { %v1020_v31 = vadd.f32 %v2280_v6, %v1019_v27  ;;  %961 = vst [vmem:[%s2867_s7 + $0x30] sm:$0xff] %v2306_v29 }
  0xec   :  { %v2313_v5 = vpop.f32.mrf.mxu0 }
  0xed   :  { %959 = vst [vmem:[%s2867_s7 + $0x20] sm:$0xff] %v2313_v5  ;;  %v1021_v49 = vadd.f32 %v2292_v19, %v1020_v31 }
  0xee   :  { %v2320_v32 = vpop.f32.mrf.mxu0 }
  0xef   :  { %v1022_v33 = vadd.f32 %v1021_v49, %v2313_v5  ;;  %962 = vst [vmem:[%s2867_s7 + $0x38] sm:$0xff] %v2320_v32 }
  0xf0   :  { %v2327_v35 = vpop.f32.mrf.mxu0 }
  0xf1   :  { %960 = vst [vmem:[%s2867_s7 + $0x28] sm:$0xff] %v2327_v35  ;;  %v1023_v36 = vadd.f32 %v1022_v33, %v2327_v35 }
  0xf2   :  { %v2334_v21 = vpop.f32.mrf.mxu0 }
  0xf3   :  { %v1024_v37 = vadd.f32 %v2306_v29, %v1023_v36  ;;  %965 = vst [vmem:[%s2867_s7 + $0x50] sm:$0xff] %v2334_v21 }
  0xf4   :  { %v2341_v38 = vpop.f32.mrf.mxu0 }
  0xf5   :  { %963 = vst [vmem:[%s2867_s7 + $0x40] sm:$0xff] %v2341_v38  ;;  %v1025_v22 = vadd.f32 %v2320_v32, %v1024_v37 }
  0xf6   :  { %v2348_v40 = vpop.f32.mrf.mxu0 }
  0xf7   :  { %v1026_v41 = vadd.f32 %v1025_v22, %v2341_v38  ;;  %966 = vst [vmem:[%s2867_s7 + $0x58] sm:$0xff] %v2348_v40 }
  0xf8   :  { %v2355_v55 = vpop.f32.mrf.mxu0 }
  0xf9   :  { %964 = vst [vmem:[%s2867_s7 + $0x48] sm:$0xff] %v2355_v55  ;;  %v1027_v42 = vadd.f32 %v1026_v41, %v2355_v55 }
  0xfa   :  { %v2362_v30 = vpop.f32.mrf.mxu0 }
  0xfb   :  { %v1028_v44 = vadd.f32 %v2334_v21, %v1027_v42  ;;  %969 = vst [vmem:[%s2867_s7 + $0x70] sm:$0xff] %v2362_v30 }
  0xfc   :  { %v2369_v17 = vpop.f32.mrf.mxu0 }
  0xfd   :  { %967 = vst [vmem:[%s2867_s7 + $0x60] sm:$0xff] %v2369_v17  ;;  %v1029_v46 = vadd.f32 %v2348_v40, %v1028_v44 }
  0xfe   :  { %v2376_v47 = vpop.f32.mrf.mxu0 }
  0xff   :  { %v1030_v48 = vadd.f32 %v1029_v46, %v2369_v17  ;;  %970 = vst [vmem:[%s2867_s7 + $0x78] sm:$0xff] %v2376_v47 }
 0x100   :  { %v2383_v50 = vpop.f32.mrf.mxu0 }
 0x101   :  { %968 = vst [vmem:[%s2867_s7 + $0x68] sm:$0xff] %v2383_v50  ;;  %v1031_v43 = vadd.f32 %v1030_v48, %v2383_v50 }
 0x102   :  { %v2390_v51 = vpop.f32.mrf.mxu0 }
 0x103   :  { %v1032_v45 = vadd.f32 %v2362_v30, %v1031_v43  ;;  %973 = vst [vmem:[%s2867_s7 + $0x90] sm:$0xff] %v2390_v51 }
 0x104   :  { %v2397_v53 = vpop.f32.mrf.mxu0 }
 0x105   :  { %971 = vst [vmem:[%s2867_s7 + $0x80] sm:$0xff] %v2397_v53  ;;  %v1033_v54 = vadd.f32 %v2376_v47, %v1032_v45 }
 0x106   :  { %v2404_v56 = vpop.f32.mrf.mxu0 }
 0x107   :  { %v1034_v24 = vadd.f32 %v1033_v54, %v2397_v53  ;;  %974 = vst [vmem:[%s2867_s7 + $0x98] sm:$0xff] %v2404_v56 }
 0x108   :  { %v2411_v57 = vpop.f32.mrf.mxu0  ;;  %v2425_v60 = vpop.f32.mrf.mxu1 }
 0x109   :  { %972 = vst [vmem:[%s2867_s7 + $0x88] sm:$0xff] %v2411_v57  ;;  %v1035_v39 = vadd.f32 %v1034_v24, %v2411_v57  ;;  %989 = vst [vmem:[%s2867_s7 + $0x110] sm:$0xff] %v2425_v60 }
 0x10a   :  { %v2418_v58 = vpop.f32.mrf.mxu0  ;;  %v2438_v0 = vpop.f32.mrf.mxu1 }
 0x10b   :  { %v1036_v59 = vadd.f32 %v2390_v51, %v1035_v39  ;;  %977 = vst [vmem:[%s2867_s7 + $0xb0] sm:$0xff] %v2418_v58  ;;  %987 = vst [vmem:[%s2867_s7 + $0x100] sm:$0xff] %v2438_v0 }
 0x10c   :  { %v2427_v61 = vpop.f32.mrf.mxu0  ;;  %v2451_v3 = vpop.f32.mrf.mxu1 }
 0x10d   :  { %975 = vst [vmem:[%s2867_s7 + $0xa0] sm:$0xff] %v2427_v61  ;;  %v1037_v63 = vadd.f32 %v2404_v56, %v1036_v59  ;;  %990 = vst [vmem:[%s2867_s7 + $0x118] sm:$0xff] %v2451_v3 }
 0x10e   :  { %v2440_v1 = vpop.f32.mrf.mxu0  ;;  %v2464_v9 = vpop.f32.mrf.mxu1 }
 0x10f   :  { %v1038_v2 = vadd.f32 %v1037_v63, %v2427_v61  ;;  %978 = vst [vmem:[%s2867_s7 + $0xb8] sm:$0xff] %v2440_v1  ;;  %988 = vst [vmem:[%s2867_s7 + $0x108] sm:$0xff] %v2464_v9 }
 0x110   :  { %v2453_v7 = vpop.f32.mrf.mxu0  ;;  %v2477_v15 = vpop.f32.mrf.mxu1 }
 0x111   :  { %976 = vst [vmem:[%s2867_s7 + $0xa8] sm:$0xff] %v2453_v7  ;;  %v1039_v10 = vadd.f32 %v1038_v2, %v2453_v7  ;;  %2886 = vst [vmem:[#allocation2_spill] sm:$0xff] %v2477_v15 }
 0x112   :  { %v2466_v11 = vpop.f32.mrf.mxu0  ;;  %993 = vst [vmem:[%s2867_s7 + $0x130] sm:$0xff] %v2477_v15  ;;  %v2490_v13 = vpop.f32.mrf.mxu1 }
 0x113   :  { %v1040_v14 = vadd.f32 %v2418_v58, %v1039_v10  ;;  %981 = vst [vmem:[%s2867_s7 + $0xd0] sm:$0xff] %v2466_v11  ;;  %991 = vst [vmem:[%s2867_s7 + $0x120] sm:$0xff] %v2490_v13 }
 0x114   :  { %v2479_v12 = vpop.f32.mrf.mxu0  ;;  %v2503_v18 = vpop.f32.mrf.mxu1 }
 0x115   :  { %979 = vst [vmem:[%s2867_s7 + $0xc0] sm:$0xff] %v2479_v12  ;;  %v1041_v4 = vadd.f32 %v2440_v1, %v1040_v14  ;;  %2887 = vst [vmem:[#allocation3_spill] sm:$0xff] %v2503_v18 }
 0x116   :  { %v2492_v28 = vpop.f32.mrf.mxu0  ;;  %994 = vst [vmem:[%s2867_s7 + $0x138] sm:$0xff] %v2503_v18  ;;  %v2516_v20 = vpop.f32.mrf.mxu1 }
 0x117   :  { %v1042_v16 = vadd.f32 %v1041_v4, %v2479_v12  ;;  %982 = vst [vmem:[%s2867_s7 + $0xd8] sm:$0xff] %v2492_v28  ;;  %992 = vst [vmem:[%s2867_s7 + $0x128] sm:$0xff] %v2516_v20 }
 0x118   :  { %v2505_v62 = vpop.f32.mrf.mxu0  ;;  %v2529_v25 = vpop.f32.mrf.mxu1 }
 0x119   :  { %980 = vst [vmem:[%s2867_s7 + $0xc8] sm:$0xff] %v2505_v62  ;;  %v1043_v8 = vadd.f32 %v1042_v16, %v2505_v62  ;;  %2888 = vst [vmem:[#allocation4_spill] sm:$0xff] %v2529_v25 }
 0x11a   :  { %v2518_v34 = vpop.f32.mrf.mxu0  ;;  %997 = vst [vmem:[%s2867_s7 + $0x150] sm:$0xff] %v2529_v25  ;;  %v2542_v49 = vpop.f32.mrf.mxu1 }
 0x11b   :  { %v1044_v23 = vadd.f32 %v2466_v11, %v1043_v8  ;;  %985 = vst [vmem:[%s2867_s7 + $0xf0] sm:$0xff] %v2518_v34  ;;  %2889 = vst [vmem:[#allocation5_spill] sm:$0xff] %v2542_v49 }
 0x11c   :  { %v2531_v27 = vpop.f32.mrf.mxu0  ;;  %995 = vst [vmem:[%s2867_s7 + $0x140] sm:$0xff] %v2542_v49  ;;  %v2555_v37 = vpop.f32.mrf.mxu1 }
 0x11d   :  { %983 = vst [vmem:[%s2867_s7 + $0xe0] sm:$0xff] %v2531_v27  ;;  %v1045_v31 = vadd.f32 %v2492_v28, %v1044_v23  ;;  %2890 = vst [vmem:[#allocation6_spill] sm:$0xff] %v2555_v37 }
 0x11e   :  { %v2544_v33 = vpop.f32.mrf.mxu0  ;;  %998 = vst [vmem:[%s2867_s7 + $0x158] sm:$0xff] %v2555_v37  ;;  %v2568_v42 = vpop.f32.mrf.mxu1 }
 0x11f   :  { %v1046_v36 = vadd.f32 %v1045_v31, %v2531_v27  ;;  %986 = vst [vmem:[%s2867_s7 + $0xf8] sm:$0xff] %v2544_v33  ;;  %2891 = vst [vmem:[#allocation7_spill] sm:$0xff] %v2568_v42 }
 0x120   :  { %v2557_v22 = vpop.f32.mrf.mxu0  ;;  %996 = vst [vmem:[%s2867_s7 + $0x148] sm:$0xff] %v2568_v42  ;;  %v2575_v46 = vpop.f32.mrf.mxu1 }
 0x121   :  { %984 = vst [vmem:[%s2867_s7 + $0xe8] sm:$0xff] %v2557_v22  ;;  %v1047_v41 = vadd.f32 %v1046_v36, %v2557_v22  ;;  %2892 = vst [vmem:[#allocation8_spill] sm:$0xff] %v2575_v46 }
 0x122   :  { %1001 = vst [vmem:[%s2867_s7 + $0x170] sm:$0xff] %v2575_v46  ;;  %v2582_v43 = vpop.f32.mrf.mxu1 }
 0x123   :  { %v1048_v44 = vadd.f32 %v2518_v34, %v1047_v41  ;;  %2893 = vst [vmem:[#allocation9_spill] sm:$0xff] %v2582_v43  ;;  %999 = vst [vmem:[%s2867_s7 + $0x160] sm:$0xff] %v2582_v43 }
 0x124   :  { %v2589_v54 = vpop.f32.mrf.mxu1 }
 0x125   :  { %v1049_v48 = vadd.f32 %v2544_v33, %v1048_v44  ;;  %2894 = vst [vmem:[#allocation10_spill] sm:$0xff] %v2589_v54  ;;  %1002 = vst [vmem:[%s2867_s7 + $0x178] sm:$0xff] %v2589_v54 }
 0x126   :  { %v2596_v39 = vpop.f32.mrf.mxu1 }
 0x127   :  { %v1050_v45 = vadd.f32 %v1049_v48, %v2438_v0  ;;  %2895 = vst [vmem:[#allocation11_spill] sm:$0xff] %v2596_v39  ;;  %1000 = vst [vmem:[%s2867_s7 + $0x168] sm:$0xff] %v2596_v39 }
 0x128   :  { %v2603_v63 = vpop.f32.mrf.mxu1 }
 0x129   :  { %v1051_v24 = vadd.f32 %v1050_v45, %v2464_v9  ;;  %2896 = vst [vmem:[#allocation12_spill] sm:$0xff] %v2603_v63  ;;  %1005 = vst [vmem:[%s2867_s7 + $0x190] sm:$0xff] %v2603_v63 }
 0x12a   :  { %v2610_v10 = vpop.f32.mrf.mxu1 }
 0x12b   :  { %v1052_v59 = vadd.f32 %v2425_v60, %v1051_v24  ;;  %2897 = vst [vmem:[#allocation13_spill] sm:$0xff] %v2610_v10  ;;  %1003 = vst [vmem:[%s2867_s7 + $0x180] sm:$0xff] %v2610_v10 }
 0x12c   :  { %v2617_v4 = vpop.f32.mrf.mxu1 }
 0x12d   :  { %v1053_v2 = vadd.f32 %v2451_v3, %v1052_v59  ;;  %2898 = vst [vmem:[#allocation14_spill] sm:$0xff] %v2617_v4  ;;  %1006 = vst [vmem:[%s2867_s7 + $0x198] sm:$0xff] %v2617_v4 }
 0x12e   :  { %v2624_v8 = vpop.f32.mrf.mxu1 }
 0x12f   :  { %v1054_v14 = vadd.f32 %v1053_v2, %v2490_v13  ;;  %2899 = vst [vmem:[#allocation15_spill] sm:$0xff] %v2624_v8  ;;  %1004 = vst [vmem:[%s2867_s7 + $0x188] sm:$0xff] %v2624_v8 }
 0x130   :  { %v2631_v31 = vpop.f32.mrf.mxu1 }
 0x131   :  { %v1055_v16 = vadd.f32 %v1054_v14, %v2516_v20  ;;  %1009 = vst [vmem:[%s2867_s7 + $0x1b0] sm:$0xff] %v2631_v31 }
 0x132   :  { %v2638_v41 = vpop.f32.mrf.mxu1 }
 0x133   :  { %v1056_v23 = vadd.f32 %v2477_v15, %v1055_v16  ;;  %2900 = vst [vmem:[#allocation16_spill] sm:$0xff] %v2638_v41  ;;  %1007 = vst [vmem:[%s2867_s7 + $0x1a0] sm:$0xff] %v2638_v41 }
 0x134   :  { %v2645_v48 = vpop.f32.mrf.mxu1 }
 0x135   :  { %v1057_v36 = vadd.f32 %v2503_v18, %v1056_v23  ;;  %1010 = vst [vmem:[%s2867_s7 + $0x1b8] sm:$0xff] %v2645_v48 }
 0x136   :  { %v2652_v24 = vpop.f32.mrf.mxu1 }
 0x137   :  { %v1058_v44 = vadd.f32 %v1057_v36, %v2542_v49  ;;  %2901 = vst [vmem:[#allocation17_spill] sm:$0xff] %v2652_v24  ;;  %1008 = vst [vmem:[%s2867_s7 + $0x1a8] sm:$0xff] %v2652_v24 }
 0x138   :  { %v2659_v2 = vpop.f32.mrf.mxu1 }
 0x139   :  { %v1059_v45 = vadd.f32 %v1058_v44, %v2568_v42  ;;  %1013 = vst [vmem:[%s2867_s7 + $0x1d0] sm:$0xff] %v2659_v2 }
 0x13a   :  { %v2666_v16 = vpop.f32.mrf.mxu1 }
 0x13b   :  { %v1060_v59 = vadd.f32 %v2529_v25, %v1059_v45  ;;  %1011 = vst [vmem:[%s2867_s7 + $0x1c0] sm:$0xff] %v2666_v16 }
 0x13c   :  { %v2673_v36 = vpop.f32.mrf.mxu1 }
 0x13d   :  { %v1061_v14 = vadd.f32 %v2555_v37, %v1060_v59  ;;  %1014 = vst [vmem:[%s2867_s7 + $0x1d8] sm:$0xff] %v2673_v36 }
 0x13e   :  { %v2680_v45 = vpop.f32.mrf.mxu1 }
 0x13f   :  { %v1062_v23 = vadd.f32 %v1061_v14, %v2582_v43  ;;  %1012 = vst [vmem:[%s2867_s7 + $0x1c8] sm:$0xff] %v2680_v45 }
 0x140   :  { %v1431_v37 = vpop.f32.mrf.mxu1 }
 0x141   :  { %v1063_v44 = vadd.f32 %v1062_v23, %v2596_v39  ;;  %1017 = vst [vmem:[%s2867_s7 + $0x1f0] sm:$0xff] %v1431_v37 }
 0x142   :  { %v940_v43 = vpop.f32.mrf.mxu1 }
 0x143   :  { %v1064_v59 = vadd.f32 %v2575_v46, %v1063_v44  ;;  %1015 = vst [vmem:[%s2867_s7 + $0x1e0] sm:$0xff] %v940_v43 }
 0x144   :  { %v1432_v39 = vpop.f32.mrf.mxu1 }
 0x145   :  { %v1065_v14 = vadd.f32 %v2589_v54, %v1064_v59  ;;  %1018 = vst [vmem:[%s2867_s7 + $0x1f8] sm:$0xff] %v1432_v39 }
 0x146   :  { %v943_v46 = vpop.f32.mrf.mxu1 }
 0x147   :  { %v1066_v23 = vadd.f32 %v1065_v14, %v2610_v10  ;;  %1016 = vst [vmem:[%s2867_s7 + $0x1e8] sm:$0xff] %v943_v46 }
 0x149   :  { %v1067_v44 = vadd.f32 %v1066_v23, %v2624_v8 }
 0x14b   :  { %v1068_v59 = vadd.f32 %v2603_v63, %v1067_v44 }
 0x14d   :  { %v1069_v54 = vadd.f32 %v2617_v4, %v1068_v59 }
 0x14f   :  { %v1070_v25 = vadd.f32 %v1069_v54, %v2638_v41 }
 0x151   :  { %v1071_v14 = vadd.f32 %v1070_v25, %v2652_v24 }
 0x153   :  { %v1072_v10 = vadd.f32 %v2631_v31, %v1071_v14 }
 0x155   :  { %v1073_v42 = vadd.f32 %v2645_v48, %v1072_v10 }
 0x157   :  { %v1074_v49 = vadd.f32 %v1073_v42, %v2666_v16 }
 0x159   :  { %v1075_v23 = vadd.f32 %v1074_v49, %v2680_v45 }
 0x15b   :  { %v1076_v8 = vadd.f32 %v2659_v2, %v1075_v23 }
 0x15d   :  { %v1077_v18 = vadd.f32 %v2673_v36, %v1076_v8 }
 0x15f   :  { %v1078_v15 = vadd.f32 %v1077_v18, %v940_v43 }
 0x161   :  { %v1079_v44 = vadd.f32 %v1078_v15, %v943_v46 }
 0x163   :  { %v1080_v63 = vadd.f32 %v1431_v37, %v1079_v44 }
 0x165   :  { %v1081_v59 = vadd.f32 %v1432_v39, %v1080_v63 }
 0x167   :  { %v1082_v4 = vrot.slane %v1081_v59, 4 }
 0x169   :  { %v1083_v54 = vadd.f32 %v1082_v4, %v1081_v59 }
 0x16b   :  { %v1084_v41 = vrot.slane %v1083_v54, 2 }
 0x16d   :  { %v1085_v25 = vadd.f32 %v1084_v41, %v1083_v54 }
 0x16f   :  { %v1086_v24 = vrot.slane %v1085_v25, 1 }
 0x171   :  { %v1087_v14 = vadd.f32 %v1086_v24, %v1085_v25 }
 0x173   :  { %1287 = vst [vmem:[%s2868_s8] sm:$0x1] %v1087_v14  ;;  %v2715_v42 = vmul.f32 0.001953125, %v1087_v14 }
 0x175   :  { %v2718_v49 = vsub.f32 %v940_v43, %v2715_v42  ;;  %v2721_v18 = vsub.f32 %v943_v46, %v2715_v42  ;;  %v2724_v15 = vsub.f32 %v1431_v37, %v2715_v42  ;;  %v2727_v63 = vsub.f32 %v1432_v39, %v2715_v42 }
 0x176   :  { %v1090_v10 = vsub.f32 %v2286_v52, %v2715_v42  ;;  %v1091_v4 = vsub.f32 %v2298_v26, %v2715_v42  ;;  %v1092_v8 = vsub.f32 %v2280_v6, %v2715_v42  ;;  %v1093_v46 = vsub.f32 %v2292_v19, %v2715_v42 }
 0x177   :  { %v1094_v37 = vsub.f32 %v2313_v5, %v2715_v42  ;;  %v1095_v23 = vsub.f32 %v2327_v35, %v2715_v42  ;;  %v1096_v26 = vsub.f32 %v2306_v29, %v2715_v42  ;;  %v1097_v54 = vsub.f32 %v2320_v32, %v2715_v42 }
 0x178   :  { %v1154_v43 = vmul.f32 %v1090_v10, %v1090_v10  ;;  %v1155_v41 = vmul.f32 %v1091_v4, %v1091_v4  ;;  %v1156_v24 = vmul.f32 %v1092_v8, %v1092_v8  ;;  %v1157_v52 = vmul.f32 %v1093_v46, %v1093_v46 }
 0x179   :  { %v1158_v59 = vmul.f32 %v1094_v37, %v1094_v37  ;;  %v1159_v25 = vmul.f32 %v1095_v23, %v1095_v23  ;;  %v1098_v5 = vsub.f32 %v2341_v38, %v2715_v42  ;;  %v1160_v14 = vmul.f32 %v1096_v26, %v1096_v26 }
 0x17a   :  { %v1218_v39 = vadd.f32 %v1155_v41, %v1154_v43  ;;  %v1099_v35 = vsub.f32 %v2355_v55, %v2715_v42  ;;  %v1161_v4 = vmul.f32 %v1097_v54, %v1097_v54  ;;  %v1100_v29 = vsub.f32 %v2334_v21, %v2715_v42 }
 0x17b   :  { %v1162_v43 = vmul.f32 %v1098_v5, %v1098_v5  ;;  %v1101_v32 = vsub.f32 %v2348_v40, %v2715_v42  ;;  %v1102_v38 = vsub.f32 %v2369_v17, %v2715_v42  ;;  %v1103_v55 = vsub.f32 %v2383_v50, %v2715_v42 }
 0x17c   :  { %v1219_v44 = vadd.f32 %v1218_v39, %v1156_v24  ;;  %v1163_v46 = vmul.f32 %v1099_v35, %v1099_v35  ;;  %v1164_v24 = vmul.f32 %v1100_v29, %v1100_v29  ;;  %v1104_v21 = vsub.f32 %v2362_v30, %v2715_v42 }
 0x17d   :  { %v1165_v23 = vmul.f32 %v1101_v32, %v1101_v32  ;;  %v1105_v40 = vsub.f32 %v2376_v47, %v2715_v42  ;;  %v1106_v17 = vsub.f32 %v2397_v53, %v2715_v42  ;;  %v1107_v50 = vsub.f32 %v2411_v57, %v2715_v42 }
 0x17e   :  { %v1220_v6 = vadd.f32 %v1219_v44, %v1157_v52  ;;  %v1166_v44 = vmul.f32 %v1102_v38, %v1102_v38  ;;  %v1168_v54 = vmul.f32 %v1104_v21, %v1104_v21  ;;  %v1108_v30 = vsub.f32 %v2390_v51, %v2715_v42 }
 0x17f   :  { %v1109_v47 = vsub.f32 %v2404_v56, %v2715_v42  ;;  %v1171_v35 = vmul.f32 %v1107_v50, %v1107_v50  ;;  %v1110_v53 = vsub.f32 %v2427_v61, %v2715_v42  ;;  %v1111_v57 = vsub.f32 %v2453_v7, %v2715_v42 }
 0x180   :  { %v1221_v19 = vadd.f32 %v1220_v6, %v1158_v59  ;;  %v1167_v59 = vmul.f32 %v1103_v55, %v1103_v55  ;;  %v1112_v51 = vsub.f32 %v2418_v58, %v2715_v42  ;;  %v1113_v56 = vsub.f32 %v2440_v1, %v2715_v42 }
 0x181   :  { %v1174_v32 = vmul.f32 %v1110_v53, %v1110_v53  ;;  %v1114_v61 = vsub.f32 %v2479_v12, %v2715_v42  ;;  %v1115_v7 = vsub.f32 %v2505_v62, %v2715_v42  ;;  %v1116_v58 = vsub.f32 %v2466_v11, %v2715_v42 }
 0x182   :  { %v1222_v10 = vadd.f32 %v1221_v19, %v1159_v25  ;;  %v1169_v19 = vmul.f32 %v1105_v40, %v1105_v40  ;;  %v1177_v55 = vmul.f32 %v1113_v56, %v1113_v56  ;;  %v1117_v1 = vsub.f32 %v2492_v28, %v2715_v42 }
 0x183   :  { %v1118_v12 = vsub.f32 %v2531_v27, %v2715_v42  ;;  %v1180_v40 = vmul.f32 %v1116_v58, %v1116_v58  ;;  %v1119_v62 = vsub.f32 %v2557_v22, %v2715_v42  ;;  %v1120_v11 = vsub.f32 %v2518_v34, %v2715_v42 }
 0x184   :  { %v1223_v8 = vadd.f32 %v1222_v10, %v1160_v14  ;;  %v1170_v14 = vmul.f32 %v1106_v17, %v1106_v17  ;;  %v1121_v28 = vsub.f32 %v2544_v33, %v2715_v42  ;;  %v1122_v27 = vsub.f32 %v2438_v0, %v2715_v42 }
 0x185   :  { %v1183_v50 = vmul.f32 %v1119_v62, %v1119_v62  ;;  %v1123_v22 = vsub.f32 %v2464_v9, %v2715_v42  ;;  %v1124_v34 = vsub.f32 %v2425_v60, %v2715_v42  ;;  %v1125_v33 = vsub.f32 %v2451_v3, %v2715_v42 }
 0x186   :  { %v1224_v41 = vadd.f32 %v1223_v8, %v1161_v4  ;;  %v1172_v8 = vmul.f32 %v1108_v30, %v1108_v30  ;;  %v1126_v0 = vsub.f32 %v2490_v13, %v2715_v42  ;;  %v1127_v9 = vsub.f32 %v2516_v20, %v2715_v42 }
 0x188   :  { %v1225_v37 = vadd.f32 %v1224_v41, %v1162_v43  ;;  %v1173_v43 = vmul.f32 %v1109_v47, %v1109_v47  ;;  %v1186_v47 = vmul.f32 %v1122_v27, %v1122_v27  ;;  %v1191_v56 = vmul.f32 %v1127_v9, %v1127_v9 }
 0x18a   :  { %v1226_v39 = vadd.f32 %v1225_v37, %v1163_v46  ;;  %v1175_v37 = vmul.f32 %v1111_v57, %v1111_v57  ;;  %v1189_v57 = vmul.f32 %v1125_v33, %v1125_v33  ;;  %v2913_v33 = vld [vmem:[#allocation15_spill] sm:$0xff] }
 0x18c   :  { %v1227_v52 = vadd.f32 %v1226_v39, %v1164_v24  ;;  %v1176_v24 = vmul.f32 %v1112_v51, %v1112_v51  ;;  %v1190_v51 = vmul.f32 %v1126_v0, %v1126_v0 }
 0x18e   :  { %v1228_v26 = vadd.f32 %v1227_v52, %v1165_v23  ;;  %v1178_v52 = vmul.f32 %v1114_v61, %v1114_v61 }
 0x190   :  { %v1229_v6 = vadd.f32 %v1228_v26, %v1166_v44  ;;  %v1179_v44 = vmul.f32 %v1115_v7, %v1115_v7 }
 0x192   :  { %v1230_v25 = vadd.f32 %v1229_v6, %v1167_v59  ;;  %v1181_v6 = vmul.f32 %v1117_v1, %v1117_v1  ;;  %v2907_v1 = vld [vmem:[#allocation6_spill] sm:$0xff] }
 0x194   :  { %v1231_v5 = vadd.f32 %v1230_v25, %v1168_v54  ;;  %v1182_v54 = vmul.f32 %v1118_v12, %v1118_v12 }
 0x196   :  { %v1232_v10 = vadd.f32 %v1231_v5, %v1169_v19  ;;  %v1184_v5 = vmul.f32 %v1120_v11, %v1120_v11 }
 0x198   :  { %v1233_v4 = vadd.f32 %v1232_v10, %v1170_v14  ;;  %v1185_v14 = vmul.f32 %v1121_v28, %v1121_v28  ;;  %v2910_v28 = vld [vmem:[#allocation8_spill] sm:$0xff] }
 0x19a   :  { %v1234_v29 = vadd.f32 %v1233_v4, %v1171_v35  ;;  %v1187_v4 = vmul.f32 %v1123_v22, %v1123_v22 }
 0x19c   :  { %v1235_v41 = vadd.f32 %v1234_v29, %v1172_v8  ;;  %v1188_v8 = vmul.f32 %v1124_v34, %v1124_v34 }
 0x19e   :  { %v1236_v46 = vadd.f32 %v1235_v41, %v1173_v43  ;;  %v2902_v41 = vld [vmem:[#allocation2_spill] sm:$0xff] }
 0x19f   :  { %v1128_v60 = vsub.f32 %v2902_v41, %v2715_v42 }
 0x1a0   :  { %v1237_v38 = vadd.f32 %v1236_v46, %v1174_v32  ;;  %v2903_v46 = vld [vmem:[#allocation3_spill] sm:$0xff] }
 0x1a1   :  { %v1129_v3 = vsub.f32 %v2903_v46, %v2715_v42  ;;  %v1192_v61 = vmul.f32 %v1128_v60, %v1128_v60 }
 0x1a2   :  { %v1238_v39 = vadd.f32 %v1237_v38, %v1175_v37  ;;  %v2904_v38 = vld [vmem:[#allocation5_spill] sm:$0xff] }
 0x1a3   :  { %v1130_v13 = vsub.f32 %v2904_v38, %v2715_v42  ;;  %v1193_v7 = vmul.f32 %v1129_v3, %v1129_v3 }
 0x1a4   :  { %v1239_v23 = vadd.f32 %v1238_v39, %v1176_v24  ;;  %v2905_v39 = vld [vmem:[#allocation7_spill] sm:$0xff] }
 0x1a5   :  { %v1131_v20 = vsub.f32 %v2905_v39, %v2715_v42 }
 0x1a6   :  { %v1240_v21 = vadd.f32 %v1239_v23, %v1177_v55  ;;  %v2906_v23 = vld [vmem:[#allocation4_spill] sm:$0xff] }
 0x1a7   :  { %v1132_v58 = vsub.f32 %v2906_v23, %v2715_v42 }
 0x1a8   :  { %v1241_v26 = vadd.f32 %v1240_v21, %v1178_v52  ;;  %v1194_v52 = vmul.f32 %v1130_v13, %v1130_v13 }
 0x1a9   :  { %v1196_v62 = vmul.f32 %v1132_v58, %v1132_v58  ;;  %v1146_v58 = vsub.f32 %v2666_v16, %v2715_v42 }
 0x1aa   :  { %v1242_v59 = vadd.f32 %v1241_v26, %v1179_v44  ;;  %v1133_v44 = vsub.f32 %v2907_v1, %v2715_v42  ;;  %v1195_v26 = vmul.f32 %v1131_v20, %v1131_v20  ;;  %v1147_v1 = vsub.f32 %v2680_v45, %v2715_v42 }
 0x1ac   :  { %v1243_v17 = vadd.f32 %v1242_v59, %v1180_v40  ;;  %v2908_v40 = vld [vmem:[#allocation9_spill] sm:$0xff] }
 0x1ad   :  { %v1134_v59 = vsub.f32 %v2908_v40, %v2715_v42 }
 0x1ae   :  { %v1244_v25 = vadd.f32 %v1243_v17, %v1181_v6  ;;  %v2909_v17 = vld [vmem:[#allocation11_spill] sm:$0xff] }
 0x1af   :  { %v1135_v11 = vsub.f32 %v2909_v17, %v2715_v42 }
 0x1b0   :  { %v1245_v19 = vadd.f32 %v1244_v25, %v1182_v54  ;;  %v1197_v54 = vmul.f32 %v1133_v44, %v1133_v44 }
 0x1b1   :  { %v1199_v22 = vmul.f32 %v1135_v11, %v1135_v11 }
 0x1b2   :  { %v1246_v30 = vadd.f32 %v1245_v19, %v1183_v50  ;;  %v1136_v50 = vsub.f32 %v2910_v28, %v2715_v42  ;;  %v1198_v19 = vmul.f32 %v1134_v59, %v1134_v59  ;;  %v1211_v59 = vmul.f32 %v1147_v1, %v1147_v1 }
 0x1b4   :  { %v1247_v10 = vadd.f32 %v1246_v30, %v1184_v5  ;;  %v2911_v5 = vld [vmem:[#allocation10_spill] sm:$0xff] }
 0x1b5   :  { %v1137_v30 = vsub.f32 %v2911_v5, %v2715_v42 }
 0x1b6   :  { %v1248_v35 = vadd.f32 %v1247_v10, %v1185_v14  ;;  %v2912_v10 = vld [vmem:[#allocation13_spill] sm:$0xff] }
 0x1b7   :  { %v1138_v34 = vsub.f32 %v2912_v10, %v2715_v42 }
 0x1b8   :  { %v1249_v53 = vadd.f32 %v1248_v35, %v1186_v47  ;;  %v1200_v47 = vmul.f32 %v1136_v50, %v1136_v50 }
 0x1b9   :  { %v1202_v9 = vmul.f32 %v1138_v34, %v1138_v34 }
 0x1ba   :  { %v1250_v29 = vadd.f32 %v1249_v53, %v1187_v4  ;;  %v1139_v4 = vsub.f32 %v2913_v33, %v2715_v42  ;;  %v1201_v53 = vmul.f32 %v1137_v30, %v1137_v30 }
 0x1bc   :  { %v1251_v43 = vadd.f32 %v1250_v29, %v1188_v8  ;;  %v2914_v8 = vld [vmem:[#allocation12_spill] sm:$0xff]  ;;  %v1203_v60 = vmul.f32 %v1139_v4, %v1139_v4 }
 0x1bd   :  { %v1140_v29 = vsub.f32 %v2914_v8, %v2715_v42 }
 0x1be   :  { %v1252_v32 = vadd.f32 %v1251_v43, %v1189_v57  ;;  %v2915_v43 = vld [vmem:[#allocation14_spill] sm:$0xff] }
 0x1bf   :  { %v1141_v41 = vsub.f32 %v2915_v43, %v2715_v42  ;;  %v1204_v3 = vmul.f32 %v1140_v29, %v1140_v29 }
 0x1c0   :  { %v1253_v37 = vadd.f32 %v1252_v32, %v1190_v51  ;;  %v2916_v32 = vld [vmem:[#allocation16_spill] sm:$0xff] }
 0x1c1   :  { %v1142_v46 = vsub.f32 %v2916_v32, %v2715_v42  ;;  %v1205_v13 = vmul.f32 %v1141_v41, %v1141_v41 }
 0x1c2   :  { %v1254_v24 = vadd.f32 %v1253_v37, %v1191_v56  ;;  %v2917_v37 = vld [vmem:[#allocation17_spill] sm:$0xff] }
 0x1c3   :  { %v1143_v38 = vsub.f32 %v2917_v37, %v2715_v42  ;;  %v1206_v39 = vmul.f32 %v1142_v46, %v1142_v46 }
 0x1c4   :  { %v1255_v55 = vadd.f32 %v1254_v24, %v1192_v61  ;;  %v1144_v24 = vsub.f32 %v2631_v31, %v2715_v42  ;;  %v1148_v31 = vsub.f32 %v2659_v2, %v2715_v42  ;;  %v1216_v2 = vmul.f32 %v2724_v15, %v2724_v15 }
 0x1c6   :  { %v1256_v21 = vadd.f32 %v1255_v55, %v1193_v7  ;;  %v1145_v7 = vsub.f32 %v2645_v48, %v2715_v42  ;;  %v1207_v55 = vmul.f32 %v1143_v38, %v1143_v38  ;;  %v1149_v48 = vsub.f32 %v2673_v36, %v2715_v42 }
 0x1c7   :  { %v1217_v36 = vmul.f32 %v2727_v63, %v2727_v63 }
 0x1c8   :  { %v1257_v12 = vadd.f32 %v1256_v21, %v1194_v52  ;;  %v1208_v52 = vmul.f32 %v1144_v24, %v1144_v24  ;;  %v1209_v44 = vmul.f32 %v1145_v7, %v1145_v7  ;;  %v1213_v16 = vmul.f32 %v1149_v48, %v1149_v48 }
 0x1ca   :  { %v1258_v6 = vadd.f32 %v1257_v12, %v1195_v26  ;;  %v1210_v12 = vmul.f32 %v1146_v58, %v1146_v58 }
 0x1cc   :  { %v1259_v25 = vadd.f32 %v1258_v6, %v1196_v62  ;;  %v1212_v6 = vmul.f32 %v1148_v31, %v1148_v31 }
 0x1ce   :  { %v1260_v27 = vadd.f32 %v1259_v25, %v1197_v54  ;;  %v1214_v54 = vmul.f32 %v2718_v49, %v2718_v49  ;;  %v1215_v25 = vmul.f32 %v2721_v18, %v2721_v18 }
 0x1d0   :  { %v1261_v14 = vadd.f32 %v1260_v27, %v1198_v19 }
 0x1d2   :  { %v1262_v35 = vadd.f32 %v1261_v14, %v1199_v22 }
 0x1d4   :  { %v1263_v0 = vadd.f32 %v1262_v35, %v1200_v47 }
 0x1d6   :  { %v1264_v57 = vadd.f32 %v1263_v0, %v1201_v53 }
 0x1d8   :  { %v1265_v51 = vadd.f32 %v1264_v57, %v1202_v9 }
 0x1da   :  { %v1266_v56 = vadd.f32 %v1265_v51, %v1203_v60 }
 0x1dc   :  { %v1267_v61 = vadd.f32 %v1266_v56, %v1204_v3 }
 0x1de   :  { %v1268_v20 = vadd.f32 %v1267_v61, %v1205_v13 }
 0x1e0   :  { %v1269_v23 = vadd.f32 %v1268_v20, %v1206_v39 }
 0x1e2   :  { %v1270_v21 = vadd.f32 %v1269_v23, %v1207_v55 }
 0x1e4   :  { %v1271_v26 = vadd.f32 %v1270_v21, %v1208_v52 }
 0x1e6   :  { %v1272_v40 = vadd.f32 %v1271_v26, %v1209_v44 }
 0x1e8   :  { %v1273_v62 = vadd.f32 %v1272_v40, %v1210_v12 }
 0x1ea   :  { %v1274_v17 = vadd.f32 %v1273_v62, %v1211_v59 }
 0x1ec   :  { %v1275_v11 = vadd.f32 %v1274_v17, %v1212_v6 }
 0x1ee   :  { %v1276_v45 = vadd.f32 %v1275_v11, %v1213_v16 }
 0x1f0   :  { %v1277_v28 = vadd.f32 %v1276_v45, %v1214_v54 }
 0x1f2   :  { %v1278_v50 = vadd.f32 %v1277_v28, %v1215_v25 }
 0x1f4   :  { %v1279_v42 = vadd.f32 %v1278_v50, %v1216_v2 }
 0x1f6   :  { %v1280_v19 = vadd.f32 %v1279_v42, %v1217_v36 }
 0x1f8   :  { %v1281_v27 = vrot.slane %v1280_v19, 4 }
 0x1fa   :  { %v1282_v5 = vadd.f32 %v1281_v27, %v1280_v19 }
 0x1fc   :  { %v1283_v30 = vrot.slane %v1282_v5, 2 }
 0x1fe   :  { %v1284_v22 = vadd.f32 %v1283_v30, %v1282_v5 }
 0x200   :  { %v1285_v14 = vrot.slane %v1284_v22, 1 }
 0x202   :  { %v1286_v49 = vadd.f32 %v1285_v14, %v1284_v22 }
 0x204   :  { %1288 = vst [vmem:[%s2869_s9] sm:$0x1] %v1286_v49 }

// kernel: res_block.5
= control target key start
LH: loop header
LB: loop body
LE: loop exit
PB: predicated region body
PF: predicated region fallthrough
CT: control target
= control target key end

     0   :  { %s5363_s13 = smov 0   ;;  %s7422_s0 = inlined_call_operand.vmem [shape: f32[2,18,18,128], index: 0, kind: input, shape index: {}]   ;;  %s7423_s1 = inlined_call_operand.vmem [shape: f32[1,128], index: 1, kind: input, shape index: {}]   ;;  %s7424_s2 = inlined_call_operand.vmem [shape: f32[1,128], index: 2, kind: input, shape index: {}]   ;;  %s7425_s3 = inlined_call_operand.vmem [shape: bf16[3,3,128,128], index: 3, kind: input, shape index: {}]   ;;  %s7426_s4 = inlined_call_operand.vmem [shape: bf16[128,128], index: 4, kind: input, shape index: {}]   ;;  %s7427_s5 = inlined_call_operand.vmem [shape: f32[2,256,128], index: 5, kind: output, shape index: {0}]   ;;  %s7428_s6 = inlined_call_operand.vmem [shape: f32[2,256,128], index: 6, kind: output, shape index: {1}]   ;;  %s7429_s7 = inlined_call_operand.vmem [shape: f32[2,1,128], index: 7, kind: output, shape index: {2}]   ;;  %s7430_s8 = inlined_call_operand.vmem [shape: f32[2,1,128], index: 8, kind: output, shape index: {3}]   ;;  %s7431_s9 = inlined_call_operand.vmem [shape: f32[2,1,128], index: 9, kind: output, shape index: {4}]   ;;  %s7432_s10 = inlined_call_operand.vmem [shape: f32[2,1,128], index: 10, kind: output, shape index: {5}]  }
   0x1 LB: > { %s4121_s14 = sadd.s32 4294967295, %s5303_s13   ;;  %p4125_p0 = scmp.ge.s32.totalorder %s5303_s13, 1  ;;  %s5303_s13 = sphi %s5363_s13, %s21_s13  }
   0x2   : > { %p323_p1 = scmp.lt.s32.totalorder %s5303_s13, 3 }
   0x4   : > { %p324_p2 = pnand %p4125_p0, %p323_p1 }
   0x6   : > { %327 = sbr.rel (%p324_p2) target bundleno = 666 (0x29a), region = 40 }
   0xb   : > { %v5215_v0 = vld [vmem:[%s7425_s3 + $0xf8] sm:$0xff]   ;;  %p378_p3 = scmp.lt.s32.totalorder %s4121_s14, 1  ;;  %v5217_v2 = vld [vmem:[%s7425_s3 + $0xf0] sm:$0xff]   ;;  %v5219_v4 = vld [vmem:[%s7425_s3 + $0xe8] sm:$0xff]   ;;  %v7433_v6 = vmov 0.0|0.0   ;;  %v636_v9 = vlaneseq  ;;  %v5306_v32 = vmov 0  }
   0xc   : > { %v5216_v1 = vld [vmem:[%s7425_s3 + $0x38] sm:$0xff]   ;;  %4723 = vmatprep.subr.bf16.mxu0 %v5215_v0  ;;  %v5218_v3 = vld [vmem:[%s7425_s3 + $0x30] sm:$0xff]   ;;  %v5220_v5 = vld [vmem:[%s7425_s3 + $0x28] sm:$0xff]   ;;  %4787 = vmatprep.mubr.bf16.mxu1 %v7433_v6  ;;  %v5448_v33 = vrot.slane %v5306_v32, 1  ;;  %vm5307_vm1 = vmmov 1   ;;  %vm2510_vm5 = vcmask 1046528  }
   0xd   : > { %4771 = vmatprep.subr.bf16.mxu1 %v5216_v1  ;;  %4724 = vmatpush3.bf16.msra.mxu0 %v5215_v0  ;;  %s7645_s14 = smov (!%p378_p3, %s4121_s14), 1  ;;  %v5221_v7 = vld [vmem:[%s7425_s3 + $0xe0] sm:$0xff]   ;;  %v5223_v10 = vld [vmem:[%s7425_s3 + $0xd8] sm:$0xff]   ;;  %v5225_v12 = vld [vmem:[%s7425_s3 + $0xd0] sm:$0xff]   ;;  %v5413_v13 = vshrl.u32 %v636_v9, 7 }
   0xe   : > { %4772 = vmatpush3.bf16.msra.mxu1 %v5216_v1  ;;  %4725 = vmatprep.subr.bf16.mxu0 %v5217_v2  ;;  %v5222_v8 = vld [vmem:[%s7425_s3 + $0x20] sm:$0xff]   ;;  %s5203_s11 = smul.u32 432, %s7645_s14  ;;  %v5224_v11 = vld [vmem:[%s7425_s3 + $0x18] sm:$0xff]   ;;  %v5226_v17 = vld [vmem:[%s7425_s3 + $0x10] sm:$0xff]   ;;  %7476 = vst [vmem:[#allocation2_spill] sm:$0xff] %v5448_v33  ;;  %s4481_s27 = sshll.u32 %s7645_s14, 8 }
   0xf   : > { %4773 = vmatprep.subr.bf16.mxu1 %v5218_v3  ;;  %v5420_v16 = vld [vmem:[%s7423_s1] ss:$0 sm:$0xff]  ;;  %v5227_v24 = vld [vmem:[%s7425_s3 + $0xc8] sm:$0xff]   ;;  %vm640_vm0 = vcmp.ge.s32.totalorder %v5413_v13, 1  ;;  %v5483_v55 = vadd.s32 16, %v5413_v13  ;;  %v5231_v61 = vld [vmem:[%s7425_s3 + $0x1b8] sm:$0xff]   ;;  %s6824_s30 = scalar_lea.vmem %s7428_s6, %s4481_s27  ;;  %s6829_s15 = scalar_lea.vmem %s7427_s5, %s4481_s27 }
  0x10   : > { %s5408_s20 = scalar_lea.vmem %s7422_s0, %s5203_s11  ;;  %v5430_v20 = vld [vmem:[%s7424_s2] ss:$0 sm:$0xff]  ;;  %v5228_v28 = vld [vmem:[%s7425_s3 + $0x8] sm:$0xff]   ;;  %vm5458_vm2 = vmpackc.low %vm5307_vm1, %vm640_vm0  ;;  %vm1469_vm4 = vsmask.f32 7424  ;;  %s401_s18 = scalar_lea.vmem %s7431_s9, %s7645_s14 }
  0x11   : > { %4726 = vmatpush3.bf16.msra.mxu0 %v5217_v2  ;;  %v409_v14 = vld [vmem:[%s5408_s20 + $0x18] sm:$0xff]  ;;  %v410_v15 = vld [vmem:[%s5408_s20 + $0x20] sm:$0xff]  ;;  %v412_v21 = vld [vmem:[%s5408_s20 + $0x30] sm:$0xff]  ;;  %vm651_vm3 = vcmp.le.s32.totalorder %v5483_v55, 16  ;;  %s395_s22 = scalar_lea.vmem %s7429_s7, %s7645_s14  ;;  %s398_s25 = scalar_lea.vmem %s7430_s8, %s7645_s14 }
  0x12   : > { %4774 = vmatpush3.bf16.msra.mxu1 %v5218_v3  ;;  %4727 = vmatprep.subr.bf16.mxu0 %v5219_v4  ;;  %v470_v18 = vmul.f32 %v5420_v16, %v409_v14  ;;  %v471_v19 = vmul.f32 %v5420_v16, %v410_v15  ;;  %v413_v22 = vld [vmem:[%s5408_s20 + $0x38] sm:$0xff]  ;;  %v473_v23 = vmul.f32 %v5420_v16, %v412_v21  ;;  %v415_v30 = vld [vmem:[%s5408_s20 + $0x48] sm:$0xff]  ;;  %v416_v31 = vld [vmem:[%s5408_s20 + $0x50] sm:$0xff]  ;;  %s404_s27 = scalar_lea.vmem %s7432_s10, %s7645_s14 }
  0x13   : > { %4775 = vmatprep.subr.bf16.mxu1 %v5220_v5  ;;  %v474_v27 = vmul.f32 %v5420_v16, %v413_v22  ;;  %v476_v37 = vmul.f32 %v5420_v16, %v415_v30  ;;  %v418_v38 = vld [vmem:[%s5408_s20 + $0x60] sm:$0xff]  ;;  %v419_v39 = vld [vmem:[%s5408_s20 + $0x68] sm:$0xff]  ;;  %v477_v42 = vmul.f32 %v5420_v16, %v416_v31  ;;  %v421_v53 = vld [vmem:[%s5408_s20 + $0x78] sm:$0xff] }
  0x14   : > { %v531_v25 = vadd.f32 %v5430_v20, %v470_v18  ;;  %v532_v26 = vadd.f32 %v5430_v20, %v471_v19  ;;  %v534_v29 = vadd.f32 %v5430_v20, %v473_v23  ;;  %v479_v43 = vmul.f32 %v5420_v16, %v418_v38  ;;  %v5229_v49 = vld [vmem:[%s7425_s3 + $0xc0] sm:$0xff]   ;;  %v424_v63 = vld [vmem:[%s5408_s20 + $0x90] sm:$0xff]  ;;  %v431_v14 = vld [vmem:[%s5408_s20 + $0xc8] sm:$0xff] }
  0x15   : > { %4728 = vmatpush3.bf16.msra.mxu0 %v5219_v4  ;;  %v5451_v36 = vadd.f32 %v5430_v20, %v474_v27  ;;  %v480_v44 = vmul.f32 %v5420_v16, %v419_v39  ;;  %v537_v48 = vadd.f32 %v5430_v20, %v476_v37  ;;  %v538_v51 = vadd.f32 %v5430_v20, %v477_v42  ;;  %v422_v54 = vld [vmem:[%s5408_s20 + $0x80] sm:$0xff]  ;;  %v425_v4 = vld [vmem:[%s5408_s20 + $0x98] sm:$0xff]  ;;  %v5233_v27 = vld [vmem:[%s7425_s3 + $0x1b0] sm:$0xff]  }
  0x16   : > { %4776 = vmatpush3.bf16.msra.mxu1 %v5220_v5  ;;  %4729 = vmatprep.subr.bf16.mxu0 %v5221_v7  ;;  %v585_v34 = vmax.f32 %v531_v25, 0.0  ;;  %v586_v35 = vmax.f32 %v532_v26, 0.0  ;;  %v588_v41 = vmax.f32 %v534_v29, 0.0  ;;  %v5478_v52 = vadd.f32 %v5430_v20, %v479_v43  ;;  %v5230_v56 = vld [vmem:[%s7425_s3] sm:$0xff]   ;;  %v427_v5 = vld [vmem:[%s5408_s20 + $0xa8] sm:$0xff]  ;;  %v5234_v43 = vld [vmem:[%s7425_s3 + $0x70] sm:$0xff]  }
  0x17   : > { %4777 = vmatprep.subr.bf16.mxu1 %v5222_v8  ;;  %v589_v47 = vmax.f32 %v5451_v36, 0.0  ;;  %v591_v57 = vmax.f32 %v537_v48, 0.0  ;;  %v5492_v58 = vadd.f32 %v5430_v20, %v480_v44  ;;  %v592_v62 = vmax.f32 %v538_v51, 0.0  ;;  %v433_v36 = vld [vmem:[%s5408_s20 + $0xd8] sm:$0xff]  ;;  %v434_v42 = vld [vmem:[%s5408_s20 + $0xe0] sm:$0xff]  ;;  %v5561_v48 = vld [vmem:[%s7425_s3 + $0x1a8] sm:$0xff]  }
  0x18   : > { %v673_v45 = vsel %vm640_vm0, %v585_v34, 0.0  ;;  %v5467_v46 = vpack.c.bf16 %v586_v35, %v585_v34  ;;  %v676_v60 = vsel %vm640_vm0, %v588_v41, 0.0  ;;  %v482_v2 = vmul.f32 %v5420_v16, %v421_v53  ;;  %v5246_v13 = vld [vmem:[%s7425_s3 + $0x40] sm:$0xff]   ;;  %v5265_v40 = vld [vmem:[%s7425_s3 + $0xb0] sm:$0xff]  }
  0x19   : > { %4730 = vmatpush3.bf16.msra.mxu0 %v5221_v7  ;;  %v5474_v50 = vpack.c.bf16 %v586_v35, %v673_v45  ;;  %v5501_v0 = vpack.c.bf16 %v589_v47, %v588_v41  ;;  %v679_v1 = vsel %vm640_vm0, %v591_v57, 0.0  ;;  %v483_v3 = vmul.f32 %v5420_v16, %v422_v54 }
  0x1a   : > { %4778 = vmatpush3.bf16.msra.mxu1 %v5222_v8  ;;  %4731 = vmatprep.subr.bf16.mxu0 %v5223_v10  ;;  %v5510_v8 = vpack.c.bf16 %v592_v62, %v679_v1  ;;  %v594_v9 = vmax.f32 %v5478_v52, 0.0  ;;  %v5522_v18 = vpack.c.bf16 %v592_v62, %v591_v57  ;;  %v543_v19 = vadd.f32 %v5430_v20, %v482_v2  ;;  %v5571_v52 = vld [vmem:[%s7425_s3 + $0x68] sm:$0xff]   ;;  %v436_v57 = vld [vmem:[%s5408_s20 + $0xf0] sm:$0xff] }
  0x1b   : > { %4779 = vmatprep.subr.bf16.mxu1 %v5224_v11  ;;  %7479 = vst [vmem:[#allocation3_spill] sm:$0xff] %v5474_v50  ;;  %4739 = vmatprep.mubr.msk.bf16.mxu0 %vm5458_vm2, %v5467_v46  ;;  %v1485_v59 = vshll.u32 %v5474_v50, 16  ;;  %v1483_v7 = vshrl.u32 %v5474_v50, 16  ;;  %v544_v21 = vadd.f32 %v5430_v20, %v483_v3  ;;  %v485_v22 = vmul.f32 %v5420_v16, %v424_v63  ;;  %v439_v62 = vld [vmem:[%s5408_s20 + $0x108] sm:$0xff] }
  0x1c   : > { %v486_v23 = vmul.f32 %v5420_v16, %v425_v4  ;;  %v682_v26 = vsel %vm640_vm0, %v594_v9, 0.0  ;;  %v492_v30 = vmul.f32 %v5420_v16, %v431_v14  ;;  %v5541_v37 = vpack.c.bf16 %v589_v47, %v676_v60  ;;  %v440_v4 = vld [vmem:[%s5408_s20 + $0x110] sm:$0xff]  ;;  %v443_v14 = vld [vmem:[%s5408_s20 + $0x128] sm:$0xff] }
  0x1d   : > { %4732 = vmatpush3.bf16.msra.mxu0 %v5223_v10  ;;  %v595_v10 = vmax.f32 %v5492_v58, 0.0  ;;  %v5517_v15 = vrot.slane %v1485_v59, 1  ;;  %v598_v31 = vmax.f32 %v544_v21, 0.0  ;;  %v546_v32 = vadd.f32 %v5430_v20, %v485_v22  ;;  %v435_v50 = vld [vmem:[%s5408_s20 + $0xe8] sm:$0x3] }
  0x1e   : > { %4780 = vmatpush3.bf16.msra.mxu1 %v5224_v11  ;;  %4733 = vmatprep.subr.bf16.mxu0 %v5225_v12  ;;  %v428_v11 = vld [vmem:[%s5408_s20 + $0xb0] sm:$0xff]  ;;  %v547_v34 = vadd.f32 %v5430_v20, %v486_v23  ;;  %7480 = vst [vmem:[#allocation4_spill] sm:$0xff] %v5541_v37  ;;  %v5574_v54 = vadd.f32 %v5430_v20, %v492_v30 }
  0x1f   : > { %4781 = vmatprep.subr.bf16.mxu1 %v5226_v17  ;;  %v489_v25 = vmul.f32 %v5420_v16, %v428_v11  ;;  %v600_v45 = vmax.f32 %v546_v32, 0.0  ;;  %v5566_v51 = vpack.c.bf16 %v595_v10, %v682_v26  ;;  %v495_v60 = vmul.f32 %v5420_v16, %v434_v42 }
  0x20   : > { %v601_v47 = vmax.f32 %v547_v34, 0.0  ;;  %v497_v11 = vmul.f32 %v5420_v16, %v436_v57  ;;  %v500_v22 = vmul.f32 %v5420_v16, %v439_v62  ;;  %v501_v26 = vmul.f32 %v5420_v16, %v440_v4  ;;  %v445_v34 = vld [vmem:[%s5408_s20 + $0x138] sm:$0xff] }
  0x21   : > { %4734 = vmatpush3.bf16.msra.mxu0 %v5225_v12  ;;  %v430_v12 = vld [vmem:[%s5408_s20 + $0xc0] sm:$0xff]  ;;  %v550_v39 = vadd.f32 %v5430_v20, %v489_v25  ;;  %v688_v58 = vsel %vm640_vm0, %v600_v45, 0.0  ;;  %v504_v32 = vmul.f32 %v5420_v16, %v443_v14  ;;  %v5240_v62 = vld [vmem:[%s7425_s3 + $0x58] sm:$0xff]  }
  0x22   : > { %4782 = vmatpush3.bf16.msra.mxu1 %v5226_v17  ;;  %4735 = vmatprep.subr.bf16.mxu0 %v5227_v24  ;;  %v5232_v17 = vld [vmem:[%s7425_s3 + $0x78] sm:$0xff]   ;;  %v491_v29 = vmul.f32 %v5420_v16, %v430_v12  ;;  %v5595_v1 = vpack.c.bf16 %v601_v47, %v600_v45  ;;  %v442_v12 = vld [vmem:[%s5408_s20 + $0x120] sm:$0xff]  ;;  %v558_v25 = vadd.f32 %v5430_v20, %v497_v11 }
  0x23   : > { %4783 = vmatprep.subr.bf16.mxu1 %v5228_v28  ;;  %v604_v53 = vmax.f32 %v550_v39, 0.0  ;;  %v5625_v30 = vadd.f32 %v5430_v20, %v500_v22  ;;  %v5638_v39 = vadd.f32 %v5430_v20, %v501_v26  ;;  %v5239_v45 = vld [vmem:[%s7425_s3 + $0x198] sm:$0xff]  }
  0x24   : > { %v5547_v41 = vadd.f32 %v5430_v20, %v491_v29 }
  0x25   : > { %4736 = vmatpush3.bf16.msra.mxu0 %v5227_v24  ;;  %v488_v24 = vmul.f32 %v5420_v16, %v427_v5  ;;  %v5601_v5 = vpack.c.bf16 %v601_v47, %v688_v58  ;;  %v615_v47 = vmax.f32 %v5625_v30, 0.0  ;;  %v616_v57 = vmax.f32 %v5638_v39, 0.0 }
  0x26   : > { %4784 = vmatpush3.bf16.msra.mxu1 %v5228_v28  ;;  %4737 = vmatprep.subr.bf16.mxu0 %v5229_v49  ;;  %v597_v28 = vmax.f32 %v543_v19, 0.0  ;;  %v606_v3 = vmax.f32 %v5547_v41, 0.0  ;;  %v607_v19 = vmax.f32 %v5574_v54, 0.0  ;;  %v446_v41 = vld [vmem:[%s5408_s20 + $0x140] sm:$0xff]  ;;  %v449_v54 = vld [vmem:[%s5408_s20 + $0x158] sm:$0xff]  ;;  %v5666_v58 = vadd.f32 %v5430_v20, %v504_v32 }
  0x27   : > { %4785 = vmatprep.subr.bf16.mxu1 %v5230_v56  ;;  %v549_v35 = vadd.f32 %v5430_v20, %v488_v24  ;;  %v703_v4 = vsel %vm640_vm0, %v615_v47, 0.0  ;;  %v507_v11 = vmul.f32 %v5420_v16, %v446_v41  ;;  %v510_v22 = vmul.f32 %v5420_v16, %v449_v54 }
  0x28   : > { %v685_v38 = vsel %vm640_vm0, %v597_v28, 0.0  ;;  %v5593_v63 = vpack.c.bf16 %v598_v31, %v597_v28  ;;  %v5238_v28 = vld [vmem:[%s7425_s3 + $0x60] sm:$0xff]  }
  0x29   : > { %4738 = vmatpush3.bf16.msra.mxu0 %v5229_v49  ;;  %v5556_v44 = vpack.c.bf16 %v598_v31, %v685_v38  ;;  %v603_v49 = vmax.f32 %v549_v35, 0.0  ;;  %v503_v31 = vmul.f32 %v5420_v16, %v442_v12  ;;  %v694_v35 = vsel %vm640_vm0, %v606_v3, 0.0  ;;  %v452_v12 = vld [vmem:[%s5408_s20 + $0x170] sm:$0xff] }
  0x2a   : > { %4786 = vmatpush3.bf16.msra.mxu1 %v5230_v56  ;;  %4819 = vmatprep.subr.bf16.mxu0 %v5231_v61  ;;  %v494_v56 = vmul.f32 %v5420_v16, %v433_v36  ;;  %v612_v38 = vmax.f32 %v558_v25, 0.0  ;;  %v619_v25 = vmax.f32 %v5666_v58, 0.0 }
  0x2b   : > { %4867 = vmatprep.subr.bf16.mxu1 %v5232_v17  ;;  %v691_v59 = vsel %vm640_vm0, %v603_v49, 0.0 }
  0x2c   : > { %4740 = vmatmul.mubr.msk.bf16.vlgmr.msra.gmra.mxu0 %vm5458_vm2, %v5501_v0  ;;  %v5597_v2 = vpack.c.bf16 %v604_v53, %v691_v59  ;;  %v506_v59 = vmul.f32 %v5420_v16, %v445_v34 }
  0x2d   : > { %4788 = vmatmul.mubr.msk.bf16.vlgmr.msra.gmra.mxu1 %vm5458_vm2, %v5467_v46  ;;  %4820 = vmatpush3.bf16.msra.mxu0 %v5231_v61  ;;  %v5581_v46 = vpack.c.bf16 %v595_v10, %v594_v9  ;;  %v437_v61 = vld [vmem:[%s5408_s20 + $0xf8] sm:$0xff]  ;;  %v555_v9 = vadd.f32 %v5430_v20, %v494_v56  ;;  %v556_v10 = vadd.f32 %v5430_v20, %v495_v60  ;;  %v700_v56 = vsel %vm640_vm0, %v612_v38, 0.0 }
  0x2e   : > { %4868 = vmatpush3.bf16.msra.mxu1 %v5232_v17  ;;  %4743 = vmatprep.mubr.msk.bf16.mxu0 %vm5458_vm2, %v5522_v18  ;;  %v5608_v17 = vpack.c.bf16 %v604_v53, %v603_v49  ;;  %v498_v21 = vmul.f32 %v5420_v16, %v437_v61  ;;  %v5654_v49 = vadd.f32 %v5430_v20, %v503_v31  ;;  %v448_v53 = vld [vmem:[%s5408_s20 + $0x150] sm:$0xff] }
  0x2f   : > { %4791 = vmatprep.mubr.msk.bf16.mxu1 %vm5458_vm2, %v5501_v0  ;;  %4821 = vmatprep.subr.bf16.mxu0 %v5233_v27  ;;  %v609_v23 = vmax.f32 %v555_v9, 0.0  ;;  %v610_v24 = vmax.f32 %v556_v10, 0.0  ;;  %v5670_v60 = vpack.c.bf16 %v607_v19, %v694_v35  ;;  %v5672_v61 = vpack.c.bf16 %v607_v19, %v606_v3  ;;  %v451_v9 = vld [vmem:[%s5408_s20 + $0x168] sm:$0xff]  ;;  %v5241_v31 = vld [vmem:[%s7425_s3 + $0x190] sm:$0xff]  }
  0x30   : > { %4869 = vmatprep.subr.bf16.mxu1 %v5234_v43  ;;  %7481 = vst [vmem:[#allocation5_spill] sm:$0xff] %v5608_v17  ;;  %v559_v29 = vadd.f32 %v5430_v20, %v498_v21  ;;  %v618_v3 = vmax.f32 %v5654_v49, 0.0  ;;  %v567_v19 = vadd.f32 %v5430_v20, %v506_v59  ;;  %v509_v21 = vmul.f32 %v5420_v16, %v448_v53 }
  0x31   : > { %4822 = vmatpush3.bf16.msra.mxu0 %v5233_v27  ;;  %v5237_v27 = vld [vmem:[%s7425_s3 + $0x1a0] sm:$0xff]   ;;  %v697_v36 = vsel %vm640_vm0, %v609_v23, 0.0  ;;  %7483 = vst [vmem:[#allocation7_spill] sm:$0xff] %v5672_v61  ;;  %v512_v30 = vmul.f32 %v5420_v16, %v451_v9  ;;  %v513_v35 = vmul.f32 %v5420_v16, %v452_v12  ;;  %v5733_v59 = vpack.c.bf16 %v616_v57, %v615_v47  ;;  %v5244_v9 = vld [vmem:[%s7425_s3 + $0x48] sm:$0xff]  }
  0x32   : > { %4870 = vmatpush3.bf16.msra.mxu1 %v5234_v43  ;;  %4823 = vmatprep.subr.bf16.mxu0 %v5561_v48  ;;  %v5647_v42 = vpack.c.bf16 %v610_v24, %v697_v36  ;;  %v613_v43 = vmax.f32 %v559_v29, 0.0  ;;  %v706_v26 = vsel %vm640_vm0, %v618_v3, 0.0  ;;  %v568_v29 = vadd.f32 %v5430_v20, %v507_v11 }
  0x33   : > { %4871 = vmatprep.subr.bf16.mxu1 %v5571_v52  ;;  %v621_v32 = vmax.f32 %v567_v19, 0.0  ;;  %v570_v34 = vadd.f32 %v5430_v20, %v509_v21  ;;  %v574_v58 = vadd.f32 %v5430_v20, %v513_v35  ;;  %7488 = vst [vmem:[#allocation12_spill] sm:$0xff] %v5733_v59  ;;  %v5741_v19 = vpack.c.bf16 %v619_v25, %v706_v26  ;;  %v417_v26 = vld [vmem:[%s5408_s20 + $0x58] sm:$0x3] }
  0x34   : > { %4744 = vmatmul.mubr.msk.bf16.gmra.mxu0 %vm5458_vm2, %v5581_v46  ;;  %7482 = vst [vmem:[#allocation6_spill] sm:$0xff] %v5647_v42  ;;  %v5682_v10 = vpack.c.bf16 %v613_v43, %v700_v56  ;;  %v5689_v14 = vpack.c.bf16 %v613_v43, %v612_v38  ;;  %v622_v36 = vmax.f32 %v568_v29, 0.0  ;;  %v573_v38 = vadd.f32 %v5430_v20, %v512_v30  ;;  %v411_v43 = vld [vmem:[%s5408_s20 + $0x28] sm:$0x3] }
  0x35   : > { %4792 = vmatmul.mubr.msk.bf16.gmra.mxu1 %vm5458_vm2, %v5522_v18  ;;  %4747 = vmatprep.mubr.msk.bf16.mxu0 %vm5458_vm2, %v5593_v63  ;;  %v709_v49 = vsel %vm640_vm0, %v621_v32, 0.0  ;;  %v624_v53 = vmax.f32 %v570_v34, 0.0  ;;  %v5243_v56 = vld [vmem:[%s7425_s3 + $0x188] sm:$0xff]  }
  0x36   : > { %4795 = vmatprep.mubr.msk.bf16.mxu1 %vm5458_vm2, %v5581_v46  ;;  %4824 = vmatpush3.bf16.msra.mxu0 %v5561_v48  ;;  %v5674_v48 = vpack.c.bf16 %v610_v24, %v609_v23  ;;  %7485 = vst [vmem:[#allocation9_spill] sm:$0xff] %v5682_v10  ;;  %7487 = vst [vmem:[#allocation11_spill] sm:$0xff] %v5689_v14  ;;  %v454_v23 = vld [vmem:[%s5408_s20 + $0x180] sm:$0xff]  ;;  %v455_v24 = vld [vmem:[%s5408_s20 + $0x188] sm:$0xff]  ;;  %v627_v11 = vmax.f32 %v573_v38, 0.0  ;;  %v5753_v29 = vpack.c.bf16 %v622_v36, %v621_v32 }
  0x37   : > { %4872 = vmatpush3.bf16.msra.mxu1 %v5571_v52  ;;  %4825 = vmatprep.subr.bf16.mxu0 %v5237_v27  ;;  %v5684_v52 = vpack.c.bf16 %v616_v57, %v703_v4  ;;  %v515_v39 = vmul.f32 %v5420_v16, %v454_v23  ;;  %v516_v41 = vmul.f32 %v5420_v16, %v455_v24  ;;  %v712_v21 = vsel %vm640_vm0, %v624_v53, 0.0  ;;  %v414_v57 = vld [vmem:[%s5408_s20 + $0x40] sm:$0x3] }
  0x38   : > { %7484 = vst [vmem:[#allocation8_spill] sm:$0xff] %v5674_v48  ;;  %4873 = vmatprep.subr.bf16.mxu1 %v5238_v28  ;;  %v5735_v4 = vpack.c.bf16 %v622_v36, %v709_v49  ;;  %v715_v23 = vsel %vm640_vm0, %v627_v11, 0.0  ;;  %7491 = vst [vmem:[#allocation15_spill] sm:$0xff] %v5753_v29  ;;  %v475_v38 = vmul.f32 %v5420_v16, %v414_v57  ;;  %v1519_v57 = vshrl.u32 %v5566_v51, 16 }
  0x39   : > { %7486 = vst [vmem:[#allocation10_spill] sm:$0xff] %v5684_v52  ;;  %v576_v12 = vadd.f32 %v5430_v20, %v515_v39  ;;  %v577_v47 = vadd.f32 %v5430_v20, %v516_v41  ;;  %v420_v39 = vld [vmem:[%s5408_s20 + $0x70] sm:$0x3]  ;;  %v5784_v49 = vor.u32 %v5517_v15, %v1483_v7  ;;  %v1521_v15 = vshll.u32 %v5566_v51, 16 }
  0x3a   : > { %4826 = vmatpush3.bf16.msra.mxu0 %v5237_v27  ;;  %v571_v27 = vadd.f32 %v5430_v20, %v510_v22  ;;  %7489 = vst [vmem:[#allocation13_spill] sm:$0xff] %v5735_v4  ;;  %v5747_v22 = vpack.c.bf16 %v619_v25, %v618_v3  ;;  %v481_v7 = vmul.f32 %v5420_v16, %v420_v39 }
  0x3b   : > { %4874 = vmatpush3.bf16.msra.mxu1 %v5238_v28  ;;  %4827 = vmatprep.subr.bf16.mxu0 %v5239_v45  ;;  %v5242_v28 = vld [vmem:[%s7425_s3 + $0x50] sm:$0xff]   ;;  %v630_v24 = vmax.f32 %v576_v12, 0.0 }
  0x3c   : > { %4748 = vmatmul.mubr.msk.bf16.gmra.mxu0 %vm5458_vm2, %v5595_v1  ;;  %4875 = vmatprep.subr.bf16.mxu1 %v5240_v62  ;;  %v625_v54 = vmax.f32 %v571_v27, 0.0  ;;  %7490 = vst [vmem:[#allocation14_spill] sm:$0xff] %v5747_v22  ;;  %v631_v27 = vmax.f32 %v577_v47, 0.0  ;;  %v1507_v47 = vshrl.u32 %v5510_v8, 16 }
  0x3d   : > { %4796 = vmatmul.mubr.msk.bf16.gmra.mxu1 %vm5458_vm2, %v5593_v63  ;;  %4751 = vmatprep.mubr.msk.bf16.mxu0 %vm5458_vm2, %v5608_v17  ;;  %v718_v3 = vsel %vm640_vm0, %v630_v24, 0.0 }
  0x3e   : > { %4799 = vmatprep.mubr.msk.bf16.mxu1 %vm5458_vm2, %v5595_v1  ;;  %4828 = vmatpush3.bf16.msra.mxu0 %v5239_v45  ;;  %v628_v45 = vmax.f32 %v574_v58, 0.0  ;;  %v5755_v30 = vpack.c.bf16 %v625_v54, %v624_v53  ;;  %v5759_v35 = vpack.c.bf16 %v625_v54, %v712_v21  ;;  %v5768_v36 = vpack.c.bf16 %v631_v27, %v718_v3  ;;  %v423_v58 = vld [vmem:[%s5408_s20 + $0x88] sm:$0x3] }
  0x3f   : > { %4876 = vmatpush3.bf16.msra.mxu1 %v5240_v62  ;;  %4829 = vmatprep.subr.bf16.mxu0 %v5241_v31  ;;  %v472_v62 = vmul.f32 %v5420_v16, %v411_v43  ;;  %v478_v43 = vmul.f32 %v5420_v16, %v417_v26  ;;  %v536_v53 = vadd.f32 %v5430_v20, %v475_v38  ;;  %v1509_v54 = vshll.u32 %v5510_v8, 16  ;;  %v426_v38 = vld [vmem:[%s5408_s20 + $0xa0] sm:$0x3] }
  0x40   : > { %4877 = vmatprep.subr.bf16.mxu1 %v5242_v28  ;;  %7492 = vst [vmem:[#allocation16_spill] sm:$0xff] %v5755_v30  ;;  %v5757_v34 = vpack.c.bf16 %v628_v45, %v715_v23  ;;  %v5766_v32 = vpack.c.bf16 %v628_v45, %v627_v11  ;;  %v1497_v11 = vshll.u32 %v5541_v37, 16 }
  0x41   : > { %v533_v25 = vadd.f32 %v5430_v20, %v472_v62  ;;  %v539_v12 = vadd.f32 %v5430_v20, %v478_v43  ;;  %v590_v45 = vmax.f32 %v536_v53, 0.0  ;;  %v5811_v62 = vld [vmem:[%s7425_s3 + $0x138] sm:$0xff]   ;;  %v1511_v3 = vrot.slane %v1509_v54, 1 }
  0x42   : > { %4830 = vmatpush3.bf16.msra.mxu0 %v5241_v31  ;;  %7493 = vst [vmem:[#allocation17_spill] sm:$0xff] %v5766_v32  ;;  %v5245_v31 = vld [vmem:[%s7425_s3 + $0x180] sm:$0xff]   ;;  %v1523_v43 = vrot.slane %v1521_v15, 1  ;;  %v1533_v15 = vshll.u32 %v5556_v44, 16 }
  0x43   : > { %4878 = vmatpush3.bf16.msra.mxu1 %v5242_v28  ;;  %4831 = vmatprep.subr.bf16.mxu0 %v5243_v56  ;;  %v587_v28 = vmax.f32 %v533_v25, 0.0  ;;  %v593_v26 = vmax.f32 %v539_v12, 0.0  ;;  %v542_v25 = vadd.f32 %v5430_v20, %v481_v7  ;;  %v678_v39 = vsel %vm651_vm3, %v590_v45, 0.0 }
  0x44   : > { %4752 = vmatmul.mubr.msk.bf16.gmra.mxu0 %vm5458_vm2, %v5672_v61  ;;  %4879 = vmatprep.subr.bf16.mxu1 %v5244_v9  ;;  %v5830_v7 = vrot.slane %v1497_v11, 1 }
  0x45   : > { %4800 = vmatmul.mubr.msk.bf16.gmra.mxu1 %vm5458_vm2, %v5608_v17  ;;  %4755 = vmatprep.mubr.msk.bf16.mxu0 %vm5458_vm2, %v5674_v48  ;;  %v675_v21 = vsel %vm651_vm3, %v587_v28, 0.0  ;;  %v484_v28 = vmul.f32 %v5420_v16, %v423_v58  ;;  %v681_v54 = vsel %vm651_vm3, %v593_v26, 0.0  ;;  %v596_v12 = vmax.f32 %v542_v25, 0.0 }
  0x46   : > { %4803 = vmatprep.mubr.msk.bf16.mxu1 %vm5458_vm2, %v5672_v61  ;;  %4832 = vmatpush3.bf16.msra.mxu0 %v5243_v56  ;;  %v5806_v23 = vpack.c.bf16 %v675_v21, %v675_v21  ;;  %v5816_v56 = vld [vmem:[%s7425_s3 + $0x1f8] sm:$0xff]   ;;  %v5826_v21 = vpack.c.bf16 %v678_v39, %v678_v39  ;;  %v1512_v58 = vor.u32 %v1511_v3, %v1507_v47  ;;  %v1531_v39 = vshrl.u32 %v5556_v44, 16 }
  0x47   : > { %4880 = vmatpush3.bf16.msra.mxu1 %v5244_v9  ;;  %4833 = vmatprep.subr.bf16.mxu0 %v5245_v31  ;;  %v5820_v9 = vpack.c.bf16 %v631_v27, %v630_v24  ;;  %v5832_v24 = vpack.c.bf16 %v681_v54, %v681_v54  ;;  %v545_v27 = vadd.f32 %v5430_v20, %v484_v28  ;;  %v684_v45 = vsel %vm651_vm3, %v596_v12, 0.0 }
  0x48   : > { %7494 = vst [vmem:[#allocation18_spill] sm:$0xff] %v5806_v23  ;;  %4881 = vmatprep.subr.bf16.mxu1 %v5246_v13  ;;  %v1490_v53 = vshll.u32 %v5806_v23, 16  ;;  %7496 = vst [vmem:[#allocation20_spill] sm:$0xff] %v5826_v21  ;;  %v487_v26 = vmul.f32 %v5420_v16, %v426_v38  ;;  %v1535_v47 = vrot.slane %v1533_v15, 1  ;;  %v1502_v38 = vshll.u32 %v5826_v21, 16 }
  0x49   : > { %7495 = vst [vmem:[#allocation19_spill] sm:$0xff] %v5820_v9  ;;  %v1514_v11 = vshll.u32 %v5832_v24, 16  ;;  %v599_v25 = vmax.f32 %v545_v27, 0.0  ;;  %v1524_v28 = vor.u32 %v1523_v43, %v1519_v57  ;;  %v1545_v57 = vshll.u32 %v5601_v5, 16  ;;  %v432_v43 = vld [vmem:[%s5408_s20 + $0xd0] sm:$0x3] }
  0x4a   : > { %4834 = vmatpush3.bf16.msra.mxu0 %v5245_v31  ;;  %v429_v31 = vld [vmem:[%s5408_s20 + $0xb8] sm:$0x3]  ;;  %v5855_v3 = vrot.slane %v1490_v53, 1  ;;  %v548_v54 = vadd.f32 %v5430_v20, %v487_v26  ;;  %v1536_v6 = vor.u32 %v1535_v47, %v1531_v39  ;;  %v1555_v23 = vshrl.u32 %v5597_v2, 16 }
  0x4b   : > { %4882 = vmatpush3.bf16.msra.mxu1 %v5246_v13  ;;  %4915 = vmatprep.subr.bf16.mxu0 %v5811_v62  ;;  %v5847_v13 = vpack.c.bf16 %v684_v45, %v684_v45  ;;  %v1516_v12 = vrot.slane %v1514_v11, 1  ;;  %v687_v15 = vsel %vm651_vm3, %v599_v25, 0.0  ;;  %v1543_v45 = vshrl.u32 %v5601_v5, 16 }
  0x4c   : > { %4756 = vmatmul.mubr.msk.bf16.gmra.mxu0 %vm5458_vm2, %v5689_v14  ;;  %4963 = vmatprep.subr.bf16.mxu1 %v5816_v56  ;;  %v5866_v53 = vpack.c.bf16 %v687_v15, %v687_v15  ;;  %v602_v41 = vmax.f32 %v548_v54, 0.0  ;;  %v490_v11 = vmul.f32 %v5420_v16, %v429_v31  ;;  %v1547_v39 = vrot.slane %v1545_v57, 1 }
  0x4d   : > { %4804 = vmatmul.mubr.msk.bf16.gmra.mxu1 %vm5458_vm2, %v5674_v48  ;;  %4759 = vmatprep.mubr.msk.bf16.mxu0 %vm5458_vm2, %v5733_v59  ;;  %v1526_v27 = vshll.u32 %v5847_v13, 16  ;;  %v5871_v26 = vsel %vm1469_vm4, %v1512_v58, %v1516_v12  ;;  %v1557_v47 = vshll.u32 %v5597_v2, 16  ;;  %v493_v31 = vmul.f32 %v5420_v16, %v432_v43  ;;  %v438_v12 = vld [vmem:[%s5408_s20 + $0x100] sm:$0x3] }
  0x4e   : > { %4807 = vmatprep.mubr.msk.bf16.mxu1 %vm5458_vm2, %v5689_v14  ;;  %v1538_v25 = vshll.u32 %v5866_v53, 16  ;;  %v690_v15 = vsel %vm651_vm3, %v602_v41, 0.0  ;;  %v551_v58 = vadd.f32 %v5430_v20, %v490_v11  ;;  %v1548_v48 = vor.u32 %v1547_v39, %v1543_v45 }
  0x4f   : > { %v1528_v21 = vrot.slane %v1526_v27, 1  ;;  %v5883_v14 = vpack.c.bf16 %v690_v15, %v690_v15  ;;  %v1559_v61 = vrot.slane %v1557_v47, 1  ;;  %v1567_v17 = vshrl.u32 %v5670_v60, 16  ;;  %v441_v15 = vld [vmem:[%s5408_s20 + $0x118] sm:$0x3] }
  0x50   : > { %v1540_v27 = vrot.slane %v1538_v25, 1  ;;  %v1569_v57 = vshll.u32 %v5670_v60, 16  ;;  %v5901_v45 = vrot.slane %v1502_v38, 1  ;;  %v496_v25 = vmul.f32 %v5420_v16, %v435_v50 }
  0x51   : > { %v5881_v54 = vsel %vm1469_vm4, %v1524_v28, %v1528_v21  ;;  %v1550_v41 = vshll.u32 %v5883_v14, 16  ;;  %v605_v21 = vmax.f32 %v551_v58, 0.0  ;;  %v554_v28 = vadd.f32 %v5430_v20, %v493_v31 }
  0x52   : > { %v5904_v43 = vsel %vm1469_vm4, %v1536_v6, %v1540_v27  ;;  %v1560_v11 = vor.u32 %v1559_v61, %v1555_v23  ;;  %v1571_v31 = vrot.slane %v1569_v57, 1  ;;  %v557_v6 = vadd.f32 %v5430_v20, %v496_v25 }
  0x53   : > { %v1552_v39 = vrot.slane %v1550_v41, 1  ;;  %v693_v47 = vsel %vm651_vm3, %v605_v21, 0.0  ;;  %v608_v58 = vmax.f32 %v554_v28, 0.0  ;;  %v1581_v61 = vshll.u32 %v5647_v42, 16  ;;  %v444_v21 = vld [vmem:[%s5408_s20 + $0x130] sm:$0x3] }
  0x54   : > { %4760 = vmatmul.mubr.msk.bf16.gmra.mxu0 %vm5458_vm2, %v5747_v22  ;;  %v5913_v38 = vpack.c.bf16 %v693_v47, %v693_v47  ;;  %v499_v23 = vmul.f32 %v5420_v16, %v438_v12  ;;  %v1572_v41 = vor.u32 %v1571_v31, %v1567_v17  ;;  %v611_v47 = vmax.f32 %v557_v6, 0.0 }
  0x55   : > { %4808 = vmatmul.mubr.msk.bf16.gmra.mxu1 %vm5458_vm2, %v5733_v59  ;;  %4763 = vmatprep.mubr.msk.bf16.mxu0 %vm5458_vm2, %v5753_v29  ;;  %v5919_v50 = vsel %vm1469_vm4, %v1548_v48, %v1552_v39  ;;  %v696_v27 = vsel %vm651_vm3, %v608_v58, 0.0  ;;  %v1591_v25 = vshrl.u32 %v5682_v10, 16  ;;  %v1583_v59 = vrot.slane %v1581_v61, 1 }
  0x56   : > { %4811 = vmatprep.mubr.msk.bf16.mxu1 %vm5458_vm2, %v5747_v22  ;;  %v1579_v22 = vshrl.u32 %v5647_v42, 16  ;;  %v1562_v28 = vshll.u32 %v5913_v38, 16  ;;  %v5926_v57 = vpack.c.bf16 %v696_v27, %v696_v27  ;;  %v560_v12 = vadd.f32 %v5430_v20, %v499_v23 }
  0x57   : > { %v1593_v48 = vshll.u32 %v5682_v10, 16  ;;  %v502_v39 = vmul.f32 %v5420_v16, %v441_v15  ;;  %v699_v31 = vsel %vm651_vm3, %v611_v47, 0.0  ;;  %v1603_v27 = vshrl.u32 %v5684_v52, 16 }
  0x58   : > { %v1564_v58 = vrot.slane %v1562_v28, 1  ;;  %v1574_v17 = vshll.u32 %v5926_v57, 16  ;;  %v5939_v6 = vpack.c.bf16 %v699_v31, %v699_v31  ;;  %v614_v61 = vmax.f32 %v560_v12, 0.0 }
  0x59   : > { %v1595_v23 = vrot.slane %v1593_v48, 1  ;;  %v563_v10 = vadd.f32 %v5430_v20, %v502_v39  ;;  %v1605_v47 = vshll.u32 %v5684_v52, 16  ;;  %v505_v12 = vmul.f32 %v5420_v16, %v444_v21  ;;  %v447_v48 = vld [vmem:[%s5408_s20 + $0x148] sm:$0x3]  ;;  %v450_v21 = vld [vmem:[%s5408_s20 + $0x160] sm:$0x3] }
  0x5a   : > { %7497 = vst [vmem:[#allocation21_spill] sm:$0xff] %v5939_v6  ;;  %v5949_v15 = vsel %vm1469_vm4, %v1560_v11, %v1564_v58  ;;  %v1576_v28 = vrot.slane %v1574_v17, 1  ;;  %v1584_v39 = vor.u32 %v1583_v59, %v1579_v22  ;;  %v1586_v31 = vshll.u32 %v5939_v6, 16 }
  0x5b   : > { %v617_v42 = vmax.f32 %v563_v10, 0.0  ;;  %v1607_v17 = vrot.slane %v1605_v47, 1  ;;  %v566_v16 = vadd.f32 %v5430_v20, %v505_v12  ;;  %v1615_v59 = vshrl.u32 %v5741_v19, 16 }
  0x5c   : > { %4764 = vmatmul.mubr.msk.bf16.gmra.mxu0 %vm5458_vm2, %v5755_v30  ;;  %v5961_v11 = vsel %vm1469_vm4, %v1572_v41, %v1576_v28  ;;  %v1588_v52 = vrot.slane %v1586_v31, 1  ;;  %v1617_v22 = vshll.u32 %v5741_v19, 16  ;;  %v1596_v6 = vor.u32 %v1595_v23, %v1591_v25 }
  0x5d   : > { %4812 = vmatmul.mubr.msk.bf16.gmra.mxu1 %vm5458_vm2, %v5753_v29  ;;  %4767 = vmatprep.mubr.msk.bf16.mxu0 %vm5458_vm2, %v5766_v32  ;;  %v702_v29 = vsel %vm651_vm3, %v614_v61, 0.0  ;;  %v620_v41 = vmax.f32 %v566_v16, 0.0  ;;  %v1608_v20 = vor.u32 %v1607_v17, %v1603_v27  ;;  %v1629_v25 = vshll.u32 %v5735_v4, 16  ;;  %v453_v16 = vld [vmem:[%s5408_s20 + $0x178] sm:$0x3] }
  0x5e   : > { %4815 = vmatprep.mubr.msk.bf16.mxu1 %vm5458_vm2, %v5755_v30  ;;  %v5963_v58 = vpack.c.bf16 %v702_v29, %v702_v29  ;;  %v705_v30 = vsel %vm651_vm3, %v617_v42, 0.0  ;;  %v5975_v29 = vsel %vm1469_vm4, %v1584_v39, %v1588_v52  ;;  %v1619_v28 = vrot.slane %v1617_v22, 1  ;;  %v5295_v42 = vld [vmem:[%s7423_s1] ss:$0 sm:$0xff] }
  0x5f   : > { %v5972_v61 = vpack.c.bf16 %v705_v30, %v705_v30  ;;  %v508_v47 = vmul.f32 %v5295_v42, %v447_v48  ;;  %v708_v30 = vsel %vm651_vm3, %v620_v41, 0.0  ;;  %v7498_v52 = vshrl.u32 %v5541_v37, 16  ;;  %v5296_v48 = vld [vmem:[%s7424_s2] ss:$0 sm:$0xff] }
  0x60   : > { %v1598_v10 = vshll.u32 %v5963_v58, 16  ;;  %v5990_v23 = vpack.c.bf16 %v708_v30, %v708_v30  ;;  %v511_v17 = vmul.f32 %v5295_v42, %v450_v21  ;;  %v1627_v41 = vshrl.u32 %v5735_v4, 16  ;;  %v456_v30 = vld [vmem:[%s5408_s20 + $0x190] sm:$0x3] }
  0x61   : > { %v1610_v31 = vshll.u32 %v5972_v61, 16  ;;  %v1500_v27 = vor.u32 %v5830_v7, %v7498_v52  ;;  %v569_v39 = vadd.f32 %v5296_v48, %v508_v47  ;;  %v1641_v37 = vshll.u32 %v5759_v35, 16 }
  0x62   : > { %v1600_v12 = vrot.slane %v1598_v10, 1  ;;  %v1620_v10 = vor.u32 %v1619_v28, %v1615_v59  ;;  %v1622_v21 = vshll.u32 %v5990_v23, 16  ;;  %v572_v52 = vadd.f32 %v5296_v48, %v511_v17 }
  0x63   : > { %v1612_v7 = vrot.slane %v1610_v31, 1  ;;  %v623_v47 = vmax.f32 %v569_v39, 0.0  ;;  %v1653_v39 = vshll.u32 %v5757_v34, 16  ;;  %v517_v17 = vmul.f32 %v5295_v42, %v456_v30 }
  0x64   : > { %4768 = vmatmul.mubr.msk.bf16.gmra.mxu0 %vm5458_vm2, %v5820_v9  ;;  %v6003_v22 = vsel %vm1469_vm4, %v1596_v6, %v1600_v12  ;;  %v1639_v6 = vshrl.u32 %v5759_v35, 16  ;;  %v514_v12 = vmul.f32 %v5295_v42, %v453_v16  ;;  %v1624_v31 = vrot.slane %v1622_v21, 1 }
  0x65   : > { %4816 = vmatmul.mubr.msk.bf16.gmra.mxu1 %vm5458_vm2, %v5766_v32  ;;  %4835 = vmatprep.mubr.msk.bf16.mxu0 %vm5458_vm2, %v5501_v0  ;;  %v6011_v9 = vsel %vm1469_vm4, %v1608_v20, %v1612_v7  ;;  %v1631_v0 = vrot.slane %v1629_v25, 1  ;;  %v711_v59 = vsel %vm651_vm3, %v623_v47, 0.0  ;;  %v626_v28 = vmax.f32 %v572_v52, 0.0  ;;  %v5249_v7 = vld [vmem:[%s7425_s3 + $0x130] sm:$0xff]  }
  0x66   : > { %4883 = vmatprep.mubr.bf16.mxu1 %v5448_v33  ;;  %v1643_v32 = vrot.slane %v1641_v37, 1  ;;  %v6016_v33 = vpack.c.bf16 %v711_v59, %v711_v59  ;;  %v575_v4 = vadd.f32 %v5296_v48, %v514_v12  ;;  %v6022_v20 = vsel %vm1469_vm4, %v5784_v49, %v5855_v3  ;;  %v5250_v3 = vld [vmem:[%s7425_s3 + $0x1f0] sm:$0xff]  }
  0x67   : > { %v6026_v25 = vsel %vm1469_vm4, %v1500_v27, %v5901_v45  ;;  %v6029_v16 = vsel %vm1469_vm4, %v1620_v10, %v1624_v31  ;;  %v714_v37 = vsel %vm651_vm3, %v626_v28, 0.0  ;;  %v1632_v42 = vor.u32 %v1631_v0, %v1627_v41 }
  0x68   : > { %v1634_v30 = vshll.u32 %v6016_v33, 16  ;;  %v6037_v21 = vpack.c.bf16 %v714_v37, %v714_v37  ;;  %v629_v49 = vmax.f32 %v575_v4, 0.0  ;;  %v1651_v45 = vshrl.u32 %v5757_v34, 16 }
  0x69   : > { %v1655_v27 = vrot.slane %v1653_v39, 1  ;;  %v578_v10 = vadd.f32 %v5296_v48, %v517_v17  ;;  %v1939_v47 = vshll.u32 %v5768_v36, 16  ;;  %v1644_v4 = vor.u32 %v1643_v32, %v1639_v6  ;;  %v5251_v48 = vld [vmem:[%s7425_s3 + $0x128] sm:$0xff]   ;;  %v5253_v39 = vld [vmem:[%s7425_s3 + $0x120] sm:$0xff]  }
  0x6a   : > { %v1636_v41 = vrot.slane %v1634_v30, 1  ;;  %v1646_v52 = vshll.u32 %v6037_v21, 16  ;;  %v5252_v32 = vld [vmem:[%s7425_s3 + $0x1e8] sm:$0xff]   ;;  %v5254_v30 = vld [vmem:[%s7425_s3 + $0x1e0] sm:$0xff]  }
  0x6b   : > { %v1941_v12 = vrot.slane %v1939_v47, 1  ;;  %v1656_v31 = vor.u32 %v1655_v27, %v1651_v45  ;;  %v2526_v47 = vrot.slane %v5556_v44, 1  ;;  %v5258_v44 = vld [vmem:[%s7425_s3 + $0x1d0] sm:$0xff]  }
  0x6c   : > { %4836 = vmatmul.mubr.msk.bf16.vlgmr.msra.gmra.mxu0 %vm5458_vm2, %v5522_v18  ;;  %v717_v18 = vsel %vm651_vm3, %v629_v49, 0.0  ;;  %v1648_v6 = vrot.slane %v1646_v52, 1  ;;  %v2523_v49 = vrot.slane %v5566_v51, 1  ;;  %v2530_v52 = vrot.slane %v5883_v14, 1  ;;  %v7503_v14 = vld [vmem:[#allocation7_spill] sm:$0xff] }
  0x6d   : > { %4884 = vmatmul.mubr.bf16.vlgmr.msra.gmra.mxu1 %v6022_v20  ;;  %4916 = vmatpush3.bf16.msra.mxu0 %v5811_v62  ;;  %v6059_v0 = vpack.c.bf16 %v717_v18, %v717_v18  ;;  %v632_v62 = vmax.f32 %v578_v10, 0.0  ;;  %v2524_v10 = vrot.slane %v5847_v13, 1  ;;  %v5257_v18 = vld [vmem:[%s7425_s3 + $0x110] sm:$0xff]  }
  0x6e   : > { %4964 = vmatpush3.bf16.msra.mxu1 %v5816_v56  ;;  %4839 = vmatprep.mubr.msk.bf16.mxu0 %vm5458_vm2, %v5581_v46  ;;  %v6066_v56 = vsel %vm1469_vm4, %v1632_v42, %v1636_v41  ;;  %v1937_v46 = vshrl.u32 %v5768_v36, 16  ;;  %v6076_v17 = vsel %vm1469_vm4, %v1644_v4, %v1648_v6  ;;  %v2520_v42 = vrot.slane %v5510_v8, 1 }
  0x6f   : > { %4887 = vmatprep.mubr.bf16.mxu1 %v6026_v25  ;;  %4917 = vmatprep.subr.bf16.mxu0 %v5249_v7  ;;  %v1658_v59 = vshll.u32 %v6059_v0, 16  ;;  %v720_v28 = vsel %vm651_vm3, %v632_v62, 0.0  ;;  %7499 = vst [vmem:[#allocation22_spill] sm:$0xff] %v6076_v17  ;;  %v2527_v41 = vrot.slane %v5866_v53, 1  ;;  %v2529_v4 = vrot.slane %v5601_v5, 1  ;;  %v7502_v62 = vld [vmem:[#allocation5_spill] sm:$0xff] }
  0x70   : > { %4965 = vmatprep.subr.bf16.mxu1 %v5250_v3  ;;  %v6078_v37 = vpack.c.bf16 %v720_v28, %v720_v28  ;;  %v1942_v45 = vor.u32 %v1941_v12, %v1937_v46  ;;  %v5259_v53 = vld [vmem:[%s7425_s3 + $0x108] sm:$0xff]   ;;  %v2532_v6 = vrot.slane %v5597_v2, 1  ;;  %v2533_v46 = vrot.slane %v5913_v38, 1  ;;  %v5262_v2 = vld [vmem:[%s7425_s3 + $0x1c0] sm:$0xff]  }
  0x71   : > { %4918 = vmatpush3.bf16.msra.mxu0 %v5249_v7  ;;  %v1660_v55 = vrot.slane %v1658_v59, 1  ;;  %v2521_v7 = vrot.slane %v5832_v24, 1  ;;  %v6102_v24 = vsel %vm2510_vm5, %v2523_v49, %v2524_v10  ;;  %v6131_v5 = vsel %vm2510_vm5, %v2529_v4, %v2530_v52  ;;  %v5261_v59 = vld [vmem:[%s7425_s3 + $0x100] sm:$0xff]   ;;  %v7505_v38 = vld [vmem:[#allocation11_spill] sm:$0xff] }
  0x72   : > { %4966 = vmatpush3.bf16.msra.mxu1 %v5250_v3  ;;  %4919 = vmatprep.subr.bf16.mxu0 %v5251_v48  ;;  %v1944_v27 = vshll.u32 %v6078_v37, 16  ;;  %v2535_v12 = vrot.slane %v5670_v60, 1  ;;  %v6152_v28 = vsel %vm2510_vm5, %v2532_v6, %v2533_v46  ;;  %v2542_v10 = vrot.slane %v5963_v58, 1  ;;  %v7511_v58 = vld [vmem:[#allocation10_spill] sm:$0xff] }
  0x73   : > { %4967 = vmatprep.subr.bf16.mxu1 %v5252_v32  ;;  %v6092_v8 = vsel %vm1469_vm4, %v1656_v31, %v1660_v55  ;;  %v6095_v3 = vsel %vm2510_vm5, %v2520_v42, %v2521_v7  ;;  %v2536_v31 = vrot.slane %v5926_v57, 1  ;;  %v5263_v57 = vld [vmem:[%s7425_s3 + $0xb8] sm:$0xff]   ;;  %v2545_v4 = vrot.slane %v5972_v61, 1 }
  0x74   : > { %4840 = vmatmul.mubr.msk.bf16.gmra.mxu0 %vm5458_vm2, %v5593_v63  ;;  %7500 = vst [vmem:[#allocation23_spill] sm:$0xff] %v6092_v8  ;;  %v1946_v51 = vrot.slane %v1944_v27, 1  ;;  %v5255_v63 = vld [vmem:[%s7425_s3 + $0x118] sm:$0xff]   ;;  %v2547_v52 = vrot.slane %v5741_v19, 1  ;;  %v2554_v6 = vrot.slane %v6037_v21, 1  ;;  %v2835_v21 = vrot.slane %v5768_v36, 1 }
  0x75   : > { %4888 = vmatmul.mubr.bf16.gmra.mxu1 %v5871_v26  ;;  %4843 = vmatprep.mubr.msk.bf16.mxu0 %vm5458_vm2, %v5595_v1  ;;  %v5256_v1 = vld [vmem:[%s7425_s3 + $0x1d8] sm:$0xff]   ;;  %v6161_v60 = vsel %vm2510_vm5, %v2535_v12, %v2536_v31  ;;  %v5267_v36 = vld [vmem:[%s7425_s3 + $0xa8] sm:$0xff]  }
  0x76   : > { %4891 = vmatprep.mubr.bf16.mxu1 %v5881_v54  ;;  %4920 = vmatpush3.bf16.msra.mxu0 %v5251_v48  ;;  %v6109_v13 = vsel %vm1469_vm4, %v1942_v45, %v1946_v51  ;;  %v6122_v48 = vsel %vm2510_vm5, %v2526_v47, %v2527_v41  ;;  %v5264_v42 = vld [vmem:[%s7425_s3 + $0x178] sm:$0xff]   ;;  %v7510_v47 = vld [vmem:[#allocation14_spill] sm:$0xff]  ;;  %v2544_v41 = vrot.slane %v7511_v58, 1 }
  0x77   : > { %4968 = vmatpush3.bf16.msra.mxu1 %v5252_v32  ;;  %4921 = vmatprep.subr.bf16.mxu0 %v5253_v39  ;;  %7501 = vst [vmem:[#allocation24_spill] sm:$0xff] %v6109_v13  ;;  %v5260_v32 = vld [vmem:[%s7425_s3 + $0x1c8] sm:$0xff]   ;;  %v7507_v7 = vld [vmem:[#allocation21_spill] sm:$0xff] }
  0x78   : > { %4969 = vmatprep.subr.bf16.mxu1 %v5254_v30  ;;  %v2539_v49 = vrot.slane %v7507_v7, 1  ;;  %v7508_v45 = vld [vmem:[#allocation9_spill] sm:$0xff]  ;;  %v5273_v7 = vld [vmem:[%s7425_s3 + $0x90] sm:$0xff]  }
  0x79   : > { %v2541_v27 = vrot.slane %v7508_v45, 1  ;;  %v7514_v19 = vld [vmem:[#allocation13_spill] sm:$0xff]  ;;  %v5275_v45 = vld [vmem:[%s7425_s3 + $0x88] sm:$0xff]  }
  0x7a   : > { %4922 = vmatpush3.bf16.msra.mxu0 %v5253_v39  ;;  %v7504_v39 = vld [vmem:[#allocation8_spill] sm:$0xff]  ;;  %v2550_v61 = vrot.slane %v7514_v19, 1  ;;  %v7515_v12 = vld [vmem:[#allocation17_spill] sm:$0xff]  ;;  %v7521_v19 = vld [vmem:[#allocation2_spill] sm:$0xff] }
  0x7b   : > { %4970 = vmatpush3.bf16.msra.mxu1 %v5254_v30  ;;  %4923 = vmatprep.subr.bf16.mxu0 %v5255_v63  ;;  %v7506_v30 = vld [vmem:[#allocation6_spill] sm:$0xff]  ;;  %v5280_v58 = vld [vmem:[%s7426_s4 + $0x38] sm:$0xff]  }
  0x7c   : > { %4844 = vmatmul.mubr.msk.bf16.gmra.mxu0 %vm5458_vm2, %v7502_v62  ;;  %4971 = vmatprep.subr.bf16.mxu1 %v5256_v1  ;;  %v2538_v55 = vrot.slane %v7506_v30, 1  ;;  %v6197_v62 = vsel %vm2510_vm5, %v2544_v41, %v2545_v4  ;;  %v7518_v41 = vld [vmem:[#allocation3_spill] sm:$0xff] }
  0x7d   : > { %4892 = vmatmul.mubr.bf16.gmra.mxu1 %v5904_v43  ;;  %4847 = vmatprep.mubr.msk.bf16.mxu0 %vm5458_vm2, %v7503_v14  ;;  %v2514_v4 = vrot.slane %v7518_v41, 1 }
  0x7e   : > { %4895 = vmatprep.mubr.bf16.mxu1 %v5919_v50  ;;  %4924 = vmatpush3.bf16.msra.mxu0 %v5255_v63  ;;  %v6179_v51 = vsel %vm2510_vm5, %v2538_v55, %v2539_v49  ;;  %v7509_v63 = vld [vmem:[#allocation12_spill] sm:$0xff]  ;;  %v5272_v55 = vld [vmem:[%s7425_s3 + $0x158] sm:$0xff]  }
  0x7f   : > { %4972 = vmatpush3.bf16.msra.mxu1 %v5256_v1  ;;  %4925 = vmatprep.subr.bf16.mxu0 %v5257_v18  ;;  %v6185_v1 = vsel %vm2510_vm5, %v2541_v27, %v2542_v10  ;;  %v5274_v49 = vld [vmem:[%s7425_s3 + $0x150] sm:$0xff]   ;;  %v5276_v27 = vld [vmem:[%s7425_s3 + $0x148] sm:$0xff]   ;;  %v5277_v10 = vld [vmem:[%s7425_s3 + $0x80] sm:$0xff]  }
  0x80   : > { %4973 = vmatprep.subr.bf16.mxu1 %v5258_v44 }
  0x82   : > { %4926 = vmatpush3.bf16.msra.mxu0 %v5257_v18  ;;  %v2548_v18 = vrot.slane %v5990_v23, 1  ;;  %v2551_v23 = vrot.slane %v6016_v33, 1  ;;  %v2556_v33 = vrot.slane %v5757_v34, 1  ;;  %v5266_v34 = vld [vmem:[%s7425_s3 + $0x170] sm:$0xff]  }
  0x83   : > { %4974 = vmatpush3.bf16.msra.mxu1 %v5258_v44  ;;  %4927 = vmatprep.subr.bf16.mxu0 %v5259_v53  ;;  %v7512_v44 = vld [vmem:[#allocation15_spill] sm:$0xff] }
  0x84   : > { %4848 = vmatmul.mubr.msk.bf16.gmra.mxu0 %vm5458_vm2, %v7504_v39  ;;  %4975 = vmatprep.subr.bf16.mxu1 %v5260_v32  ;;  %v6203_v14 = vsel %vm2510_vm5, %v2547_v52, %v2548_v18  ;;  %v6215_v46 = vsel %vm2510_vm5, %v2550_v61, %v2551_v23  ;;  %v2836_v39 = vrot.slane %v6078_v37, 1  ;;  %v5269_v37 = vld [vmem:[%s7425_s3 + $0xa0] sm:$0xff]   ;;  %v7522_v61 = vld [vmem:[#allocation4_spill] sm:$0xff] }
  0x85   : > { %4896 = vmatmul.mubr.bf16.gmra.mxu1 %v5949_v15  ;;  %4851 = vmatprep.mubr.msk.bf16.mxu0 %vm5458_vm2, %v7505_v38  ;;  %v7517_v38 = vmov 0.0|0.0   ;;  %v7519_v52 = vld [vmem:[#allocation18_spill] sm:$0xff]  ;;  %v2517_v23 = vrot.slane %v7522_v61, 1 }
  0x86   : > { %4899 = vmatprep.mubr.bf16.mxu1 %v5961_v11  ;;  %4928 = vmatpush3.bf16.msra.mxu0 %v5259_v53  ;;  %v7513_v53 = vld [vmem:[#allocation16_spill] sm:$0xff]  ;;  %v6237_v30 = vsel %vm2510_vm5, %v2835_v21, %v2836_v39  ;;  %v2515_v18 = vrot.slane %v7519_v52, 1 }
  0x87   : > { %4976 = vmatpush3.bf16.msra.mxu1 %v5260_v32  ;;  %4929 = vmatprep.subr.bf16.mxu0 %v5261_v59  ;;  %v2553_v32 = vrot.slane %v5759_v35, 1  ;;  %v2557_v35 = vrot.slane %v6059_v0, 1  ;;  %v5268_v0 = vld [vmem:[%s7425_s3 + $0x168] sm:$0xff]  }
  0x88   : > { %4977 = vmatprep.subr.bf16.mxu1 %v5262_v2 }
  0x89   : > { %v6221_v31 = vsel %vm2510_vm5, %v2553_v32, %v2554_v6  ;;  %v7523_v32 = vld [vmem:[#allocation20_spill] sm:$0xff] }
  0x8a   : > { %4930 = vmatpush3.bf16.msra.mxu0 %v5261_v59  ;;  %v7516_v59 = vld [vmem:[#allocation19_spill] sm:$0xff]  ;;  %v2518_v6 = vrot.slane %v7523_v32, 1 }
  0x8b   : > { %4978 = vmatpush3.bf16.msra.mxu1 %v5262_v2  ;;  %5011 = vmatprep.subr.bf16.mxu0 %v5263_v57  ;;  %v6233_v2 = vsel %vm2510_vm5, %v2556_v33, %v2557_v35  ;;  %v5282_v35 = vld [vmem:[%s7426_s4 + $0x30] sm:$0xff]  }
  0x8c   : > { %4852 = vmatmul.mubr.msk.bf16.gmra.mxu0 %vm5458_vm2, %v7509_v63  ;;  %5059 = vmatprep.subr.bf16.mxu1 %v5264_v42  ;;  %v5278_v63 = vld [vmem:[%s7425_s3 + $0x140] sm:$0xff]  }
  0x8d   : > { %4900 = vmatmul.mubr.bf16.gmra.mxu1 %v5975_v29  ;;  %4855 = vmatprep.mubr.msk.bf16.mxu0 %vm5458_vm2, %v7510_v47  ;;  %v5279_v47 = vld [vmem:[%s7425_s3 + $0x238] sm:$0xff]  }
  0x8e   : > { %4903 = vmatprep.mubr.bf16.mxu1 %v6003_v22 }
  0x94   : > { %4856 = vmatmul.mubr.msk.bf16.gmra.mxu0 %vm5458_vm2, %v7512_v44  ;;  %v6321_v44 = vrot.slane %v7517_v38, 1 }
  0x95   : > { %4904 = vmatmul.mubr.bf16.gmra.mxu1 %v6011_v9  ;;  %4859 = vmatprep.mubr.msk.bf16.mxu0 %vm5458_vm2, %v7513_v53  ;;  %v2516_v53 = vsel %vm2510_vm5, %v2514_v4, %v2515_v18  ;;  %v5287_v4 = vld [vmem:[%s7425_s3 + $0x218] sm:$0xff]  }
  0x96   : > { %4907 = vmatprep.mubr.bf16.mxu1 %v6029_v16  ;;  %7520 = vst [vmem:[#allocation5_spill] sm:$0xff] %v6321_v44 }
  0x9c   : > { %4860 = vmatmul.mubr.msk.bf16.gmra.mxu0 %vm5458_vm2, %v7515_v12  ;;  %v6330_v12 = vsel %vm2510_vm5, %v2517_v23, %v2518_v6  ;;  %v5289_v6 = vld [vmem:[%s7425_s3 + $0x210] sm:$0xff]  }
  0x9d   : > { %4908 = vmatmul.mubr.bf16.gmra.mxu1 %v6066_v56  ;;  %4863 = vmatprep.mubr.msk.bf16.mxu0 %vm5458_vm2, %v7516_v59  ;;  %v5281_v59 = vld [vmem:[%s7425_s3 + $0x230] sm:$0xff]  }
  0x9e   : > { %4911 = vmatprep.mubr.bf16.mxu1 %v6076_v17 }
  0xa4   : > { %4864 = vmatmul.mubr.bf16.gmra.mxu0 %v7517_v38 }
  0xa5   : > { %4912 = vmatmul.mubr.bf16.gmra.mxu1 %v6092_v8  ;;  %4931 = vmatprep.mubr.bf16.mxu0 %v6022_v20 }
  0xa6   : > { %4979 = vmatprep.mubr.bf16.mxu1 %v6026_v25 }
  0xac   : > { %4932 = vmatmul.mubr.bf16.vlgmr.msra.gmra.mxu0 %v6026_v25 }
  0xad   : > { %4980 = vmatmul.mubr.bf16.vlgmr.msra.gmra.mxu1 %v5871_v26  ;;  %5012 = vmatpush3.bf16.msra.mxu0 %v5263_v57  ;;  %v5270_v57 = vld [vmem:[%s7425_s3 + $0x160] sm:$0xff]  }
  0xae   : > { %5060 = vmatpush3.bf16.msra.mxu1 %v5264_v42  ;;  %4935 = vmatprep.mubr.bf16.mxu0 %v5871_v26  ;;  %v5271_v42 = vld [vmem:[%s7425_s3 + $0x98] sm:$0xff]  }
  0xaf   : > { %4983 = vmatprep.mubr.bf16.mxu1 %v5881_v54  ;;  %5013 = vmatprep.subr.bf16.mxu0 %v5265_v40 }
  0xb0   : > { %5061 = vmatprep.subr.bf16.mxu1 %v5266_v34 }
  0xb1   : > { %5014 = vmatpush3.bf16.msra.mxu0 %v5265_v40  ;;  %v5283_v40 = vld [vmem:[%s7425_s3 + $0x228] sm:$0xff]  }
  0xb2   : > { %5062 = vmatpush3.bf16.msra.mxu1 %v5266_v34  ;;  %5015 = vmatprep.subr.bf16.mxu0 %v5267_v36 }
  0xb3   : > { %5063 = vmatprep.subr.bf16.mxu1 %v5268_v0 }
  0xb4   : > { %4936 = vmatmul.mubr.bf16.gmra.mxu0 %v5881_v54 }
  0xb5   : > { %4984 = vmatmul.mubr.bf16.gmra.mxu1 %v5904_v43  ;;  %4939 = vmatprep.mubr.bf16.mxu0 %v5904_v43 }
  0xb6   : > { %4987 = vmatprep.mubr.bf16.mxu1 %v5919_v50  ;;  %5016 = vmatpush3.bf16.msra.mxu0 %v5267_v36  ;;  %v5284_v36 = vld [vmem:[%s7426_s4 + $0x28] sm:$0xff]  }
  0xb7   : > { %5064 = vmatpush3.bf16.msra.mxu1 %v5268_v0  ;;  %5017 = vmatprep.subr.bf16.mxu0 %v5269_v37 }
  0xb8   : > { %5065 = vmatprep.subr.bf16.mxu1 %v5270_v57 }
  0xba   : > { %5018 = vmatpush3.bf16.msra.mxu0 %v5269_v37 }
  0xbb   : > { %5066 = vmatpush3.bf16.msra.mxu1 %v5270_v57  ;;  %5019 = vmatprep.subr.bf16.mxu0 %v5271_v42 }
  0xbc   : > { %4940 = vmatmul.mubr.bf16.gmra.mxu0 %v5919_v50  ;;  %5067 = vmatprep.subr.bf16.mxu1 %v5272_v55 }
  0xbd   : > { %4988 = vmatmul.mubr.bf16.gmra.mxu1 %v5949_v15  ;;  %4943 = vmatprep.mubr.bf16.mxu0 %v5949_v15 }
  0xbe   : > { %4991 = vmatprep.mubr.bf16.mxu1 %v5961_v11  ;;  %5020 = vmatpush3.bf16.msra.mxu0 %v5271_v42 }
  0xbf   : > { %5068 = vmatpush3.bf16.msra.mxu1 %v5272_v55  ;;  %5021 = vmatprep.subr.bf16.mxu0 %v5273_v7 }
  0xc0   : > { %5069 = vmatprep.subr.bf16.mxu1 %v5274_v49 }
  0xc2   : > { %5022 = vmatpush3.bf16.msra.mxu0 %v5273_v7 }
  0xc3   : > { %5070 = vmatpush3.bf16.msra.mxu1 %v5274_v49  ;;  %5023 = vmatprep.subr.bf16.mxu0 %v5275_v45  ;;  %v5285_v49 = vld [vmem:[%s7425_s3 + $0x220] sm:$0xff]  }
  0xc4   : > { %4944 = vmatmul.mubr.bf16.gmra.mxu0 %v5961_v11  ;;  %5071 = vmatprep.subr.bf16.mxu1 %v5276_v27 }
  0xc5   : > { %4992 = vmatmul.mubr.bf16.gmra.mxu1 %v5975_v29  ;;  %4947 = vmatprep.mubr.bf16.mxu0 %v5975_v29 }
  0xc6   : > { %4995 = vmatprep.mubr.bf16.mxu1 %v6003_v22  ;;  %5024 = vmatpush3.bf16.msra.mxu0 %v5275_v45 }
  0xc7   : > { %5072 = vmatpush3.bf16.msra.mxu1 %v5276_v27  ;;  %5025 = vmatprep.subr.bf16.mxu0 %v5277_v10 }
  0xc8   : > { %5073 = vmatprep.subr.bf16.mxu1 %v5278_v63 }
  0xca   : > { %5026 = vmatpush3.bf16.msra.mxu0 %v5277_v10  ;;  %v5286_v10 = vld [vmem:[%s7426_s4 + $0x20] sm:$0xff]  }
  0xcb   : > { %5074 = vmatpush3.bf16.msra.mxu1 %v5278_v63  ;;  %5107 = vmatprep.subr.bf16.mxu0 %v5279_v47 }
  0xcc   : > { %4948 = vmatmul.mubr.bf16.gmra.mxu0 %v6003_v22  ;;  %5155 = vmatprep.subr.bf16.mxu1 %v5280_v58 }
  0xcd   : > { %4996 = vmatmul.mubr.bf16.gmra.mxu1 %v6011_v9  ;;  %4951 = vmatprep.mubr.bf16.mxu0 %v6011_v9 }
  0xce   : > { %4999 = vmatprep.mubr.bf16.mxu1 %v6029_v16 }
  0xd4   : > { %4952 = vmatmul.mubr.bf16.gmra.mxu0 %v6029_v16 }
  0xd5   : > { %5000 = vmatmul.mubr.bf16.gmra.mxu1 %v6066_v56  ;;  %4955 = vmatprep.mubr.bf16.mxu0 %v6066_v56 }
  0xd6   : > { %5003 = vmatprep.mubr.bf16.mxu1 %v6076_v17 }
  0xdc   : > { %4956 = vmatmul.mubr.bf16.gmra.mxu0 %v6076_v17 }
  0xdd   : > { %5004 = vmatmul.mubr.bf16.gmra.mxu1 %v6092_v8  ;;  %4959 = vmatprep.mubr.bf16.mxu0 %v6092_v8 }
  0xde   : > { %5007 = vmatprep.mubr.bf16.mxu1 %v6109_v13 }
  0xe4   : > { %4960 = vmatmul.mubr.bf16.gmra.mxu0 %v6109_v13 }
  0xe5   : > { %5008 = vmatmul.mubr.bf16.gmra.mxu1 %v7521_v19  ;;  %5027 = vmatprep.mubr.bf16.mxu0 %v6321_v44 }
  0xe6   : > { %5075 = vmatprep.mubr.bf16.mxu1 %v2516_v53 }
  0xec   : > { %v4741_v33 = vpop.f32.mrf.mxu0  ;;  %5028 = vmatmul.mubr.bf16.vlgmr.msra.gmra.mxu0 %v2516_v53  ;;  %v5288_v53 = vld [vmem:[%s7426_s4 + $0x18] sm:$0xff]  }
  0xed   : > { %v4789_v21 = vpop.f32.mrf.mxu1  ;;  %5076 = vmatmul.mubr.bf16.vlgmr.msra.gmra.mxu1 %v6330_v12  ;;  %5108 = vmatpush3.bf16.msra.mxu0 %v5279_v47 }
  0xee   : > { %v6339_v39 = vadd.f32 %v4789_v21, %v4741_v33  ;;  %v875_v38 = vpop.f32.mrf.mxu0  ;;  %5156 = vmatpush3.bf16.msra.mxu1 %v5280_v58  ;;  %5031 = vmatprep.mubr.bf16.mxu0 %v6330_v12 }
  0xef   : > { %v1084_v34 = vpop.f32.mrf.mxu1  ;;  %5079 = vmatprep.mubr.bf16.mxu1 %v6095_v3  ;;  %5109 = vmatprep.subr.bf16.mxu0 %v5281_v59 }
  0xf0   : > { %v6349_v0 = vadd.f32 %v1084_v34, %v875_v38  ;;  %v4742_v37 = vpop.f32.mrf.mxu0  ;;  %5157 = vmatprep.subr.bf16.mxu1 %v5282_v35 }
  0xf1   : > { %v4790_v57 = vpop.f32.mrf.mxu1  ;;  %5110 = vmatpush3.bf16.msra.mxu0 %v5281_v59 }
  0xf2   : > { %v6351_v42 = vadd.f32 %v4790_v57, %v4742_v37  ;;  %v878_v55 = vpop.f32.mrf.mxu0  ;;  %5158 = vmatpush3.bf16.msra.mxu1 %v5282_v35  ;;  %5111 = vmatprep.subr.bf16.mxu0 %v5283_v40  ;;  %v5290_v35 = vld [vmem:[%s7426_s4 + $0x10] sm:$0xff]  }
  0xf3   : > { %v1087_v7 = vpop.f32.mrf.mxu1  ;;  %5159 = vmatprep.subr.bf16.mxu1 %v5284_v36 }
  0xf4   : > { %v6356_v45 = vadd.f32 %v1087_v7, %v878_v55  ;;  %v4745_v27 = vpop.f32.mrf.mxu0  ;;  %5032 = vmatmul.mubr.bf16.gmra.mxu0 %v6095_v3  ;;  %v5292_v55 = vld [vmem:[%s7426_s4 + $0x8] sm:$0xff]  }
  0xf5   : > { %v4793_v63 = vpop.f32.mrf.mxu1  ;;  %5080 = vmatmul.mubr.bf16.gmra.mxu1 %v6102_v24  ;;  %5035 = vmatprep.mubr.bf16.mxu0 %v6102_v24 }
  0xf6   : > { %v6364_v47 = vadd.f32 %v4793_v63, %v4745_v27  ;;  %v891_v58 = vpop.f32.mrf.mxu0  ;;  %5083 = vmatprep.mubr.bf16.mxu1 %v6122_v48  ;;  %5112 = vmatpush3.bf16.msra.mxu0 %v5283_v40  ;;  %v5293_v63 = vld [vmem:[%s7425_s3 + $0x200] sm:$0xff]  }
  0xf7   : > { %v1100_v41 = vpop.f32.mrf.mxu1  ;;  %5160 = vmatpush3.bf16.msra.mxu1 %v5284_v36  ;;  %5113 = vmatprep.subr.bf16.mxu0 %v5285_v49  ;;  %v5291_v36 = vld [vmem:[%s7425_s3 + $0x208] sm:$0xff]  }
  0xf8   : > { %v6370_v52 = vadd.f32 %v1100_v41, %v891_v58  ;;  %v4746_v18 = vpop.f32.mrf.mxu0  ;;  %5161 = vmatprep.subr.bf16.mxu1 %v5286_v10 }
  0xf9   : > { %v4794_v19 = vpop.f32.mrf.mxu1 }
  0xfa   : > { %v6375_v61 = vadd.f32 %v4794_v19, %v4746_v18  ;;  %v894_v23 = vpop.f32.mrf.mxu0  ;;  %5114 = vmatpush3.bf16.msra.mxu0 %v5285_v49 }
  0xfb   : > { %v1103_v32 = vpop.f32.mrf.mxu1  ;;  %5162 = vmatpush3.bf16.msra.mxu1 %v5286_v10  ;;  %5115 = vmatprep.subr.bf16.mxu0 %v5287_v4 }
  0xfc   : > { %v6380_v59 = vadd.f32 %v1103_v32, %v894_v23  ;;  %v4749_v33 = vpop.f32.mrf.mxu0  ;;  %5036 = vmatmul.mubr.bf16.gmra.mxu0 %v6122_v48  ;;  %5163 = vmatprep.subr.bf16.mxu1 %v5288_v53 }
  0xfd   : > { %v4797_v21 = vpop.f32.mrf.mxu1  ;;  %5084 = vmatmul.mubr.bf16.gmra.mxu1 %v6131_v5  ;;  %5039 = vmatprep.mubr.bf16.mxu0 %v6131_v5 }
  0xfe   : > { %v6388_v38 = vadd.f32 %v4797_v21, %v4749_v33  ;;  %v907_v40 = vpop.f32.mrf.mxu0  ;;  %5087 = vmatprep.mubr.bf16.mxu1 %v6152_v28  ;;  %5116 = vmatpush3.bf16.msra.mxu0 %v5287_v4  ;;  %v5294_v4 = vld [vmem:[%s7426_s4] sm:$0xff]  }
  0xff   : > { %v1116_v34 = vpop.f32.mrf.mxu1  ;;  %5164 = vmatpush3.bf16.msra.mxu1 %v5288_v53  ;;  %5117 = vmatprep.subr.bf16.mxu0 %v5289_v6 }
 0x100   : > { %v6394_v37 = vadd.f32 %v1116_v34, %v907_v40  ;;  %v4750_v57 = vpop.f32.mrf.mxu0  ;;  %5165 = vmatprep.subr.bf16.mxu1 %v5290_v35 }
 0x101   : > { %v4798_v7 = vpop.f32.mrf.mxu1 }
 0x102   : > { %v6399_v49 = vadd.f32 %v4798_v7, %v4750_v57  ;;  %v910_v27 = vpop.f32.mrf.mxu0  ;;  %5118 = vmatpush3.bf16.msra.mxu0 %v5289_v6 }
 0x103   : > { %v1119_v10 = vpop.f32.mrf.mxu1  ;;  %5166 = vmatpush3.bf16.msra.mxu1 %v5290_v35  ;;  %5119 = vmatprep.subr.bf16.mxu0 %v5291_v36 }
 0x104   : > { %v6404_v58 = vadd.f32 %v1119_v10, %v910_v27  ;;  %v4753_v41 = vpop.f32.mrf.mxu0  ;;  %5040 = vmatmul.mubr.bf16.gmra.mxu0 %v6152_v28  ;;  %5167 = vmatprep.subr.bf16.mxu1 %v5292_v55 }
 0x105   : > { %v4801_v18 = vpop.f32.mrf.mxu1  ;;  %5088 = vmatmul.mubr.bf16.gmra.mxu1 %v6161_v60  ;;  %5043 = vmatprep.mubr.bf16.mxu0 %v6161_v60 }
 0x106   : > { %v6412_v53 = vadd.f32 %v4801_v18, %v4753_v41  ;;  %v923_v19 = vpop.f32.mrf.mxu0  ;;  %5091 = vmatprep.mubr.bf16.mxu1 %v6179_v51  ;;  %5120 = vmatpush3.bf16.msra.mxu0 %v5291_v36 }
 0x107   : > { %v1132_v23 = vpop.f32.mrf.mxu1  ;;  %5168 = vmatpush3.bf16.msra.mxu1 %v5292_v55  ;;  %5121 = vmatprep.subr.bf16.mxu0 %v5293_v63 }
 0x108   : > { %v6415_v32 = vadd.f32 %v1132_v23, %v923_v19  ;;  %v4754_v6 = vpop.f32.mrf.mxu0  ;;  %5169 = vmatprep.subr.bf16.mxu1 %v5294_v4 }
 0x109   : > { %v4802_v33 = vpop.f32.mrf.mxu1 }
 0x10a   : > { %v6417_v35 = vadd.f32 %v4802_v33, %v4754_v6  ;;  %v926_v21 = vpop.f32.mrf.mxu0  ;;  %5122 = vmatpush3.bf16.msra.mxu0 %v5293_v63 }
 0x10b   : > { %v1135_v40 = vpop.f32.mrf.mxu1  ;;  %5170 = vmatpush3.bf16.msra.mxu1 %v5294_v4 }
 0x10c   : > { %v6419_v34 = vadd.f32 %v1135_v40, %v926_v21  ;;  %v4757_v57 = vpop.f32.mrf.mxu0  ;;  %5044 = vmatmul.mubr.bf16.gmra.mxu0 %v6179_v51 }
 0x10d   : > { %v4805_v36 = vpop.f32.mrf.mxu1  ;;  %5092 = vmatmul.mubr.bf16.gmra.mxu1 %v6185_v1  ;;  %5047 = vmatprep.mubr.bf16.mxu0 %v6185_v1 }
 0x10e   : > { %v6424_v55 = vadd.f32 %v4805_v36, %v4757_v57  ;;  %v939_v7 = vpop.f32.mrf.mxu0  ;;  %5095 = vmatprep.mubr.bf16.mxu1 %v6197_v62 }
 0x10f   : > { %v1148_v27 = vpop.f32.mrf.mxu1 }
 0x110   : > { %v6427_v10 = vadd.f32 %v1148_v27, %v939_v7  ;;  %v4758_v63 = vpop.f32.mrf.mxu0 }
 0x111   : > { %v4806_v41 = vpop.f32.mrf.mxu1 }
 0x112   : > { %v6429_v4 = vadd.f32 %v4806_v41, %v4758_v63  ;;  %v942_v18 = vpop.f32.mrf.mxu0 }
 0x113   : > { %v1151_v19 = vpop.f32.mrf.mxu1 }
 0x114   : > { %v6431_v23 = vadd.f32 %v1151_v19, %v942_v18  ;;  %v4761_v6 = vpop.f32.mrf.mxu0  ;;  %5048 = vmatmul.mubr.bf16.gmra.mxu0 %v6197_v62 }
 0x115   : > { %v4809_v33 = vpop.f32.mrf.mxu1  ;;  %5096 = vmatmul.mubr.bf16.gmra.mxu1 %v6203_v14  ;;  %5051 = vmatprep.mubr.bf16.mxu0 %v6203_v14 }
 0x116   : > { %v6436_v21 = vadd.f32 %v4809_v33, %v4761_v6  ;;  %v955_v40 = vpop.f32.mrf.mxu0  ;;  %5099 = vmatprep.mubr.bf16.mxu1 %v6215_v46 }
 0x117   : > { %v1164_v57 = vpop.f32.mrf.mxu1 }
 0x118   : > { %v6439_v36 = vadd.f32 %v1164_v57, %v955_v40  ;;  %v4762_v7 = vpop.f32.mrf.mxu0 }
 0x119   : > { %v4810_v27 = vpop.f32.mrf.mxu1 }
 0x11a   : > { %v6441_v63 = vadd.f32 %v4810_v27, %v4762_v7  ;;  %v958_v41 = vpop.f32.mrf.mxu0 }
 0x11b   : > { %v1167_v18 = vpop.f32.mrf.mxu1 }
 0x11c   : > { %7524 = vst [vmem:[#allocation7_spill] sm:$0xff] %v6441_v63  ;;  %v6443_v19 = vadd.f32 %v1167_v18, %v958_v41  ;;  %v4765_v13 = vpop.f32.mrf.mxu0  ;;  %5052 = vmatmul.mubr.bf16.gmra.mxu0 %v6215_v46 }
 0x11d   : > { %v4813_v44 = vpop.f32.mrf.mxu1  ;;  %5100 = vmatmul.mubr.bf16.gmra.mxu1 %v6221_v31  ;;  %5055 = vmatprep.mubr.bf16.mxu0 %v6221_v31 }
 0x11e   : > { %7525 = vst [vmem:[#allocation8_spill] sm:$0xff] %v6443_v19  ;;  %v6448_v6 = vadd.f32 %v4813_v44, %v4765_v13  ;;  %v971_v33 = vpop.f32.mrf.mxu0  ;;  %5103 = vmatprep.mubr.bf16.mxu1 %v6233_v2 }
 0x11f   : > { %v1180_v40 = vpop.f32.mrf.mxu1 }
 0x120   : > { %v6451_v57 = vadd.f32 %v1180_v40, %v971_v33  ;;  %v4766_v7 = vpop.f32.mrf.mxu0 }
 0x121   : > { %v4814_v27 = vpop.f32.mrf.mxu1 }
 0x122   : > { %7526 = vst [vmem:[#allocation11_spill] sm:$0xff] %v6451_v57  ;;  %v6453_v41 = vadd.f32 %v4814_v27, %v4766_v7  ;;  %v974_v18 = vpop.f32.mrf.mxu0 }
 0x123   : > { %v1183_v8 = vpop.f32.mrf.mxu1 }
 0x124   : > { %7527 = vst [vmem:[#allocation6_spill] sm:$0xff] %v6453_v41  ;;  %v6455_v17 = vadd.f32 %v1183_v8, %v974_v18  ;;  %v4769_v19 = vpop.f32.mrf.mxu0  ;;  %5056 = vmatmul.mubr.bf16.gmra.mxu0 %v6233_v2 }
 0x125   : > { %v4817_v63 = vpop.f32.mrf.mxu1  ;;  %5104 = vmatmul.mubr.bf16.gmra.mxu1 %v6237_v30  ;;  %5123 = vmatprep.mubr.bf16.mxu0 %v6330_v12 }
 0x126   : > { %7528 = vst [vmem:[#allocation21_spill] sm:$0xff] %v6455_v17  ;;  %v6460_v13 = vadd.f32 %v4817_v63, %v4769_v19  ;;  %v987_v44 = vpop.f32.mrf.mxu0  ;;  %5171 = vmatprep.mubr.bf16.mxu1 %v6022_v20 }
 0x127   : > { %v1196_v33 = vpop.f32.mrf.mxu1 }
 0x128   : > { %v6463_v40 = vadd.f32 %v1196_v33, %v987_v44  ;;  %v4770_v7 = vpop.f32.mrf.mxu0 }
 0x129   : > { %v4818_v27 = vpop.f32.mrf.mxu1 }
 0x12a   : > { %v6465_v8 = vadd.f32 %v4818_v27, %v4770_v7  ;;  %v990_v18 = vpop.f32.mrf.mxu0 }
 0x12b   : > { %v1199_v17 = vpop.f32.mrf.mxu1 }
 0x12c   : > { %v6467_v41 = vadd.f32 %v1199_v17, %v990_v18  ;;  %v4837_v57 = vpop.f32.mrf.mxu0  ;;  %5124 = vmatmul.mubr.bf16.vlgmr.msra.gmra.mxu0 %v6095_v3 }
 0x12d   : > { %v1439_v12 = vadd.f32 %v4837_v57, %v6339_v39  ;;  %v4885_v63 = vpop.f32.mrf.mxu1  ;;  %5172 = vmatmul.mubr.bf16.vlgmr.msra.gmra.mxu1 %v6026_v25  ;;  %5127 = vmatprep.mubr.bf16.mxu0 %v6102_v24 }
 0x12e   : > { %v1310_v20 = vpop.f32.mrf.mxu0  ;;  %5175 = vmatprep.mubr.bf16.mxu1 %v5871_v26 }
 0x12f   : > { %v6474_v19 = vadd.f32 %v4885_v63, %v1439_v12  ;;  %v1437_v44 = vadd.f32 %v1310_v20, %v6349_v0  ;;  %v1777_v33 = vpop.f32.mrf.mxu1 }
 0x130   : > { %v4838_v17 = vpop.f32.mrf.mxu0 }
 0x131   : > { %v6477_v7 = vadd.f32 %v1777_v33, %v1437_v44  ;;  %v1440_v3 = vadd.f32 %v4838_v17, %v6351_v42  ;;  %v4886_v27 = vpop.f32.mrf.mxu1 }
 0x132   : > { %v1313_v39 = vpop.f32.mrf.mxu0 }
 0x133   : > { %v6480_v57 = vadd.f32 %v4886_v27, %v1440_v3  ;;  %v1438_v25 = vadd.f32 %v1313_v39, %v6356_v45  ;;  %v1780_v24 = vpop.f32.mrf.mxu1 }
 0x134   : > { %v4841_v18 = vpop.f32.mrf.mxu0  ;;  %5128 = vmatmul.mubr.bf16.gmra.mxu0 %v6122_v48 }
 0x135   : > { %v6484_v26 = vadd.f32 %v1780_v24, %v1438_v25  ;;  %v1443_v0 = vadd.f32 %v4841_v18, %v6364_v47  ;;  %v4889_v12 = vpop.f32.mrf.mxu1  ;;  %5176 = vmatmul.mubr.bf16.gmra.mxu1 %v5881_v54  ;;  %5131 = vmatprep.mubr.bf16.mxu0 %v6131_v5 }
 0x136   : > { %v1326_v42 = vpop.f32.mrf.mxu0  ;;  %5179 = vmatprep.mubr.bf16.mxu1 %v5904_v43 }
 0x137   : > { %v6490_v63 = vadd.f32 %v4889_v12, %v1443_v0  ;;  %v1441_v45 = vadd.f32 %v1326_v42, %v6370_v52  ;;  %v1793_v20 = vpop.f32.mrf.mxu1 }
 0x138   : > { %v4842_v44 = vpop.f32.mrf.mxu0 }
 0x139   : > { %v6493_v33 = vadd.f32 %v1793_v20, %v1441_v45  ;;  %v1444_v48 = vadd.f32 %v4842_v44, %v6375_v61  ;;  %v4890_v17 = vpop.f32.mrf.mxu1 }
 0x13a   : > { %v1329_v47 = vpop.f32.mrf.mxu0 }
 0x13b   : > { %v6496_v3 = vadd.f32 %v4890_v17, %v1444_v48  ;;  %v1442_v54 = vadd.f32 %v1329_v47, %v6380_v59  ;;  %v1796_v5 = vpop.f32.mrf.mxu1 }
 0x13c   : > { %v4845_v27 = vpop.f32.mrf.mxu0  ;;  %5132 = vmatmul.mubr.bf16.gmra.mxu0 %v6152_v28 }
 0x13d   : > { %v6500_v43 = vadd.f32 %v1796_v5, %v1442_v54  ;;  %v1447_v52 = vadd.f32 %v4845_v27, %v6388_v38  ;;  %v4893_v39 = vpop.f32.mrf.mxu1  ;;  %5180 = vmatmul.mubr.bf16.gmra.mxu1 %v5919_v50  ;;  %5135 = vmatprep.mubr.bf16.mxu0 %v6161_v60 }
 0x13e   : > { %v1342_v61 = vpop.f32.mrf.mxu0  ;;  %5183 = vmatprep.mubr.bf16.mxu1 %v5949_v15 }
 0x13f   : > { %v6506_v25 = vadd.f32 %v4893_v39, %v1447_v52  ;;  %v1445_v59 = vadd.f32 %v1342_v61, %v6394_v37  ;;  %v1809_v24 = vpop.f32.mrf.mxu1 }
 0x140   : > { %v4846_v18 = vpop.f32.mrf.mxu0 }
 0x141   : > { %v6509_v0 = vadd.f32 %v1809_v24, %v1445_v59  ;;  %v1448_v28 = vadd.f32 %v4846_v18, %v6399_v49  ;;  %v4894_v12 = vpop.f32.mrf.mxu1 }
 0x142   : > { %v1345_v38 = vpop.f32.mrf.mxu0 }
 0x143   : > { %v6512_v42 = vadd.f32 %v4894_v12, %v1448_v28  ;;  %v1446_v50 = vadd.f32 %v1345_v38, %v6404_v58  ;;  %v1812_v60 = vpop.f32.mrf.mxu1 }
 0x144   : > { %v4849_v45 = vpop.f32.mrf.mxu0  ;;  %5136 = vmatmul.mubr.bf16.gmra.mxu0 %v6179_v51 }
 0x145   : > { %v6516_v15 = vadd.f32 %v1812_v60, %v1446_v50  ;;  %v1451_v37 = vadd.f32 %v4849_v45, %v6412_v53  ;;  %v4897_v20 = vpop.f32.mrf.mxu1  ;;  %5184 = vmatmul.mubr.bf16.gmra.mxu1 %v5961_v11  ;;  %5139 = vmatprep.mubr.bf16.mxu0 %v6185_v1 }
 0x146   : > { %v1358_v49 = vpop.f32.mrf.mxu0  ;;  %5187 = vmatprep.mubr.bf16.mxu1 %v5975_v29 }
 0x147   : > { %v6522_v44 = vadd.f32 %v4897_v20, %v1451_v37  ;;  %v1449_v58 = vadd.f32 %v1358_v49, %v6415_v32  ;;  %v1825_v48 = vpop.f32.mrf.mxu1 }
 0x148   : > { %v4850_v17 = vpop.f32.mrf.mxu0 }
 0x149   : > { %v6525_v47 = vadd.f32 %v1825_v48, %v1449_v58  ;;  %v1452_v51 = vadd.f32 %v4850_v17, %v6417_v35  ;;  %v4898_v54 = vpop.f32.mrf.mxu1 }
 0x14a   : > { %v1361_v53 = vpop.f32.mrf.mxu0 }
 0x14b   : > { %v6528_v5 = vadd.f32 %v4898_v54, %v1452_v51  ;;  %v1450_v11 = vadd.f32 %v1361_v53, %v6419_v34  ;;  %v1828_v1 = vpop.f32.mrf.mxu1  ;;  %v7531_v54 = vld [vmem:[#allocation22_spill] sm:$0xff] }
 0x14c   : > { %v4853_v27 = vpop.f32.mrf.mxu0  ;;  %5140 = vmatmul.mubr.bf16.gmra.mxu0 %v6197_v62 }
 0x14d   : > { %v6532_v29 = vadd.f32 %v1828_v1, %v1450_v11  ;;  %v1455_v32 = vadd.f32 %v4853_v27, %v6424_v55  ;;  %v4901_v52 = vpop.f32.mrf.mxu1  ;;  %5188 = vmatmul.mubr.bf16.gmra.mxu1 %v6003_v22  ;;  %5143 = vmatprep.mubr.bf16.mxu0 %v6203_v14  ;;  %v7532_v11 = vld [vmem:[#allocation23_spill] sm:$0xff] }
 0x14e   : > { %v1374_v35 = vpop.f32.mrf.mxu0  ;;  %5191 = vmatprep.mubr.bf16.mxu1 %v6011_v9  ;;  %v7533_v27 = vld [vmem:[#allocation11_spill] sm:$0xff] }
 0x14f   : > { %v6538_v39 = vadd.f32 %v4901_v52, %v1455_v32  ;;  %v1453_v34 = vadd.f32 %v1374_v35, %v6427_v10  ;;  %v1841_v61 = vpop.f32.mrf.mxu1 }
 0x150   : > { %v4854_v59 = vpop.f32.mrf.mxu0 }
 0x151   : > { %v6541_v24 = vadd.f32 %v1841_v61, %v1453_v34  ;;  %v1456_v62 = vadd.f32 %v4854_v59, %v6429_v4  ;;  %v4902_v18 = vpop.f32.mrf.mxu1 }
 0x152   : > { %v1377_v55 = vpop.f32.mrf.mxu0 }
 0x153   : > { %v6544_v28 = vadd.f32 %v4902_v18, %v1456_v62  ;;  %v1454_v22 = vadd.f32 %v1377_v55, %v6431_v23  ;;  %v1844_v14 = vpop.f32.mrf.mxu1  ;;  %v7535_v18 = vld [vmem:[#allocation21_spill] sm:$0xff] }
 0x154   : > { %v4857_v12 = vpop.f32.mrf.mxu0  ;;  %5144 = vmatmul.mubr.bf16.gmra.mxu0 %v6215_v46  ;;  %v7529_v46 = vld [vmem:[#allocation7_spill] sm:$0xff] }
 0x155   : > { %v6548_v9 = vadd.f32 %v1844_v14, %v1454_v22  ;;  %v1459_v10 = vadd.f32 %v4857_v12, %v6436_v21  ;;  %v4905_v38 = vpop.f32.mrf.mxu1  ;;  %5192 = vmatmul.mubr.bf16.gmra.mxu1 %v6029_v16  ;;  %5147 = vmatprep.mubr.bf16.mxu0 %v6221_v31  ;;  %v7530_v16 = vld [vmem:[#allocation8_spill] sm:$0xff]  ;;  %v7536_v14 = vld [vmem:[#allocation5_spill] sm:$0xff] }
 0x156   : > { %v1390_v4 = vpop.f32.mrf.mxu0  ;;  %5195 = vmatprep.mubr.bf16.mxu1 %v6066_v56 }
 0x157   : > { %v6554_v50 = vadd.f32 %v4905_v38, %v1459_v10  ;;  %v1457_v23 = vadd.f32 %v1390_v4, %v6439_v36  ;;  %v1857_v60 = vpop.f32.mrf.mxu1  ;;  %v7537_v4 = vld [vmem:[#allocation24_spill] sm:$0xff] }
 0x158   : > { %v4858_v45 = vpop.f32.mrf.mxu0 }
 0x159   : > { %v6557_v37 = vadd.f32 %v1857_v60, %v1457_v23  ;;  %v1460_v20 = vadd.f32 %v4858_v45, %v7529_v46  ;;  %v4906_v49 = vpop.f32.mrf.mxu1 }
 0x15a   : > { %v1393_v21 = vpop.f32.mrf.mxu0 }
 0x15b   : > { %v6560_v58 = vadd.f32 %v4906_v49, %v1460_v20  ;;  %v1458_v48 = vadd.f32 %v1393_v21, %v7530_v16  ;;  %v1860_v31 = vpop.f32.mrf.mxu1 }
 0x15c   : > { %v4861_v17 = vpop.f32.mrf.mxu0  ;;  %5148 = vmatmul.mubr.bf16.gmra.mxu0 %v6233_v2  ;;  %v7534_v2 = vld [vmem:[#allocation6_spill] sm:$0xff] }
 0x15d   : > { %v6564_v56 = vadd.f32 %v1860_v31, %v1458_v48  ;;  %v1463_v36 = vadd.f32 %v4861_v17, %v6448_v6  ;;  %v4909_v51 = vpop.f32.mrf.mxu1  ;;  %5196 = vmatmul.mubr.bf16.gmra.mxu1 %v7531_v54  ;;  %5151 = vmatprep.mubr.bf16.mxu0 %v6237_v30 }
 0x15e   : > { %v1406_v53 = vpop.f32.mrf.mxu0  ;;  %5199 = vmatprep.mubr.bf16.mxu1 %v7532_v11 }
 0x15f   : > { %v6570_v1 = vadd.f32 %v4909_v51, %v1463_v36  ;;  %v1461_v32 = vadd.f32 %v1406_v53, %v7533_v27  ;;  %v1873_v52 = vpop.f32.mrf.mxu1 }
 0x160   : > { %v4862_v35 = vpop.f32.mrf.mxu0 }
 0x161   : > { %v6573_v34 = vadd.f32 %v1873_v52, %v1461_v32  ;;  %v1464_v61 = vadd.f32 %v4862_v35, %v7534_v2  ;;  %v4910_v59 = vpop.f32.mrf.mxu1 }
 0x162   : > { %v1409_v6 = vpop.f32.mrf.mxu0 }
 0x163   : > { %v6576_v62 = vadd.f32 %v4910_v59, %v1464_v61  ;;  %v1462_v55 = vadd.f32 %v1409_v6, %v7535_v18  ;;  %v1876_v30 = vpop.f32.mrf.mxu1 }
 0x164   : > { %v4865_v22 = vpop.f32.mrf.mxu0  ;;  %5152 = vmatmul.mubr.bf16.gmra.mxu0 %v7536_v14 }
 0x165   : > { %v6580_v12 = vadd.f32 %v1876_v30, %v1462_v55  ;;  %v1467_v10 = vadd.f32 %v4865_v22, %v6460_v13  ;;  %v4913_v38 = vpop.f32.mrf.mxu1  ;;  %5200 = vmatmul.mubr.bf16.gmra.mxu1 %v7537_v4 }
 0x166   : > { %v1422_v23 = vpop.f32.mrf.mxu0 }
 0x167   : > { %v6584_v60 = vadd.f32 %v4913_v38, %v1467_v10  ;;  %v1465_v45 = vadd.f32 %v1422_v23, %v6463_v40  ;;  %v1889_v46 = vpop.f32.mrf.mxu1 }
 0x168   : > { %v4866_v20 = vpop.f32.mrf.mxu0 }
 0x169   : > { %v6587_v49 = vadd.f32 %v1889_v46, %v1465_v45  ;;  %v1468_v21 = vadd.f32 %v4866_v20, %v6465_v8  ;;  %v4914_v16 = vpop.f32.mrf.mxu1 }
 0x16a   : > { %v1425_v48 = vpop.f32.mrf.mxu0 }
 0x16b   : > { %v6590_v31 = vadd.f32 %v4914_v16, %v1468_v21  ;;  %v1466_v13 = vadd.f32 %v1425_v48, %v6467_v41  ;;  %v1892_v17 = vpop.f32.mrf.mxu1 }
 0x16c   : > { %v4933_v36 = vpop.f32.mrf.mxu0 }
 0x16d   : > { %v6593_v51 = vadd.f32 %v1892_v17, %v1466_v13  ;;  %v2177_v54 = vadd.f32 %v4933_v36, %v6474_v19  ;;  %v4981_v53 = vpop.f32.mrf.mxu1 }
 0x16e   : > { %v2048_v40 = vpop.f32.mrf.mxu0 }
 0x16f   : > { %v6596_v11 = vadd.f32 %v4981_v53, %v2177_v54  ;;  %v2175_v27 = vadd.f32 %v2048_v40, %v6477_v7  ;;  %v2319_v32 = vpop.f32.mrf.mxu1 }
 0x170   : > { %v4934_v8 = vpop.f32.mrf.mxu0 }
 0x171   : > { %v6599_v52 = vadd.f32 %v2319_v32, %v2175_v27  ;;  %v2178_v35 = vadd.f32 %v4934_v8, %v6480_v57  ;;  %v4982_v2 = vpop.f32.mrf.mxu1 }
 0x172   : > { %v2051_v41 = vpop.f32.mrf.mxu0 }
 0x173   : > { %v6602_v61 = vadd.f32 %v4982_v2, %v2178_v35  ;;  %v2176_v59 = vadd.f32 %v2051_v41, %v6484_v26  ;;  %v2322_v6 = vpop.f32.mrf.mxu1 }
 0x174   : > { %v4937_v19 = vpop.f32.mrf.mxu0 }
 0x175   : > { %v6605_v18 = vadd.f32 %v2322_v6, %v2176_v59  ;;  %v2181_v55 = vadd.f32 %v4937_v19, %v6490_v63  ;;  %v4985_v30 = vpop.f32.mrf.mxu1 }
 0x176   : > { %v2064_v7 = vpop.f32.mrf.mxu0 }
 0x177   : > { %v6608_v22 = vadd.f32 %v4985_v30, %v2181_v55  ;;  %v2179_v14 = vadd.f32 %v2064_v7, %v6493_v33  ;;  %v2335_v10 = vpop.f32.mrf.mxu1 }
 0x178   : > { %v4938_v57 = vpop.f32.mrf.mxu0 }
 0x179   : > { %v6611_v38 = vadd.f32 %v2335_v10, %v2179_v14  ;;  %v2182_v4 = vadd.f32 %v4938_v57, %v6496_v3  ;;  %v4986_v23 = vpop.f32.mrf.mxu1 }
 0x17a   : > { %v2067_v26 = vpop.f32.mrf.mxu0 }
 0x17b   : > { %v6614_v45 = vadd.f32 %v4986_v23, %v2182_v4  ;;  %v2180_v46 = vadd.f32 %v2067_v26, %v6500_v43  ;;  %v2338_v20 = vpop.f32.mrf.mxu1 }
 0x17c   : > { %v4941_v63 = vpop.f32.mrf.mxu0 }
 0x17d   : > { %v6617_v21 = vadd.f32 %v2338_v20, %v2180_v46  ;;  %v2185_v16 = vadd.f32 %v4941_v63, %v6506_v25  ;;  %v4989_v48 = vpop.f32.mrf.mxu1 }
 0x17e   : > { %v2080_v33 = vpop.f32.mrf.mxu0 }
 0x17f   : > { %v6620_v13 = vadd.f32 %v4989_v48, %v2185_v16  ;;  %v2183_v17 = vadd.f32 %v2080_v33, %v6509_v0  ;;  %v2351_v36 = vpop.f32.mrf.mxu1 }
 0x180   : > { %v4942_v3 = vpop.f32.mrf.mxu0 }
 0x181   : > { %v6623_v54 = vadd.f32 %v2351_v36, %v2183_v17  ;;  %v2186_v53 = vadd.f32 %v4942_v3, %v6512_v42  ;;  %v4990_v40 = vpop.f32.mrf.mxu1 }
 0x182   : > { %v2083_v43 = vpop.f32.mrf.mxu0 }
 0x183   : > { %v6626_v27 = vadd.f32 %v4990_v40, %v2186_v53  ;;  %v2184_v32 = vadd.f32 %v2083_v43, %v6516_v15  ;;  %v2354_v8 = vpop.f32.mrf.mxu1 }
 0x184   : > { %v4945_v25 = vpop.f32.mrf.mxu0 }
 0x185   : > { %v6629_v35 = vadd.f32 %v2354_v8, %v2184_v32  ;;  %v2189_v2 = vadd.f32 %v4945_v25, %v6522_v44  ;;  %v4993_v41 = vpop.f32.mrf.mxu1 }
 0x186   : > { %v2096_v0 = vpop.f32.mrf.mxu0 }
 0x187   : > { %v6632_v59 = vadd.f32 %v4993_v41, %v2189_v2  ;;  %v2187_v6 = vadd.f32 %v2096_v0, %v6525_v47  ;;  %v2367_v19 = vpop.f32.mrf.mxu1 }
 0x188   : > { %v4946_v42 = vpop.f32.mrf.mxu0 }
 0x189   : > { %v6635_v55 = vadd.f32 %v2367_v19, %v2187_v6  ;;  %v2190_v30 = vadd.f32 %v4946_v42, %v6528_v5  ;;  %v4994_v7 = vpop.f32.mrf.mxu1 }
 0x18a   : > { %v2099_v15 = vpop.f32.mrf.mxu0 }
 0x18b   : > { %v6638_v14 = vadd.f32 %v4994_v7, %v2190_v30  ;;  %v2188_v10 = vadd.f32 %v2099_v15, %v6532_v29  ;;  %v2370_v57 = vpop.f32.mrf.mxu1 }
 0x18c   : > { %v4949_v44 = vpop.f32.mrf.mxu0 }
 0x18d   : > { %v6641_v4 = vadd.f32 %v2370_v57, %v2188_v10  ;;  %v2193_v23 = vadd.f32 %v4949_v44, %v6538_v39  ;;  %v4997_v26 = vpop.f32.mrf.mxu1 }
 0x18e   : > { %v2112_v47 = vpop.f32.mrf.mxu0 }
 0x18f   : > { %v6644_v46 = vadd.f32 %v4997_v26, %v2193_v23  ;;  %v2191_v20 = vadd.f32 %v2112_v47, %v6541_v24  ;;  %v2383_v63 = vpop.f32.mrf.mxu1 }
 0x190   : > { %v4950_v5 = vpop.f32.mrf.mxu0 }
 0x191   : > { %v6647_v16 = vadd.f32 %v2383_v63, %v2191_v20  ;;  %v2194_v48 = vadd.f32 %v4950_v5, %v6544_v28  ;;  %v4998_v33 = vpop.f32.mrf.mxu1 }
 0x192   : > { %v2115_v29 = vpop.f32.mrf.mxu0 }
 0x193   : > { %v6650_v17 = vadd.f32 %v4998_v33, %v2194_v48  ;;  %v2192_v36 = vadd.f32 %v2115_v29, %v6548_v9  ;;  %v2386_v3 = vpop.f32.mrf.mxu1 }
 0x194   : > { %v4953_v39 = vpop.f32.mrf.mxu0 }
 0x195   : > { %7538 = vst [vmem:[#allocation9_spill] sm:$0xff] %v6650_v17  ;;  %v6653_v53 = vadd.f32 %v2386_v3, %v2192_v36  ;;  %v2197_v40 = vadd.f32 %v4953_v39, %v6554_v50  ;;  %v5001_v43 = vpop.f32.mrf.mxu1 }
 0x196   : > { %v2128_v24 = vpop.f32.mrf.mxu0 }
 0x197   : > { %7539 = vst [vmem:[#allocation12_spill] sm:$0xff] %v6653_v53  ;;  %v6656_v32 = vadd.f32 %v5001_v43, %v2197_v40  ;;  %v2195_v8 = vadd.f32 %v2128_v24, %v6557_v37  ;;  %v2399_v25 = vpop.f32.mrf.mxu1 }
 0x198   : > { %v4954_v28 = vpop.f32.mrf.mxu0 }
 0x199   : > { %7540 = vst [vmem:[#allocation14_spill] sm:$0xff] %v6656_v32  ;;  %v6659_v2 = vadd.f32 %v2399_v25, %v2195_v8  ;;  %v2198_v41 = vadd.f32 %v4954_v28, %v6560_v58  ;;  %v5002_v0 = vpop.f32.mrf.mxu1 }
 0x19a   : > { %v2131_v9 = vpop.f32.mrf.mxu0 }
 0x19b   : > { %7541 = vst [vmem:[#allocation10_spill] sm:$0xff] %v6659_v2  ;;  %v6662_v6 = vadd.f32 %v5002_v0, %v2198_v41  ;;  %v2196_v19 = vadd.f32 %v2131_v9, %v6564_v56  ;;  %v2402_v42 = vpop.f32.mrf.mxu1 }
 0x19c   : > { %v4957_v50 = vpop.f32.mrf.mxu0 }
 0x19d   : > { %7542 = vst [vmem:[#allocation15_spill] sm:$0xff] %v6662_v6  ;;  %v6665_v30 = vadd.f32 %v2402_v42, %v2196_v19  ;;  %v2201_v7 = vadd.f32 %v4957_v50, %v6570_v1  ;;  %v5005_v15 = vpop.f32.mrf.mxu1 }
 0x19e   : > { %v2144_v37 = vpop.f32.mrf.mxu0 }
 0x19f   : > { %7543 = vst [vmem:[#allocation16_spill] sm:$0xff] %v6665_v30  ;;  %v6668_v10 = vadd.f32 %v5005_v15, %v2201_v7  ;;  %v2199_v57 = vadd.f32 %v2144_v37, %v6573_v34  ;;  %v2415_v44 = vpop.f32.mrf.mxu1 }
 0x1a0   : > { %v4958_v58 = vpop.f32.mrf.mxu0 }
 0x1a1   : > { %7544 = vst [vmem:[#allocation13_spill] sm:$0xff] %v6668_v10  ;;  %v6671_v23 = vadd.f32 %v2415_v44, %v2199_v57  ;;  %v2202_v26 = vadd.f32 %v4958_v58, %v6576_v62  ;;  %v5006_v47 = vpop.f32.mrf.mxu1 }
 0x1a2   : > { %v2147_v56 = vpop.f32.mrf.mxu0 }
 0x1a3   : > { %7545 = vst [vmem:[#allocation17_spill] sm:$0xff] %v6671_v23  ;;  %v6674_v20 = vadd.f32 %v5006_v47, %v2202_v26  ;;  %v2200_v63 = vadd.f32 %v2147_v56, %v6580_v12  ;;  %v2418_v5 = vpop.f32.mrf.mxu1 }
 0x1a4   : > { %v4961_v1 = vpop.f32.mrf.mxu0 }
 0x1a5   : > { %7546 = vst [vmem:[#allocation19_spill] sm:$0xff] %v6674_v20  ;;  %v6677_v48 = vadd.f32 %v2418_v5, %v2200_v63  ;;  %v2205_v33 = vadd.f32 %v4961_v1, %v6584_v60  ;;  %v5009_v29 = vpop.f32.mrf.mxu1 }
 0x1a6   : > { %v2160_v34 = vpop.f32.mrf.mxu0 }
 0x1a7   : > { %7547 = vst [vmem:[#allocation3_spill] sm:$0xff] %v6677_v48  ;;  %v6680_v36 = vadd.f32 %v5009_v29, %v2205_v33  ;;  %v2203_v3 = vadd.f32 %v2160_v34, %v6587_v49  ;;  %v2431_v39 = vpop.f32.mrf.mxu1 }
 0x1a8   : > { %v4962_v62 = vpop.f32.mrf.mxu0 }
 0x1a9   : > { %7548 = vst [vmem:[#allocation18_spill] sm:$0xff] %v6680_v36  ;;  %v6683_v40 = vadd.f32 %v2431_v39, %v2203_v3  ;;  %v2206_v43 = vadd.f32 %v4962_v62, %v6590_v31  ;;  %v5010_v24 = vpop.f32.mrf.mxu1 }
 0x1aa   : > { %v2163_v12 = vpop.f32.mrf.mxu0 }
 0x1ab   : > { %7549 = vst [vmem:[#allocation2_spill] sm:$0xff] %v6683_v40  ;;  %v6686_v8 = vadd.f32 %v5010_v24, %v2206_v43  ;;  %v2204_v25 = vadd.f32 %v2163_v12, %v6593_v51  ;;  %v2434_v28 = vpop.f32.mrf.mxu1 }
 0x1ac   : > { %v5029_v60 = vpop.f32.mrf.mxu0 }
 0x1ad   : > { %7550 = vst [vmem:[#allocation4_spill] sm:$0xff] %v6686_v8  ;;  %v6689_v41 = vadd.f32 %v2434_v28, %v2204_v25  ;;  %v6691_v0 = vpop.f32.mrf.mxu1 }
 0x1ae   : > { %v2674_v9 = vpop.f32.mrf.mxu0 }
 0x1af   : > { %7551 = vst [vmem:[#allocation20_spill] sm:$0xff] %v6689_v41  ;;  %v6693_v49 = vpop.f32.mrf.mxu1 }
 0x1b0   : > { %v6695_v19 = vpop.f32.mrf.mxu0 }
 0x1b1   : > { %v6697_v42 = vpop.f32.mrf.mxu1 }
 0x1b2   : > { %v6699_v31 = vpop.f32.mrf.mxu0 }
 0x1b3   : > { %v6701_v50 = vpop.f32.mrf.mxu1 }
 0x1b4   : > { %v6703_v7 = vpop.f32.mrf.mxu0 }
 0x1b5   : > { %v6705_v51 = vpop.f32.mrf.mxu1 }
 0x1b6   : > { %v6707_v15 = vpop.f32.mrf.mxu0 }
 0x1b7   : > { %v6709_v37 = vpop.f32.mrf.mxu1 }
 0x1b8   : > { %v6711_v57 = vpop.f32.mrf.mxu0 }
 0x1b9   : > { %v6713_v44 = vpop.f32.mrf.mxu1 }
 0x1ba   : > { %v6715_v58 = vpop.f32.mrf.mxu0 }
 0x1bb   : > { %v6717_v26 = vpop.f32.mrf.mxu1 }
 0x1bc   : > { %v6719_v47 = vpop.f32.mrf.mxu0 }
 0x1bd   : > { %v6721_v56 = vpop.f32.mrf.mxu1 }
 0x1be   : > { %v6723_v63 = vpop.f32.mrf.mxu0 }
 0x1bf   : > { %v6725_v5 = vpop.f32.mrf.mxu1 }
 0x1c0   : > { %v6727_v1 = vpop.f32.mrf.mxu0 }
 0x1c1   : > { %v6729_v33 = vpop.f32.mrf.mxu1 }
 0x1c2   : > { %v6731_v29 = vpop.f32.mrf.mxu0 }
 0x1c3   : > { %v6733_v34 = vpop.f32.mrf.mxu1 }
 0x1c4   : > { %v6735_v3 = vpop.f32.mrf.mxu0 }
 0x1c5   : > { %v6737_v39 = vpop.f32.mrf.mxu1 }
 0x1c6   : > { %v6739_v62 = vpop.f32.mrf.mxu0 }
 0x1c7   : > { %v6741_v43 = vpop.f32.mrf.mxu1 }
 0x1c8   : > { %v6743_v24 = vpop.f32.mrf.mxu0 }
 0x1c9   : > { %v6745_v12 = vpop.f32.mrf.mxu1 }
 0x1ca   : > { %v6747_v25 = vpop.f32.mrf.mxu0 }
 0x1cb   : > { %v6749_v28 = vpop.f32.mrf.mxu1 }
 0x1cc   : > { %v6751_v41 = vpop.f32.mrf.mxu0 }
 0x1cd   : > { %v6753_v8 = vpop.f32.mrf.mxu1 }
 0x1ce   : > { %v6755_v40 = vpop.f32.mrf.mxu0 }
 0x1cf   : > { %v6757_v36 = vpop.f32.mrf.mxu1 }
 0x1d0   : > { %7552 = vst [vmem:[#allocation7_spill] sm:$0xff] %v6757_v36  ;;  %v6759_v48 = vpop.f32.mrf.mxu0 }
 0x1d1   : > { %7553 = vst [vmem:[#allocation8_spill] sm:$0xff] %v6759_v48  ;;  %v6761_v20 = vpop.f32.mrf.mxu1 }
 0x1d2   : > { %7554 = vst [vmem:[#allocation22_spill] sm:$0xff] %v6761_v20  ;;  %v6763_v23 = vpop.f32.mrf.mxu0 }
 0x1d3   : > { %7555 = vst [vmem:[#allocation23_spill] sm:$0xff] %v6763_v23  ;;  %v6765_v10 = vpop.f32.mrf.mxu1 }
 0x1d4   : > { %7556 = vst [vmem:[#allocation11_spill] sm:$0xff] %v6765_v10  ;;  %v6767_v30 = vpop.f32.mrf.mxu0 }
 0x1d5   : > { %7557 = vst [vmem:[#allocation6_spill] sm:$0xff] %v6767_v30  ;;  %v6769_v6 = vpop.f32.mrf.mxu1 }
 0x1d6   : > { %7558 = vst [vmem:[#allocation21_spill] sm:$0xff] %v6769_v6  ;;  %v6771_v2 = vpop.f32.mrf.mxu0 }
 0x1d7   : > { %7559 = vst [vmem:[#allocation5_spill] sm:$0xff] %v6771_v2  ;;  %v6773_v32 = vpop.f32.mrf.mxu1 }
 0x1d8   : > { %7560 = vst [vmem:[#allocation24_spill] sm:$0xff] %v6773_v32  ;;  %v6775_v53 = vpop.f32.mrf.mxu0 }
 0x1d9   : > { %7561 = vst [vmem:[#allocation25_spill] sm:$0xff] %v6775_v53  ;;  %v6777_v17 = vpop.f32.mrf.mxu1 }
 0x1da   : > { %7562 = vst [vmem:[#allocation26_spill] sm:$0xff] %v6777_v17  ;;  %v6779_v36 = vpop.f32.mrf.mxu0 }
 0x1db   : > { %7563 = vst [vmem:[#allocation27_spill] sm:$0xff] %v6779_v36  ;;  %v6781_v20 = vpop.f32.mrf.mxu1 }
 0x1dc   : > { %7564 = vst [vmem:[#allocation28_spill] sm:$0xff] %v6781_v20  ;;  %v6783_v23 = vpop.f32.mrf.mxu0 }
 0x1dd   : > { %7565 = vst [vmem:[#allocation29_spill] sm:$0xff] %v6783_v23  ;;  %v6785_v10 = vpop.f32.mrf.mxu1 }
 0x1de   : > { %7566 = vst [vmem:[#allocation30_spill] sm:$0xff] %v6785_v10  ;;  %v6787_v30 = vpop.f32.mrf.mxu0  ;;  %v2803_v10 = vadd.f32 %v5029_v60, %v6596_v11 }
 0x1df   : > { %7567 = vst [vmem:[#allocation31_spill] sm:$0xff] %v6787_v30  ;;  %v6789_v6 = vpop.f32.mrf.mxu1 }
 0x1e0   : > { %7568 = vst [vmem:[#allocation32_spill] sm:$0xff] %v6789_v6  ;;  %v6791_v2 = vpop.f32.mrf.mxu0  ;;  %v2801_v6 = vadd.f32 %v2674_v9, %v6599_v52 }
 0x1e1   : > { %v6793_v32 = vpop.f32.mrf.mxu1 }
 0x1e2   : > { %7569 = vst [vmem:[#allocation33_spill] sm:$0xff] %v6793_v32  ;;  %v6795_v53 = vpop.f32.mrf.mxu0  ;;  %v3065_v52 = vadd.f32 %v6693_v49, %v2801_v6 }
 0x1e3   : > { %7570 = vst [vmem:[#allocation34_spill] sm:$0xff] %v6795_v53  ;;  %v6797_v17 = vpop.f32.mrf.mxu1 }
 0x1e4   : > { %7571 = vst [vmem:[#allocation35_spill] sm:$0xff] %v6797_v17  ;;  %v6799_v36 = vpop.f32.mrf.mxu0  ;;  %v3067_v17 = vadd.f32 %v6691_v0, %v2803_v10 }
 0x1e5   : > { %7572 = vst [vmem:[#allocation36_spill] sm:$0xff] %v6799_v36  ;;  %v6801_v48 = vpop.f32.mrf.mxu1 }
 0x1e6   : > { %7573 = vst [vmem:[#allocation37_spill] sm:$0xff] %v6801_v48  ;;  %v6803_v20 = vpop.f32.mrf.mxu0  ;;  %v2804_v48 = vadd.f32 %v6695_v19, %v6602_v61  ;;  %v2802_v61 = vadd.f32 %v6699_v31, %v6605_v18  ;;  %v2807_v19 = vadd.f32 %v6703_v7, %v6608_v22  ;;  %v2805_v31 = vadd.f32 %v6707_v15, %v6611_v38 }
 0x1e7   : > { %v6806_v23 = vpop.f32.mrf.mxu1 }
 0x1e8   : > { %v6808_v30 = vpop.f32.mrf.mxu0  ;;  %v3068_v9 = vadd.f32 %v6697_v42, %v2804_v48  ;;  %v3066_v49 = vadd.f32 %v6701_v50, %v2802_v61  ;;  %v3071_v7 = vadd.f32 %v6705_v51, %v2807_v19  ;;  %v3069_v61 = vadd.f32 %v6709_v37, %v2805_v31 }
 0x1e9   : > { %v6812_v32 = vpop.f32.mrf.mxu1  ;;  %v2806_v51 = vadd.f32 %v6715_v58, %v6617_v21  ;;  %v2811_v21 = vadd.f32 %v6719_v47, %v6620_v13  ;;  %v2809_v13 = vadd.f32 %v6723_v63, %v6623_v54  ;;  %v2812_v54 = vadd.f32 %v6727_v1, %v6626_v27 }
 0x1ea   : > { %v6814_v53 = vpop.f32.mrf.mxu0  ;;  %v2810_v27 = vadd.f32 %v6731_v29, %v6629_v35  ;;  %v2815_v35 = vadd.f32 %v6735_v3, %v6632_v59  ;;  %v2813_v59 = vadd.f32 %v6739_v62, %v6635_v55  ;;  %v2816_v55 = vadd.f32 %v6743_v24, %v6638_v14 }
 0x1eb   : > { %v6819_v36 = vpop.f32.mrf.mxu1  ;;  %v2814_v14 = vadd.f32 %v6747_v25, %v6641_v4  ;;  %v2819_v4 = vadd.f32 %v6751_v41, %v6644_v46  ;;  %v2817_v46 = vadd.f32 %v6755_v40, %v6647_v16 }
 0x1ec   : > { %v5125_v11 = vpop.f32.mrf.mxu0 }
 0x1ed   : > { %v6834_v10 = vadd.f32 %v5125_v11, %v3067_v17  ;;  %v6836_v60 = vpop.f32.mrf.mxu1  ;;  %v2808_v11 = vadd.f32 %v6711_v57, %v6614_v45 }
 0x1ee   : > { %3620 = vst [vmem:[%s6824_s30 + $0x10] sm:$0xff] %v6836_v60  ;;  %v3202_v0 = vpop.f32.mrf.mxu0 }
 0x1ef   : > { %3588 = vst [vmem:[%s6829_s15 + $0x10] sm:$0xff] %v6834_v10  ;;  %v6845_v6 = vadd.f32 %v3202_v0, %v3065_v52  ;;  %v6847_v18 = vpop.f32.mrf.mxu1  ;;  %v3072_v37 = vadd.f32 %v6713_v44, %v2808_v11  ;;  %v3070_v44 = vadd.f32 %v6717_v26, %v2806_v51 }
 0x1f0   : > { %3618 = vst [vmem:[%s6824_s30] sm:$0xff] %v6847_v18  ;;  %v5126_v17 = vpop.f32.mrf.mxu0 }
 0x1f1   : > { %3586 = vst [vmem:[%s6829_s15] sm:$0xff] %v6845_v6  ;;  %v6856_v48 = vadd.f32 %v5126_v17, %v3068_v9  ;;  %v6858_v22 = vpop.f32.mrf.mxu1 }
 0x1f2   : > { %3621 = vst [vmem:[%s6824_s30 + $0x18] sm:$0xff] %v6858_v22  ;;  %v3205_v42 = vpop.f32.mrf.mxu0 }
 0x1f3   : > { %3589 = vst [vmem:[%s6829_s15 + $0x18] sm:$0xff] %v6856_v48  ;;  %v6867_v50 = vadd.f32 %v3205_v42, %v3066_v49  ;;  %v6869_v38 = vpop.f32.mrf.mxu1 }
 0x1f4   : > { %3619 = vst [vmem:[%s6824_s30 + $0x8] sm:$0xff] %v6869_v38  ;;  %v3790_v15 = vadd.f32 %v6869_v38, %v6847_v18  ;;  %v5129_v52 = vpop.f32.mrf.mxu0 }
 0x1f5   : > { %3587 = vst [vmem:[%s6829_s15 + $0x8] sm:$0xff] %v6867_v50  ;;  %v3650_v45 = vadd.f32 %v6867_v50, %v6845_v6  ;;  %v6882_v57 = vadd.f32 %v5129_v52, %v3071_v7  ;;  %v6884_v0 = vpop.f32.mrf.mxu1 }
 0x1f6   : > { %v3791_v9 = vadd.f32 %v6836_v60, %v3790_v15  ;;  %3624 = vst [vmem:[%s6824_s30 + $0x30] sm:$0xff] %v6884_v0  ;;  %v3218_v19 = vpop.f32.mrf.mxu0 }
 0x1f7   : > { %v3651_v58 = vadd.f32 %v3650_v45, %v6834_v10  ;;  %3592 = vst [vmem:[%s6829_s15 + $0x30] sm:$0xff] %v6882_v57  ;;  %v6895_v17 = vadd.f32 %v3218_v19, %v3069_v61  ;;  %v6897_v49 = vpop.f32.mrf.mxu1  ;;  %v3075_v61 = vadd.f32 %v6721_v56, %v2811_v21  ;;  %v3073_v56 = vadd.f32 %v6725_v5, %v2809_v13 }
 0x1f8   : > { %3622 = vst [vmem:[%s6824_s30 + $0x20] sm:$0xff] %v6897_v49  ;;  %v3792_v31 = vadd.f32 %v6858_v22, %v3791_v9  ;;  %v5130_v42 = vpop.f32.mrf.mxu0 }
 0x1f9   : > { %3590 = vst [vmem:[%s6829_s15 + $0x20] sm:$0xff] %v6895_v17  ;;  %v3652_v47 = vadd.f32 %v3651_v58, %v6856_v48  ;;  %v6908_v7 = vadd.f32 %v5130_v42, %v3072_v37  ;;  %v6910_v11 = vpop.f32.mrf.mxu1 }
 0x1fa   : > { %v3793_v15 = vadd.f32 %v3792_v31, %v6897_v49  ;;  %3625 = vst [vmem:[%s6824_s30 + $0x38] sm:$0xff] %v6910_v11  ;;  %v3221_v52 = vpop.f32.mrf.mxu0  ;;  %v3076_v31 = vadd.f32 %v6729_v33, %v2812_v54  ;;  %v3074_v33 = vadd.f32 %v6733_v34, %v2810_v27  ;;  %v3079_v54 = vadd.f32 %v6737_v39, %v2815_v35 }
 0x1fb   : > { %v3653_v26 = vadd.f32 %v3652_v47, %v6895_v17  ;;  %3593 = vst [vmem:[%s6829_s15 + $0x38] sm:$0xff] %v6908_v7  ;;  %v6921_v63 = vadd.f32 %v3221_v52, %v3070_v44  ;;  %v6923_v51 = vpop.f32.mrf.mxu1  ;;  %v3077_v39 = vadd.f32 %v6741_v43, %v2813_v59 }
 0x1fc   : > { %3623 = vst [vmem:[%s6824_s30 + $0x28] sm:$0xff] %v6923_v51  ;;  %v3794_v45 = vadd.f32 %v3793_v15, %v6923_v51  ;;  %v5133_v9 = vpop.f32.mrf.mxu0 }
 0x1fd   : > { %3591 = vst [vmem:[%s6829_s15 + $0x28] sm:$0xff] %v6921_v63  ;;  %v3654_v1 = vadd.f32 %v3653_v26, %v6921_v63  ;;  %v6934_v19 = vadd.f32 %v5133_v9, %v3075_v61  ;;  %v6936_v37 = vpop.f32.mrf.mxu1 }
 0x1fe   : > { %v3795_v21 = vadd.f32 %v6884_v0, %v3794_v45  ;;  %3628 = vst [vmem:[%s6824_s30 + $0x50] sm:$0xff] %v6936_v37  ;;  %v3234_v58 = vpop.f32.mrf.mxu0 }
 0x1ff   : > { %v3655_v5 = vadd.f32 %v3654_v1, %v6882_v57  ;;  %3596 = vst [vmem:[%s6829_s15 + $0x50] sm:$0xff] %v6934_v19  ;;  %v6947_v29 = vadd.f32 %v3234_v58, %v3073_v56  ;;  %v6949_v42 = vpop.f32.mrf.mxu1  ;;  %v3080_v58 = vadd.f32 %v6745_v12, %v2816_v55  ;;  %v3078_v12 = vadd.f32 %v6749_v28, %v2814_v14  ;;  %v7576_v28 = vld [vmem:[#allocation9_spill] sm:$0xff] }
 0x200   : > { %3626 = vst [vmem:[%s6824_s30 + $0x40] sm:$0xff] %v6949_v42  ;;  %v3796_v44 = vadd.f32 %v6910_v11, %v3795_v21  ;;  %v5134_v13 = vpop.f32.mrf.mxu0 }
 0x201   : > { %3594 = vst [vmem:[%s6829_s15 + $0x40] sm:$0xff] %v6947_v29  ;;  %v3656_v3 = vadd.f32 %v3655_v5, %v6908_v7  ;;  %v6960_v47 = vadd.f32 %v5134_v13, %v3076_v31  ;;  %v6962_v15 = vpop.f32.mrf.mxu1 }
 0x202   : > { %v3797_v52 = vadd.f32 %v3796_v44, %v6949_v42  ;;  %3629 = vst [vmem:[%s6824_s30 + $0x58] sm:$0xff] %v6962_v15  ;;  %v3237_v61 = vpop.f32.mrf.mxu0 }
 0x203   : > { %v3657_v34 = vadd.f32 %v3656_v3, %v6947_v29  ;;  %3597 = vst [vmem:[%s6829_s15 + $0x58] sm:$0xff] %v6960_v47  ;;  %v6973_v62 = vadd.f32 %v3237_v61, %v3074_v33  ;;  %v6975_v26 = vpop.f32.mrf.mxu1  ;;  %v3083_v3 = vadd.f32 %v6753_v8, %v2819_v4 }
 0x204   : > { %3627 = vst [vmem:[%s6824_s30 + $0x48] sm:$0xff] %v6975_v26  ;;  %v3798_v45 = vadd.f32 %v3797_v52, %v6975_v26  ;;  %v5137_v9 = vpop.f32.mrf.mxu0  ;;  %v7577_v52 = vld [vmem:[#allocation8_spill] sm:$0xff] }
 0x205   : > { %3595 = vst [vmem:[%s6829_s15 + $0x48] sm:$0xff] %v6973_v62  ;;  %v3658_v24 = vadd.f32 %v3657_v34, %v6973_v62  ;;  %v6986_v56 = vadd.f32 %v5137_v9, %v3079_v54  ;;  %v6988_v27 = vpop.f32.mrf.mxu1  ;;  %v2820_v16 = vadd.f32 %v7577_v52, %v7576_v28  ;;  %v7580_v9 = vld [vmem:[#allocation12_spill] sm:$0xff]  ;;  %v7587_v52 = vld [vmem:[#allocation11_spill] sm:$0xff] }
 0x206   : > { %7574 = vst [vmem:[#allocation38_spill] sm:$0xff] %v6988_v27  ;;  %v3799_v1 = vadd.f32 %v6936_v37, %v3798_v45  ;;  %3632 = vst [vmem:[%s6824_s30 + $0x70] sm:$0xff] %v6988_v27  ;;  %v3250_v21 = vpop.f32.mrf.mxu0  ;;  %v7579_v45 = vld [vmem:[#allocation7_spill] sm:$0xff] }
 0x207   : > { %v3659_v43 = vadd.f32 %v3658_v24, %v6934_v19  ;;  %3600 = vst [vmem:[%s6829_s15 + $0x70] sm:$0xff] %v6986_v56  ;;  %v6999_v25 = vadd.f32 %v3250_v21, %v3077_v39  ;;  %v7001_v31 = vpop.f32.mrf.mxu1  ;;  %v3081_v8 = vadd.f32 %v7579_v45, %v2817_v46  ;;  %v7581_v39 = vld [vmem:[#allocation23_spill] sm:$0xff] }
 0x208   : > { %3630 = vst [vmem:[%s6824_s30 + $0x60] sm:$0xff] %v7001_v31  ;;  %v3800_v35 = vadd.f32 %v6962_v15, %v3799_v1  ;;  %v5138_v5 = vpop.f32.mrf.mxu0  ;;  %v2818_v14 = vadd.f32 %v7581_v39, %v7580_v9 }
 0x209   : > { %3598 = vst [vmem:[%s6829_s15 + $0x60] sm:$0xff] %v6999_v25  ;;  %v3660_v41 = vadd.f32 %v3659_v43, %v6960_v47  ;;  %v7012_v44 = vadd.f32 %v5138_v5, %v3080_v58  ;;  %v7014_v13 = vpop.f32.mrf.mxu1  ;;  %v7583_v43 = vld [vmem:[#allocation22_spill] sm:$0xff] }
 0x20a   : > { %7575 = vst [vmem:[#allocation39_spill] sm:$0xff] %v7014_v13  ;;  %v3801_v33 = vadd.f32 %v3800_v35, %v7001_v31  ;;  %3633 = vst [vmem:[%s6824_s30 + $0x78] sm:$0xff] %v7014_v13  ;;  %v3253_v59 = vpop.f32.mrf.mxu0  ;;  %v3084_v35 = vadd.f32 %v7583_v43, %v2820_v16  ;;  %v7584_v5 = vld [vmem:[#allocation14_spill] sm:$0xff]  ;;  %v3082_v16 = vadd.f32 %v7587_v52, %v2818_v14  ;;  %v7592_v14 = vld [vmem:[#allocation15_spill] sm:$0xff] }
 0x20b   : > { %v3661_v40 = vadd.f32 %v3660_v41, %v6999_v25  ;;  %3601 = vst [vmem:[%s6829_s15 + $0x78] sm:$0xff] %v7012_v44  ;;  %v7025_v61 = vadd.f32 %v3253_v59, %v3078_v12  ;;  %v7027_v54 = vpop.f32.mrf.mxu1  ;;  %v7585_v12 = vld [vmem:[#allocation6_spill] sm:$0xff]  ;;  %v7593_v43 = vld [vmem:[#allocation25_spill] sm:$0xff]  ;;  %v7595_v52 = vld [vmem:[#allocation24_spill] sm:$0xff] }
 0x20c   : > { %7578 = vst [vmem:[#allocation9_spill] sm:$0xff] %v7027_v54  ;;  %3631 = vst [vmem:[%s6824_s30 + $0x68] sm:$0xff] %v7027_v54  ;;  %v3802_v55 = vadd.f32 %v3801_v33, %v7027_v54  ;;  %v5141_v34 = vpop.f32.mrf.mxu0  ;;  %v2823_v46 = vadd.f32 %v7585_v12, %v7584_v5  ;;  %v2824_v5 = vadd.f32 %v7593_v43, %v7592_v14  ;;  %v7599_v43 = vld [vmem:[#allocation26_spill] sm:$0xff] }
 0x20d   : > { %3599 = vst [vmem:[%s6829_s15 + $0x68] sm:$0xff] %v7025_v61  ;;  %v3662_v24 = vadd.f32 %v3661_v40, %v7025_v61  ;;  %v7038_v1 = vadd.f32 %v5141_v34, %v3083_v3  ;;  %v7040_v21 = vpop.f32.mrf.mxu1  ;;  %v7588_v40 = vld [vmem:[#allocation10_spill] sm:$0xff] }
 0x20e   : > { %7582 = vst [vmem:[#allocation8_spill] sm:$0xff] %v7040_v21  ;;  %v3803_v58 = vadd.f32 %v6988_v27, %v3802_v55  ;;  %3636 = vst [vmem:[%s6824_s30 + $0x90] sm:$0xff] %v7040_v21  ;;  %v3266_v4 = vpop.f32.mrf.mxu0  ;;  %v7589_v55 = vld [vmem:[#allocation5_spill] sm:$0xff] }
 0x20f   : > { %v3663_v41 = vadd.f32 %v3662_v24, %v6986_v56  ;;  %3604 = vst [vmem:[%s6829_s15 + $0x90] sm:$0xff] %v7038_v1  ;;  %v7051_v33 = vadd.f32 %v3266_v4, %v3081_v8  ;;  %v7053_v59 = vpop.f32.mrf.mxu1  ;;  %v2821_v34 = vadd.f32 %v7589_v55, %v7588_v40  ;;  %v7596_v40 = vld [vmem:[#allocation16_spill] sm:$0xff]  ;;  %v7597_v55 = vld [vmem:[#allocation27_spill] sm:$0xff] }
 0x210   : > { %7586 = vst [vmem:[#allocation7_spill] sm:$0xff] %v7053_v59  ;;  %3634 = vst [vmem:[%s6824_s30 + $0x80] sm:$0xff] %v7053_v59  ;;  %v3804_v3 = vadd.f32 %v7014_v13, %v3803_v58  ;;  %v5142_v28 = vpop.f32.mrf.mxu0  ;;  %v7591_v58 = vld [vmem:[#allocation21_spill] sm:$0xff] }
 0x211   : > { %3602 = vst [vmem:[%s6829_s15 + $0x80] sm:$0xff] %v7051_v33  ;;  %v3664_v45 = vadd.f32 %v3663_v41, %v7012_v44  ;;  %v7064_v8 = vadd.f32 %v5142_v28, %v3084_v35  ;;  %v7066_v9 = vpop.f32.mrf.mxu1  ;;  %v3087_v4 = vadd.f32 %v7591_v58, %v2823_v46  ;;  %v3085_v46 = vadd.f32 %v7595_v52, %v2821_v34  ;;  %v7600_v34 = vld [vmem:[#allocation13_spill] sm:$0xff] }
 0x212   : > { %7590 = vst [vmem:[#allocation12_spill] sm:$0xff] %v7066_v9  ;;  %v3805_v39 = vadd.f32 %v3804_v3, %v7053_v59  ;;  %3637 = vst [vmem:[%s6824_s30 + $0x98] sm:$0xff] %v7066_v9  ;;  %v3269_v24 = vpop.f32.mrf.mxu0  ;;  %v2822_v58 = vadd.f32 %v7597_v55, %v7596_v40  ;;  %v7601_v52 = vld [vmem:[#allocation29_spill] sm:$0xff]  ;;  %v7605_v59 = vld [vmem:[#allocation31_spill] sm:$0xff] }
 0x213   : > { %v3665_v12 = vadd.f32 %v3664_v45, %v7051_v33  ;;  %3605 = vst [vmem:[%s6829_s15 + $0x98] sm:$0xff] %v7064_v8  ;;  %v7077_v35 = vadd.f32 %v3269_v24, %v3082_v16  ;;  %v7079_v41 = vpop.f32.mrf.mxu1  ;;  %v2827_v40 = vadd.f32 %v7601_v52, %v7600_v34 }
 0x214   : > { %7594 = vst [vmem:[#allocation23_spill] sm:$0xff] %v7079_v41  ;;  %3635 = vst [vmem:[%s6824_s30 + $0x88] sm:$0xff] %v7079_v41  ;;  %v3806_v3 = vadd.f32 %v3805_v39, %v7079_v41  ;;  %v5145_v28 = vpop.f32.mrf.mxu0  ;;  %v3088_v41 = vadd.f32 %v7599_v43, %v2824_v5  ;;  %v7604_v43 = vld [vmem:[#allocation17_spill] sm:$0xff] }
 0x215   : > { %3603 = vst [vmem:[%s6829_s15 + $0x88] sm:$0xff] %v7077_v35  ;;  %v3666_v45 = vadd.f32 %v3665_v12, %v7077_v35  ;;  %v7090_v16 = vadd.f32 %v5145_v28, %v3087_v4  ;;  %v7092_v24 = vpop.f32.mrf.mxu1  ;;  %v2825_v34 = vadd.f32 %v7605_v59, %v7604_v43  ;;  %v7610_v43 = vld [vmem:[#allocation32_spill] sm:$0xff] }
 0x216   : > { %7598 = vst [vmem:[#allocation22_spill] sm:$0xff] %v7092_v24  ;;  %v3807_v14 = vadd.f32 %v7040_v21, %v3806_v3  ;;  %3640 = vst [vmem:[%s6824_s30 + $0xb0] sm:$0xff] %v7092_v24  ;;  %v3282_v39 = vpop.f32.mrf.mxu0  ;;  %v7603_v21 = vld [vmem:[#allocation28_spill] sm:$0xff] }
 0x217   : > { %v3667_v55 = vadd.f32 %v3666_v45, %v7038_v1  ;;  %3608 = vst [vmem:[%s6829_s15 + $0xb0] sm:$0xff] %v7090_v16  ;;  %v7103_v4 = vadd.f32 %v3282_v39, %v3085_v46  ;;  %v7105_v12 = vpop.f32.mrf.mxu1  ;;  %v3086_v5 = vadd.f32 %v7603_v21, %v2822_v58  ;;  %v7608_v21 = vld [vmem:[#allocation19_spill] sm:$0xff] }
 0x218   : > { %7602 = vst [vmem:[#allocation14_spill] sm:$0xff] %v7105_v12  ;;  %3638 = vst [vmem:[%s6824_s30 + $0xa0] sm:$0xff] %v7105_v12  ;;  %v3808_v3 = vadd.f32 %v7066_v9, %v3807_v14  ;;  %v5146_v28 = vpop.f32.mrf.mxu0  ;;  %v7607_v9 = vld [vmem:[#allocation30_spill] sm:$0xff]  ;;  %v2828_v59 = vadd.f32 %v6791_v2, %v7608_v21 }
 0x219   : > { %3606 = vst [vmem:[%s6829_s15 + $0xa0] sm:$0xff] %v7103_v4  ;;  %v3668_v45 = vadd.f32 %v3667_v55, %v7064_v8  ;;  %v7116_v46 = vadd.f32 %v5146_v28, %v3088_v41  ;;  %v7118_v39 = vpop.f32.mrf.mxu1  ;;  %v3091_v13 = vadd.f32 %v7607_v9, %v2827_v40  ;;  %v3089_v9 = vadd.f32 %v7610_v43, %v2825_v34  ;;  %v7611_v40 = vld [vmem:[#allocation3_spill] sm:$0xff]  ;;  %v7615_v34 = vld [vmem:[#allocation18_spill] sm:$0xff]  ;;  %v7616_v43 = vld [vmem:[#allocation36_spill] sm:$0xff] }
 0x21a   : > { %7606 = vst [vmem:[#allocation6_spill] sm:$0xff] %v7118_v39  ;;  %v3809_v52 = vadd.f32 %v3808_v3, %v7105_v12  ;;  %3641 = vst [vmem:[%s6824_s30 + $0xb8] sm:$0xff] %v7118_v39  ;;  %v3285_v14 = vpop.f32.mrf.mxu0  ;;  %v7612_v12 = vld [vmem:[#allocation34_spill] sm:$0xff] }
 0x21b   : > { %v3669_v58 = vadd.f32 %v3668_v45, %v7103_v4  ;;  %3609 = vst [vmem:[%s6829_s15 + $0xb8] sm:$0xff] %v7116_v46  ;;  %v7129_v41 = vadd.f32 %v3285_v14, %v3086_v5  ;;  %v7131_v55 = vpop.f32.mrf.mxu1  ;;  %v2826_v2 = vadd.f32 %v7612_v12, %v7611_v40  ;;  %v2831_v12 = vadd.f32 %v7616_v43, %v7615_v34 }
 0x21c   : > { %7609 = vst [vmem:[#allocation11_spill] sm:$0xff] %v7131_v55  ;;  %3639 = vst [vmem:[%s6824_s30 + $0xa8] sm:$0xff] %v7131_v55  ;;  %v3810_v3 = vadd.f32 %v3809_v52, %v7131_v55  ;;  %v5149_v28 = vpop.f32.mrf.mxu0  ;;  %v7614_v55 = vld [vmem:[#allocation33_spill] sm:$0xff] }
 0x21d   : > { %3607 = vst [vmem:[%s6829_s15 + $0xa8] sm:$0xff] %v7129_v41  ;;  %v3670_v45 = vadd.f32 %v3669_v58, %v7129_v41  ;;  %v7142_v5 = vadd.f32 %v5149_v28, %v3091_v13  ;;  %v7144_v14 = vpop.f32.mrf.mxu1  ;;  %v3092_v27 = vadd.f32 %v7614_v55, %v2828_v59  ;;  %v7619_v55 = vld [vmem:[#allocation2_spill] sm:$0xff] }
 0x21e   : > { %7613 = vst [vmem:[#allocation10_spill] sm:$0xff] %v7144_v14  ;;  %v3811_v21 = vadd.f32 %v7092_v24, %v3810_v3  ;;  %3644 = vst [vmem:[%s6824_s30 + $0xd0] sm:$0xff] %v7144_v14  ;;  %v3298_v52 = vpop.f32.mrf.mxu0  ;;  %v7618_v24 = vld [vmem:[#allocation35_spill] sm:$0xff]  ;;  %v2829_v34 = vadd.f32 %v6803_v20, %v7619_v55 }
 0x21f   : > { %v3671_v40 = vadd.f32 %v3670_v45, %v7090_v16  ;;  %3612 = vst [vmem:[%s6829_s15 + $0xd0] sm:$0xff] %v7142_v5  ;;  %v7155_v13 = vadd.f32 %v3298_v52, %v3089_v9  ;;  %v7157_v58 = vpop.f32.mrf.mxu1  ;;  %v3090_v59 = vadd.f32 %v7618_v24, %v2826_v2  ;;  %v7622_v24 = vld [vmem:[#allocation4_spill] sm:$0xff] }
 0x220   : > { %7617 = vst [vmem:[#allocation5_spill] sm:$0xff] %v7157_v58  ;;  %3642 = vst [vmem:[%s6824_s30 + $0xc0] sm:$0xff] %v7157_v58  ;;  %v3812_v3 = vadd.f32 %v7118_v39, %v3811_v21  ;;  %v5150_v28 = vpop.f32.mrf.mxu0  ;;  %v7621_v39 = vld [vmem:[#allocation37_spill] sm:$0xff]  ;;  %v2832_v20 = vadd.f32 %v6808_v30, %v7622_v24 }
 0x221   : > { %3610 = vst [vmem:[%s6829_s15 + $0xc0] sm:$0xff] %v7155_v13  ;;  %v3672_v45 = vadd.f32 %v3671_v40, %v7116_v46  ;;  %v7168_v9 = vadd.f32 %v5150_v28, %v3092_v27  ;;  %v7170_v52 = vpop.f32.mrf.mxu1  ;;  %v3095_v54 = vadd.f32 %v7621_v39, %v2831_v12  ;;  %v3093_v39 = vadd.f32 %v6806_v23, %v2829_v34  ;;  %v7624_v12 = vld [vmem:[#allocation20_spill] sm:$0xff] }
 0x222   : > { %7620 = vst [vmem:[#allocation21_spill] sm:$0xff] %v7170_v52  ;;  %v3813_v43 = vadd.f32 %v3812_v3, %v7157_v58  ;;  %3645 = vst [vmem:[%s6824_s30 + $0xd8] sm:$0xff] %v7170_v52  ;;  %v3301_v21 = vpop.f32.mrf.mxu0  ;;  %v2830_v30 = vadd.f32 %v6814_v53, %v7624_v12  ;;  %v3096_v23 = vadd.f32 %v6812_v32, %v2832_v20 }
 0x223   : > { %v3673_v2 = vadd.f32 %v3672_v45, %v7155_v13  ;;  %3613 = vst [vmem:[%s6829_s15 + $0xd8] sm:$0xff] %v7168_v9  ;;  %v7181_v27 = vadd.f32 %v3301_v21, %v3090_v59  ;;  %v7183_v40 = vpop.f32.mrf.mxu1 }
 0x224   : > { %7623 = vst [vmem:[#allocation15_spill] sm:$0xff] %v7183_v40  ;;  %3643 = vst [vmem:[%s6824_s30 + $0xc8] sm:$0xff] %v7183_v40  ;;  %v3814_v3 = vadd.f32 %v3813_v43, %v7183_v40  ;;  %v5153_v28 = vpop.f32.mrf.mxu0 }
 0x225   : > { %3611 = vst [vmem:[%s6829_s15 + $0xc8] sm:$0xff] %v7181_v27  ;;  %v3674_v59 = vadd.f32 %v3673_v2, %v7181_v27  ;;  %v7194_v55 = vadd.f32 %v5153_v28, %v3095_v54  ;;  %v7196_v45 = vpop.f32.mrf.mxu1 }
 0x226   : > { %v3815_v21 = vadd.f32 %v7144_v14, %v3814_v3  ;;  %3648 = vst [vmem:[%s6824_s30 + $0xf0] sm:$0xff] %v7196_v45  ;;  %v3314_v43 = vpop.f32.mrf.mxu0  ;;  %v3094_v3 = vadd.f32 %v6819_v36, %v2830_v30 }
 0x227   : > { %v3675_v34 = vadd.f32 %v3674_v59, %v7142_v5  ;;  %3616 = vst [vmem:[%s6829_s15 + $0xf0] sm:$0xff] %v7194_v55  ;;  %v3357_v53 = vadd.f32 %v3314_v43, %v3093_v39  ;;  %v7205_v24 = vpop.f32.mrf.mxu1 }
 0x228   : > { %7625 = vst [vmem:[#allocation25_spill] sm:$0xff] %v7205_v24  ;;  %3646 = vst [vmem:[%s6824_s30 + $0xe0] sm:$0xff] %v7205_v24  ;;  %v3816_v54 = vadd.f32 %v7170_v52, %v3815_v21  ;;  %v5154_v2 = vpop.f32.mrf.mxu0 }
 0x229   : > { %3614 = vst [vmem:[%s6829_s15 + $0xe0] sm:$0xff] %v3357_v53  ;;  %v3676_v32 = vadd.f32 %v3675_v34, %v7168_v9  ;;  %v3360_v20 = vadd.f32 %v5154_v2, %v3096_v23  ;;  %v7213_v28 = vpop.f32.mrf.mxu1 }
 0x22a   : > { %v3817_v12 = vadd.f32 %v3816_v54, %v7205_v24  ;;  %3649 = vst [vmem:[%s6824_s30 + $0xf8] sm:$0xff] %v7213_v28  ;;  %v3317_v39 = vpop.f32.mrf.mxu0 }
 0x22b   : > { %v3677_v59 = vadd.f32 %v3676_v32, %v3357_v53  ;;  %3617 = vst [vmem:[%s6829_s15 + $0xf8] sm:$0xff] %v3360_v20  ;;  %v3358_v43 = vadd.f32 %v3317_v39, %v3094_v3  ;;  %v7219_v14 = vpop.f32.mrf.mxu1 }
 0x22c   : > { %7626 = vst [vmem:[#allocation24_spill] sm:$0xff] %v7219_v14  ;;  %3647 = vst [vmem:[%s6824_s30 + $0xe8] sm:$0xff] %v7219_v14  ;;  %v3818_v36 = vadd.f32 %v3817_v12, %v7219_v14 }
 0x22d   : > { %3615 = vst [vmem:[%s6829_s15 + $0xe8] sm:$0xff] %v3358_v43  ;;  %v3678_v30 = vadd.f32 %v3677_v59, %v3358_v43 }
 0x22e   : > { %v3819_v21 = vadd.f32 %v7196_v45, %v3818_v36 }
 0x22f   : > { %v3679_v23 = vadd.f32 %v3678_v30, %v7194_v55 }
 0x230   : > { %v3820_v34 = vadd.f32 %v7213_v28, %v3819_v21 }
 0x231   : > { %v3680_v54 = vadd.f32 %v3679_v23, %v3360_v20 }
 0x232   : > { %v3821_v2 = vrot.slane %v3820_v34, 4 }
 0x233   : > { %v3681_v32 = vrot.slane %v3680_v54, 4 }
 0x234   : > { %v3822_v3 = vadd.f32 %v3821_v2, %v3820_v34 }
 0x235   : > { %v3682_v39 = vadd.f32 %v3681_v32, %v3680_v54 }
 0x236   : > { %v3823_v24 = vrot.slane %v3822_v3, 2 }
 0x237   : > { %v3683_v52 = vrot.slane %v3682_v39, 2 }
 0x238   : > { %v3824_v40 = vadd.f32 %v3823_v24, %v3822_v3 }
 0x239   : > { %v3684_v58 = vadd.f32 %v3683_v52, %v3682_v39 }
 0x23a   : > { %v3825_v12 = vrot.slane %v3824_v40, 1 }
 0x23b   : > { %v3685_v14 = vrot.slane %v3684_v58, 1 }
 0x23c   : > { %v3826_v59 = vadd.f32 %v3825_v12, %v3824_v40 }
 0x23d   : > { %v3686_v36 = vadd.f32 %v3685_v14, %v3684_v58 }
 0x23e   : > { %3931 = vst [vmem:[%s401_s18] sm:$0x1] %v3826_v59 }
 0x23f   : > { %v3688_v30 = vmul.f32 0.00390625, %v3686_v36  ;;  %3929 = vst [vmem:[%s395_s22] sm:$0x1] %v3686_v36  ;;  %v7302_v36 = vmul.f32 0.00390625, %v3826_v59 }
 0x241   : > { %v3698_v21 = vsub.f32 %v6973_v62, %v3688_v30  ;;  %v3700_v24 = vsub.f32 %v6960_v47, %v3688_v30  ;;  %v7239_v52 = vsub.f32 %v6999_v25, %v3688_v30  ;;  %v7242_v23 = vsub.f32 %v7025_v61, %v3688_v30 }
 0x242   : > { %v7245_v34 = vsub.f32 %v6986_v56, %v3688_v30  ;;  %v7248_v54 = vsub.f32 %v7012_v44, %v3688_v30  ;;  %v7251_v14 = vsub.f32 %v7051_v33, %v3688_v30  ;;  %v7254_v58 = vsub.f32 %v7077_v35, %v3688_v30 }
 0x243   : > { %v7257_v47 = vsub.f32 %v7038_v1, %v3688_v30  ;;  %v7260_v62 = vsub.f32 %v7064_v8, %v3688_v30  ;;  %v7263_v25 = vsub.f32 %v7103_v4, %v3688_v30  ;;  %v7266_v56 = vsub.f32 %v7129_v41, %v3688_v30 }
 0x244   : > { %v7269_v44 = vsub.f32 %v7090_v16, %v3688_v30  ;;  %v7272_v61 = vsub.f32 %v7116_v46, %v3688_v30  ;;  %v7275_v33 = vsub.f32 %v7155_v13, %v3688_v30  ;;  %v7278_v1 = vsub.f32 %v7181_v27, %v3688_v30 }
 0x245   : > { %v7281_v8 = vsub.f32 %v7142_v5, %v3688_v30  ;;  %v7284_v35 = vsub.f32 %v7168_v9, %v3688_v30  ;;  %v7286_v4 = vsub.f32 %v3357_v53, %v3688_v30  ;;  %v7288_v41 = vsub.f32 %v3358_v43, %v3688_v30 }
 0x246   : > { %v7291_v16 = vsub.f32 %v7194_v55, %v3688_v30  ;;  %v7293_v46 = vsub.f32 %v3360_v20, %v3688_v30  ;;  %v3689_v13 = vsub.f32 %v6845_v6, %v3688_v30  ;;  %v3690_v27 = vsub.f32 %v6867_v50, %v3688_v30 }
 0x247   : > { %v3691_v40 = vsub.f32 %v6834_v10, %v3688_v30  ;;  %v3692_v9 = vsub.f32 %v6856_v48, %v3688_v30  ;;  %v3693_v53 = vsub.f32 %v6895_v17, %v3688_v30  ;;  %v3694_v3 = vsub.f32 %v6921_v63, %v3688_v30 }
 0x248   : > { %v3721_v5 = vmul.f32 %v3689_v13, %v3689_v13  ;;  %v3722_v2 = vmul.f32 %v3690_v27, %v3690_v27  ;;  %v3695_v20 = vsub.f32 %v6882_v57, %v3688_v30  ;;  %v3696_v10 = vsub.f32 %v6908_v7, %v3688_v30 }
 0x249   : > { %v3723_v32 = vmul.f32 %v3691_v40, %v3691_v40  ;;  %v3724_v55 = vmul.f32 %v3692_v9, %v3692_v9  ;;  %v3725_v12 = vmul.f32 %v3693_v53, %v3693_v53  ;;  %v3726_v50 = vmul.f32 %v3694_v3, %v3694_v3 }
 0x24a   : > { %v3753_v43 = vadd.f32 %v3722_v2, %v3721_v5  ;;  %v3697_v48 = vsub.f32 %v6947_v29, %v3688_v30  ;;  %v3727_v27 = vmul.f32 %v3695_v20, %v3695_v20  ;;  %v3828_v40 = vsub.f32 %v6847_v18, %v7302_v36 }
 0x24b   : > { %v3829_v63 = vsub.f32 %v6869_v38, %v7302_v36  ;;  %v3728_v5 = vmul.f32 %v3696_v10, %v3696_v10  ;;  %v3699_v2 = vsub.f32 %v6934_v19, %v3688_v30  ;;  %v3830_v7 = vsub.f32 %v6836_v60, %v7302_v36 }
 0x24c   : > { %v3754_v39 = vadd.f32 %v3753_v43, %v3723_v32  ;;  %v3729_v59 = vmul.f32 %v3697_v48, %v3697_v48  ;;  %v3860_v53 = vmul.f32 %v3828_v40, %v3828_v40  ;;  %v3730_v29 = vmul.f32 %v3698_v21, %v3698_v21 }
 0x24d   : > { %v3861_v32 = vmul.f32 %v3829_v63, %v3829_v63  ;;  %v3831_v3 = vsub.f32 %v6858_v22, %v7302_v36  ;;  %v3731_v18 = vmul.f32 %v3699_v2, %v3699_v2  ;;  %v3832_v38 = vsub.f32 %v6897_v49, %v7302_v36 }
 0x24e   : > { %v3755_v6 = vadd.f32 %v3754_v39, %v3724_v55  ;;  %v3862_v39 = vmul.f32 %v3830_v7, %v3830_v7  ;;  %v3732_v19 = vmul.f32 %v3700_v24, %v3700_v24  ;;  %v3733_v21 = vmul.f32 %v7239_v52, %v7239_v52 }
 0x24f   : > { %v3892_v20 = vadd.f32 %v3861_v32, %v3860_v53  ;;  %v3863_v60 = vmul.f32 %v3831_v3, %v3831_v3  ;;  %v3834_v22 = vsub.f32 %v6884_v0, %v7302_v36  ;;  %v3734_v49 = vmul.f32 %v7242_v23, %v7242_v23 }
 0x250   : > { %v3756_v13 = vadd.f32 %v3755_v6, %v3725_v12  ;;  %v3833_v12 = vsub.f32 %v6923_v51, %v7302_v36  ;;  %v3835_v24 = vsub.f32 %v6910_v11, %v7302_v36  ;;  %v3836_v52 = vsub.f32 %v6949_v42, %v7302_v36 }
 0x251   : > { %v3893_v6 = vadd.f32 %v3892_v20, %v3862_v39  ;;  %v3866_v63 = vmul.f32 %v3834_v22, %v3834_v22  ;;  %v3837_v23 = vsub.f32 %v6975_v26, %v7302_v36  ;;  %v3738_v53 = vmul.f32 %v7254_v58, %v7254_v58  ;;  %v7627_v58 = vld [vmem:[#allocation9_spill] sm:$0xff] }
 0x252   : > { %v3757_v17 = vadd.f32 %v3756_v13, %v3726_v50  ;;  %v3864_v50 = vmul.f32 %v3832_v38, %v3832_v38  ;;  %v3867_v2 = vmul.f32 %v3835_v24, %v3835_v24  ;;  %v3868_v7 = vmul.f32 %v3836_v52, %v3836_v52 }
 0x253   : > { %v3894_v13 = vadd.f32 %v3893_v6, %v3863_v60  ;;  %v3841_v39 = vsub.f32 %v7627_v58, %v7302_v36  ;;  %v3742_v6 = vmul.f32 %v7266_v56, %v7266_v56  ;;  %v7631_v56 = vld [vmem:[#allocation23_spill] sm:$0xff] }
 0x254   : > { %v3758_v57 = vadd.f32 %v3757_v17, %v3727_v27  ;;  %v3865_v27 = vmul.f32 %v3833_v12, %v3833_v12  ;;  %v3735_v17 = vmul.f32 %v7245_v34, %v7245_v34  ;;  %v3838_v34 = vsub.f32 %v6936_v37, %v7302_v36 }
 0x255   : > { %v3895_v51 = vadd.f32 %v3894_v13, %v3864_v50  ;;  %v3873_v22 = vmul.f32 %v3841_v39, %v3841_v39  ;;  %v3743_v13 = vmul.f32 %v7269_v44, %v7269_v44  ;;  %v7632_v44 = vld [vmem:[#allocation8_spill] sm:$0xff] }
 0x256   : > { %v3759_v9 = vadd.f32 %v3758_v57, %v3728_v5  ;;  %v3736_v5 = vmul.f32 %v7248_v54, %v7248_v54  ;;  %v3839_v54 = vsub.f32 %v6962_v15, %v7302_v36 }
 0x257   : > { %v3896_v0 = vadd.f32 %v3895_v51, %v3865_v27  ;;  %v3744_v51 = vmul.f32 %v7272_v61, %v7272_v61  ;;  %v7633_v61 = vld [vmem:[#allocation12_spill] sm:$0xff] }
 0x258   : > { %v3760_v43 = vadd.f32 %v3759_v9, %v3729_v59  ;;  %v3737_v59 = vmul.f32 %v7251_v14, %v7251_v14  ;;  %v3840_v14 = vsub.f32 %v7001_v31, %v7302_v36  ;;  %v3871_v20 = vmul.f32 %v3839_v54, %v3839_v54 }
 0x259   : > { %v3897_v11 = vadd.f32 %v3896_v0, %v3866_v63  ;;  %v3745_v0 = vmul.f32 %v7275_v33, %v7275_v33  ;;  %v7634_v33 = vld [vmem:[#allocation14_spill] sm:$0xff] }
 0x25a   : > { %v3761_v55 = vadd.f32 %v3760_v43, %v3730_v29  ;;  %v3869_v29 = vmul.f32 %v3837_v23, %v3837_v23  ;;  %v3739_v43 = vmul.f32 %v7257_v47, %v7257_v47  ;;  %v7628_v47 = vld [vmem:[#allocation38_spill] sm:$0xff]  ;;  %v3872_v60 = vmul.f32 %v3840_v14, %v3840_v14 }
 0x25b   : > { %v3898_v42 = vadd.f32 %v3897_v11, %v3867_v2  ;;  %v3842_v12 = vsub.f32 %v7628_v47, %v7302_v36  ;;  %v3746_v11 = vmul.f32 %v7278_v1, %v7278_v1  ;;  %v7635_v1 = vld [vmem:[#allocation11_spill] sm:$0xff] }
 0x25c   : > { %v3762_v30 = vadd.f32 %v3761_v55, %v3731_v18  ;;  %v3870_v18 = vmul.f32 %v3838_v34, %v3838_v34  ;;  %v3740_v55 = vmul.f32 %v7260_v62, %v7260_v62  ;;  %v7629_v62 = vld [vmem:[#allocation39_spill] sm:$0xff] }
 0x25d   : > { %v3899_v26 = vadd.f32 %v3898_v42, %v3868_v7  ;;  %v3874_v24 = vmul.f32 %v3842_v12, %v3842_v12  ;;  %v3747_v42 = vmul.f32 %v7281_v8, %v7281_v8  ;;  %v7636_v8 = vld [vmem:[#allocation22_spill] sm:$0xff]  ;;  %v3751_v12 = vmul.f32 %v7291_v16, %v7291_v16 }
 0x25e   : > { %v3763_v10 = vadd.f32 %v3762_v30, %v3732_v19  ;;  %v3741_v19 = vmul.f32 %v7263_v25, %v7263_v25  ;;  %v7630_v25 = vld [vmem:[#allocation7_spill] sm:$0xff] }
 0x25f   : > { %v3900_v37 = vadd.f32 %v3899_v26, %v3869_v29  ;;  %v3748_v26 = vmul.f32 %v7284_v35, %v7284_v35  ;;  %v7637_v35 = vld [vmem:[#allocation6_spill] sm:$0xff] }
 0x260   : > { %v3764_v48 = vadd.f32 %v3763_v10, %v3733_v21  ;;  %v3843_v10 = vsub.f32 %v7629_v62, %v7302_v36  ;;  %v3752_v62 = vmul.f32 %v7293_v46, %v7293_v46 }
 0x261   : > { %v3901_v15 = vadd.f32 %v3900_v37, %v3870_v18  ;;  %v3749_v37 = vmul.f32 %v7286_v4, %v7286_v4  ;;  %v7638_v4 = vld [vmem:[#allocation5_spill] sm:$0xff] }
 0x262   : > { %v3765_v40 = vadd.f32 %v3764_v48, %v3734_v49  ;;  %v3844_v48 = vsub.f32 %v7630_v25, %v7302_v36  ;;  %v3875_v52 = vmul.f32 %v3843_v10, %v3843_v10  ;;  %v7640_v25 = vld [vmem:[#allocation10_spill] sm:$0xff] }
 0x263   : > { %v3902_v31 = vadd.f32 %v3901_v15, %v3871_v20  ;;  %v3750_v20 = vmul.f32 %v7288_v41, %v7288_v41  ;;  %v7639_v41 = vld [vmem:[#allocation15_spill] sm:$0xff] }
 0x264   : > { %v3766_v57 = vadd.f32 %v3765_v40, %v3735_v17  ;;  %v3845_v40 = vsub.f32 %v7631_v56, %v7302_v36  ;;  %v3876_v23 = vmul.f32 %v3844_v48, %v3844_v48  ;;  %v3854_v48 = vsub.f32 %v7640_v25, %v7302_v36 }
 0x265   : > { %v3903_v50 = vadd.f32 %v3902_v31, %v3872_v60  ;;  %v3852_v31 = vsub.f32 %v7638_v4, %v7302_v36 }
 0x266   : > { %v3767_v9 = vadd.f32 %v3766_v57, %v3736_v5  ;;  %v3846_v57 = vsub.f32 %v7632_v44, %v7302_v36  ;;  %v3877_v34 = vmul.f32 %v3845_v40, %v3845_v40 }
 0x267   : > { %v3904_v27 = vadd.f32 %v3903_v50, %v3873_v22  ;;  %v3853_v22 = vsub.f32 %v7639_v41, %v7302_v36  ;;  %v3884_v16 = vmul.f32 %v3852_v31, %v3852_v31 }
 0x268   : > { %v3768_v32 = vadd.f32 %v3767_v9, %v3737_v59  ;;  %v3847_v9 = vsub.f32 %v7633_v61, %v7302_v36  ;;  %v3878_v54 = vmul.f32 %v3846_v57, %v3846_v57  ;;  %v7643_v57 = vld [vmem:[#allocation24_spill] sm:$0xff]  ;;  %v3858_v61 = vsub.f32 %v7196_v45, %v7302_v36 }
 0x269   : > { %v3905_v63 = vadd.f32 %v3904_v27, %v3874_v24  ;;  %v3885_v56 = vmul.f32 %v3853_v22, %v3853_v22 }
 0x26a   : > { %v3769_v3 = vadd.f32 %v3768_v32, %v3738_v53  ;;  %v3848_v32 = vsub.f32 %v7634_v33, %v7302_v36  ;;  %v3879_v14 = vmul.f32 %v3847_v9, %v3847_v9 }
 0x26b   : > { %v3906_v2 = vadd.f32 %v3905_v63, %v3875_v52  ;;  %v7642_v52 = vld [vmem:[#allocation25_spill] sm:$0xff] }
 0x26c   : > { %v3770_v38 = vadd.f32 %v3769_v3, %v3739_v43  ;;  %v3849_v3 = vsub.f32 %v7635_v1, %v7302_v36  ;;  %v3880_v58 = vmul.f32 %v3848_v32, %v3848_v32  ;;  %v3856_v63 = vsub.f32 %v7642_v52, %v7302_v36 }
 0x26d   : > { %v3907_v7 = vadd.f32 %v3906_v2, %v3876_v23  ;;  %v3857_v23 = vsub.f32 %v7643_v57, %v7302_v36 }
 0x26e   : > { %v3771_v30 = vadd.f32 %v3770_v38, %v3740_v55  ;;  %v3850_v38 = vsub.f32 %v7636_v8, %v7302_v36  ;;  %v3888_v9 = vmul.f32 %v3856_v63, %v3856_v63 }
 0x26f   : > { %v3908_v29 = vadd.f32 %v3907_v7, %v3877_v34 }
 0x270   : > { %v3772_v21 = vadd.f32 %v3771_v30, %v3741_v19  ;;  %v3851_v19 = vsub.f32 %v7637_v35, %v7302_v36  ;;  %v3881_v30 = vmul.f32 %v3849_v3, %v3849_v3 }
 0x271   : > { %v3909_v18 = vadd.f32 %v3908_v29, %v3878_v54  ;;  %v3890_v54 = vmul.f32 %v3858_v61, %v3858_v61 }
 0x272   : > { %v3773_v49 = vadd.f32 %v3772_v21, %v3742_v6  ;;  %v3882_v6 = vmul.f32 %v3850_v38, %v3850_v38  ;;  %v3883_v50 = vmul.f32 %v3851_v19, %v3851_v19 }
 0x273   : > { %v3910_v39 = vadd.f32 %v3909_v18, %v3879_v14 }
 0x274   : > { %v3774_v17 = vadd.f32 %v3773_v49, %v3743_v13 }
 0x275   : > { %v3911_v47 = vadd.f32 %v3910_v39, %v3880_v58 }
 0x276   : > { %v3775_v5 = vadd.f32 %v3774_v17, %v3744_v51  ;;  %v7641_v51 = vld [vmem:[#allocation21_spill] sm:$0xff] }
 0x277   : > { %v3912_v21 = vadd.f32 %v3911_v47, %v3881_v30  ;;  %v3855_v17 = vsub.f32 %v7641_v51, %v7302_v36 }
 0x278   : > { %v3776_v59 = vadd.f32 %v3775_v5, %v3745_v0  ;;  %v3886_v0 = vmul.f32 %v3854_v48, %v3854_v48 }
 0x279   : > { %v3913_v13 = vadd.f32 %v3912_v21, %v3882_v6  ;;  %v3887_v2 = vmul.f32 %v3855_v17, %v3855_v17 }
 0x27a   : > { %v3777_v53 = vadd.f32 %v3776_v59, %v3746_v11 }
 0x27b   : > { %v3914_v24 = vadd.f32 %v3913_v13, %v3883_v50 }
 0x27c   : > { %v3778_v43 = vadd.f32 %v3777_v53, %v3747_v42  ;;  %v3859_v42 = vsub.f32 %v7213_v28, %v7302_v36  ;;  %v3889_v53 = vmul.f32 %v3857_v23, %v3857_v23 }
 0x27d   : > { %v3915_v40 = vadd.f32 %v3914_v24, %v3884_v16 }
 0x27e   : > { %v3779_v55 = vadd.f32 %v3778_v43, %v3748_v26  ;;  %v3891_v26 = vmul.f32 %v3859_v42, %v3859_v42 }
 0x27f   : > { %v3916_v5 = vadd.f32 %v3915_v40, %v3885_v56 }
 0x280   : > { %v3780_v15 = vadd.f32 %v3779_v55, %v3749_v37 }
 0x281   : > { %v3917_v11 = vadd.f32 %v3916_v5, %v3886_v0 }
 0x282   : > { %v3781_v60 = vadd.f32 %v3780_v15, %v3750_v20 }
 0x283   : > { %v3918_v34 = vadd.f32 %v3917_v11, %v3887_v2 }
 0x284   : > { %v3782_v10 = vadd.f32 %v3781_v60, %v3751_v12 }
 0x285   : > { %v3919_v33 = vadd.f32 %v3918_v34, %v3888_v9 }
 0x286   : > { %v3783_v49 = vadd.f32 %v3782_v10, %v3752_v62 }
 0x287   : > { %v3920_v29 = vadd.f32 %v3919_v33, %v3889_v53 }
 0x288   : > { %v3784_v27 = vrot.slane %v3783_v49, 4 }
 0x289   : > { %v3921_v43 = vadd.f32 %v3920_v29, %v3890_v54 }
 0x28a   : > { %v3785_v46 = vadd.f32 %v3784_v27, %v3783_v49 }
 0x28b   : > { %v3922_v45 = vadd.f32 %v3921_v43, %v3891_v26 }
 0x28c   : > { %v3786_v44 = vrot.slane %v3785_v46, 2 }
 0x28d   : > { %v3923_v1 = vrot.slane %v3922_v45, 4 }
 0x28e   : > { %v3787_v59 = vadd.f32 %v3786_v44, %v3785_v46 }
 0x28f   : > { %v3924_v3 = vadd.f32 %v3923_v1, %v3922_v45 }
 0x290   : > { %v3788_v7 = vrot.slane %v3787_v59, 1 }
 0x291   : > { %v3925_v14 = vrot.slane %v3924_v3, 2 }
 0x292   : > { %v3789_v32 = vadd.f32 %v3788_v7, %v3787_v59 }
 0x293   : > { %v3926_v18 = vadd.f32 %v3925_v14, %v3924_v3 }
 0x294   : > { %3930 = vst [vmem:[%s398_s25] sm:$0x1] %v3789_v32 }
 0x295   : > { %v3927_v37 = vrot.slane %v3926_v18, 1 }
 0x297   : > { %v3928_v55 = vadd.f32 %v3927_v37, %v3926_v18 }
 0x299   : > { %3932 = vst [vmem:[%s404_s27] sm:$0x1] %v3928_v55 }
 0x29a PF: > { %s21_s13 = sadd.s32 1, %s5303_s13  }
 0x29b   : > { %p18_p4 = scmp.ge.s32.totalorder %s21_s13, 4  }
 0x29d   :  { %20 = sbr.rel (!%p18_p4) target bundleno = 1 (0x1), region = 138 }

</bundles_post_ra>
